<compile_context>
chip_gen: v7x
topology: tpu7x:2x2x1
jax: 0.10.0
libtpu: 0.0.40
codegen_flags: <defaults>
</compile_context>

<pallas_src>
import functools
import numpy as np
import jax
import jax.numpy as jnp
from jax.experimental import pallas as pl
from jax.experimental.pallas import tpu as pltpu


# VGG-11 ("A") feature configuration: conv channel counts, 'M' = 2x2 maxpool.
VGG11_CFG = (64, "M", 128, "M", 256, 256, "M", 512, 512, "M", 512, 512, "M")
_IN_CH_PAD = 128                  # lane-dense channel padding for the 3-ch input
_ROW_TILE_MAX = 16                # max conv output rows per grid step
_VMEM_LIMIT = 64 * 1024 * 1024    # explicit scoped-VMEM ceiling (v7x-safe)


# ----------------------------------------------------------------------------
# small helpers
# ----------------------------------------------------------------------------
def _round_up(x, m):
    return ((x + m - 1) // m) * m


def _pick_tile(d, cands):
    for c in cands:
        if d % c == 0:
            return c
    return d


def _pick_row_tile(h, pool, th_max=_ROW_TILE_MAX):
    if h <= th_max:
        return h
    for th in range(th_max, 0, -1):
        if h % th == 0 and (not pool or th % 2 == 0):
            return th
    return h


def _conv_pool_flags(cfg):
    flags, i = [], 0
    while i < len(cfg):
        if cfg[i] == "M":
            i += 1
            continue
        pool = i + 1 < len(cfg) and cfg[i + 1] == "M"
        flags.append(pool)
        i += 2 if pool else 1
    return tuple(flags)


_POOL_AFTER = _conv_pool_flags(VGG11_CFG)   # (T, T, F, T, F, T, F, T)


# ----------------------------------------------------------------------------
# Pallas kernels
# ----------------------------------------------------------------------------
def _conv3x3_kernel(x_ref, top_ref, bot_ref, w_ref, s_ref, b_ref, o_ref,
                    xpk_ref, *, pool):
    """Fused 3x3/s1/p1 conv + folded-BN + ReLU (+ optional fused 2x2 maxpool).

    x_ref:   (1, TH, W, C)   bf16  TH unpadded input rows of one image
    top_ref: (1, 1, W, C)    bf16  row above the tile (border-clamped)
    bot_ref: (1, 1, W, C)    bf16  row below the tile (border-clamped)
    w_ref:   (3, 3*C, TN)    bf16  packed weights  w[di, dj*C + c, co]
    s_ref:   (1, TN)  f32          folded-BN scale
    b_ref:   (1, TN)  f32          folded-BN bias (conv bias folded in)
    o_ref:   (1, TH, W, TN)  or (1, TH//2, W//2, TN) when pool
    xpk_ref: (TH+2, W, 3*C)  bf16  scratch: dj-packed, zero-padded slab
    """
    th = x_ref.shape[1]
    w_sp = x_ref.shape[2]
    c = x_ref.shape[3]
    tn = o_ref.shape[3]
    r = pl.program_id(1)
    r_last = pl.num_programs(1) - 1

    top = top_ref[0]                                        # (1, W, C)
    bot = bot_ref[0]
    top = jnp.where(r == 0, jnp.zeros_like(top), top)       # top image border
    bot = jnp.where(r == r_last, jnp.zeros_like(bot), bot)  # bottom image border

    # center band (dj=1): rows [-1 .. TH] of the virtually zero-padded tile
    xpk_ref[0:1, :, c:2 * c] = top
    xpk_ref[1:th + 1, :, c:2 * c] = x_ref[0]
    xpk_ref[th + 1:th + 2, :, c:2 * c] = bot
    # left-neighbour band (dj=0): x[.., w-1, ..]; column 0 is zero padding
    xpk_ref[:, 1:w_sp, 0:c] = xpk_ref[:, 0:w_sp - 1, c:2 * c]
    xpk_ref[:, 0:1, 0:c] = jnp.zeros((th + 2, 1, c), jnp.bfloat16)
    # right-neighbour band (dj=2): x[.., w+1, ..]; column W-1 is zero padding
    xpk_ref[:, 0:w_sp - 1, 2 * c:3 * c] = xpk_ref[:, 1:w_sp, c:2 * c]
    xpk_ref[:, w_sp - 1:w_sp, 2 * c:3 * c] = jnp.zeros((th + 2, 1, c), jnp.bfloat16)

    # 3 MXU calls with K = 3*C; the di shifts are cheap leading-dim slices.
    acc = jnp.zeros((th * w_sp, tn), jnp.float32)
    for di in range(3):
        lhs = xpk_ref[di:di + th, :, :].reshape(th * w_sp, 3 * c)
        acc = acc + jnp.dot(lhs, w_ref[di], preferred_element_type=jnp.float32)

    y = jnp.maximum(acc * s_ref[...] + b_ref[...], 0.0)     # folded BN + ReLU

    if pool:                                                # fused 2x2 maxpool
        ow = w_sp // 2
        y = y.reshape(th * ow, 2, tn)                        # col parity -> axis 1
        y = jnp.max(y, axis=1)                               # pool columns
        y = y.reshape(th // 2, 2, ow, tn)                    # row parity -> axis 1
        y = jnp.maximum(y[:, 0], y[:, 1])                    # pool rows
    o_ref[...] = y.reshape(o_ref.shape).astype(o_ref.dtype)


def _fc_kernel(x_ref, w_ref, b_ref, o_ref, acc_ref, *, relu):
    # grid = (Np // tn, K // tk); K is the reduction (innermost, "arbitrary")
    k = pl.program_id(1)

    @pl.when(k == 0)
    def _():
        acc_ref[...] = jnp.zeros_like(acc_ref)

    acc_ref[...] += jnp.dot(x_ref[...], w_ref[...],
                            preferred_element_type=jnp.float32)

    @pl.when(k == pl.num_programs(1) - 1)
    def _():
        y = acc_ref[...] + b_ref[...]
        if relu:
            y = jnp.maximum(y, 0.0)
        o_ref[...] = y.astype(o_ref.dtype)


# ----------------------------------------------------------------------------
# op wrappers
# ----------------------------------------------------------------------------
def conv3x3_bn_relu(x, w_packed, scale, bias, *, pool):
    """3x3/s1/p1 conv + folded BN + ReLU (+ fused 2x2 maxpool). NHWC bf16."""
    n, h, w_sp, cp = x.shape
    cout_p = w_packed.shape[-1]
    th = _pick_row_tile(h, pool)
    rtiles = h // th
    if pool:
        out_shape = (n, h // 2, w_sp // 2, cout_p)
        out_block = (1, th // 2, w_sp // 2, cout_p)
    else:
        out_shape = (n, h, w_sp, cout_p)
        out_block = (1, th, w_sp, cout_p)

    return pl.pallas_call(
        functools.partial(_conv3x3_kernel, pool=pool),
        out_shape=jax.ShapeDtypeStruct(out_shape, jnp.bfloat16),
        grid_spec=pltpu.PrefetchScalarGridSpec(
            num_scalar_prefetch=0,
            grid=(n, rtiles),
            in_specs=[
                # main TH-row band of the (unpadded) input
                pl.BlockSpec((1, th, w_sp, cp), lambda i, r: (i, r, 0, 0)),
                # halo row above the band (clamped at the top border)
                pl.BlockSpec((1, 1, w_sp, cp),
                             lambda i, r: (i, jnp.maximum(r * th - 1, 0), 0, 0)),
                # halo row below the band (clamped at the bottom border)
                pl.BlockSpec((1, 1, w_sp, cp),
                             lambda i, r: (i, jnp.minimum(r * th + th, h - 1), 0, 0)),
                # packed weights: constant index -> DMA'd once, VMEM-resident
                pl.BlockSpec((3, 3 * cp, cout_p), lambda i, r: (0, 0, 0)),
                pl.BlockSpec((1, cout_p), lambda i, r: (0, 0)),
                pl.BlockSpec((1, cout_p), lambda i, r: (0, 0)),
            ],
            out_specs=pl.BlockSpec(out_block, lambda i, r: (i, r, 0, 0)),
            scratch_shapes=[pltpu.VMEM((th + 2, w_sp, 3 * cp), jnp.bfloat16)],
        ),
        compiler_params=pltpu.CompilerParams(
            dimension_semantics=("parallel", "arbitrary"),
            vmem_limit_bytes=_VMEM_LIMIT),
    )(x, x, x, w_packed, scale, bias)


def linear(x, w, bias, *, relu, out_dtype):
    """y = maybe_relu(x @ w + bias). x:(M,K) bf16, w:(K,Np) bf16, bias:(1,Np) f32."""
    m, k_dim = x.shape
    np_out = w.shape[1]
    mp = _round_up(max(m, 16), 16)                 # bf16-native sublane multiple
    xp = jnp.pad(x, ((0, mp - m), (0, 0))) if mp != m else x

    tn = _pick_tile(np_out, (1024, 512, 256, 128))
    tk = _pick_tile(k_dim, (4096, 3584, 3072, 2048, 1536, 1024, 512, 256, 128))

    out = pl.pallas_call(
        functools.partial(_fc_kernel, relu=relu),
        out_shape=jax.ShapeDtypeStruct((mp, np_out), out_dtype),
        grid_spec=pltpu.PrefetchScalarGridSpec(
            num_scalar_prefetch=0,
            grid=(np_out // tn, k_dim // tk),
            in_specs=[
                pl.BlockSpec((mp, tk), lambda j, k: (0, k)),
                pl.BlockSpec((tk, tn), lambda j, k: (k, j)),
                pl.BlockSpec((1, tn), lambda j, k: (0, j)),
            ],
            out_specs=pl.BlockSpec((mp, tn), lambda j, k: (0, j)),
            scratch_shapes=[pltpu.VMEM((mp, tn), jnp.float32)],
        ),
        compiler_params=pltpu.CompilerParams(
            dimension_semantics=("parallel", "arbitrary"),
            vmem_limit_bytes=_VMEM_LIMIT),
    )(xp, w, bias)
    return out[:m]


def adaptive_avg_pool_nhwc(x, out_hw=(7, 7)):
    # TODO(synk): AdaptiveAvgPool2d((7,7)) kept as tiny plain-JAX glue (<=7x7
    # static windows, negligible work) -- not worth a dedicated Pallas kernel.
    x = x.astype(jnp.float32)                       # f32 reduction
    n, h, w, c = x.shape
    oh, ow = out_hw
    rows = []
    for i in range(oh):
        h0, h1 = (i * h) // oh, -((-(i + 1) * h) // oh)
        cols = []
        for j in range(ow):
            w0, w1 = (j * w) // ow, -((-(j + 1) * w) // ow)
            cols.append(jnp.mean(x[:, h0:h1, w0:w1, :], axis=(1, 2)))
        rows.append(jnp.stack(cols, axis=1))
    return jnp.stack(rows, axis=1)                  # (N, OH, OW, C) f32


# ----------------------------------------------------------------------------
# parameters (deterministic random init; BN + conv-bias folded; packed; bf16)
# ----------------------------------------------------------------------------
def _conv_bn_params(key, cin, cout, cin_p, cout_p):
    kw, kb, k1, k2, k3, k4 = jax.random.split(key, 6)
    fan_in = 9 * cin
    w = jax.random.normal(kw, (3, 3, cin, cout), jnp.float32) * (1.0 / float(np.sqrt(fan_in)))
    conv_b = 0.01 * jax.random.normal(kb, (cout,), jnp.float32)
    gamma = 1.0 + 0.1 * jax.random.normal(k1, (cout,), jnp.float32)
    beta = 0.1 * jax.random.normal(k2, (cout,), jnp.float32)
    mean = 0.1 * jax.random.normal(k3, (cout,), jnp.float32)
    var = jax.random.uniform(k4, (cout,), jnp.float32, minval=0.5, maxval=1.5)
    scale = gamma / jnp.sqrt(var + 1e-5)
    bias = beta + (conv_b - mean) * scale           # conv bias folded into BN bias
    # pad + pack: (3,3,cin,cout) -> (3,3,cin_p,cout_p) -> (3, 3*cin_p, cout_p)
    w = jnp.pad(w, ((0, 0), (0, 0), (0, cin_p - cin), (0, cout_p - cout)))
    w_packed = w.reshape(3, 3 * cin_p, cout_p).astype(jnp.bfloat16)
    scale = jnp.pad(scale, (0, cout_p - cout)).reshape(1, cout_p)
    bias = jnp.pad(bias, (0, cout_p - cout)).reshape(1, cout_p)
    return {"w": w_packed, "scale": scale, "bias": bias}


def _fc_params(key, kin, nout, nout_p):
    kw, kb = jax.random.split(key)
    w = jax.random.normal(kw, (kin, nout), jnp.float32) * (1.0 / float(np.sqrt(kin)))
    w = jnp.pad(w, ((0, 0), (0, nout_p - nout))).astype(jnp.bfloat16)
    b = 0.01 * jax.random.normal(kb, (nout,), jnp.float32)
    b = jnp.pad(b, (0, nout_p - nout)).reshape(1, nout_p)
    return w, b


def init_params(key, class_num=8):
    ks = iter(jax.random.split(key, 16))
    convs = []
    cin, cin_p = 3, _IN_CH_PAD
    for v in VGG11_CFG:
        if v == "M":
            continue
        cout = v
        cout_p = _round_up(cout, 128)
        convs.append(_conv_bn_params(next(ks), cin, cout, cin_p, cout_p))
        cin, cin_p = cout, cout_p
    in_feat = 512 * 7 * 7                            # VGG classifier in_features
    fc1_w, fc1_b = _fc_params(next(ks), in_feat, 4096, 4096)
    fc2_w, fc2_b = _fc_params(next(ks), 4096, 4096, 4096)
    fc3_w, fc3_b = _fc_params(next(ks), 4096, class_num,
                              _round_up(max(class_num, 128), 128))
    return {"convs": convs,
            "fc1_w": fc1_w, "fc1_b": fc1_b,
            "fc2_w": fc2_w, "fc2_b": fc2_b,
            "fc3_w": fc3_w, "fc3_b": fc3_b}


# ----------------------------------------------------------------------------
# forward
# ----------------------------------------------------------------------------
@functools.partial(jax.jit, static_argnames=("class_num",))
def vgg11_bn_forward(params, x_nchw, class_num=8):
    x = jnp.transpose(x_nchw, (0, 2, 3, 1)).astype(jnp.bfloat16)       # NHWC bf16
    x = jnp.pad(x, ((0, 0), (0, 0), (0, 0), (0, _IN_CH_PAD - x.shape[-1])))

    for blk, pool in zip(params["convs"], _POOL_AFTER):
        x = conv3x3_bn_relu(x, blk["w"], blk["scale"], blk["bias"], pool=pool)

    x = adaptive_avg_pool_nhwc(x, (7, 7))                               # (N,7,7,512) f32
    n = x.shape[0]
    feats = jnp.transpose(x, (0, 3, 1, 2)).reshape(n, -1).astype(jnp.bfloat16)

    h = linear(feats, params["fc1_w"], params["fc1_b"], relu=True,
               out_dtype=jnp.bfloat16)                                  # Dropout = id (eval)
    h = linear(h, params["fc2_w"], params["fc2_b"], relu=True,
               out_dtype=jnp.bfloat16)                                  # Dropout = id (eval)
    logits = linear(h, params["fc3_w"], params["fc3_b"], relu=False,
                    out_dtype=jnp.float32)
    return logits[:, :class_num]


# ----------------------------------------------------------------------------
if __name__ == "__main__":
    key = jax.random.PRNGKey(0)
    pkey, xkey = jax.random.split(key)
    params = init_params(pkey, class_num=8)
    # small input consistent with the module: RGB images, batch=2, 32x32
    x = jax.random.normal(xkey, (2, 3, 32, 32), jnp.float32)

    # ---- correctness check of the fused conv+BN+ReLU+pool kernel (layer 1:
    #      2 row tiles -> exercises the halo path) against an XLA reference.
    xh = jnp.transpose(x, (0, 2, 3, 1)).astype(jnp.bfloat16)
    xh = jnp.pad(xh, ((0, 0), (0, 0), (0, 0), (0, _IN_CH_PAD - 3)))
    blk0 = params["convs"][0]
    y_pal = conv3x3_bn_relu(xh, blk0["w"], blk0["scale"], blk0["bias"], pool=True)
    w_full = blk0["w"].astype(jnp.float32).reshape(3, 3, _IN_CH_PAD, -1)
    ref = jax.lax.conv_general_dilated(
        xh.astype(jnp.float32), w_full, (1, 1), ((1, 1), (1, 1)),
        dimension_numbers=("NHWC", "HWIO", "NHWC"))
    ref = jnp.maximum(ref * blk0["scale"].reshape(1, 1, 1, -1)
                      + blk0["bias"].reshape(1, 1, 1, -1), 0.0)
    ref = jax.lax.reduce_window(ref, -jnp.inf, jax.lax.max,
                                (1, 2, 2, 1), (1, 2, 2, 1), "VALID")
    err = float(jnp.max(jnp.abs(y_pal.astype(jnp.float32) - ref)))
    tol = 0.05 * float(jnp.max(jnp.abs(ref))) + 1e-3
    assert err <= tol, (err, tol)

    # ---- full forward
    logits = vgg11_bn_forward(params, x, class_num=8)
    jax.block_until_ready(logits)

    assert logits.shape == (2, 8)
    assert bool(jnp.all(jnp.isfinite(logits)))
    print("KERNEL_OK")
</pallas_src>

<mosaic_0001>
module attributes {stable_mosaic.version = 11 : i64} {
  func.func @_conv3x3_kernel(%arg0: i32, %arg1: i32, %arg2: memref<1x16x32x128xbf16, #tpu.memory_space<vmem>>, %arg3: memref<1x1x32x128xbf16, #tpu.memory_space<vmem>>, %arg4: memref<1x1x32x128xbf16, #tpu.memory_space<vmem>>, %arg5: memref<3x384x128xbf16, #tpu.memory_space<vmem>>, %arg6: memref<1x128xf32, #tpu.memory_space<vmem>>, %arg7: memref<1x128xf32, #tpu.memory_space<vmem>>, %arg8: memref<1x8x16x128xbf16, #tpu.memory_space<vmem>>, %arg9: memref<18x32x384xbf16, #tpu.memory_space<vmem>>) attributes {dimension_semantics = [#tpu.dimension_semantics<parallel>, #tpu.dimension_semantics<arbitrary>], iteration_bounds = array<i64: 2, 2>, scalar_prefetch = 0 : i64, scratch_operands = 1 : i64, tpu.core_type = #tpu.core_type<tc>, window_params = [{transform_indices = @transform_0, window_bounds = array<i64: 1, 16, 32, 128>}, {transform_indices = @transform_1, window_bounds = array<i64: 1, 1, 32, 128>}, {transform_indices = @transform_2, window_bounds = array<i64: 1, 1, 32, 128>}, {pipeline_mode = #tpu.pipeline_mode<synchronous>, transform_indices = @transform_3, window_bounds = array<i64: 3, 384, 128>}, {pipeline_mode = #tpu.pipeline_mode<synchronous>, transform_indices = @transform_4, window_bounds = array<i64: 1, 128>}, {pipeline_mode = #tpu.pipeline_mode<synchronous>, transform_indices = @transform_5, window_bounds = array<i64: 1, 128>}, {transform_indices = @transform_6, window_bounds = array<i64: 1, 8, 16, 128>}]} {
    %c0 = arith.constant 0 : index
    %c0_0 = arith.constant 0 : index
    %c0_1 = arith.constant 0 : index
    %c0_2 = arith.constant 0 : index
    %0 = vector.load %arg3[%c0, %c0_0, %c0_1, %c0_2] : memref<1x1x32x128xbf16, #tpu.memory_space<vmem>>, vector<1x1x32x128xbf16>
    %1 = vector.shape_cast %0 : vector<1x1x32x128xbf16> to vector<1x32x128xbf16>
    %c0_3 = arith.constant 0 : index
    %c0_4 = arith.constant 0 : index
    %c0_5 = arith.constant 0 : index
    %c0_6 = arith.constant 0 : index
    %2 = vector.load %arg4[%c0_3, %c0_4, %c0_5, %c0_6] : memref<1x1x32x128xbf16, #tpu.memory_space<vmem>>, vector<1x1x32x128xbf16>
    %3 = vector.shape_cast %2 : vector<1x1x32x128xbf16> to vector<1x32x128xbf16>
    %c0_i32 = arith.constant 0 : i32
    %4 = arith.cmpi eq, %arg1, %c0_i32 : i32
    %cst = arith.constant 0.000000e+00 : bf16
    %5 = vector.broadcast %cst : bf16 to vector<1x32x128xbf16>
    %6 = arith.select %4, %5, %1 : vector<1x32x128xbf16>
    %c1_i32 = arith.constant 1 : i32
    %7 = arith.cmpi eq, %arg1, %c1_i32 : i32
    %cst_7 = arith.constant 0.000000e+00 : bf16
    %8 = vector.broadcast %cst_7 : bf16 to vector<1x32x128xbf16>
    %9 = arith.select %7, %8, %3 : vector<1x32x128xbf16>
    %c0_8 = arith.constant 0 : index
    %c0_9 = arith.constant 0 : index
    %c128 = arith.constant 128 : index
    %10 = vector.load %arg9[%c0_8, %c0_9, %c128] : memref<18x32x384xbf16, #tpu.memory_space<vmem>>, vector<1x32x128xbf16>
    tpu.vector_store %arg9[%c0_8, %c0_9, %c128], %6 {strides = array<i32>} : memref<18x32x384xbf16, #tpu.memory_space<vmem>>, vector<1x32x128xbf16>,
    %c0_10 = arith.constant 0 : index
    %c0_11 = arith.constant 0 : index
    %c0_12 = arith.constant 0 : index
    %c0_13 = arith.constant 0 : index
    %11 = vector.load %arg2[%c0_10, %c0_11, %c0_12, %c0_13] : memref<1x16x32x128xbf16, #tpu.memory_space<vmem>>, vector<1x16x32x128xbf16>
    %12 = vector.shape_cast %11 : vector<1x16x32x128xbf16> to vector<16x32x128xbf16>
    %c1 = arith.constant 1 : index
    %c0_14 = arith.constant 0 : index
    %c128_15 = arith.constant 128 : index
    %13 = vector.load %arg9[%c1, %c0_14, %c128_15] : memref<18x32x384xbf16, #tpu.memory_space<vmem>>, vector<16x32x128xbf16>
    tpu.vector_store %arg9[%c1, %c0_14, %c128_15], %12 {strides = array<i32>} : memref<18x32x384xbf16, #tpu.memory_space<vmem>>, vector<16x32x128xbf16>,
    %c17 = arith.constant 17 : index
    %c0_16 = arith.constant 0 : index
    %c128_17 = arith.constant 128 : index
    %14 = vector.load %arg9[%c17, %c0_16, %c128_17] : memref<18x32x384xbf16, #tpu.memory_space<vmem>>, vector<1x32x128xbf16>
    tpu.vector_store %arg9[%c17, %c0_16, %c128_17], %9 {strides = array<i32>} : memref<18x32x384xbf16, #tpu.memory_space<vmem>>, vector<1x32x128xbf16>,
    %c0_18 = arith.constant 0 : index
    %c0_19 = arith.constant 0 : index
    %c128_20 = arith.constant 128 : index
    %15 = vector.load %arg9[%c0_18, %c0_19, %c128_20] : memref<18x32x384xbf16, #tpu.memory_space<vmem>>, vector<18x31x128xbf16>
    %c0_21 = arith.constant 0 : index
    %c1_22 = arith.constant 1 : index
    %c0_23 = arith.constant 0 : index
    %16 = vector.load %arg9[%c0_21, %c1_22, %c0_23] : memref<18x32x384xbf16, #tpu.memory_space<vmem>>, vector<18x31x128xbf16>
    tpu.vector_store %arg9[%c0_21, %c1_22, %c0_23], %15 {strides = array<i32>} : memref<18x32x384xbf16, #tpu.memory_space<vmem>>, vector<18x31x128xbf16>,
    %cst_24 = arith.constant 0.000000e+00 : bf16
    %17 = vector.broadcast %cst_24 : bf16 to vector<18x1x128xbf16>
    %c0_25 = arith.constant 0 : index
    %c0_26 = arith.constant 0 : index
    %c0_27 = arith.constant 0 : index
    %18 = vector.load %arg9[%c0_25, %c0_26, %c0_27] : memref<18x32x384xbf16, #tpu.memory_space<vmem>>, vector<18x1x128xbf16>
    tpu.vector_store %arg9[%c0_25, %c0_26, %c0_27], %17 {strides = array<i32>} : memref<18x32x384xbf16, #tpu.memory_space<vmem>>, vector<18x1x128xbf16>,
    %c0_28 = arith.constant 0 : index
    %c1_29 = arith.constant 1 : index
    %c128_30 = arith.constant 128 : index
    %19 = vector.load %arg9[%c0_28, %c1_29, %c128_30] : memref<18x32x384xbf16, #tpu.memory_space<vmem>>, vector<18x31x128xbf16>
    %c0_31 = arith.constant 0 : index
    %c0_32 = arith.constant 0 : index
    %c256 = arith.constant 256 : index
    %20 = vector.load %arg9[%c0_31, %c0_32, %c256] : memref<18x32x384xbf16, #tpu.memory_space<vmem>>, vector<18x31x128xbf16>
    tpu.vector_store %arg9[%c0_31, %c0_32, %c256], %19 {strides = array<i32>} : memref<18x32x384xbf16, #tpu.memory_space<vmem>>, vector<18x31x128xbf16>,
    %cst_33 = arith.constant 0.000000e+00 : bf16
    %21 = vector.broadcast %cst_33 : bf16 to vector<18x1x128xbf16>
    %c0_34 = arith.constant 0 : index
    %c31 = arith.constant 31 : index
    %c256_35 = arith.constant 256 : index
    %22 = vector.load %arg9[%c0_34, %c31, %c256_35] : memref<18x32x384xbf16, #tpu.memory_space<vmem>>, vector<18x1x128xbf16>
    tpu.vector_store %arg9[%c0_34, %c31, %c256_35], %21 {strides = array<i32>} : memref<18x32x384xbf16, #tpu.memory_space<vmem>>, vector<18x1x128xbf16>,
    %cst_36 = arith.constant 0.000000e+00 : f32
    %23 = vector.broadcast %cst_36 : f32 to vector<512x128xf32>
    %c0_37 = arith.constant 0 : index
    %c0_38 = arith.constant 0 : index
    %c0_39 = arith.constant 0 : index
    %24 = vector.load %arg9[%c0_37, %c0_38, %c0_39] : memref<18x32x384xbf16, #tpu.memory_space<vmem>>, vector<16x32x384xbf16>
    %25 = vector.shape_cast %24 : vector<16x32x384xbf16> to vector<512x384xbf16>
    %c0_40 = arith.constant 0 : index
    %c0_41 = arith.constant 0 : index
    %c0_42 = arith.constant 0 : index
    %26 = vector.load %arg5[%c0_40, %c0_41, %c0_42] : memref<3x384x128xbf16, #tpu.memory_space<vmem>>, vector<1x384x128xbf16>
    %27 = vector.shape_cast %26 : vector<1x384x128xbf16> to vector<384x128xbf16>
    %cst_43 = arith.constant dense<0.000000e+00> : vector<512x128xf32>
    %28 = tpu.matmul %25, %27, %cst_43 {dimension_numbers = #tpu.dot_dimension_numbers<[1], [0], [0], [1], [0, 0, 1, 1], [], []>} : vector<512x384xbf16>, vector<384x128xbf16>, vector<512x128xf32> -> vector<512x128xf32>
    %29 = arith.addf %23, %28 : vector<512x128xf32>
    %c1_44 = arith.constant 1 : index
    %c0_45 = arith.constant 0 : index
    %c0_46 = arith.constant 0 : index
    %30 = vector.load %arg9[%c1_44, %c0_45, %c0_46] : memref<18x32x384xbf16, #tpu.memory_space<vmem>>, vector<16x32x384xbf16>
    %31 = vector.shape_cast %30 : vector<16x32x384xbf16> to vector<512x384xbf16>
    %c1_47 = arith.constant 1 : index
    %c0_48 = arith.constant 0 : index
    %c0_49 = arith.constant 0 : index
    %32 = vector.load %arg5[%c1_47, %c0_48, %c0_49] : memref<3x384x128xbf16, #tpu.memory_space<vmem>>, vector<1x384x128xbf16>
    %33 = vector.shape_cast %32 : vector<1x384x128xbf16> to vector<384x128xbf16>
    %cst_50 = arith.constant dense<0.000000e+00> : vector<512x128xf32>
    %34 = tpu.matmul %31, %33, %cst_50 {dimension_numbers = #tpu.dot_dimension_numbers<[1], [0], [0], [1], [0, 0, 1, 1], [], []>} : vector<512x384xbf16>, vector<384x128xbf16>, vector<512x128xf32> -> vector<512x128xf32>
    %35 = arith.addf %29, %34 : vector<512x128xf32>
    %c2 = arith.constant 2 : index
    %c0_51 = arith.constant 0 : index
    %c0_52 = arith.constant 0 : index
    %36 = vector.load %arg9[%c2, %c0_51, %c0_52] : memref<18x32x384xbf16, #tpu.memory_space<vmem>>, vector<16x32x384xbf16>
    %37 = vector.shape_cast %36 : vector<16x32x384xbf16> to vector<512x384xbf16>
    %c2_53 = arith.constant 2 : index
    %c0_54 = arith.constant 0 : index
    %c0_55 = arith.constant 0 : index
    %38 = vector.load %arg5[%c2_53, %c0_54, %c0_55] : memref<3x384x128xbf16, #tpu.memory_space<vmem>>, vector<1x384x128xbf16>
    %39 = vector.shape_cast %38 : vector<1x384x128xbf16> to vector<384x128xbf16>
    %cst_56 = arith.constant dense<0.000000e+00> : vector<512x128xf32>
    %40 = tpu.matmul %37, %39, %cst_56 {dimension_numbers = #tpu.dot_dimension_numbers<[1], [0], [0], [1], [0, 0, 1, 1], [], []>} : vector<512x384xbf16>, vector<384x128xbf16>, vector<512x128xf32> -> vector<512x128xf32>
    %41 = arith.addf %35, %40 : vector<512x128xf32>
    %c0_57 = arith.constant 0 : index
    %c0_58 = arith.constant 0 : index
    %42 = vector.load %arg6[%c0_57, %c0_58] : memref<1x128xf32, #tpu.memory_space<vmem>>, vector<1x128xf32>
    %43 = vector.broadcast %42 : vector<1x128xf32> to vector<512x128xf32>
    %44 = arith.mulf %41, %43 : vector<512x128xf32>
    %c0_59 = arith.constant 0 : index
    %c0_60 = arith.constant 0 : index
    %45 = vector.load %arg7[%c0_59, %c0_60] : memref<1x128xf32, #tpu.memory_space<vmem>>, vector<1x128xf32>
    %46 = vector.broadcast %45 : vector<1x128xf32> to vector<512x128xf32>
    %47 = arith.addf %44, %46 : vector<512x128xf32>
    %cst_61 = arith.constant 0.000000e+00 : f32
    %48 = vector.broadcast %cst_61 : f32 to vector<512x128xf32>
    %49 = arith.maximumf %47, %48 : vector<512x128xf32>
    %50 = vector.shape_cast %49 : vector<512x128xf32> to vector<256x2x128xf32>
    %cst_62 = arith.constant dense<0xFF800000> : vector<256x128xf32>
    %51 = vector.multi_reduction <maximumf>, %50, %cst_62 [1] : vector<256x2x128xf32> to vector<256x128xf32>
    %52 = vector.shape_cast %51 : vector<256x128xf32> to vector<8x2x16x128xf32>
    %53 = vector.extract_strided_slice %52 {offsets = [0, 0, 0, 0], sizes = [8, 1, 16, 128], strides = [1, 1, 1, 1]} : vector<8x2x16x128xf32> to vector<8x1x16x128xf32>
    %54 = vector.shape_cast %53 : vector<8x1x16x128xf32> to vector<8x16x128xf32>
    %55 = vector.extract_strided_slice %52 {offsets = [0, 1, 0, 0], sizes = [8, 1, 16, 128], strides = [1, 1, 1, 1]} : vector<8x2x16x128xf32> to vector<8x1x16x128xf32>
    %56 = vector.shape_cast %55 : vector<8x1x16x128xf32> to vector<8x16x128xf32>
    %57 = arith.maximumf %54, %56 : vector<8x16x128xf32>
    %58 = vector.shape_cast %57 : vector<8x16x128xf32> to vector<1x8x16x128xf32>
    %59 = arith.truncf %58 : vector<1x8x16x128xf32> to vector<1x8x16x128xbf16>
    %c0_63 = arith.constant 0 : index
    %c0_64 = arith.constant 0 : index
    %c0_65 = arith.constant 0 : index
    %c0_66 = arith.constant 0 : index
    %60 = vector.load %arg8[%c0_63, %c0_64, %c0_65, %c0_66] : memref<1x8x16x128xbf16, #tpu.memory_space<vmem>>, vector<1x8x16x128xbf16>
    tpu.vector_store %arg8[%c0_63, %c0_64, %c0_65, %c0_66], %59 {strides = array<i32>} : memref<1x8x16x128xbf16, #tpu.memory_space<vmem>>, vector<1x8x16x128xbf16>,
    return
  }
  func.func @transform_0(%arg0: i32, %arg1: i32) -> (i32, i32, i32, i32) {
    %c0_i32 = arith.constant 0 : i32
    %c0_i32_0 = arith.constant 0 : i32
    %c0_i32_1 = arith.constant 0 : i32
    return %arg0, %arg1, %c0_i32, %c0_i32_0 : i32, i32, i32, i32
  }
  func.func @transform_1(%arg0: i32, %arg1: i32) -> (i32, i32, i32, i32) {
    %c16_i32 = arith.constant 16 : i32
    %0 = arith.muli %arg1, %c16_i32 : i32
    %c1_i32 = arith.constant 1 : i32
    %1 = arith.subi %0, %c1_i32 : i32
    %c0_i32 = arith.constant 0 : i32
    %2 = arith.maxsi %1, %c0_i32 : i32
    %c0_i32_0 = arith.constant 0 : i32
    %c0_i32_1 = arith.constant 0 : i32
    %c0_i32_2 = arith.constant 0 : i32
    return %arg0, %2, %c0_i32_0, %c0_i32_1 : i32, i32, i32, i32
  }
  func.func @transform_2(%arg0: i32, %arg1: i32) -> (i32, i32, i32, i32) {
    %c16_i32 = arith.constant 16 : i32
    %0 = arith.muli %arg1, %c16_i32 : i32
    %c16_i32_0 = arith.constant 16 : i32
    %1 = arith.addi %0, %c16_i32_0 : i32
    %c31_i32 = arith.constant 31 : i32
    %2 = arith.minsi %1, %c31_i32 : i32
    %c0_i32 = arith.constant 0 : i32
    %c0_i32_1 = arith.constant 0 : i32
    %c0_i32_2 = arith.constant 0 : i32
    return %arg0, %2, %c0_i32, %c0_i32_1 : i32, i32, i32, i32
  }
  func.func @transform_3(%arg0: i32, %arg1: i32) -> (i32, i32, i32) {
    %c0_i32 = arith.constant 0 : i32
    %c0_i32_0 = arith.constant 0 : i32
    %c0_i32_1 = arith.constant 0 : i32
    %c0_i32_2 = arith.constant 0 : i32
    return %c0_i32, %c0_i32_0, %c0_i32_1 : i32, i32, i32
  }
  func.func @transform_4(%arg0: i32, %arg1: i32) -> (i32, i32) {
    %c0_i32 = arith.constant 0 : i32
    %c0_i32_0 = arith.constant 0 : i32
    %c0_i32_1 = arith.constant 0 : i32
    return %c0_i32, %c0_i32_0 : i32, i32
  }
  func.func @transform_5(%arg0: i32, %arg1: i32) -> (i32, i32) {
    %c0_i32 = arith.constant 0 : i32
    %c0_i32_0 = arith.constant 0 : i32
    %c0_i32_1 = arith.constant 0 : i32
    return %c0_i32, %c0_i32_0 : i32, i32
  }
  func.func @transform_6(%arg0: i32, %arg1: i32) -> (i32, i32, i32, i32) {
    %c0_i32 = arith.constant 0 : i32
    %c0_i32_0 = arith.constant 0 : i32
    %c0_i32_1 = arith.constant 0 : i32
    return %arg0, %arg1, %c0_i32, %c0_i32_0 : i32, i32, i32, i32
  }
}

</mosaic_0001>

<bundles_post_ra>
// kernel: tpu_custom_call.1
= control target key start
LH: loop header
LB: loop body
LE: loop exit
PB: predicated region body
PF: predicated region fallthrough
CT: control target
= control target key end

     0   :  { %s14275_s0 = inlined_call_operand.hbm [shape: bf16[2,32,32,128], index: 0, kind: input, shape index: {}]   ;;  %s14276_s1 = inlined_call_operand.hbm [shape: bf16[2,32,32,128], index: 1, kind: input, shape index: {}]   ;;  %s14277_s2 = inlined_call_operand.hbm [shape: bf16[2,32,32,128], index: 2, kind: input, shape index: {}]   ;;  %s14278_s3 = inlined_call_operand.hbm [shape: bf16[3,384,128], index: 3, kind: input, shape index: {}]   ;;  %s14279_s4 = inlined_call_operand.hbm [shape: f32[1,128], index: 4, kind: input, shape index: {}]   ;;  %s14280_s5 = inlined_call_operand.hbm [shape: f32[1,128], index: 5, kind: input, shape index: {}]   ;;  %s14281_s6 = inlined_call_operand.hbm [shape: bf16[2,16,16,128], index: 6, kind: output, shape index: {}]  }
   0x1   :  { %14329 = sst [smem:[#allocation123_spill]] %s14275_s0 }
   0x2   :  { %14330 = sst [smem:[#allocation124_spill]] %s14276_s1 }
   0x3   :  { %14331 = sst [smem:[#allocation125_spill]] %s14277_s2 }
   0x4   :  { %14332 = sst [smem:[#allocation126_spill]] %s14278_s3 }
   0x5   :  { %14333 = sst [smem:[#allocation127_spill]] %s14279_s4 }
   0x6   :  { %14334 = sst [smem:[#allocation128_spill]] %s14280_s5 }
   0x7   :  { %14335 = sst [smem:[#allocation129_spill]] %s14281_s6 }
   0x8   :  { %11 = vsyncpa [#allocation4], 0 }
   0x9   :  { %13 = vsyncpa [#allocation4 + $0x1], 0 }
   0xa   :  { %14 = vsyncpa [#allocation7], 0 }
   0xb   :  { %16 = vsyncpa [#allocation7 + $0x1], 0 }
   0xc   :  { %17 = vsyncpa [#allocation10], 0 }
   0xd   :  { %18 = vsyncpa [#allocation13], 0 }
   0xe   :  { %19 = vsyncpa [#allocation5], 0 }
   0xf   :  { %21 = vsyncpa [#allocation5 + $0x1], 0  ;;  %s10405_s21 = smov 0   ;;  %s10407_s22 = smov 0  }
  0x10   :  { %s10409_s23 = smov 0   ;;  %s10411_s24 = smov 0  }
  0x11   :  { %s10413_s25 = smov 0   ;;  %s10415_s26 = smov 0  }
  0x12   :  { %s10417_s27 = smov 0   ;;  %s10419_s28 = smov 0  }
  0x13   :  { %s10421_s29 = smov 0   ;;  %s10423_s30 = smov 0  }
  0x14   :  { %s10425_s7 = smov 0   ;;  %s10427_s8 = smov 0  }
  0x15   :  { %s10429_s9 = smov 0   ;;  %s10431_s10 = smov 0  }
  0x16 LB: > { %14336 = sst [smem:[#allocation21_spill]] %s10303_s21  ;;  %s10476_s11 = sadd.s32 4294967295, %s10355_s10   ;;  %s10355_s10 = sphi %s10431_s10, %s27_s10   ;;  %s10351_s9 = sphi %s10429_s9, %s14798_s9   ;;  %s10347_s8 = sphi %s10427_s8, %s14797_s8   ;;  %s10343_s7 = sphi %s10425_s7, %s14807_s7   ;;  %s10339_s30 = sphi %s10423_s30, %s14795_s30   ;;  %s10335_s29 = sphi %s10421_s29, %s14806_s29   ;;  %s10331_s28 = sphi %s10419_s28, %s14805_s28   ;;  %s10327_s27 = sphi %s10417_s27, %s14804_s27   ;;  %s10323_s26 = sphi %s10415_s26, %s14803_s26   ;;  %s10319_s25 = sphi %s10413_s25, %s14802_s25   ;;  %s10315_s24 = sphi %s10411_s24, %s14801_s24   ;;  %s10311_s23 = sphi %s10409_s23, %s14800_s23   ;;  %s10307_s22 = sphi %s10407_s22, %s14791_s22   ;;  %s10303_s21 = sphi %s10405_s21, %s14790_s21  }
  0x17   : > { %14337 = sst [smem:[#allocation22_spill]] %s10307_s22  ;;  %p8938_p0 = scmp.ge.s32.totalorder %s10355_s10, 1 }
  0x18   : > { %14338 = sst [smem:[#allocation23_spill]] %s10311_s23  ;;  %p14283_p1 = scmp.eq.s32.totalorder %s10476_s11, 0 }
  0x19   : > { %14339 = sst [smem:[#allocation24_spill]] %s10319_s25  ;;  %p235_p3 = scmp.lt.s32.totalorder %s10355_s10, 5 }
  0x1a   : > { %14340 = sst [smem:[#allocation25_spill]] %s10339_s30  ;;  %s10357_s13 = smov [#allocation9]  }
  0x1b   : > { %14341 = sst [smem:[#allocation26_spill]] %s10343_s7  ;;  %p10482_p4 = pnand %p8938_p0, %p235_p3 }
  0x1c   : > { %14342 = sst [smem:[#allocation27_spill]] %s10347_s8  ;;  %s247_s14 = sshll.u32 %s10357_s13, 4  ;;  %s248_s14 = int_to_ptr.vmem [resolvable:$true] %s247_s14 }
  0x1d   : > { %14343 = sst [smem:[#allocation28_spill]] %s10351_s9  ;;  %p9738_p5 = pneg %p10482_p4 }
  0x1e   : > { %s14344_s12 = scalar_select %p10482_p4, 1, 0 }
  0x1f   : > { %p10490_p6 = pnand %p9738_p5, %p14283_p1  ;;  %s14347_s3 = sld [smem:[#allocation126_spill]] }
  0x20   : > { %14345 = sst [smem:[#allocation29_spill]] %s14344_s12 }
  0x21   : > { %s14346_s15 = scalar_select %p10490_p6, 1, 0 }
  0x22   : > { %p10502_p8 = pneg %p10490_p6 }
  0x25   : > { %s10019_s18 = scalar_lea.hbm %s14347_s3, 9216 }
  0x26   : > { %p10020_p7 = scmp.ne.s32.totalorder %s14347_s3, %s10019_s18  ;;  %p10026_p11 = scmp.lt.u32.totalorder %s10019_s18, %s14347_s3 }
  0x28   : > { %p10022_p9 = pnand %p10502_p8, %p10020_p7 }
  0x2a   : > { %p10023_p10 = pneg %p10022_p9 }
  0x2c   : > { %p10028_p12 = pnand %p10026_p11, %p10023_p10 }
  0x2e   : > { %10031 = shalt.err (!%p10028_p12)
}
  0x2f   : > { %s10032_s16 = scalar_lea.vmem %s248_s14, 9216  ;;  %p10040_p5 = scmp.lt.s32.totalorder %s248_s14, %s248_s14 }
  0x30   : > { %p10033_p13 = scmp.ne.s32.totalorder %s248_s14, %s10032_s16  ;;  %p10041_p2 = scmp.lt.s32.totalorder %s10032_s16, %s10032_s16 }
  0x32   : > { %p10035_p0 = pnand %p10033_p13, %p10502_p8  ;;  %p10042_p1 = por %p10041_p2, %p10040_p5 }
  0x34   : > { %p10036_p3 = pneg %p10035_p0 }
  0x36   : > { %p10043_p4 = pnand %p10042_p1, %p10036_p3 }
  0x38   : > { %10046 = shalt.err (!%p10043_p4)
}
  0x39   : > { %s14288_s17 = smov 64   ;;  %s14290_s6 = smov 4  }
  0x3a   : > { %9741 = dma.hbm_to_vmem [thread:$0]  (!%p10490_p6), %s14347_s3, 9216, %s248_s14, [#allocation10], %s14288_s17, %s14288_s17, %s14290_s6  }
  0x3b   : > { %s36_s19 = sadd.s32 1, %s10347_s8  ;;  %s39_s20 = sadd.s32 1, %s10351_s9 }
  0x3c   : > { %p37_p1 = scmp.ge.s32.totalorder %s36_s19, 2  ;;  %p14304_p2 = scmp.eq.s32.totalorder %s10355_s10, 0 }
  0x3d   : > { %s8932_s16 = sshll.u32 %s10347_s8, 4  ;;  %s84_s30 = sadd.s32 1, %s10323_s26 }
  0x3e   : > { %s14809_s19 = smov (%p37_p1, %s36_s19), 0  ;;  %s14811_s20 = smov (!%p37_p1, %s39_s20), %s10351_s9 }
  0x3f   : > { %14349 = sst [smem:[#allocation30_spill]] %s14809_s19  ;;  %s44_s12 = ssub.s32 %s10347_s8, %s14809_s19 }
  0x40   : > { %s8933_s2 = sadd.s32 4294967295, %s8932_s16  ;;  %p41_p4 = scmp.ge.s32.totalorder %s14811_s20, 2 }
  0x41   : > { %p73_p7 = scmp.gt.s32.totalorder %s8933_s2, 0  ;;  %s8934_s14 = sshll.u32 %s14809_s19, 4 }
  0x42   : > { %p91_p9 = scmp.ne.s32.totalorder %s10323_s26, %s10319_s25  ;;  %s14813_s20 = smov (%p41_p4, %s14811_s20), 0 }
  0x43   : > { %14350 = sst [smem:[#allocation31_spill]] %s14813_s20  ;;  %s14815_s2 = smov (!%p73_p7, %s8933_s2), 0 }
  0x44   : > { %s10538_s7 = ssub.s32 %s10351_s9, %s14813_s20  ;;  %s8935_s18 = sadd.s32 4294967295, %s8934_s14 }
  0x45   : > { %14351 = sst [smem:[#allocation32_spill]] %s10538_s7  ;;  %s10541_s17 = sor.u32 %s44_s12, %s10538_s7 }
  0x46   : > { %p77_p10 = scmp.gt.s32.totalorder %s8935_s18, 0  ;;  %p10546_p12 = por %p91_p9, %p14304_p2 }
  0x47   : > { %p97_p13 = scmp.ne.s32.totalorder %s10319_s25, %s10315_s24  ;;  %s10552_s3 = sadd.s32 16, %s8932_s16 }
  0x48   : > { %s14817_s18 = smov (!%p77_p10, %s8935_s18), 0  ;;  %14353 = sst [smem:[#allocation33_spill]] %s10552_s3 }
  0x49   : > { %s80_s20 = ssub.s32 %s14815_s2, %s14817_s18  ;;  %p14354_p3 = scmp.eq.s32.totalorder %s10476_s11, 0 }
  0x4a   : > { %s81_s12 = sor.u32 %s80_s20, %s10538_s7  ;;  %s10562_s21 = sadd.s32 16, %s8934_s14 }
  0x4b   : > { %p10558_p5 = por %p97_p13, %p14354_p3  ;;  %p82_p1 = scmp.eq.s32.totalorder %s81_s12, 0 }
  0x4c   : > { %p14303_p7 = scmp.lt.s32.totalorder %s10355_s10, 4  ;;  %s10570_s16 = sshll.u32 %s10351_s9, 7 }
  0x4d   : > { %s14355_s19 = scalar_select %p10558_p5, 1, 0 }
  0x4e   : > { %s10567_s24 = scalar_select %p82_p1, %s10323_s26, %s84_s30  }
  0x4f   : > { %14356 = sst [smem:[#allocation34_spill]] %s14355_s19  ;;  %s307_s18 = sand.u32 1, %s10355_s10  }
  0x50   : > { %s309_s20 = sand.u32 1, %s10323_s26   ;;  %s8951_s7 = sshll.u32 %s14815_s2, 2 }
  0x51   : > { %s8948_s25 = sshll.u32 %s309_s20, 4  ;;  %s321_s22 = sadd.s32 %s8951_s7, %s10570_s16 }
  0x52   : > { %s8953_s3 = sshll.u32 %s321_s22, 6  ;;  %s311_s19 = scalar_lea.vmem [#allocation6], %s8948_s25 }
  0x53   : > { %s324_s12 = sshll.u32 %s311_s19, 4  ;;  %s14357_s1 = sld [smem:[#allocation124_spill]]  ;;  %s10580_s12 = int_to_ptr.vmem [resolvable:$true] %s324_s12 }
  0x54   : > { %p10586_p9 = pnand %p14303_p7, %p10546_p12  ;;  %s10360_s2 = smov [#allocation11]  }
  0x55   : > { %s261_s22 = sshll.u32 %s10360_s2, 4  ;;  %s10592_s0 = scalar_lea.sflag [#allocation7], %s307_s18  ;;  %s10590_s22 = int_to_ptr.vmem [resolvable:$true] %s261_s22 }
  0x56   : > { %p10049_p13 = pneg %p10586_p9 }
  0x59   : > { %s10578_s14 = scalar_lea.hbm %s14357_s1, %s8953_s3  ;;  %s10052_s6 = scalar_lea.hbm %s14357_s1, 16384 }
  0x5a   : > { %s10047_s3 = scalar_lea.hbm %s10578_s14, 256  ;;  %p10053_p12 = scmp.lt.u32.totalorder %s10578_s14, %s14357_s1 }
  0x5b   : > { %p10048_p10 = scmp.ne.s32.totalorder %s10578_s14, %s10047_s3  ;;  %p10054_p4 = scmp.lt.u32.totalorder %s10052_s6, %s10047_s3 }
  0x5c   : > { %p10056_p7 = scmp.lt.u32.totalorder %s10047_s3, %s10578_s14 }
  0x5d   : > { %p10050_p3 = pnand %p10049_p13, %p10048_p10  ;;  %p10055_p0 = por %p10054_p4, %p10053_p12 }
  0x5f   : > { %p10051_p1 = pneg %p10050_p3  ;;  %p10057_p2 = por %p10056_p7, %p10055_p0 }
  0x61   : > { %p10058_p11 = pnand %p10057_p2, %p10051_p1 }
  0x63   : > { %10061 = shalt.err (!%p10058_p11)
}
  0x64   : > { %s10062_s18 = scalar_lea.vmem %s10580_s12, 256  ;;  %s10361_s20 = smov [#allocation6]  }
  0x65   : > { %p10063_p10 = scmp.ne.s32.totalorder %s10580_s12, %s10062_s18  ;;  %s10067_s2 = sshll.u32 %s10361_s20, 4  ;;  %s10068_s2 = int_to_ptr.vmem [resolvable:$false] %s10067_s2 }
  0x66   : > { %s10069_s23 = scalar_lea.vmem %s10068_s2, 512  ;;  %p10070_p6 = scmp.lt.s32.totalorder %s10580_s12, %s10068_s2 }
  0x67   : > { %p10065_p3 = pnand %p10063_p10, %p10049_p13  ;;  %p10071_p4 = scmp.lt.s32.totalorder %s10069_s23, %s10062_s18 }
  0x69   : > { %p10066_p5 = pneg %p10065_p3  ;;  %p10072_p12 = por %p10071_p4, %p10070_p6 }
  0x6b   : > { %p10073_p0 = pnand %p10072_p12, %p10066_p5 }
  0x6d   : > { %10076 = shalt.err (!%p10073_p0)
}
  0x6e   : > { %s14359_s3 = smov 4   ;;  %s14360_s25 = smov 64  }
  0x6f   : > { %9754 = dma.hbm_to_vmem [thread:$0]  (!%p10586_p9), %s10578_s14, 256, %s10580_s12, %s10592_s0, %s14360_s25, %s14360_s25, %s14359_s3  }
  0x70   : > { %s14361_s4 = sld [smem:[#allocation127_spill]] }
  0x76   : > { %s10077_s7 = scalar_lea.hbm %s14361_s4, 16 }
  0x77   : > { %p10078_p6 = scmp.ne.s32.totalorder %s14361_s4, %s10077_s7  ;;  %p10084_p5 = scmp.lt.u32.totalorder %s10077_s7, %s14361_s4 }
  0x79   : > { %p10080_p2 = pnand %p10078_p6, %p10502_p8 }
  0x7b   : > { %p10081_p11 = pneg %p10080_p2 }
  0x7d   : > { %p10086_p7 = pnand %p10084_p5, %p10081_p11 }
  0x7f   : > { %10089 = shalt.err (!%p10086_p7)
}
  0x80   : > { %s10090_s12 = scalar_lea.vmem %s10590_s22, 16  ;;  %s10097_s14 = scalar_lea.vmem %s10590_s22, 32 }
  0x81   : > { %p10091_p9 = scmp.ne.s32.totalorder %s10590_s22, %s10090_s12  ;;  %p10098_p10 = scmp.lt.s32.totalorder %s10590_s22, %s10590_s22 }
  0x82   : > { %p10099_p3 = scmp.lt.s32.totalorder %s10097_s14, %s10090_s12 }
  0x83   : > { %p10093_p13 = pnand %p10091_p9, %p10502_p8 }
  0x84   : > { %p10100_p4 = por %p10099_p3, %p10098_p10 }
  0x85   : > { %p10094_p1 = pneg %p10093_p13 }
  0x87   : > { %p10101_p12 = pnand %p10100_p4, %p10094_p1 }
  0x89   : > { %10104 = shalt.err (!%p10101_p12)
}
  0x8a   : > { %p14362_p0 = scmp.ne.s32.totalorder %s14346_s15, 0  ;;  %s10362_s19 = smov [#allocation12]  }
  0x8b   : > { %s272_s7 = sshll.u32 %s10362_s19, 4  ;;  %s14363_s5 = sld [smem:[#allocation128_spill]]  ;;  %s273_s7 = int_to_ptr.vmem [resolvable:$true] %s272_s7 }
  0x8c   : > { %9744 = dma.hbm_to_vmem [thread:$0]  (!%p14362_p0), %s14361_s4, 16, %s10590_s22, [#allocation10]  }
  0x91   : > { %s10105_s30 = scalar_lea.hbm %s14363_s5, 16 }
  0x92   : > { %p10106_p6 = scmp.ne.s32.totalorder %s14363_s5, %s10105_s30  ;;  %p10112_p5 = scmp.lt.u32.totalorder %s10105_s30, %s14363_s5 }
  0x94   : > { %p10108_p2 = pnand %p10106_p6, %p10502_p8 }
  0x96   : > { %p10109_p11 = pneg %p10108_p2 }
  0x98   : > { %p10114_p7 = pnand %p10112_p5, %p10109_p11 }
  0x9a   : > { %10117 = shalt.err (!%p10114_p7)
}
  0x9b   : > { %s10118_s22 = scalar_lea.vmem %s273_s7, 16  ;;  %s10125_s23 = scalar_lea.vmem %s273_s7, 32 }
  0x9c   : > { %p10119_p9 = scmp.ne.s32.totalorder %s273_s7, %s10118_s22  ;;  %p10126_p10 = scmp.lt.s32.totalorder %s273_s7, %s273_s7 }
  0x9d   : > { %p10127_p3 = scmp.lt.s32.totalorder %s10125_s23, %s10118_s22 }
  0x9e   : > { %p10121_p13 = pnand %p10119_p9, %p10502_p8 }
  0x9f   : > { %p10128_p4 = por %p10127_p3, %p10126_p10 }
  0xa0   : > { %p10122_p1 = pneg %p10121_p13 }
  0xa2   : > { %p10129_p12 = pnand %p10128_p4, %p10122_p1 }
  0xa4   : > { %10132 = shalt.err (!%p10129_p12)
}
  0xa5   : > { %9747 = dma.hbm_to_vmem [thread:$0]  (!%p14362_p0), %s14363_s5, 16, %s273_s7, [#allocation13]  }
  0xa6   : > { %s8931_s1 = sadd.s32 4294967294, %s10355_s10   ;;  %s48_s15 = sadd.s32 1, %s10335_s29 }
  0xa7   : > { %p14364_p8 = scmp.eq.s32.totalorder %s10541_s17, 0  ;;  %p55_p6 = scmp.ne.s32.totalorder %s10335_s29, %s10331_s28 }
  0xa8   : > { %p61_p2 = scmp.ne.s32.totalorder %s10331_s28, %s10327_s27  ;;  %p228_p11 = scmp.eq.s32.totalorder %s8931_s1, 3 }
  0xa9   : > { %s10670_s13 = scalar_select %p14364_p8, %s10335_s29, %s48_s15  }
  0xaa   : > { %s283_s20 = sand.u32 1, %s10335_s29   ;;  %p14366_p5 = scmp.eq.s32.totalorder %s10355_s10, 0 }
  0xab   : > { %14365 = sst [smem:[#allocation35_spill]] %s10670_s13  ;;  %p14367_p9 = scmp.eq.s32.totalorder %s10476_s11, 0 }
  0xac   : > { %p57_p7 = por %p14366_p5, %p55_p6  ;;  %p14369_p1 = scmp.eq.s32.totalorder %s10476_s11, 3 }
  0xad   : > { %p10681_p13 = por %p14367_p9, %p61_p2  ;;  %p10691_p0 = por %p228_p11, %p61_p2 }
  0xae   : > { %p10687_p10 = por %p14369_p1, %p55_p6  ;;  %s8943_s30 = sshll.u32 %s283_s20, 8 }
  0xaf   : > { %s14371_s17 = scalar_select %p10691_p0, 1, 0 }
  0xb0   : > { %s14370_s7 = scalar_select %p10687_p10, 1, 0 }
  0xb1   : > { %s9212_s18 = sshll.u32 %s10347_s8, 6  ;;  %s287_s14 = scalar_lea.vmem [#allocation3], %s8943_s30 }
  0xb2   : > { %s294_s12 = sadd.s32 %s9212_s18, %s10570_s16  ;;  %s297_s22 = sshll.u32 %s287_s14, 4  ;;  %s10697_s22 = int_to_ptr.vmem [resolvable:$true] %s297_s22 }
  0xb3   : > { %s8947_s23 = sshll.u32 %s294_s12, 6  ;;  %s14372_s1 = sld [smem:[#allocation123_spill]] }
  0xb4   : > { %p14373_p3 = scmp.lt.s32.totalorder %s10355_s10, 4  ;;  %s10710_s30 = scalar_lea.sflag [#allocation4], %s283_s20 }
  0xb6   : > { %p10706_p4 = pnand %p14373_p3, %p57_p7 }
  0xb8   : > { %p10135_p8 = pneg %p10706_p4 }
  0xb9   : > { %s10702_s15 = scalar_lea.hbm %s14372_s1, %s8947_s23  ;;  %s10138_s23 = scalar_lea.hbm %s14372_s1, 16384 }
  0xba   : > { %s10133_s18 = scalar_lea.hbm %s10702_s15, 4096  ;;  %p10139_p11 = scmp.lt.u32.totalorder %s10702_s15, %s14372_s1 }
  0xbb   : > { %p10134_p12 = scmp.ne.s32.totalorder %s10702_s15, %s10133_s18  ;;  %p10140_p5 = scmp.lt.u32.totalorder %s10138_s23, %s10133_s18 }
  0xbc   : > { %p10142_p9 = scmp.lt.u32.totalorder %s10133_s18, %s10702_s15 }
  0xbd   : > { %p10136_p6 = pnand %p10135_p8, %p10134_p12  ;;  %p10141_p7 = por %p10140_p5, %p10139_p11 }
  0xbf   : > { %p10137_p2 = pneg %p10136_p6  ;;  %p10143_p1 = por %p10142_p9, %p10141_p7 }
  0xc1   : > { %p10144_p3 = pnand %p10143_p1, %p10137_p2 }
  0xc3   : > { %10147 = shalt.err (!%p10144_p3)
}
  0xc4   : > { %s10148_s20 = scalar_lea.vmem %s10697_s22, 4096  ;;  %s10363_s12 = smov [#allocation3]  }
  0xc5   : > { %p10149_p12 = scmp.ne.s32.totalorder %s10697_s22, %s10148_s20  ;;  %s10153_s14 = sshll.u32 %s10363_s12, 4  ;;  %s10154_s14 = int_to_ptr.vmem [resolvable:$false] %s10153_s14 }
  0xc6   : > { %s10155_s6 = scalar_lea.vmem %s10154_s14, 8192  ;;  %p10156_p10 = scmp.lt.s32.totalorder %s10697_s22, %s10154_s14 }
  0xc7   : > { %p10151_p6 = pnand %p10149_p12, %p10135_p8  ;;  %p10157_p11 = scmp.lt.s32.totalorder %s10155_s6, %s10148_s20 }
  0xc9   : > { %p10152_p0 = pneg %p10151_p6  ;;  %p10158_p5 = por %p10157_p11, %p10156_p10 }
  0xcb   : > { %p10159_p7 = pnand %p10158_p5, %p10152_p0 }
  0xcd   : > { %10162 = shalt.err (!%p10159_p7)
}
  0xce   : > { %s14375_s18 = sld [smem:[#allocation23_spill]]  ;;  %s14376_s23 = sld [smem:[#allocation33_spill]] }
  0xcf   : > { %s14377_s19 = sld [smem:[#allocation22_spill]]  ;;  %s14379_s20 = sld [smem:[#allocation32_spill]] }
  0xd0   : > { %s14378_s12 = sld [smem:[#allocation21_spill]]  ;;  %p14381_p0 = scmp.lt.s32.totalorder %s10562_s21, 31 }
  0xd1   : > { %9751 = dma.hbm_to_vmem [thread:$0]  (!%p10706_p4), %s10702_s15, 4096, %s10697_s22, %s10710_s30, %s14360_s25, %s14360_s25, %s14359_s3  }
  0xd2   : > { %s14821_s21 = smov (!%p14381_p0, %s10562_s21), 31  ;;  %p14382_p9 = scmp.eq.s32.totalorder %s10355_s10, 0 }
  0xd3   : > { %p14383_p12 = scmp.eq.s32.totalorder %s10476_s11, 0  ;;  %s14385_s13 = sld [smem:[#allocation125_spill]] }
  0xd4   : > { %s120_s4 = sadd.s32 1, %s14375_s18  ;;  %p14380_p10 = scmp.lt.s32.totalorder %s14376_s23, 31 }
  0xd5   : > { %p127_p8 = scmp.ne.s32.totalorder %s14375_s18, %s14377_s19  ;;  %s336_s6 = sand.u32 1, %s14375_s18  }
  0xd6   : > { %s14819_s23 = smov (!%p14380_p10, %s14376_s23), 31  ;;  %p133_p2 = scmp.ne.s32.totalorder %s14377_s19, %s14378_s12 }
  0xd7   : > { %s116_s14 = ssub.s32 %s14819_s23, %s14821_s21  ;;  %p129_p1 = por %p127_p8, %p14382_p9 }
  0xd8   : > { %s117_s1 = sor.u32 %s116_s14, %s14379_s20  ;;  %p10758_p6 = por %p133_p2, %p14383_p12 }
  0xd9   : > { %p118_p3 = scmp.eq.s32.totalorder %s117_s1, 0  ;;  %s8954_s22 = sshll.u32 %s336_s6, 4 }
  0xda   : > { %s14384_s5 = scalar_select %p10758_p6, 1, 0 }
  0xdb   : > { %s8956_s15 = sshll.u32 %s14819_s23, 2  ;;  %s14823_s18 = smov (!%p118_p3, %s14375_s18), %s120_s4 }
  0xdc   : > { %s348_s30 = sadd.s32 %s8956_s15, %s10570_s16  ;;  %s338_s8 = scalar_lea.vmem [#allocation8], %s8954_s22 }
  0xdd   : > { %s8958_s9 = sshll.u32 %s348_s30, 6  ;;  %s351_s19 = sshll.u32 %s338_s8, 4  ;;  %s10771_s19 = int_to_ptr.vmem [resolvable:$true] %s351_s19 }
  0xde   : > { %s10769_s20 = scalar_lea.hbm %s14385_s13, %s8958_s9  ;;  %p14386_p4 = scmp.lt.s32.totalorder %s10355_s10, 4 }
  0xdf   : > { %s10163_s16 = scalar_lea.hbm %s10769_s20, 256  ;;  %s10168_s23 = scalar_lea.hbm %s14385_s13, 16384 }
  0xe0   : > { %p10775_p11 = pnand %p14386_p4, %p129_p1  ;;  %p10164_p5 = scmp.ne.s32.totalorder %s10769_s20, %s10163_s16 }
  0xe1   : > { %p10169_p8 = scmp.lt.u32.totalorder %s10769_s20, %s14385_s13  ;;  %p10170_p2 = scmp.lt.u32.totalorder %s10168_s23, %s10163_s16 }
  0xe2   : > { %p10165_p7 = pneg %p10775_p11  ;;  %p10172_p1 = scmp.lt.u32.totalorder %s10163_s16, %s10769_s20 }
  0xe3   : > { %p10171_p9 = por %p10170_p2, %p10169_p8 }
  0xe4   : > { %p10166_p10 = pnand %p10165_p7, %p10164_p5 }
  0xe5   : > { %p10173_p3 = por %p10172_p1, %p10171_p9 }
  0xe6   : > { %p10167_p0 = pneg %p10166_p10 }
  0xe8   : > { %p10174_p12 = pnand %p10173_p3, %p10167_p0 }
  0xea   : > { %10177 = shalt.err (!%p10174_p12)
}
  0xeb   : > { %s10178_s6 = scalar_lea.vmem %s10771_s19, 256  ;;  %s10364_s22 = smov [#allocation8]  }
  0xec   : > { %p10179_p4 = scmp.ne.s32.totalorder %s10771_s19, %s10178_s6  ;;  %s10183_s15 = sshll.u32 %s10364_s22, 4  ;;  %s10184_s15 = int_to_ptr.vmem [resolvable:$false] %s10183_s15 }
  0xed   : > { %s10185_s30 = scalar_lea.vmem %s10184_s15, 512  ;;  %p10186_p6 = scmp.lt.s32.totalorder %s10771_s19, %s10184_s15 }
  0xee   : > { %p10181_p5 = pnand %p10179_p4, %p10165_p7  ;;  %p10187_p8 = scmp.lt.s32.totalorder %s10185_s30, %s10178_s6 }
  0xf0   : > { %p10182_p10 = pneg %p10181_p5  ;;  %p10188_p2 = por %p10187_p8, %p10186_p6 }
  0xf2   : > { %p10189_p9 = pnand %p10188_p2, %p10182_p10 }
  0xf4   : > { %10192 = shalt.err (!%p10189_p9)
}
  0xf5   : > { %9757 = dma.hbm_to_vmem [thread:$0]  (!%p10775_p11), %s10769_s20, 256, %s10771_s19, %s10592_s0, %s14360_s25, %s14360_s25, %s14359_s3  }
  0xf6   : > { %s14388_s12 = sld [smem:[#allocation29_spill]] }
  0xfc   : > { %p14389_p7 = scmp.ne.s32.totalorder %s14388_s12, 0 }
  0xfe   : > { %363 = sbr.rel (%p14389_p7) target bundleno = 1766 (0x6e6), region = 44 }
 0x105   : > { %s10811_s21 = sand.u32 1, %s10331_s28  }
 0x106   : > { %s8960_s16 = sshll.u32 %s10811_s21, 8  ;;  %s366_s8 = scalar_lea.sflag [#allocation4], %s10811_s21 }
 0x107   : > { %s10815_s9 = scalar_lea.vmem [#allocation3], %s8960_s16 }
 0x108   : > { %10278 = dma.done.wait (%p10681_p13), %s366_s8, 4096  }
 0x109   : > { %10280 = vsyncadd (%p10681_p13), %s366_s8, 4294963200  ;;  %s14390_s0 = sld [smem:[#allocation24_spill]]  ;;  %s14391_s3 = sld [smem:[#allocation34_spill]] }
 0x10a   : > { %s374_s25 = sand.u32 1, %s10476_s11  }
 0x10b   : > { %s375_s1 = scalar_lea.sflag [#allocation7], %s374_s25 }
 0x10f   : > { %s376_s19 = sand.u32 1, %s14390_s0   ;;  %p14392_p6 = scmp.ne.s32.totalorder %s14391_s3, 0 }
 0x110   : > { %s8961_s20 = sshll.u32 %s376_s19, 4 }
 0x111   : > { %s10823_s23 = scalar_lea.vmem [#allocation6], %s8961_s20 }
 0x112   : > { %10282 = dma.done.wait (%p14392_p6), %s375_s1, 256  }
 0x113   : > { %10284 = vsyncadd (%p14392_p6), %s375_s1, 4294967040  ;;  %s14393_s4 = sld [smem:[#allocation22_spill]]  ;;  %p14394_p13 = scmp.ne.s32.totalorder %s14384_s5, 0 }
 0x119   : > { %s385_s14 = sand.u32 1, %s14393_s4  }
 0x11a   : > { %s8962_s6 = sshll.u32 %s385_s14, 4 }
 0x11b   : > { %s10830_s2 = scalar_lea.vmem [#allocation8], %s8962_s6 }
 0x11c   : > { %10286 = dma.done.wait (%p14394_p13), %s375_s1, 256  }
 0x11d   : > { %10288 = vsyncadd (%p14394_p13), %s375_s1, 4294967040  ;;  %p14395_p11 = scmp.eq.s32.totalorder %s10476_s11, 0 }
 0x11f   : > { %10290 = dma.done.wait (%p14395_p11), [#allocation10], 9232   ;;  %p14396_p0 = pmov %p14395_p11 }
 0x121   : > { %10292 = vsyncadd (%p14396_p0), [#allocation10], 4294958064  ;;  %p14397_p1 = pmov %p14396_p0 }
 0x122   : > { %p14398_p3 = pmov %p14396_p0 }
 0x123   : > { %10294 = dma.done.wait (%p14397_p1), [#allocation13], 16  }
 0x124   : > { %10296 = vsyncadd (%p14398_p3), [#allocation13], 4294967280  ;;  %v14313_v0 = vmov 0   ;;  %v9891_v1 = vld [vmem:[#allocation9 + $0xc0] sm:$0xff]   ;;  %v9893_v3 = vld [vmem:[#allocation9 + $0xc8] sm:$0xff]   ;;  %vm1134_vm1 = vcmask 1047552  }
 0x125   : > { %2171 = vmatprep.subr.bf16.mxu0 %v14313_v0  ;;  %v10845_v2 = vld [vmem:[#allocation9 + $0x140] sm:$0xff]   ;;  %v10849_v4 = vld [vmem:[#allocation9 + $0x148] sm:$0xff]   ;;  %v10853_v5 = vld [vmem:[#allocation9 + $0x150] sm:$0xff]   ;;  %vm1301_vm0 = vsmask.f32 7424  ;;  %v14399_v19 = vmov 0 }
 0x126   : > { %2172 = vmatpush1.bf16.msra.mxu0 %v9891_v1  ;;  %9702 = vmatprep.subr.bf16.mxu1 %v10845_v2  ;;  %v9895_v6 = vld [vmem:[#allocation9 + $0xd0] sm:$0xff]   ;;  %v10858_v7 = vld [vmem:[#allocation9 + $0x158] sm:$0xff]   ;;  %v10863_v9 = vld [vmem:[#allocation9 + $0x160] sm:$0xff]   ;;  %vm1681_vm3 = vcmask 1047559   ;;  %vm1682_vm4 = vsmask.f32 7966 }
 0x127   : > { %2173 = vmatprep.subr.bf16.mxu0 %v14313_v0  ;;  %9710 = vmatpush3.bf16.msra.mxu1 %v10845_v2  ;;  %v9897_v8 = vld [vmem:[#allocation9 + $0xd8] sm:$0xff]   ;;  %v9899_v10 = vld [vmem:[#allocation9 + $0xe0] sm:$0xff]   ;;  %v10866_v11 = vld [vmem:[#allocation9 + $0x168] sm:$0xff]   ;;  %v14402_v47 = vmov 0  ;;  %s14405_s5 = sld [smem:[#allocation25_spill]]  ;;  %vm1209_vm9 = vcmask 1040384  }
 0x128   : > { %9703 = vmatprep.subr.bf16.mxu1 %v10849_v4  ;;  %v9907_v12 = vld [vmem:[%s10815_s9 + $0x60] sm:$0xff]   ;;  %v9908_v13 = vld [vmem:[%s10815_s9 + $0x68] sm:$0xff]   ;;  %vm10875_vm2 = vmand %vm1134_vm1, %vm1301_vm0  ;;  %vm1135_vm6 = vsmask.f32 7938  ;;  %vm827_vm7 = vsmask.f32 256 }
 0x129   : > { %v9901_v14 = vld [vmem:[#allocation9 + $0xe8] sm:$0xff]   ;;  %756 = vst [vmem:[#allocation2 + $0x158] sm:$0xff] %v9907_v12  ;;  %757 = vst [vmem:[#allocation2 + $0x170] sm:$0xff] %v9908_v13  ;;  %v1408_v15 = vshrl.u32 %v9907_v12, 16  ;;  %v1410_v16 = vshll.u32 %v9907_v12, 16  ;;  %v1415_v17 = vshll.u32 %v9908_v13, 16 }
 0x12a   : > { %2174 = vmatpush1.bf16.msra.mxu0 %v9893_v3  ;;  %v1419_v18 = vshrl.u32 %v9908_v13, 16  ;;  %v14400_v19 = vsel %vm10875_vm2, 4294967295, %v14399_v19  ;;  %v9903_v20 = vld [vmem:[#allocation9 + $0xf0] sm:$0xff]   ;;  %v1638_v24 = vld [vmem:[#allocation2 + $0x178] sm:$0xff]  ;;  %v1642_v39 = vld [vmem:[#allocation2 + $0x1a8] sm:$0xff]  ;;  %vm6017_vm13 = vcmask 1041408  }
 0x12b   : > { %2175 = vmatprep.subr.bf16.mxu0 %v14313_v0  ;;  %9711 = vmatpush3.bf16.msra.mxu1 %v10849_v4  ;;  %14401 = vst [vmem:[#allocation36_spill] sm:$0xff] %v14400_v19  ;;  %v10881_v21 = vld [vmem:[#allocation9 + $0x170] sm:$0xff]   ;;  %v1412_v22 = vrot.slane %v1410_v16, 1  ;;  %v1417_v23 = vrot.slane %v1415_v17, 1  ;;  %v9914_v28 = vld [vmem:[%s10815_s9 + $0x78] sm:$0xff]   ;;  %v9918_v40 = vld [vmem:[%s10815_s9 + $0x80] sm:$0xff]  }
 0x12c   : > { %9704 = vmatprep.subr.bf16.mxu1 %v10853_v5  ;;  %v9913_v27 = vld [vmem:[%s10815_s9 + $0x70] sm:$0xff]   ;;  %v9905_v29 = vld [vmem:[#allocation9 + $0xf8] sm:$0xff]   ;;  %759 = vst [vmem:[#allocation2 + $0x1a0] sm:$0xff] %v9914_v28  ;;  %v1430_v35 = vshll.u32 %v9914_v28, 16  ;;  %v1434_v36 = vshrl.u32 %v9914_v28, 16  ;;  %v9909_v41 = vld [vmem:[#allocation9 + $0x100] sm:$0xff]  }
 0x12d   : > { %v1413_v25 = vor.u32 %v1412_v22, %v1408_v15  ;;  %v1421_v26 = vor.u32 %v1419_v18, %v1417_v23  ;;  %v9906_v30 = vld [vmem:[#allocation9 + $0x178] sm:$0xff]   ;;  %758 = vst [vmem:[#allocation2 + $0x188] sm:$0xff] %v9913_v27  ;;  %v1423_v33 = vshrl.u32 %v9913_v27, 16  ;;  %v1425_v34 = vshll.u32 %v9913_v27, 16  ;;  %v9919_v44 = vld [vmem:[%s10815_s9 + $0x88] sm:$0xff]   ;;  %760 = vst [vmem:[#allocation2 + $0x1b8] sm:$0xff] %v9918_v40 }
 0x12e   : > { %2176 = vmatpush1.bf16.msra.mxu0 %v9895_v6  ;;  %v1432_v38 = vrot.slane %v1430_v35, 1  ;;  %v1438_v45 = vshrl.u32 %v9918_v40, 16  ;;  %v1440_v46 = vshll.u32 %v9918_v40, 16  ;;  %vm10898_vm5 = vmand %vm1681_vm3, %vm1682_vm4  ;;  %761 = vst [vmem:[#allocation2 + $0x1d0] sm:$0xff] %v9919_v44  ;;  %v1445_v51 = vshll.u32 %v9919_v44, 16  ;;  %v9911_v55 = vld [vmem:[#allocation9 + $0x108] sm:$0xff]  }
 0x12f   : > { %2177 = vmatprep.subr.bf16.mxu0 %v14313_v0  ;;  %9712 = vmatpush3.bf16.msra.mxu1 %v10853_v5  ;;  %v1418_v31 = vsel %vm1301_vm0, %v1413_v25, %v1417_v23  ;;  %v1639_v32 = vsel %vm10875_vm2, %v1421_v26, %v1638_v24  ;;  %v1427_v37 = vrot.slane %v1425_v34, 1  ;;  %v14403_v47 = vsel %vm10898_vm5, 4294967295, %v14402_v47  ;;  %v1646_v58 = vld [vmem:[#allocation2 + $0x1d8] sm:$0xff]  ;;  %v9924_v61 = vld [vmem:[%s10815_s9 + $0x90] sm:$0xff]   ;;  %v9910_v63 = vld [vmem:[#allocation9] sm:$0xff]   ;;  %p457_p12 = scmp.eq.s32.totalorder %s14405_s5, 0 }
 0x130   : > { %9705 = vmatprep.subr.bf16.mxu1 %v10858_v7  ;;  %1637 = vst [vmem:[#allocation2 + $0x160] sm:$0xff] %v1418_v31  ;;  %9502 = vmatprep.mubr.bf16.mxu1 %v1418_v31  ;;  %1640 = vst [vmem:[#allocation2 + $0x178] sm:$0xff] %v1639_v32  ;;  %v1436_v43 = vor.u32 %v1434_v36, %v1432_v38  ;;  %v1442_v50 = vrot.slane %v1440_v46, 1  ;;  %v1449_v53 = vshrl.u32 %v9919_v44, 16  ;;  %v1447_v57 = vrot.slane %v1445_v51, 1  ;;  %v9925_v62 = vld [vmem:[%s10815_s9 + $0x98] sm:$0xff]  }
 0x131   : > { %v1428_v42 = vor.u32 %v1427_v37, %v1423_v33  ;;  %14404 = vst [vmem:[#allocation37_spill] sm:$0xff] %v14403_v47  ;;  %v9915_v1 = vld [vmem:[#allocation9 + $0x110] sm:$0xff]   ;;  %762 = vst [vmem:[#allocation2 + $0x1e8] sm:$0xff] %v9924_v61  ;;  %v1453_v6 = vshrl.u32 %v9924_v61, 16  ;;  %v1464_v12 = vshrl.u32 %v9925_v62, 16  ;;  %v1650_v18 = vld [vmem:[#allocation2 + $0x208] sm:$0xff] }
 0x132   : > { %2178 = vmatpush1.bf16.msra.mxu0 %v9897_v8  ;;  %v1643_v49 = vsel %vm10875_vm2, %v1436_v43, %v1642_v39  ;;  %v1443_v56 = vor.u32 %v1442_v50, %v1438_v45  ;;  %v1451_v60 = vor.u32 %v1449_v53, %v1447_v57  ;;  %763 = vst [vmem:[#allocation2 + $0x200] sm:$0xff] %v9925_v62  ;;  %v1455_v8 = vshll.u32 %v9924_v61, 16  ;;  %v9912_v22 = vld [vmem:[#allocation9 + $0x8] sm:$0xff]   ;;  %v9929_v25 = vld [vmem:[%s10815_s9] sm:$0xff]   ;;  %s10925_s11 = scalar_select %p457_p12, 1, 0  ;;  %vm10943_vm8 = vmand %vm1134_vm1, %vm1135_vm6 }
 0x133   : > { %2179 = vmatprep.subr.bf16.mxu0 %v14313_v0  ;;  %9713 = vmatpush3.bf16.msra.mxu1 %v10858_v7  ;;  %v1433_v48 = vsel %vm1301_vm0, %v1428_v42, %v1432_v38  ;;  %1644 = vst [vmem:[#allocation2 + $0x1a8] sm:$0xff] %v1643_v49  ;;  %v9920_v26 = vld [vmem:[#allocation9 + $0x120] sm:$0xff]   ;;  %744 = vst [vmem:[#allocation2 + $0x38] sm:$0xff] %v9929_v25  ;;  %v9931_v32 = vld [vmem:[%s10815_s9 + $0xa8] sm:$0xff]   ;;  %p465_p4 = scmp.eq.s32.totalorder %s14405_s5, 1  ;;  %vm8578_vm14 = vcmask 1041409  }
 0x134   : > { %9706 = vmatprep.subr.bf16.mxu1 %v10863_v9  ;;  %1641 = vst [vmem:[#allocation2 + $0x190] sm:$0xff] %v1433_v48  ;;  %v10910_v59 = vsel %vm1301_vm0, %v1443_v56, %v1447_v57  ;;  %v1647_v3 = vsel %vm10875_vm2, %v1451_v60, %v1646_v58  ;;  %v1457_v16 = vrot.slane %v1455_v8, 1  ;;  %2203 = vmatprep.mubr.bf16.mxu0 %v9929_v25  ;;  %v9930_v31 = vld [vmem:[%s10815_s9 + $0xa0] sm:$0xff]   ;;  %v9916_v34 = vld [vmem:[#allocation9 + $0x10] sm:$0xff]   ;;  %765 = vst [vmem:[#allocation2 + $0x230] sm:$0xff] %v9931_v32  ;;  %vm8580_vm15 = vcmask 1042434  }
 0x135   : > { %1645 = vst [vmem:[#allocation2 + $0x1c0] sm:$0xff] %v10910_v59  ;;  %1648 = vst [vmem:[#allocation2 + $0x1d8] sm:$0xff] %v1647_v3  ;;  %v1141_v37 = vld [vmem:[#allocation2 + $0x30] sm:$0xff]  ;;  %v1468_v38 = vshrl.u32 %v9930_v31, 16  ;;  %v1470_v39 = vshll.u32 %v9930_v31, 16  ;;  %v9922_v40 = vld [vmem:[#allocation9 + $0x128] sm:$0xff]  }
 0x136   : > { %2180 = vmatpush1.bf16.msra.mxu0 %v9899_v10  ;;  %v1460_v10 = vshll.u32 %v9925_v62, 16  ;;  %v1458_v23 = vor.u32 %v1457_v16, %v1453_v6  ;;  %764 = vst [vmem:[#allocation2 + $0x218] sm:$0xff] %v9930_v31  ;;  %v1475_v42 = vshll.u32 %v9931_v32, 16  ;;  %v1479_v43 = vshrl.u32 %v9931_v32, 16  ;;  %v10950_v50 = vld [vmem:[%s10815_s9 + $0x8] sm:$0xff]   ;;  %v9921_v53 = vld [vmem:[#allocation9 + $0x18] sm:$0xff]   ;;  %vm10973_vm10 = vmand %vm1209_vm9, %vm827_vm7 }
 0x137   : > { %2181 = vmatprep.subr.bf16.mxu0 %v14313_v0  ;;  %9714 = vmatpush3.bf16.msra.mxu1 %v10863_v9  ;;  %v1705_v52 = vld [vmem:[#allocation2 + $0x178] sm:$0x80]  ;;  %v1472_v46 = vrot.slane %v1470_v39, 1  ;;  %745 = vst [vmem:[#allocation2 + $0x50] sm:$0xff] %v10950_v50  ;;  %v854_v56 = vshll.u32 %v10950_v50, 16  ;;  %v9935_v57 = vld [vmem:[%s10815_s9 + $0xb0] sm:$0xff]  }
 0x138   : > { %9707 = vmatprep.subr.bf16.mxu1 %v10866_v11  ;;  %v1706_v54 = vsel %vm10898_vm5, 0, %v1705_v52  ;;  %v1462_v17 = vrot.slane %v1460_v10, 1  ;;  %v1477_v49 = vrot.slane %v1475_v42, 1  ;;  %v9936_v58 = vld [vmem:[%s10815_s9 + $0xb8] sm:$0xff]   ;;  %v9926_v62 = vld [vmem:[#allocation9 + $0x130] sm:$0xff]   ;;  %766 = vst [vmem:[#allocation2 + $0x248] sm:$0xff] %v9935_v57 }
 0x139   : > { %1707 = vst [vmem:[#allocation2 + $0x178] sm:$0x80] %v1706_v54  ;;  %v1473_v52 = vor.u32 %v1472_v46, %v1468_v38  ;;  %767 = vst [vmem:[#allocation2 + $0x260] sm:$0xff] %v9936_v58  ;;  %v1483_v6 = vshrl.u32 %v9935_v57, 16  ;;  %v14409_v10 = vmov 0  ;;  %v10978_v16 = vld [vmem:[%s10815_s9 + $0x10] sm:$0xff]  }
 0x13a   : > { %2182 = vmatpush1.bf16.msra.mxu0 %v9901_v14  ;;  %v1708_v13 = vld [vmem:[#allocation2 + $0x1a8] sm:$0x80]  ;;  %v9917_v14 = vld [vmem:[#allocation9 + $0x118] sm:$0xff]   ;;  %v1466_v24 = vor.u32 %v1464_v12, %v1462_v17  ;;  %v10929_v27 = vsel %vm1301_vm0, %v1458_v23, %v1462_v17  ;;  %v1481_v54 = vor.u32 %v1479_v43, %v1477_v49  ;;  %v14410_v10 = vsel %vm10973_vm10, 4294967295, %v14409_v10  ;;  %746 = vst [vmem:[#allocation2 + $0x68] sm:$0xff] %v10978_v16  ;;  %v9932_v42 = vld [vmem:[#allocation9 + $0x30] sm:$0xff]  }
 0x13b   : > { %2183 = vmatprep.subr.bf16.mxu0 %v14313_v0  ;;  %9715 = vmatpush3.bf16.msra.mxu1 %v10866_v11  ;;  %v1709_v15 = vsel %vm10898_vm5, 0, %v1708_v13  ;;  %1649 = vst [vmem:[#allocation2 + $0x1f0] sm:$0xff] %v10929_v27  ;;  %v10963_v61 = vsel %vm1301_vm0, %v1473_v52, %v1477_v49  ;;  %14411 = vst [vmem:[#allocation39_spill] sm:$0xff] %v14410_v10  ;;  %v1485_v12 = vshll.u32 %v9935_v57, 16  ;;  %v1490_v13 = vshll.u32 %v9936_v58, 16  ;;  %v9928_v17 = vld [vmem:[#allocation9 + $0x138] sm:$0xff]  }
 0x13c   : > { %9708 = vmatprep.subr.bf16.mxu1 %v10881_v21  ;;  %1710 = vst [vmem:[#allocation2 + $0x1a8] sm:$0x80] %v1709_v15  ;;  %v1651_v28 = vsel %vm10875_vm2, %v1466_v24, %v1650_v18  ;;  %v1711_v33 = vld [vmem:[#allocation2 + $0x1d8] sm:$0x80]  ;;  %1653 = vst [vmem:[#allocation2 + $0x220] sm:$0xff] %v10963_v61  ;;  %v859_v24 = vshrl.u32 %v10978_v16, 16 }
 0x13d   : > { %1652 = vst [vmem:[#allocation2 + $0x208] sm:$0xff] %v1651_v28  ;;  %v1712_v35 = vsel %vm10898_vm5, 0, %v1711_v33  ;;  %v1487_v18 = vrot.slane %v1485_v12, 1  ;;  %v9927_v31 = vld [vmem:[#allocation9 + $0x28] sm:$0xff]   ;;  %v11004_v39 = vld [vmem:[%s10815_s9 + $0x18] sm:$0xff]   ;;  %vm8584_vm1 = vcmask 1044484  }
 0x13e   : > { %2184 = vmatpush1.bf16.msra.mxu0 %v9903_v20  ;;  %1713 = vst [vmem:[#allocation2 + $0x1d8] sm:$0x80] %v1712_v35  ;;  %v10994_v33 = vrot.slane %v859_v24, 7  ;;  %v1662_v52 = vld [vmem:[#allocation2 + $0x298] sm:$0xff]  ;;  %747 = vst [vmem:[#allocation2 + $0x80] sm:$0xff] %v11004_v39  ;;  %vm8588_vm4 = vcmask 1046534  }
 0x13f   : > { %2185 = vmatprep.subr.bf16.mxu0 %v14313_v0  ;;  %9716 = vmatpush3.bf16.msra.mxu1 %v10881_v21  ;;  %v1488_v28 = vor.u32 %v1487_v18, %v1483_v6  ;;  %v9945_v57 = vld [vmem:[%s10815_s9 + $0xd8] sm:$0xff]   ;;  %s466_s22 = scalar_select %p465_p4, 1, 0 }
 0x140   : > { %9709 = vmatprep.subr.bf16.mxu1 %v9906_v30  ;;  %v1923_v20 = vld [vmem:[#allocation2 + $0x178] sm:$0xff]  ;;  %771 = vst [vmem:[#allocation2 + $0x2c0] sm:$0xff] %v9945_v57  ;;  %v1520_v6 = vshll.u32 %v9945_v57, 16  ;;  %s8966_s15 = sshll.u32 %s10811_s21, 6  ;;  %s14785_s12 = sld [smem:[#allocation26_spill]] }
 0x141   : > { %s12834_s30 = scalar_lea.vmem [#allocation14], %s8966_s15  ;;  %s9341_s16 = sshll.u32 %s14405_s5, 4 }
 0x142   : > { %2186 = vmatpush1.bf16.msra.mxu0 %v9905_v29  ;;  %v844_v29 = vshrl.u32 %v9929_v25, 16  ;;  %v1522_v18 = vrot.slane %v1520_v6, 1  ;;  %v459_v6 = vstv %s10925_s11  ;;  %s8762_s0 = sshll.u32 %s12834_s30, 4  ;;  %s14786_s20 = sld [smem:[#allocation129_spill]]  ;;  %s14191_s0 = int_to_ptr.vmem [resolvable:$true] %s8762_s0 }
 0x143   : > { %2187 = vmatprep.subr.bf16.mxu0 %v14313_v0  ;;  %9717 = vmatpush3.bf16.msra.mxu1 %v9906_v30  ;;  %v847_v30 = vshll.u32 %v9929_v25, 16  ;;  %v1929_v44 = vld [vmem:[#allocation2 + $0x1a8] sm:$0xff]  ;;  %v862_v25 = vshll.u32 %v10978_v16, 16  ;;  %vm11097_vm11 = vcmp.eq.s32.totalorder %v459_v6, 1  ;;  %s10193_s4 = scalar_lea.vmem %s14191_s0, 1024  ;;  %p14787_p10 = scmp.ne.s32.totalorder %s14370_s7, 0 }
 0x144   : > { %2893 = vmatprep.subr.bf16.mxu1 %v14313_v0  ;;  %v10939_v36 = vrot.slane %v844_v29, 7  ;;  %v1714_v60 = vld [vmem:[#allocation2 + $0x208] sm:$0x80]  ;;  %p10194_p5 = scmp.ne.s32.totalorder %s14191_s0, %s10193_s4  ;;  %s10367_s14 = smov [#allocation14]  }
 0x145   : > { %v1935_v8 = vld [vmem:[#allocation2 + $0x1d8] sm:$0xff]  ;;  %s10197_s6 = sshll.u32 %s10367_s14, 4  ;;  %s10198_s6 = int_to_ptr.vmem [resolvable:$false] %s10197_s6 }
 0x146   : > { %2188 = vmatpush1.bf16.msra.mxu0 %v9909_v41  ;;  %9503 = vmatmul.mubr.bf16.vlgmr.msra.gmra.mrb[0].mxu1 %v1923_v20  ;;  %v14406_v41 = vmov 0  ;;  %v849_v45 = vor.u32 %v847_v30, %v10939_v36  ;;  %v1492_v20 = vrot.slane %v1490_v13, 1  ;;  %v9940_v30 = vld [vmem:[%s10815_s9 + $0xc0] sm:$0xff]   ;;  %s9208_s8 = sshll.u32 %s14785_s12, 5  ;;  %p10195_p8 = pnand %p10194_p5, %p14787_p10 }
 0x147   : > { %2189 = vmatprep.subr.bf16.mxu0 %v14313_v0  ;;  %2894 = vmatpush1.bf16.msra.mxu1 %v9910_v63  ;;  %v14407_v41 = vsel %vm10943_vm8, 4294967295, %v14406_v41  ;;  %v1715_v63 = vsel %vm10898_vm5, 0, %v1714_v60  ;;  %768 = vst [vmem:[#allocation2 + $0x278] sm:$0xff] %v9940_v30  ;;  %v1500_v38 = vshll.u32 %v9940_v30, 16  ;;  %p10200_p9 = scmp.lt.s32.totalorder %s14191_s0, %s10198_s6 }
 0x148   : > { %9506 = vmatprep.mubr.bf16.mxu1 %v1433_v48  ;;  %2895 = vmatprep.subr.bf16.mxu1 %v14313_v0  ;;  %14408 = vst [vmem:[#allocation38_spill] sm:$0xff] %v14407_v41  ;;  %v1654_v48 = vld [vmem:[#allocation2 + $0x238] sm:$0xff]  ;;  %v1142_v51 = vsel %vm10943_vm8, %v849_v45, %v1141_v37  ;;  %1716 = vst [vmem:[#allocation2 + $0x208] sm:$0x80] %v1715_v63  ;;  %v10999_v35 = vsel %vm1301_vm0, %v1488_v28, %v1492_v20  ;;  %v1145_v37 = vld [vmem:[#allocation2 + $0x60] sm:$0xff]  ;;  %p10196_p2 = pneg %p10195_p8 }
 0x149   : > { %1143 = vst [vmem:[#allocation2 + $0x30] sm:$0xff] %v1142_v51  ;;  %1657 = vst [vmem:[#allocation2 + $0x250] sm:$0xff] %v10999_v35  ;;  %v1502_v51 = vrot.slane %v1500_v38, 1 }
 0x14a   : > { %2190 = vmatpush1.bf16.msra.mxu0 %v9911_v55  ;;  %v851_v55 = vshrl.u32 %v10950_v50, 16 }
 0x14b   : > { %2191 = vmatprep.subr.bf16.mxu0 %v14313_v0  ;;  %2896 = vmatpush1.bf16.msra.mxu1 %v9912_v22  ;;  %v1658_v22 = vld [vmem:[#allocation2 + $0x268] sm:$0xff] }
 0x14c   : > { %2897 = vmatprep.subr.bf16.mxu1 %v14313_v0  ;;  %v853_v3 = vrot.slane %v851_v55, 7  ;;  %v866_v55 = vshrl.u32 %v11004_v39, 16 }
 0x14e   : > { %2192 = vmatpush1.bf16.msra.mxu0 %v9915_v1  ;;  %9507 = vmatmul.mubr.bf16.gmra.mrb[4].mxu1 %v1929_v44  ;;  %v1655_v1 = vsel %vm10875_vm2, %v1481_v54, %v1654_v48  ;;  %v856_v15 = vor.u32 %v854_v56, %v853_v3  ;;  %v864_v44 = vor.u32 %v862_v25, %v10994_v33  ;;  %v9944_v48 = vld [vmem:[%s10815_s9 + $0xd0] sm:$0xff]   ;;  %v869_v56 = vshll.u32 %v11004_v39, 16 }
 0x14f   : > { %2193 = vmatprep.subr.bf16.mxu0 %v14313_v0  ;;  %2898 = vmatpush1.bf16.msra.mxu1 %v9916_v34  ;;  %1656 = vst [vmem:[#allocation2 + $0x238] sm:$0xff] %v1655_v1  ;;  %v9941_v34 = vld [vmem:[%s10815_s9 + $0xc8] sm:$0xff]   ;;  %770 = vst [vmem:[#allocation2 + $0x2a8] sm:$0xff] %v9944_v48  ;;  %v1515_v63 = vshll.u32 %v9944_v48, 16  ;;  %v9933_v1 = vld [vmem:[#allocation9 + $0x38] sm:$0xff]  }
 0x150   : > { %9510 = vmatprep.mubr.bf16.mxu1 %v10910_v59  ;;  %2899 = vmatprep.subr.bf16.mxu1 %v14313_v0  ;;  %v9923_v59 = vld [vmem:[#allocation9 + $0x20] sm:$0xff]   ;;  %v10983_v23 = vsel %vm827_vm7, %v10939_v36, %v856_v15  ;;  %769 = vst [vmem:[#allocation2 + $0x290] sm:$0xff] %v9941_v34  ;;  %v1505_v45 = vshll.u32 %v9941_v34, 16  ;;  %v1509_v46 = vshrl.u32 %v9941_v34, 16 }
 0x151   : > { %1144 = vst [vmem:[#allocation2 + $0x48] sm:$0xff] %v10983_v23  ;;  %v1517_v15 = vrot.slane %v1515_v63, 1 }
 0x152   : > { %2194 = vmatpush1.bf16.msra.mxu0 %v9917_v14  ;;  %v1494_v14 = vshrl.u32 %v9936_v58, 16  ;;  %v1507_v54 = vrot.slane %v1505_v45, 1 }
 0x153   : > { %2195 = vmatprep.subr.bf16.mxu0 %v14313_v0  ;;  %2900 = vmatpush1.bf16.msra.mxu1 %v9921_v53  ;;  %v1146_v53 = vsel %vm10943_vm8, %v864_v44, %v1145_v37  ;;  %v1149_v37 = vld [vmem:[#allocation2 + $0x90] sm:$0xff] }
 0x154   : > { %2901 = vmatprep.subr.bf16.mxu1 %v14313_v0  ;;  %v1496_v29 = vor.u32 %v1494_v14, %v1492_v20  ;;  %1147 = vst [vmem:[#allocation2 + $0x60] sm:$0xff] %v1146_v53  ;;  %v1511_v60 = vor.u32 %v1509_v46, %v1507_v54  ;;  %v11031_v20 = vld [vmem:[%s10815_s9 + $0x20] sm:$0xff]  }
 0x155   : > { %748 = vst [vmem:[#allocation2 + $0x98] sm:$0xff] %v11031_v20 }
 0x156   : > { %2196 = vmatpush1.bf16.msra.mxu0 %v9920_v26  ;;  %9511 = vmatmul.mubr.bf16.gmra.mrb[8].mxu1 %v1935_v8  ;;  %v1214_v26 = vld [vmem:[#allocation2 + $0x30] sm:$0x1]  ;;  %v1659_v36 = vsel %vm10875_vm2, %v1496_v29, %v1658_v22  ;;  %v1717_v43 = vld [vmem:[#allocation2 + $0x238] sm:$0x80]  ;;  %v1524_v8 = vshrl.u32 %v9945_v57, 16  ;;  %v1663_v13 = vsel %vm10875_vm2, %v1511_v60, %v1662_v52  ;;  %v9937_v22 = vld [vmem:[#allocation9 + $0x40] sm:$0xff]  }
 0x157   : > { %2197 = vmatprep.subr.bf16.mxu0 %v14313_v0  ;;  %2902 = vmatpush1.bf16.msra.mxu1 %v9923_v59  ;;  %v1215_v32 = vsel %vm10973_vm10, 0, %v1214_v26  ;;  %1660 = vst [vmem:[#allocation2 + $0x268] sm:$0xff] %v1659_v36  ;;  %v1718_v49 = vsel %vm10898_vm5, 0, %v1717_v43  ;;  %v868_v59 = vrot.slane %v866_v55, 7  ;;  %1664 = vst [vmem:[#allocation2 + $0x298] sm:$0xff] %v1663_v13  ;;  %v1666_v26 = vld [vmem:[#allocation2 + $0x2c8] sm:$0xff] }
 0x158   : > { %9514 = vmatprep.mubr.bf16.mxu1 %v10929_v27  ;;  %2903 = vmatprep.subr.bf16.mxu1 %v14313_v0  ;;  %1216 = vst [vmem:[#allocation2 + $0x30] sm:$0x1] %v1215_v32  ;;  %v1498_v27 = vshrl.u32 %v9940_v30, 16  ;;  %1719 = vst [vmem:[#allocation2 + $0x238] sm:$0x80] %v1718_v49  ;;  %v1526_v29 = vor.u32 %v1524_v8, %v1522_v18  ;;  %v9949_v30 = vld [vmem:[%s10815_s9 + $0xe0] sm:$0xff]  }
 0x159   : > { %v871_v14 = vor.u32 %v869_v56, %v868_v59  ;;  %772 = vst [vmem:[#allocation2 + $0x2d8] sm:$0xff] %v9949_v30  ;;  %v1528_v38 = vshrl.u32 %v9949_v30, 16  ;;  %v11059_v43 = vld [vmem:[%s10815_s9 + $0x28] sm:$0xff]   ;;  %v9953_v52 = vld [vmem:[%s10815_s9 + $0xf0] sm:$0xff]   ;;  %v1670_v56 = vld [vmem:[#allocation2 + $0x2f8] sm:$0xff] }
 0x15a   : > { %2198 = vmatpush1.bf16.msra.mxu0 %v9922_v40  ;;  %v1941_v40 = vld [vmem:[#allocation2 + $0x208] sm:$0xff]  ;;  %v1503_v58 = vor.u32 %v1502_v51, %v1498_v27  ;;  %v1667_v34 = vsel %vm10875_vm2, %v1526_v29, %v1666_v26  ;;  %749 = vst [vmem:[#allocation2 + $0xb0] sm:$0xff] %v11059_v43  ;;  %v881_v51 = vshrl.u32 %v11059_v43, 16  ;;  %774 = vst [vmem:[#allocation2 + $0x308] sm:$0xff] %v9953_v52  ;;  %v9954_v60 = vld [vmem:[%s10815_s9 + $0xf8] sm:$0xff]   ;;  %v1543_v59 = vshrl.u32 %v9953_v52, 16 }
 0x15b   : > { %2199 = vmatprep.subr.bf16.mxu0 %v14313_v0  ;;  %2904 = vmatpush1.bf16.msra.mxu1 %v9927_v31  ;;  %v11039_v24 = vsel %vm827_vm7, %v10994_v33, %v871_v14  ;;  %v1217_v31 = vld [vmem:[#allocation2 + $0x60] sm:$0x1]  ;;  %v9950_v27 = vld [vmem:[%s10815_s9 + $0xe8] sm:$0xff]   ;;  %1668 = vst [vmem:[#allocation2 + $0x2c8] sm:$0xff] %v1667_v34  ;;  %775 = vst [vmem:[#allocation2 + $0x320] sm:$0xff] %v9954_v60  ;;  %v1550_v14 = vshll.u32 %v9954_v60, 16 }
 0x15c   : > { %2905 = vmatprep.subr.bf16.mxu1 %v14313_v0  ;;  %v11020_v3 = vsel %vm1301_vm0, %v1503_v58, %v1507_v54  ;;  %1148 = vst [vmem:[#allocation2 + $0x78] sm:$0xff] %v11039_v24  ;;  %v1218_v33 = vsel %vm10973_vm10, 0, %v1217_v31  ;;  %773 = vst [vmem:[#allocation2 + $0x2f0] sm:$0xff] %v9950_v27  ;;  %v1535_v45 = vshll.u32 %v9950_v27, 16  ;;  %v1539_v46 = vshrl.u32 %v9950_v27, 16 }
 0x15d   : > { %1661 = vst [vmem:[#allocation2 + $0x280] sm:$0xff] %v11020_v3  ;;  %1219 = vst [vmem:[#allocation2 + $0x60] sm:$0x1] %v1218_v33  ;;  %v883_v57 = vrot.slane %v881_v51, 7  ;;  %v1552_v26 = vrot.slane %v1550_v14, 1 }
 0x15e   : > { %2200 = vmatpush1.bf16.msra.mxu0 %v9926_v62  ;;  %v1513_v62 = vshrl.u32 %v9944_v48, 16  ;;  %9515 = vmatmul.mubr.bf16.gmra.mrb[12].mxu1 %v1941_v40  ;;  %v9939_v40 = vld [vmem:[#allocation9 + $0x48] sm:$0xff]   ;;  %v1723_v48 = vld [vmem:[#allocation2 + $0x298] sm:$0x80]  ;;  %v1537_v54 = vrot.slane %v1535_v45, 1 }
 0x15f   : > { %2201 = vmatprep.subr.bf16.mxu0 %v14313_v0  ;;  %v11022_v12 = vld [vmem:[#allocation2 + $0x30] sm:$0xff]  ;;  %9518 = vmatprep.mubr.bf16.mxu1 %v10963_v61  ;;  %v1947_v28 = vld [vmem:[#allocation2 + $0x238] sm:$0xff]  ;;  %v1724_v53 = vsel %vm10898_vm5, 0, %v1723_v48  ;;  %v11130_v48 = vld [vmem:[%s10815_s9 + $0x40] sm:$0xff]  }
 0x160   : > { %2906 = vmatpush1.bf16.msra.mxu1 %v9932_v42  ;;  %v1518_v25 = vor.u32 %v1517_v15, %v1513_v62  ;;  %v1530_v42 = vshll.u32 %v9949_v30, 16  ;;  %1725 = vst [vmem:[#allocation2 + $0x298] sm:$0x80] %v1724_v53  ;;  %v1541_v58 = vor.u32 %v1539_v46, %v1537_v54  ;;  %v1545_v62 = vshll.u32 %v9953_v52, 16  ;;  %v451_v51 = vld [vmem:[%s10823_s23 + $0x8] sm:$0xf] }
 0x161   : > { %2907 = vmatprep.subr.bf16.mxu1 %v14313_v0  ;;  %v1554_v15 = vshrl.u32 %v9954_v60, 16  ;;  %752 = vst [vmem:[#allocation2 + $0xf8] sm:$0xff] %v11130_v48 }
 0x162   : > { %2202 = vmatpush1.bf16.msra.mxu0 %v9928_v17  ;;  %v1720_v17 = vld [vmem:[#allocation2 + $0x268] sm:$0x80]  ;;  %v11048_v32 = vsel %vm1301_vm0, %v1518_v25, %v1522_v18  ;;  %v1532_v49 = vrot.slane %v1530_v42, 1  ;;  %v1547_v13 = vrot.slane %v1545_v62, 1 }
 0x163   : > { %9462 = vmatprep.subr.bf16.mxu0 %v10845_v2  ;;  %v1721_v61 = vsel %vm10898_vm5, 0, %v1720_v17  ;;  %1665 = vst [vmem:[#allocation2 + $0x2b0] sm:$0xff] %v11048_v32  ;;  %v1726_v8 = vld [vmem:[#allocation2 + $0x2c8] sm:$0x80]  ;;  %v1556_v33 = vor.u32 %v1554_v15, %v1552_v26 }
 0x164   : > { %1722 = vst [vmem:[#allocation2 + $0x268] sm:$0x80] %v1721_v61  ;;  %2908 = vmatpush1.bf16.msra.mxu1 %v9933_v1  ;;  %v1533_v55 = vor.u32 %v1532_v49, %v1528_v38  ;;  %v11085_v17 = vld [vmem:[#allocation2 + $0x60] sm:$0xff]  ;;  %v1727_v18 = vsel %vm10898_vm5, 0, %v1726_v8  ;;  %v1548_v25 = vor.u32 %v1547_v13, %v1543_v59  ;;  %v907_v8 = vshll.u32 %v11130_v48, 16  ;;  %v11163_v15 = vld [vmem:[%s10815_s9 + $0x48] sm:$0xff]  }
 0x165   : > { %2204 = vmatmul.mubr.bf16.vlgmr.msra.gmra.mrb[0].mxu0 %v11022_v12  ;;  %2909 = vmatprep.subr.bf16.mxu1 %v14313_v0  ;;  %1728 = vst [vmem:[#allocation2 + $0x2c8] sm:$0x80] %v1727_v18  ;;  %v1153_v38 = vld [vmem:[#allocation2 + $0xc0] sm:$0xff]  ;;  %753 = vst [vmem:[#allocation2 + $0x110] sm:$0xff] %v11163_v15 }
 0x166   : > { %9463 = vmatpush3.bf16.msra.mxu0 %v10845_v2  ;;  %2211 = vmatprep.mubr.bf16.mxu0 %v10950_v50  ;;  %v874_v2 = vshrl.u32 %v11031_v20, 16  ;;  %v877_v50 = vshll.u32 %v11031_v20, 16  ;;  %v11108_v31 = vsel %vm1301_vm0, %v1548_v25, %v1552_v26 }
 0x167   : > { %9464 = vmatprep.subr.bf16.mxu0 %v10849_v4  ;;  %9519 = vmatmul.mubr.bf16.gmra.mrb[16].mxu1 %v1947_v28  ;;  %v11095_v28 = vld [vmem:[%s10815_s9 + $0x30] sm:$0xff]   ;;  %1673 = vst [vmem:[#allocation2 + $0x310] sm:$0xff] %v11108_v31 }
 0x168   : > { %v876_v36 = vrot.slane %v874_v2, 7  ;;  %9522 = vmatprep.mubr.bf16.mxu1 %v10999_v35  ;;  %2910 = vmatpush1.bf16.msra.mxu1 %v9937_v22  ;;  %v9946_v22 = vld [vmem:[#allocation9 + $0x58] sm:$0xff]   ;;  %v1674_v2 = vld [vmem:[#allocation2 + $0x328] sm:$0xff]  ;;  %750 = vst [vmem:[#allocation2 + $0xc8] sm:$0xff] %v11095_v28  ;;  %v889_v34 = vshrl.u32 %v11095_v28, 16 }
 0x169   : > { %2911 = vmatprep.subr.bf16.mxu1 %v14313_v0 }
 0x16a   : > { %9465 = vmatpush3.bf16.msra.mxu0 %v10849_v4  ;;  %v879_v44 = vor.u32 %v877_v50, %v876_v36  ;;  %v884_v4 = vshll.u32 %v11059_v43, 16  ;;  %v450_v50 = vld [vmem:[%s10823_s23 + $0x4] sm:$0xf]  ;;  %v891_v45 = vrot.slane %v889_v34, 7 }
 0x16b   : > { %9466 = vmatprep.subr.bf16.mxu0 %v10853_v5  ;;  %v1953_v63 = vld [vmem:[#allocation2 + $0x268] sm:$0xff]  ;;  %v462_v42 = vsel %vm11097_vm11, 0, %v450_v50  ;;  %v11178_v34 = vld [vmem:[%s10815_s9 + $0x50] sm:$0xff]  }
 0x16c   : > { %v1150_v35 = vsel %vm10943_vm8, %v879_v44, %v1149_v37  ;;  %2912 = vmatpush1.bf16.msra.mxu1 %v9939_v40  ;;  %v886_v1 = vor.u32 %v884_v4, %v883_v57  ;;  %v9947_v37 = vld [vmem:[#allocation9 + $0x60] sm:$0xff]   ;;  %v11122_v44 = vld [vmem:[%s10815_s9 + $0x38] sm:$0xff]   ;;  %v463_v57 = vsel %vm11097_vm11, 0, %v451_v51  ;;  %v1965_v50 = vld [vmem:[#allocation2 + $0x2c8] sm:$0xff]  ;;  %754 = vst [vmem:[#allocation2 + $0x128] sm:$0xff] %v11178_v34 }
 0x16d   : > { %2212 = vmatmul.mubr.bf16.gmra.mrb[4].mxu0 %v10983_v23  ;;  %1151 = vst [vmem:[#allocation2 + $0x90] sm:$0xff] %v1150_v35  ;;  %v9942_v23 = vld [vmem:[#allocation9 + $0x50] sm:$0xff]   ;;  %2913 = vmatprep.subr.bf16.mxu1 %v14313_v0  ;;  %751 = vst [vmem:[#allocation2 + $0xe0] sm:$0xff] %v11122_v44  ;;  %v896_v49 = vshrl.u32 %v11122_v44, 16  ;;  %v11194_v51 = vld [vmem:[#allocation2 + $0x158] sm:$0xff] }
 0x16e   : > { %2219 = vmatprep.mubr.bf16.mxu0 %v10978_v16  ;;  %9467 = vmatpush3.bf16.msra.mxu0 %v10853_v5  ;;  %v11078_v16 = vsel %vm1301_vm0, %v1533_v55, %v1537_v54  ;;  %v1671_v5 = vsel %vm10875_vm2, %v1541_v58, %v1670_v56  ;;  %v11090_v61 = vsel %vm827_vm7, %v876_v36, %v886_v1  ;;  %v1959_v36 = vld [vmem:[#allocation2 + $0x298] sm:$0xff]  ;;  %v9951_v55 = vld [vmem:[#allocation9 + $0x68] sm:$0xff]   ;;  %v1137_v1 = vld [vmem:[#allocation2] sm:$0xff] }
 0x16f   : > { %9468 = vmatprep.subr.bf16.mxu0 %v10858_v7  ;;  %1669 = vst [vmem:[#allocation2 + $0x2e0] sm:$0xff] %v11078_v16  ;;  %1672 = vst [vmem:[#allocation2 + $0x2f8] sm:$0xff] %v1671_v5  ;;  %9523 = vmatmul.mubr.bf16.gmra.mrb[20].mxu1 %v1953_v63  ;;  %v898_v56 = vrot.slane %v896_v49, 7  ;;  %v9995_v58 = vld [vmem:[#allocation9 + $0x168] sm:$0xff]   ;;  %v904_v63 = vshrl.u32 %v11130_v48, 16 }
 0x170   : > { %1152 = vst [vmem:[#allocation2 + $0xa8] sm:$0xff] %v11090_v61  ;;  %9526 = vmatprep.mubr.bf16.mxu1 %v11020_v3  ;;  %2914 = vmatpush1.bf16.msra.mxu1 %v9942_v23  ;;  %v892_v3 = vshll.u32 %v11095_v28, 16 }
 0x171   : > { %2915 = vmatprep.subr.bf16.mxu1 %v14313_v0 }
 0x172   : > { %9469 = vmatpush3.bf16.msra.mxu0 %v10858_v7  ;;  %v449_v7 = vld [vmem:[%s10823_s23] sm:$0xf]  ;;  %v894_v52 = vor.u32 %v892_v3, %v891_v45 }
 0x173   : > { %9470 = vmatprep.subr.bf16.mxu0 %v10863_v9  ;;  %v461_v40 = vsel %vm11097_vm11, 0, %v449_v7  ;;  %v9997_v7 = vld [vmem:[#allocation9 + $0x178] sm:$0xff]  }
 0x174   : > { %v1220_v30 = vld [vmem:[#allocation2 + $0x90] sm:$0x1]  ;;  %v11127_v46 = vcombine.low %v461_v40, %v462_v42  ;;  %2916 = vmatpush1.bf16.msra.mxu1 %v9946_v22  ;;  %v1154_v60 = vsel %vm10943_vm8, %v894_v52, %v1153_v38  ;;  %v919_v38 = vshrl.u32 %v11178_v34, 16  ;;  %v922_v40 = vshll.u32 %v11178_v34, 16  ;;  %v11189_v42 = vld [vmem:[%s10815_s9 + $0x58] sm:$0xff]   ;;  %s8759_s9 = sadd.s32 %s9341_s16, %s9208_s8 }
 0x175   : > { %2220 = vmatmul.mubr.bf16.gmra.mrb[8].mxu0 %v11085_v17  ;;  %v1221_v27 = vsel %vm10973_vm10, 0, %v1220_v30  ;;  %2917 = vmatprep.subr.bf16.mxu1 %v14313_v0  ;;  %1155 = vst [vmem:[#allocation2 + $0xc0] sm:$0xff] %v1154_v60  ;;  %v1157_v22 = vld [vmem:[#allocation2 + $0xf0] sm:$0xff]  ;;  %755 = vst [vmem:[#allocation2 + $0x140] sm:$0xff] %v11189_v42  ;;  %s9209_s3 = sshll.u32 %s8759_s9, 6 }
 0x176   : > { %2227 = vmatprep.mubr.bf16.mxu0 %v11004_v39  ;;  %9471 = vmatpush3.bf16.msra.mxu0 %v10863_v9  ;;  %1222 = vst [vmem:[#allocation2 + $0x90] sm:$0x1] %v1221_v27  ;;  %v1675_v39 = vsel %vm10875_vm2, %v1556_v33, %v1674_v2  ;;  %v899_v9 = vshll.u32 %v11122_v44, 16  ;;  %v1729_v4 = vld [vmem:[#allocation2 + $0x2f8] sm:$0x80]  ;;  %485 = vst [vmem:[#allocation2 + $0x8] sm:$0xff] %v11127_v46  ;;  %s14196_s1 = scalar_lea.hbm %s14786_s20, %s9209_s3 }
 0x177   : > { %9472 = vmatprep.subr.bf16.mxu0 %v10866_v11  ;;  %1676 = vst [vmem:[#allocation2 + $0x328] sm:$0xff] %v1675_v39  ;;  %v829_v53 = vshrl.u32 %v11127_v46, 16  ;;  %v832_v35 = vshll.u32 %v11127_v46, 16  ;;  %v452_v11 = vld [vmem:[%s10823_s23 + $0xc] sm:$0xf]  ;;  %v1730_v54 = vsel %vm10898_vm5, 0, %v1729_v4  ;;  %9527 = vmatmul.mubr.bf16.gmra.mrb[24].mxu1 %v1959_v36 }
 0x178   : > { %v464_v23 = vsel %vm11097_vm11, 0, %v452_v11  ;;  %1731 = vst [vmem:[#allocation2 + $0x2f8] sm:$0x80] %v1730_v54  ;;  %9530 = vmatprep.mubr.bf16.mxu1 %v11048_v32  ;;  %2918 = vmatpush1.bf16.msra.mxu1 %v9947_v37  ;;  %v901_v6 = vor.u32 %v899_v9, %v898_v56  ;;  %v9955_v32 = vld [vmem:[#allocation9 + $0x70] sm:$0xff]   ;;  %v914_v33 = vshll.u32 %v11163_v15, 16  ;;  %v9956_v39 = vld [vmem:[#allocation9 + $0x78] sm:$0xff]  }
 0x179   : > { %v831_v59 = vrot.slane %v829_v53, 7  ;;  %v11151_v62 = vcombine.low %v463_v57, %v464_v23  ;;  %2919 = vmatprep.subr.bf16.mxu1 %v14313_v0  ;;  %v921_v52 = vrot.slane %v919_v38, 7  ;;  %v926_v53 = vshrl.u32 %v11189_v42, 16  ;;  %v11209_v56 = vld [vmem:[#allocation2 + $0x170] sm:$0xff]  ;;  %s8746_s23 = scalar_lea.sflag [#allocation5], %s10811_s21 }
 0x17a   : > { %9473 = vmatpush3.bf16.msra.mxu0 %v9995_v58  ;;  %v11167_v18 = vsel %vm827_vm7, %v891_v45, %v901_v6  ;;  %v934_v54 = vshrl.u32 %v11194_v51, 16  ;;  %v941_v60 = vshrl.u32 %v11209_v56, 16 }
 0x17b   : > { %9474 = vmatprep.subr.bf16.mxu0 %v10881_v21  ;;  %v834_v5 = vor.u32 %v832_v35, %v831_v59  ;;  %486 = vst [vmem:[#allocation2 + $0x20] sm:$0xff] %v11151_v62  ;;  %v836_v13 = vshrl.u32 %v11151_v62, 16  ;;  %v839_v14 = vshll.u32 %v11151_v62, 16  ;;  %v906_v21 = vrot.slane %v904_v63, 7  ;;  %1156 = vst [vmem:[#allocation2 + $0xd8] sm:$0xff] %v11167_v18  ;;  %v11215_v63 = vld [vmem:[#allocation2 + $0x188] sm:$0xff] }
 0x17c   : > { %2920 = vmatpush1.bf16.msra.mxu1 %v9951_v55  ;;  %v1223_v45 = vld [vmem:[#allocation2 + $0xc0] sm:$0x1]  ;;  %v929_v35 = vshll.u32 %v11189_v42, 16  ;;  %v937_v55 = vshll.u32 %v11194_v51, 16  ;;  %v924_v23 = vor.u32 %v922_v40, %v921_v52  ;;  %v928_v58 = vrot.slane %v926_v53, 7  ;;  %v11239_v40 = vld [vmem:[#allocation2 + $0x1d0] sm:$0xff] }
 0x17d   : > { %2228 = vmatmul.mubr.bf16.gmra.mrb[12].mxu0 %v11039_v24  ;;  %v9996_v24 = vld [vmem:[#allocation9 + $0x170] sm:$0xff]   ;;  %v1138_v26 = vsel %vm10943_vm8, %v834_v5, %v1137_v1  ;;  %v838_v29 = vrot.slane %v836_v13, 7  ;;  %v909_v2 = vor.u32 %v907_v8, %v906_v21  ;;  %2921 = vmatprep.subr.bf16.mxu1 %v14313_v0  ;;  %v1224_v4 = vsel %vm10973_vm10, 0, %v1223_v45  ;;  %v11219_v13 = vld [vmem:[#allocation2 + $0x1a0] sm:$0xff] }
 0x17e   : > { %2235 = vmatprep.mubr.bf16.mxu0 %v11031_v20  ;;  %9475 = vmatpush3.bf16.msra.mxu0 %v9996_v24  ;;  %v1732_v25 = vld [vmem:[#allocation2 + $0x328] sm:$0x80]  ;;  %v911_v20 = vshrl.u32 %v11163_v15, 16  ;;  %1139 = vst [vmem:[#allocation2] sm:$0xff] %v1138_v26  ;;  %v11183_v27 = vld [vmem:[#allocation2 + $0x90] sm:$0xff]  ;;  %v936_v6 = vrot.slane %v934_v54, 7 }
 0x17f   : > { %9476 = vmatprep.subr.bf16.mxu0 %v9997_v7  ;;  %v1733_v30 = vsel %vm10898_vm5, 0, %v1732_v25  ;;  %v841_v3 = vor.u32 %v839_v14, %v838_v29  ;;  %v1158_v36 = vsel %vm10943_vm8, %v909_v2, %v1157_v22  ;;  %9531 = vmatmul.mubr.bf16.gmra.mrb[28].mxu1 %v1965_v50  ;;  %1225 = vst [vmem:[#allocation2 + $0xc0] sm:$0x1] %v1224_v4  ;;  %v1971_v57 = vld [vmem:[#allocation2 + $0x2f8] sm:$0xff]  ;;  %v949_v8 = vshrl.u32 %v11215_v63, 16 }
 0x180   : > { %1734 = vst [vmem:[#allocation2 + $0x328] sm:$0x80] %v1733_v30  ;;  %v913_v37 = vrot.slane %v911_v20, 7  ;;  %1159 = vst [vmem:[#allocation2 + $0xf0] sm:$0xff] %v1158_v36  ;;  %9534 = vmatprep.mubr.bf16.mxu1 %v11078_v16  ;;  %2922 = vmatpush1.bf16.msra.mxu1 %v9955_v32  ;;  %v1161_v16 = vld [vmem:[#allocation2 + $0x120] sm:$0xff]  ;;  %v952_v5 = vshll.u32 %v11215_v63, 16  ;;  %v939_v26 = vor.u32 %v937_v55, %v936_v6 }
 0x181   : > { %v11192_v49 = vsel %vm827_vm7, %v831_v59, %v841_v3  ;;  %2923 = vmatprep.subr.bf16.mxu1 %v14313_v0  ;;  %v944_v59 = vshll.u32 %v11209_v56, 16  ;;  %v1162_v14 = vsel %vm10943_vm8, %v924_v23, %v1161_v16  ;;  %v1165_v32 = vld [vmem:[#allocation2 + $0x150] sm:$0xff]  ;;  %v943_v22 = vrot.slane %v941_v60, 7  ;;  %v11225_v24 = vld [vmem:[#allocation2 + $0x1b8] sm:$0xff]  ;;  %v1169_v30 = vld [vmem:[#allocation2 + $0x180] sm:$0xff] }
 0x182   : > { %9477 = vmatpush3.bf16.msra.mxu0 %v9997_v7  ;;  %v916_v9 = vor.u32 %v914_v33, %v913_v37  ;;  %1163 = vst [vmem:[#allocation2 + $0x120] sm:$0xff] %v1162_v14  ;;  %v951_v29 = vrot.slane %v949_v8, 7  ;;  %v956_v2 = vshrl.u32 %v11219_v13, 16  ;;  %v959_v33 = vshll.u32 %v11219_v13, 16  ;;  %v1173_v55 = vld [vmem:[#allocation2 + $0x1b0] sm:$0xff]  ;;  %v11259_v60 = vld [vmem:[#allocation2 + $0x218] sm:$0xff] }
 0x183   : > { %v946_v50 = vor.u32 %v944_v59, %v943_v22  ;;  %v1166_v3 = vsel %vm10943_vm8, %v939_v26, %v1165_v32  ;;  %v964_v38 = vshrl.u32 %v11225_v24, 16  ;;  %v971_v4 = vshrl.u32 %v11239_v40, 16  ;;  %v1177_v14 = vld [vmem:[#allocation2 + $0x1e0] sm:$0xff] }
 0x184   : > { %v11205_v11 = vsel %vm827_vm7, %v906_v21, %v916_v9  ;;  %2924 = vmatpush1.bf16.msra.mxu1 %v9956_v39  ;;  %v931_v21 = vor.u32 %v929_v35, %v928_v58  ;;  %v954_v36 = vor.u32 %v952_v5, %v951_v29  ;;  %v958_v37 = vrot.slane %v956_v2, 7  ;;  %v11241_v39 = vld [vmem:[#allocation2 + $0x1e8] sm:$0xff]  ;;  %1167 = vst [vmem:[#allocation2 + $0x150] sm:$0xff] %v1166_v3  ;;  %v11257_v58 = vld [vmem:[#allocation2 + $0x200] sm:$0xff] }
 0x185   : > { %2236 = vmatmul.mubr.bf16.gmra.mrb[16].mxu0 %v11183_v27  ;;  %1160 = vst [vmem:[#allocation2 + $0x108] sm:$0xff] %v11205_v11  ;;  %v1211_v1 = vld [vmem:[#allocation2] sm:$0x1]  ;;  %3761 = vmatprep.subr.bf16.mxu1 %v14313_v0  ;;  %v11245_v45 = vsel %vm827_vm7, %v936_v6, %v946_v50  ;;  %v967_v9 = vshll.u32 %v11225_v24, 16  ;;  %v966_v16 = vrot.slane %v964_v38, 7  ;;  %v982_v23 = vshll.u32 %v11241_v39, 16 }
 0x186   : > { %2243 = vmatprep.mubr.bf16.mxu0 %v11059_v43  ;;  %v1212_v43 = vsel %vm10973_vm10, 0, %v1211_v1  ;;  %v11232_v7 = vsel %vm827_vm7, %v921_v52, %v931_v21  ;;  %v974_v52 = vshll.u32 %v11239_v40, 16  ;;  %1168 = vst [vmem:[#allocation2 + $0x168] sm:$0xff] %v11245_v45  ;;  %v1170_v53 = vsel %vm10943_vm8, %v954_v36, %v1169_v30  ;;  %v11275_v50 = vld [vmem:[#allocation2 + $0x248] sm:$0xff]  ;;  %v11277_v30 = vld [vmem:[#allocation2 + $0xc0] sm:$0xff]  ;;  %v1181_v36 = vld [vmem:[#allocation2 + $0x210] sm:$0xff] }
 0x187   : > { %1213 = vst [vmem:[#allocation2] sm:$0x1] %v1212_v43  ;;  %v1226_v25 = vld [vmem:[#allocation2 + $0xf0] sm:$0x1]  ;;  %9535 = vmatmul.mubr.bf16.gmra.mrb[32].mxu1 %v1971_v57  ;;  %1164 = vst [vmem:[#allocation2 + $0x138] sm:$0xff] %v11232_v7  ;;  %v961_v35 = vor.u32 %v959_v33, %v958_v37  ;;  %v1977_v54 = vld [vmem:[#allocation2 + $0x328] sm:$0xff]  ;;  %v969_v1 = vor.u32 %v967_v9, %v966_v16 }
 0x188   : > { %v1227_v20 = vsel %vm10973_vm10, 0, %v1226_v25  ;;  %9538 = vmatprep.mubr.bf16.mxu1 %v11108_v31  ;;  %v979_v31 = vshrl.u32 %v11241_v39, 16  ;;  %1171 = vst [vmem:[#allocation2 + $0x180] sm:$0xff] %v1170_v53  ;;  %v973_v57 = vrot.slane %v971_v4, 7  ;;  %v986_v8 = vshrl.u32 %v11257_v58, 16  ;;  %v11284_v9 = vld [vmem:[#allocation2 + $0x278] sm:$0xff] }
 0x189   : > { %1228 = vst [vmem:[#allocation2 + $0xf0] sm:$0x1] %v1227_v20  ;;  %v11262_v59 = vsel %vm827_vm7, %v951_v29, %v961_v35  ;;  %v1229_v5 = vld [vmem:[#allocation2 + $0x120] sm:$0x1]  ;;  %v989_v21 = vshll.u32 %v11257_v58, 16  ;;  %v994_v32 = vshrl.u32 %v11259_v60, 16  ;;  %v1174_v26 = vsel %vm10943_vm8, %v969_v1, %v1173_v55 }
 0x18a   : > { %v981_v6 = vrot.slane %v979_v31, 7  ;;  %1172 = vst [vmem:[#allocation2 + $0x198] sm:$0xff] %v11262_v59  ;;  %v976_v43 = vor.u32 %v974_v52, %v973_v57  ;;  %v997_v22 = vshll.u32 %v11259_v60, 16  ;;  %v1230_v25 = vsel %vm10973_vm10, 0, %v1229_v5  ;;  %v11273_v20 = vld [vmem:[#allocation2 + $0x230] sm:$0xff]  ;;  %1175 = vst [vmem:[#allocation2 + $0x1b0] sm:$0xff] %v1174_v26 }
 0x18b   : > { %v988_v2 = vrot.slane %v986_v8, 7  ;;  %1231 = vst [vmem:[#allocation2 + $0x120] sm:$0x1] %v1230_v25  ;;  %v996_v3 = vrot.slane %v994_v32, 7  ;;  %v1001_v37 = vshrl.u32 %v11273_v20, 16  ;;  %v1004_v38 = vshll.u32 %v11273_v20, 16 }
 0x18c   : > { %v984_v29 = vor.u32 %v982_v23, %v981_v6  ;;  %v11280_v33 = vsel %vm827_vm7, %v966_v16, %v976_v43  ;;  %v1232_v4 = vld [vmem:[#allocation2 + $0x150] sm:$0x1]  ;;  %v1009_v35 = vshrl.u32 %v11275_v50, 16  ;;  %v1012_v16 = vshll.u32 %v11275_v50, 16 }
 0x18d   : > { %2244 = vmatmul.mubr.bf16.gmra.mrb[20].mxu0 %v11090_v61  ;;  %1176 = vst [vmem:[#allocation2 + $0x1c8] sm:$0xff] %v11280_v33  ;;  %v991_v53 = vor.u32 %v989_v21, %v988_v2  ;;  %v1233_v31 = vsel %vm10973_vm10, 0, %v1232_v4  ;;  %v999_v55 = vor.u32 %v997_v22, %v996_v3  ;;  %v1003_v57 = vrot.slane %v1001_v37, 7  ;;  %v1189_v26 = vld [vmem:[#allocation2 + $0x270] sm:$0xff] }
 0x18e   : > { %2251 = vmatprep.mubr.bf16.mxu0 %v11095_v28  ;;  %v1178_v52 = vsel %vm10943_vm8, %v984_v29, %v1177_v14  ;;  %v1024_v23 = vshrl.u32 %v11284_v9, 16  ;;  %1234 = vst [vmem:[#allocation2 + $0x150] sm:$0x1] %v1233_v31  ;;  %v1011_v5 = vrot.slane %v1009_v35, 7  ;;  %v1027_v43 = vshll.u32 %v11284_v9, 16  ;;  %v9958_v14 = vld [vmem:[#allocation9 + $0x180] sm:$0xff]  }
 0x18f   : > { %9539 = vmatmul.mubr.bf16.gmra.mrb[36].mxu1 %v1977_v54  ;;  %1179 = vst [vmem:[#allocation2 + $0x1e0] sm:$0xff] %v1178_v52  ;;  %v1185_v54 = vld [vmem:[#allocation2 + $0x240] sm:$0xff]  ;;  %v11297_v8 = vsel %vm827_vm7, %v981_v6, %v991_v53  ;;  %v1182_v32 = vsel %vm10943_vm8, %v999_v55, %v1181_v36  ;;  %v1006_v22 = vor.u32 %v1004_v38, %v1003_v57  ;;  %v9961_v35 = vld [vmem:[#allocation9 + $0x188] sm:$0xff]  }
 0x190   : > { %2925 = vmatprep.mubr.bf16.mxu1 %v11127_v46  ;;  %v1235_v1 = vld [vmem:[#allocation2 + $0x180] sm:$0x1]  ;;  %1180 = vst [vmem:[#allocation2 + $0x1f8] sm:$0xff] %v11297_v8  ;;  %v11306_v25 = vrot.slane %v1024_v23, 7  ;;  %1183 = vst [vmem:[#allocation2 + $0x210] sm:$0xff] %v1182_v32  ;;  %v1014_v6 = vor.u32 %v1012_v16, %v1011_v5 }
 0x191   : > { %v1738_v46 = vld [vmem:[#allocation2] sm:$0xff]  ;;  %v1236_v21 = vsel %vm10973_vm10, 0, %v1235_v1  ;;  %v11309_v29 = vsel %vm827_vm7, %v996_v3, %v1006_v22  ;;  %v1238_v37 = vld [vmem:[#allocation2 + $0x1b0] sm:$0x1] }
 0x192   : > { %1237 = vst [vmem:[#allocation2 + $0x180] sm:$0x1] %v1236_v21  ;;  %v1029_v2 = vor.u32 %v1027_v43, %v11306_v25  ;;  %1184 = vst [vmem:[#allocation2 + $0x228] sm:$0xff] %v11309_v29  ;;  %v1186_v4 = vsel %vm10943_vm8, %v1014_v6, %v1185_v54  ;;  %v1239_v36 = vsel %vm10973_vm10, 0, %v1238_v37  ;;  %v11317_v38 = vld [vmem:[#allocation2 + $0x260] sm:$0xff]  ;;  %v9964_v54 = vld [vmem:[#allocation9 + $0x190] sm:$0xff]  }
 0x193   : > { %1187 = vst [vmem:[#allocation2 + $0x240] sm:$0xff] %v1186_v4  ;;  %1240 = vst [vmem:[#allocation2 + $0x1b0] sm:$0x1] %v1239_v36  ;;  %v1016_v53 = vshrl.u32 %v11317_v38, 16  ;;  %v1019_v55 = vshll.u32 %v11317_v38, 16  ;;  %v9967_v4 = vld [vmem:[#allocation9 + $0x1a0] sm:$0xff]  }
 0x194   : > { %v1190_v52 = vsel %vm10943_vm8, %v1029_v2, %v1189_v26  ;;  %v9966_v26 = vld [vmem:[#allocation9 + $0x198] sm:$0xff]   ;;  %v1193_v36 = vld [vmem:[#allocation2 + $0x2a0] sm:$0xff] }
 0x195   : > { %2252 = vmatmul.mubr.bf16.gmra.mrb[24].mxu0 %v11277_v30  ;;  %1191 = vst [vmem:[#allocation2 + $0x270] sm:$0xff] %v1190_v52  ;;  %v1018_v31 = vrot.slane %v1016_v53, 7  ;;  %v9968_v53 = vld [vmem:[#allocation9 + $0x1a8] sm:$0xff]  }
 0x196   : > { %2259 = vmatprep.mubr.bf16.mxu0 %v11122_v44  ;;  %v1241_v3 = vld [vmem:[#allocation2 + $0x1e0] sm:$0x1] }
 0x197   : > { %2926 = vmatmul.mubr.bf16.vlgmr.msra.gmra.mrb[40].mxu1 %v1738_v46  ;;  %v1242_v16 = vsel %vm10973_vm10, 0, %v1241_v3  ;;  %v1244_v57 = vld [vmem:[#allocation2 + $0x210] sm:$0x1]  ;;  %v11335_v46 = vld [vmem:[#allocation2 + $0x2a8] sm:$0xff] }
 0x198   : > { %3762 = vmatpush1.bf16.msra.mxu1 %v9958_v14  ;;  %2933 = vmatprep.mubr.bf16.mxu1 %v11151_v62  ;;  %1243 = vst [vmem:[#allocation2 + $0x1e0] sm:$0x1] %v1242_v16  ;;  %v1245_v23 = vsel %vm10973_vm10, 0, %v1244_v57  ;;  %v1021_v62 = vor.u32 %v1019_v55, %v1018_v31  ;;  %v11337_v14 = vld [vmem:[#allocation2 + $0xf0] sm:$0xff]  ;;  %v1039_v22 = vshrl.u32 %v11335_v46, 16  ;;  %v1042_v37 = vshll.u32 %v11335_v46, 16 }
 0x199   : > { %3763 = vmatprep.subr.bf16.mxu1 %v14313_v0  ;;  %1246 = vst [vmem:[#allocation2 + $0x210] sm:$0x1] %v1245_v23  ;;  %v11356_v3 = vld [vmem:[#allocation2 + $0x290] sm:$0xff] }
 0x19a   : > { %v1247_v1 = vld [vmem:[#allocation2 + $0x240] sm:$0x1]  ;;  %v11333_v43 = vsel %vm827_vm7, %v1011_v5, %v1021_v62  ;;  %v9998_v5 = vld [vmem:[#allocation2 + $0x38] sm:$0xff]  ;;  %v11346_v2 = vrot.slane %v1039_v22, 7  ;;  %v9999_v16 = vld [vmem:[#allocation2 + $0x50] sm:$0xff]  ;;  %v1034_v55 = vshll.u32 %v11356_v3, 16 }
 0x19b   : > { %v1248_v21 = vsel %vm10973_vm10, 0, %v1247_v1  ;;  %1188 = vst [vmem:[#allocation2 + $0x258] sm:$0xff] %v11333_v43  ;;  %v11371_v1 = vld [vmem:[#allocation2 + $0x2d8] sm:$0xff]  ;;  %v10000_v22 = vld [vmem:[#allocation2 + $0x48] sm:$0xff] }
 0x19c   : > { %3764 = vmatpush1.bf16.msra.mxu1 %v9961_v35  ;;  %v1250_v32 = vld [vmem:[#allocation2 + $0x270] sm:$0x1]  ;;  %1249 = vst [vmem:[#allocation2 + $0x240] sm:$0x1] %v1248_v21  ;;  %v1031_v35 = vshrl.u32 %v11356_v3, 16  ;;  %v11373_v21 = vld [vmem:[#allocation2 + $0x120] sm:$0xff] }
 0x19d   : > { %2260 = vmatmul.mubr.bf16.gmra.mrb[28].mxu0 %v11167_v18  ;;  %3765 = vmatprep.subr.bf16.mxu1 %v14313_v0  ;;  %v1251_v6 = vsel %vm10973_vm10, 0, %v1250_v32  ;;  %v1054_v32 = vshrl.u32 %v11371_v1, 16 }
 0x19e   : > { %2267 = vmatprep.mubr.bf16.mxu0 %v11130_v48  ;;  %1252 = vst [vmem:[#allocation2 + $0x270] sm:$0x1] %v1251_v6  ;;  %v1033_v31 = vrot.slane %v1031_v35, 7  ;;  %v10001_v6 = vld [vmem:[#allocation2 + $0x68] sm:$0xff]  ;;  %v10002_v35 = vld [vmem:[#allocation2 + $0x80] sm:$0xff] }
 0x19f   : > { %2934 = vmatmul.mubr.bf16.gmra.mrb[44].mxu1 %v11192_v49  ;;  %v1044_v49 = vor.u32 %v1042_v37, %v11346_v2 }
 0x1a0   : > { %2941 = vmatprep.mubr.bf16.mxu1 %v9998_v5  ;;  %3766 = vmatpush1.bf16.msra.mxu1 %v9964_v54  ;;  %v1036_v57 = vor.u32 %v1034_v55, %v1033_v31  ;;  %v9969_v54 = vld [vmem:[#allocation9 + $0x1b0] sm:$0xff]   ;;  %v9970_v5 = vld [vmem:[#allocation9 + $0x1b8] sm:$0xff]  }
 0x1a1   : > { %3767 = vmatprep.subr.bf16.mxu1 %v14313_v0  ;;  %v1194_v52 = vsel %vm10943_vm8, %v1044_v49, %v1193_v36  ;;  %v1197_v49 = vld [vmem:[#allocation2 + $0x2d0] sm:$0xff] }
 0x1a2   : > { %1195 = vst [vmem:[#allocation2 + $0x2a0] sm:$0xff] %v1194_v52  ;;  %v11387_v52 = vld [vmem:[#allocation2 + $0x2c0] sm:$0xff] }
 0x1a3   : > { %v1049_v55 = vshll.u32 %v11387_v52, 16 }
 0x1a4   : > { %3768 = vmatpush1.bf16.msra.mxu1 %v9966_v26  ;;  %v1057_v26 = vshll.u32 %v11371_v1, 16 }
 0x1a5   : > { %2268 = vmatmul.mubr.bf16.gmra.mrb[32].mxu0 %v11337_v14  ;;  %3769 = vmatprep.subr.bf16.mxu1 %v14313_v0 }
 0x1a6   : > { %2275 = vmatprep.mubr.bf16.mxu0 %v11163_v15 }
 0x1a7   : > { %2942 = vmatmul.mubr.bf16.gmra.mrb[48].mxu1 %v11022_v12  ;;  %v11367_v12 = vsel %vm827_vm7, %v11306_v25, %v1036_v57  ;;  %v11377_v25 = vrot.slane %v1054_v32, 7  ;;  %v11402_v32 = vld [vmem:[#allocation2 + $0x308] sm:$0xff] }
 0x1a8   : > { %2949 = vmatprep.mubr.bf16.mxu1 %v9999_v16  ;;  %3770 = vmatpush1.bf16.msra.mxu1 %v9967_v4  ;;  %1192 = vst [vmem:[#allocation2 + $0x288] sm:$0xff] %v11367_v12  ;;  %v9971_v4 = vld [vmem:[#allocation9 + $0x1c0] sm:$0xff]   ;;  %v9972_v16 = vld [vmem:[#allocation9 + $0x1c8] sm:$0xff]  }
 0x1a9   : > { %3771 = vmatprep.subr.bf16.mxu1 %v14313_v0  ;;  %v1253_v23 = vld [vmem:[#allocation2 + $0x2a0] sm:$0x1]  ;;  %v1059_v37 = vor.u32 %v1057_v26, %v11377_v25  ;;  %v10004_v26 = vld [vmem:[#allocation2 + $0x98] sm:$0xff] }
 0x1aa   : > { %v1254_v62 = vsel %vm10973_vm10, 0, %v1253_v23 }
 0x1ab   : > { %1255 = vst [vmem:[#allocation2 + $0x2a0] sm:$0x1] %v1254_v62  ;;  %v1198_v36 = vsel %vm10943_vm8, %v1059_v37, %v1197_v49 }
 0x1ac   : > { %3772 = vmatpush1.bf16.msra.mxu1 %v9968_v53  ;;  %1199 = vst [vmem:[#allocation2 + $0x2d0] sm:$0xff] %v1198_v36  ;;  %v1046_v53 = vshrl.u32 %v11387_v52, 16 }
 0x1ad   : > { %2276 = vmatmul.mubr.bf16.gmra.mrb[36].mxu0 %v11205_v11  ;;  %3773 = vmatprep.subr.bf16.mxu1 %v14313_v0 }
 0x1ae   : > { %2283 = vmatprep.mubr.bf16.mxu0 %v11178_v34  ;;  %v1048_v31 = vrot.slane %v1046_v53, 7  ;;  %v11414_v53 = vld [vmem:[#allocation2 + $0x2f0] sm:$0xff] }
 0x1af   : > { %2950 = vmatmul.mubr.bf16.gmra.mrb[52].mxu1 %v10000_v22  ;;  %v11404_v22 = vld [vmem:[#allocation2 + $0x150] sm:$0xff] }
 0x1b0   : > { %2957 = vmatprep.mubr.bf16.mxu1 %v10001_v6  ;;  %3774 = vmatpush1.bf16.msra.mxu1 %v9969_v54  ;;  %v1051_v57 = vor.u32 %v1049_v55, %v1048_v31  ;;  %v9973_v54 = vld [vmem:[#allocation9 + $0x1d0] sm:$0xff]   ;;  %v1069_v6 = vshrl.u32 %v11402_v32, 16 }
 0x1b1   : > { %3775 = vmatprep.subr.bf16.mxu1 %v14313_v0  ;;  %v10005_v31 = vld [vmem:[#allocation2 + $0xb0] sm:$0xff] }
 0x1b2   : > { %v1071_v37 = vrot.slane %v1069_v6, 7  ;;  %v1268_v6 = vld [vmem:[#allocation2 + $0x50] sm:$0xff] }
 0x1b3   : > { %v1256_v23 = vld [vmem:[#allocation2 + $0x2d0] sm:$0x1] }
 0x1b4   : > { %3776 = vmatpush1.bf16.msra.mxu1 %v9970_v5  ;;  %v1257_v62 = vsel %vm10973_vm10, 0, %v1256_v23  ;;  %v10003_v5 = vld [vmem:[#allocation2 + $0x78] sm:$0xff] }
 0x1b5   : > { %2284 = vmatmul.mubr.bf16.gmra.mrb[40].mxu0 %v11373_v21  ;;  %3777 = vmatprep.subr.bf16.mxu1 %v14313_v0  ;;  %1258 = vst [vmem:[#allocation2 + $0x2d0] sm:$0x1] %v1257_v62 }
 0x1b6   : > { %2291 = vmatprep.mubr.bf16.mxu0 %v11189_v42 }
 0x1b7   : > { %2958 = vmatmul.mubr.bf16.gmra.mrb[56].mxu1 %v11085_v17  ;;  %v11398_v17 = vsel %vm827_vm7, %v11346_v2, %v1051_v57  ;;  %v1072_v2 = vshll.u32 %v11402_v32, 16  ;;  %v1064_v57 = vshll.u32 %v11414_v53, 16 }
 0x1b8   : > { %2965 = vmatprep.mubr.bf16.mxu1 %v10002_v35  ;;  %3778 = vmatpush1.bf16.msra.mxu1 %v9971_v4  ;;  %1196 = vst [vmem:[#allocation2 + $0x2b8] sm:$0xff] %v11398_v17  ;;  %v1201_v4 = vld [vmem:[#allocation2 + $0x300] sm:$0xff]  ;;  %v9974_v35 = vld [vmem:[#allocation9 + $0x1d8] sm:$0xff]  }
 0x1b9   : > { %3779 = vmatprep.subr.bf16.mxu1 %v14313_v0  ;;  %v1074_v49 = vor.u32 %v1072_v2, %v1071_v37 }
 0x1bb   : > { %v1202_v36 = vsel %vm10943_vm8, %v1074_v49, %v1201_v4  ;;  %v1329_v49 = vshrl.u32 %v1268_v6, 16  ;;  %v1614_v4 = vld [vmem:[#allocation2 + $0x58] sm:$0xff] }
 0x1bc   : > { %3780 = vmatpush1.bf16.msra.mxu1 %v9972_v16  ;;  %1203 = vst [vmem:[#allocation2 + $0x300] sm:$0xff] %v1202_v36  ;;  %v1061_v16 = vshrl.u32 %v11414_v53, 16 }
 0x1bd   : > { %2292 = vmatmul.mubr.bf16.gmra.mrb[44].mxu0 %v11232_v7  ;;  %3781 = vmatprep.subr.bf16.mxu1 %v14313_v0 }
 0x1be   : > { %2299 = vmatprep.mubr.bf16.mxu0 %v11194_v51  ;;  %v1063_v55 = vrot.slane %v1061_v16, 7  ;;  %v11439_v16 = vld [vmem:[#allocation2 + $0x320] sm:$0xff] }
 0x1bf   : > { %2966 = vmatmul.mubr.bf16.gmra.mrb[60].mxu1 %v10003_v5  ;;  %v11428_v5 = vld [vmem:[#allocation2 + $0x180] sm:$0xff] }
 0x1c0   : > { %2973 = vmatprep.mubr.bf16.mxu1 %v10004_v26  ;;  %3782 = vmatpush1.bf16.msra.mxu1 %v9973_v54  ;;  %v1066_v54 = vor.u32 %v1064_v57, %v1063_v55  ;;  %v1325_v26 = vshll.u32 %v1268_v6, 16  ;;  %v1618_v6 = vld [vmem:[#allocation2 + $0x88] sm:$0xff] }
 0x1c1   : > { %3783 = vmatprep.subr.bf16.mxu1 %v14313_v0 }
 0x1c2   : > { %v1327_v2 = vrot.slane %v1325_v26, 1 }
 0x1c3   : > { %v1259_v23 = vld [vmem:[#allocation2 + $0x300] sm:$0x1] }
 0x1c4   : > { %3784 = vmatpush1.bf16.msra.mxu1 %v9974_v35  ;;  %v1260_v62 = vsel %vm10973_vm10, 0, %v1259_v23  ;;  %v11437_v35 = vld [vmem:[#allocation2 + $0x80] sm:$0xff]  ;;  %v1079_v23 = vshll.u32 %v11439_v16, 16 }
 0x1c5   : > { %2300 = vmatmul.mubr.bf16.gmra.mrb[48].mxu0 %v11404_v22  ;;  %3785 = vmatprep.subr.bf16.mxu1 %v14313_v0  ;;  %1261 = vst [vmem:[#allocation2 + $0x300] sm:$0x1] %v1260_v62  ;;  %v1344_v57 = vshrl.u32 %v11437_v35, 16 }
 0x1c6   : > { %2307 = vmatprep.mubr.bf16.mxu0 %v11209_v56 }
 0x1c7   : > { %2974 = vmatmul.mubr.bf16.gmra.mrb[64].mxu1 %v11183_v27  ;;  %v11424_v27 = vsel %vm827_vm7, %v11377_v25, %v1066_v54  ;;  %v1331_v25 = vor.u32 %v1329_v49, %v1327_v2 }
 0x1c8   : > { %2981 = vmatprep.mubr.bf16.mxu1 %v10005_v31  ;;  %1200 = vst [vmem:[#allocation2 + $0x2e8] sm:$0xff] %v11424_v27  ;;  %v1076_v31 = vshrl.u32 %v11439_v16, 16 }
 0x1c9   : > { %v1615_v36 = vsel %vm10875_vm2, %v1331_v25, %v1614_v4  ;;  %v1267_v25 = vld [vmem:[#allocation2 + $0x38] sm:$0xff] }
 0x1ca   : > { %1616 = vst [vmem:[#allocation2 + $0x58] sm:$0xff] %v1615_v36  ;;  %v1078_v54 = vrot.slane %v1076_v31, 7  ;;  %v11457_v36 = vld [vmem:[#allocation2 + $0xb0] sm:$0xff] }
 0x1cb   : > { %v1355_v31 = vshll.u32 %v11457_v36, 16 }
 0x1cd   : > { %2308 = vmatmul.mubr.bf16.gmra.mrb[52].mxu0 %v11245_v45 }
 0x1ce   : > { %2315 = vmatprep.mubr.bf16.mxu0 %v11215_v63 }
 0x1cf   : > { %2982 = vmatmul.mubr.bf16.gmra.mrb[68].mxu1 %v11090_v61  ;;  %v1340_v61 = vshll.u32 %v11437_v35, 16 }
 0x1d0   : > { %2989 = vmatprep.mubr.bf16.mxu1 %v11095_v28  ;;  %v9975_v28 = vld [vmem:[#allocation9 + $0x1e0] sm:$0xff]  }
 0x1d1   : > { %v1342_v55 = vrot.slane %v1340_v61, 1  ;;  %3786 = vmatpush1.bf16.msra.mxu1 %v9975_v28  ;;  %v1687_v26 = vld [vmem:[#allocation2 + $0x58] sm:$0x80]  ;;  %v11459_v61 = vld [vmem:[#allocation2 + $0x1b0] sm:$0xff]  ;;  %v1320_v28 = vshll.u32 %v1267_v25, 16 }
 0x1d2   : > { %3787 = vmatprep.subr.bf16.mxu1 %v14313_v0  ;;  %v1688_v4 = vsel %vm10898_vm5, 0, %v1687_v26 }
 0x1d3   : > { %v1346_v62 = vor.u32 %v1344_v57, %v1342_v55  ;;  %1689 = vst [vmem:[#allocation2 + $0x58] sm:$0x80] %v1688_v4  ;;  %v1322_v57 = vrot.slane %v1320_v28, 1 }
 0x1d5   : > { %2316 = vmatmul.mubr.bf16.gmra.mrb[56].mxu0 %v11428_v5 }
 0x1d6   : > { %2323 = vmatprep.mubr.bf16.mxu0 %v11219_v13 }
 0x1d7   : > { %2990 = vmatmul.mubr.bf16.gmra.mrb[72].mxu1 %v11277_v30  ;;  %v1081_v30 = vor.u32 %v1079_v23, %v1078_v54  ;;  %v1357_v54 = vrot.slane %v1355_v31, 1  ;;  %v1359_v23 = vshrl.u32 %v11457_v36, 16  ;;  %v11480_v31 = vld [vmem:[#allocation2 + $0xe0] sm:$0xff] }
 0x1d8   : > { %2997 = vmatprep.mubr.bf16.mxu1 %v11122_v44  ;;  %v1619_v44 = vsel %vm10875_vm2, %v1346_v62, %v1618_v6  ;;  %v1622_v6 = vld [vmem:[#allocation2 + $0xb8] sm:$0xff] }
 0x1d9   : > { %v11453_v49 = vsel %vm827_vm7, %v1071_v37, %v1081_v30  ;;  %1620 = vst [vmem:[#allocation2 + $0x88] sm:$0xff] %v1619_v44  ;;  %v1318_v37 = vshrl.u32 %v1267_v25, 16  ;;  %v1361_v30 = vor.u32 %v1359_v23, %v1357_v54  ;;  %v11475_v25 = vld [vmem:[#allocation2 + $0x68] sm:$0xff] }
 0x1da   : > { %1204 = vst [vmem:[#allocation2 + $0x318] sm:$0xff] %v11453_v49  ;;  %v1335_v28 = vshll.u32 %v11475_v25, 16 }
 0x1db   : > { %v1323_v62 = vor.u32 %v1322_v57, %v1318_v37  ;;  %v1370_v37 = vshll.u32 %v11480_v31, 16  ;;  %v1333_v57 = vshrl.u32 %v11475_v25, 16 }
 0x1dc   : > { %v1337_v23 = vrot.slane %v1335_v28, 1 }
 0x1dd   : > { %2324 = vmatmul.mubr.bf16.gmra.mrb[60].mxu0 %v11262_v59  ;;  %v11469_v26 = vsel %vm1301_vm0, %v1323_v62, %v1327_v2  ;;  %v9977_v2 = vld [vmem:[#allocation9 + $0x1e8] sm:$0xff]   ;;  %v1374_v62 = vshrl.u32 %v11480_v31, 16 }
 0x1de   : > { %2331 = vmatprep.mubr.bf16.mxu0 %v11225_v24  ;;  %3788 = vmatpush1.bf16.msra.mxu1 %v9977_v2 }
 0x1df   : > { %2998 = vmatmul.mubr.bf16.gmra.mrb[76].mxu1 %v11167_v18  ;;  %v1623_v18 = vsel %vm10875_vm2, %v1361_v30, %v1622_v6  ;;  %v1372_v30 = vrot.slane %v1370_v37, 1  ;;  %v1338_v6 = vor.u32 %v1337_v23, %v1333_v57  ;;  %3789 = vmatprep.subr.bf16.mxu1 %v14313_v0  ;;  %v11501_v37 = vld [vmem:[#allocation2 + $0x110] sm:$0xff]  ;;  %v11503_v57 = vld [vmem:[#allocation2 + $0x1e0] sm:$0xff] }
 0x1e0   : > { %3005 = vmatprep.mubr.bf16.mxu1 %v11130_v48  ;;  %v1690_v44 = vld [vmem:[#allocation2 + $0x88] sm:$0x80]  ;;  %v11473_v48 = vld [vmem:[#allocation9 + $0x80] sm:$0xff]   ;;  %1624 = vst [vmem:[#allocation2 + $0xb8] sm:$0xff] %v1623_v18  ;;  %14414 = vst [vmem:[#allocation40_spill] sm:$0xff] %v11501_v37 }
 0x1e1   : > { %v1691_v4 = vsel %vm10898_vm5, 0, %v1690_v44  ;;  %9542 = vmatprep.subr.bf16.mxu0 %v11473_v48  ;;  %v1626_v44 = vld [vmem:[#allocation2 + $0xe8] sm:$0xff]  ;;  %v11492_v18 = vsel %vm1301_vm0, %v1338_v6, %v1342_v55  ;;  %v1385_v55 = vshll.u32 %v11501_v37, 16 }
 0x1e2   : > { %1692 = vst [vmem:[#allocation2 + $0x88] sm:$0x80] %v1691_v4  ;;  %1617 = vst [vmem:[#allocation2 + $0x70] sm:$0xff] %v11492_v18  ;;  %v11495_v4 = vld [vmem:[#allocation2 + $0x98] sm:$0xff] }
 0x1e3   : > { %v1350_v23 = vshll.u32 %v11495_v4, 16 }
 0x1e5   : > { %2332 = vmatmul.mubr.bf16.gmra.mrb[64].mxu0 %v11459_v61  ;;  %v1352_v6 = vrot.slane %v1350_v23, 1 }
 0x1e6   : > { %2339 = vmatprep.mubr.bf16.mxu0 %v11239_v40 }
 0x1e7   : > { %3006 = vmatmul.mubr.bf16.gmra.mrb[80].mxu1 %v11337_v14  ;;  %v1376_v14 = vor.u32 %v1374_v62, %v1372_v30  ;;  %v1348_v62 = vshrl.u32 %v11495_v4, 16 }
 0x1e8   : > { %3013 = vmatprep.mubr.bf16.mxu1 %v11163_v15  ;;  %v1693_v15 = vld [vmem:[#allocation2 + $0xb8] sm:$0x80] }
 0x1e9   : > { %v1694_v28 = vsel %vm10898_vm5, 0, %v1693_v15  ;;  %v1627_v2 = vsel %vm10875_vm2, %v1376_v14, %v1626_v44  ;;  %v1387_v15 = vrot.slane %v1385_v55, 1  ;;  %v1389_v14 = vshrl.u32 %v11501_v37, 16  ;;  %v1610_v37 = vld [vmem:[#allocation2 + $0x28] sm:$0xff] }
 0x1ea   : > { %1695 = vst [vmem:[#allocation2 + $0xb8] sm:$0x80] %v1694_v28  ;;  %1628 = vst [vmem:[#allocation2 + $0xe8] sm:$0xff] %v1627_v2  ;;  %v1353_v44 = vor.u32 %v1352_v6, %v1348_v62  ;;  %v1630_v28 = vld [vmem:[#allocation2 + $0x118] sm:$0xff]  ;;  %v11524_v62 = vld [vmem:[#allocation2 + $0x140] sm:$0xff] }
 0x1eb   : > { %v1391_v0 = vor.u32 %v1389_v14, %v1387_v15  ;;  %14415 = vst [vmem:[#allocation41_spill] sm:$0xff] %v11524_v62  ;;  %v1400_v6 = vshll.u32 %v11524_v62, 16 }
 0x1ec   : > { %v11514_v2 = vsel %vm1301_vm0, %v1353_v44, %v1357_v54  ;;  %v9981_v54 = vld [vmem:[#allocation9 + $0x1f0] sm:$0xff]   ;;  %v1404_v44 = vshrl.u32 %v11524_v62, 16 }
 0x1ed   : > { %2340 = vmatmul.mubr.bf16.gmra.mrb[68].mxu0 %v11280_v33  ;;  %1621 = vst [vmem:[#allocation2 + $0xa0] sm:$0xff] %v11514_v2  ;;  %3790 = vmatpush1.bf16.msra.mxu1 %v9981_v54 }
 0x1ee   : > { %2347 = vmatprep.mubr.bf16.mxu0 %v11241_v39 }
 0x1ef   : > { %3014 = vmatmul.mubr.bf16.gmra.mrb[84].mxu1 %v11205_v11  ;;  %v1631_v11 = vsel %vm10875_vm2, %v1391_v0, %v1630_v28  ;;  %v1402_v28 = vrot.slane %v1400_v6, 1  ;;  %v1266_v6 = vld [vmem:[#allocation2 + $0x20] sm:$0xff] }
 0x1f0   : > { %3021 = vmatprep.mubr.bf16.mxu1 %v11178_v34  ;;  %v11519_v34 = vld [vmem:[#allocation2 + $0xc8] sm:$0xff]  ;;  %1632 = vst [vmem:[#allocation2 + $0x118] sm:$0xff] %v1631_v11 }
 0x1f1   : > { %v1696_v23 = vld [vmem:[#allocation2 + $0xe8] sm:$0x80]  ;;  %v1365_v55 = vshll.u32 %v11519_v34, 16  ;;  %v1363_v0 = vshrl.u32 %v11519_v34, 16 }
 0x1f2   : > { %v1697_v10 = vsel %vm10898_vm5, 0, %v1696_v23  ;;  %v14416_v23 = vmov 0  }
 0x1f3   : > { %1698 = vst [vmem:[#allocation2 + $0xe8] sm:$0x80] %v1697_v10  ;;  %v1367_v14 = vrot.slane %v1365_v55, 1  ;;  %3791 = vmatprep.subr.bf16.mxu1 %v14416_v23  ;;  %v1634_v10 = vld [vmem:[#allocation2 + $0x148] sm:$0xff]  ;;  %v11538_v55 = vld [vmem:[#allocation2 + $0xf8] sm:$0xff] }
 0x1f5   : > { %2348 = vmatmul.mubr.bf16.gmra.mrb[72].mxu0 %v11503_v57  ;;  %v1368_v11 = vor.u32 %v1367_v14, %v1363_v0  ;;  %v11544_v0 = vld [vmem:[#allocation2 + $0x210] sm:$0xff]  ;;  %v1380_v14 = vshll.u32 %v11538_v55, 16 }
 0x1f6   : > { %2355 = vmatprep.mubr.bf16.mxu0 %v11257_v58 }
 0x1f7   : > { %3022 = vmatmul.mubr.bf16.gmra.mrb[88].mxu1 %v11373_v21  ;;  %v1406_v21 = vor.u32 %v1404_v44, %v1402_v28  ;;  %v11535_v41 = vsel %vm1301_vm0, %v1368_v11, %v1372_v30  ;;  %v1310_v30 = vshll.u32 %v1266_v6, 16  ;;  %v1378_v44 = vshrl.u32 %v11538_v55, 16 }
 0x1f8   : > { %3029 = vmatprep.mubr.bf16.mxu1 %v11189_v42  ;;  %v1699_v42 = vld [vmem:[#allocation2 + $0x118] sm:$0x80]  ;;  %1625 = vst [vmem:[#allocation2 + $0xd0] sm:$0xff] %v11535_v41  ;;  %v1382_v11 = vrot.slane %v1380_v14, 1 }
 0x1f9   : > { %v1700_v62 = vsel %vm10898_vm5, 0, %v1699_v42  ;;  %v1635_v54 = vsel %vm10875_vm2, %v1406_v21, %v1634_v10  ;;  %v1312_v23 = vrot.slane %v1310_v30, 1  ;;  %v1314_v42 = vshrl.u32 %v1266_v6, 16  ;;  %v9984_v30 = vld [vmem:[#allocation9 + $0x1f8] sm:$0xff]  }
 0x1fa   : > { %1701 = vst [vmem:[#allocation2 + $0x118] sm:$0x80] %v1700_v62  ;;  %1636 = vst [vmem:[#allocation2 + $0x148] sm:$0xff] %v1635_v54  ;;  %v1383_v21 = vor.u32 %v1382_v11, %v1378_v44  ;;  %3792 = vmatpush1.bf16.msra.mxu1 %v9984_v30 }
 0x1fb   : > { %v1316_v10 = vor.u32 %v1314_v42, %v1312_v23 }
 0x1fc   : > { %v11553_v62 = vsel %vm1301_vm0, %v1383_v21, %v1387_v15 }
 0x1fd   : > { %2356 = vmatmul.mubr.bf16.gmra.mrb[76].mxu0 %v11297_v8  ;;  %1629 = vst [vmem:[#allocation2 + $0x100] sm:$0xff] %v11553_v62 }
 0x1fe   : > { %2363 = vmatprep.mubr.bf16.mxu0 %v11259_v60 }
 0x1ff   : > { %3030 = vmatmul.mubr.bf16.gmra.mrb[92].mxu1 %v11232_v7  ;;  %v1611_v7 = vsel %vm10875_vm2, %v1316_v10, %v1610_v37 }
 0x200   : > { %3037 = vmatprep.mubr.bf16.mxu1 %v11194_v51  ;;  %v11558_v51 = vld [vmem:[#allocation2 + $0x128] sm:$0xff]  ;;  %1612 = vst [vmem:[#allocation2 + $0x28] sm:$0xff] %v1611_v7 }
 0x201   : > { %v1702_v54 = vld [vmem:[#allocation2 + $0x148] sm:$0x80]  ;;  %v1395_v6 = vshll.u32 %v11558_v51, 16  ;;  %v1393_v15 = vshrl.u32 %v11558_v51, 16 }
 0x202   : > { %v1703_v14 = vsel %vm10898_vm5, 0, %v1702_v54 }
 0x203   : > { %1704 = vst [vmem:[#allocation2 + $0x148] sm:$0x80] %v1703_v14  ;;  %v1397_v37 = vrot.slane %v1395_v6, 1 }
 0x205   : > { %2364 = vmatmul.mubr.bf16.gmra.mrb[80].mxu0 %v11544_v0  ;;  %v1398_v44 = vor.u32 %v1397_v37, %v1393_v15  ;;  %v11595_v15 = vld [vmem:[#allocation2 + $0x270] sm:$0xff] }
 0x206   : > { %2371 = vmatprep.mubr.bf16.mxu0 %v11273_v20 }
 0x207   : > { %3038 = vmatmul.mubr.bf16.gmra.mrb[96].mxu1 %v11404_v22  ;;  %v11569_v11 = vsel %vm1301_vm0, %v1398_v44, %v1402_v28  ;;  %v1684_v42 = vld [vmem:[#allocation2 + $0x28] sm:$0x80] }
 0x208   : > { %3045 = vmatprep.mubr.bf16.mxu1 %v11209_v56  ;;  %1633 = vst [vmem:[#allocation2 + $0x130] sm:$0xff] %v11569_v11  ;;  %v1265_v22 = vld [vmem:[#allocation2 + $0x8] sm:$0xff]  ;;  %v1685_v21 = vsel %vm10898_vm5, 0, %v1684_v42  ;;  %v11574_v56 = vld [vmem:[#allocation2 + $0x240] sm:$0xff] }
 0x209   : > { %v1305_v10 = vshll.u32 %v1265_v22, 16  ;;  %1686 = vst [vmem:[#allocation2 + $0x28] sm:$0x80] %v1685_v21  ;;  %v1303_v7 = vshrl.u32 %v1265_v22, 16  ;;  %v11621_v42 = vld [vmem:[#allocation2 + $0x2a0] sm:$0xff] }
 0x20b   : > { %v1307_v54 = vrot.slane %v1305_v10, 1 }
 0x20d   : > { %2372 = vmatmul.mubr.bf16.gmra.mrb[84].mxu0 %v11309_v29  ;;  %v1308_v28 = vor.u32 %v1307_v54, %v1303_v7 }
 0x20e   : > { %2379 = vmatprep.mubr.bf16.mxu0 %v11275_v50 }
 0x20f   : > { %3046 = vmatmul.mubr.bf16.gmra.mrb[100].mxu1 %v11245_v45  ;;  %v11581_v6 = vsel %vm1301_vm0, %v1308_v28, %v1312_v23 }
 0x210   : > { %3053 = vmatprep.mubr.bf16.mxu1 %v11215_v63 }
 0x215   : > { %2380 = vmatmul.mubr.bf16.gmra.mrb[88].mxu0 %v11574_v56 }
 0x216   : > { %2387 = vmatprep.mubr.bf16.mxu0 %v11317_v38 }
 0x217   : > { %3054 = vmatmul.mubr.bf16.gmra.mrb[104].mxu1 %v11428_v5 }
 0x218   : > { %3061 = vmatprep.mubr.bf16.mxu1 %v11219_v13 }
 0x219   : > { %v11586_v14 = vpop.f32.mrb[0].mxu1 }
 0x21a   : > { %v11589_v63 = vpop.f32.mrb[1].mxu1 }
 0x21b   : > { %v11591_v45 = vpop.f32.mrb[2].mxu1 }
 0x21c   : > { %v11593_v30 = vpop.f32.mrb[3].mxu1 }
 0x21d   : > { %2388 = vmatmul.mubr.bf16.gmra.mrb[92].mxu0 %v11333_v43 }
 0x21e   : > { %2395 = vmatprep.mubr.bf16.mxu0 %v11284_v9 }
 0x21f   : > { %3062 = vmatmul.mubr.bf16.gmra.mrb[108].mxu1 %v11262_v59 }
 0x220   : > { %3069 = vmatprep.mubr.bf16.mxu1 %v11225_v24 }
 0x221   : > { %v11600_v13 = vpop.f32.mrb[4].mxu1 }
 0x222   : > { %v11603_v5 = vpop.f32.mrb[5].mxu1 }
 0x223   : > { %v11605_v9 = vpop.f32.mrb[6].mxu1 }
 0x224   : > { %v11607_v23 = vpop.f32.mrb[7].mxu1 }
 0x225   : > { %2396 = vmatmul.mubr.bf16.gmra.mrb[96].mxu0 %v11595_v15 }
 0x226   : > { %2403 = vmatprep.mubr.bf16.mxu0 %v11356_v3 }
 0x227   : > { %3070 = vmatmul.mubr.bf16.gmra.mrb[112].mxu1 %v11459_v61 }
 0x228   : > { %3077 = vmatprep.mubr.bf16.mxu1 %v11239_v40 }
 0x229   : > { %v11612_v59 = vpop.f32.mrb[8].mxu1 }
 0x22a   : > { %v11615_v24 = vpop.f32.mrb[9].mxu1 }
 0x22b   : > { %v11617_v37 = vpop.f32.mrb[10].mxu1 }
 0x22c   : > { %v11619_v44 = vpop.f32.mrb[11].mxu1 }
 0x22d   : > { %2404 = vmatmul.mubr.bf16.gmra.mrb[100].mxu0 %v11367_v12 }
 0x22e   : > { %2411 = vmatprep.mubr.bf16.mxu0 %v11335_v46 }
 0x22f   : > { %3078 = vmatmul.mubr.bf16.gmra.mrb[116].mxu1 %v11280_v33 }
 0x230   : > { %3085 = vmatprep.mubr.bf16.mxu1 %v11241_v39 }
 0x231   : > { %v11626_v40 = vpop.f32.mrb[12].mxu1 }
 0x232   : > { %v11629_v61 = vpop.f32.mrb[13].mxu1 }
 0x233   : > { %v11631_v22 = vpop.f32.mrb[14].mxu1 }
 0x234   : > { %v11635_v10 = vpop.f32.mrb[15].mxu1 }
 0x235   : > { %2412 = vmatmul.mubr.bf16.gmra.mrb[104].mxu0 %v11621_v42 }
 0x236   : > { %2419 = vmatprep.mubr.bf16.mxu0 %v11387_v52 }
 0x237   : > { %3086 = vmatmul.mubr.bf16.gmra.mrb[120].mxu1 %v11503_v57  ;;  %v11655_v57 = vld [vmem:[#allocation2 + $0x2d0] sm:$0xff] }
 0x238   : > { %v11633_v21 = vpop.f32.mrb[0].mxu0  ;;  %3093 = vmatprep.mubr.bf16.mxu1 %v11257_v58 }
 0x239   : > { %14417 = vst [vmem:[#allocation42_spill] sm:$0xff] %v11633_v21  ;;  %v2207_v7 = vpop.f32.mrb[1].mxu0 }
 0x23a   : > { %v11637_v54 = vpop.f32.mrb[2].mxu0  ;;  %v11642_v33 = vpop.f32.mrb[16].mxu1 }
 0x23b   : > { %14418 = vst [vmem:[#allocation43_spill] sm:$0xff] %v11637_v54  ;;  %v2210_v39 = vpop.f32.mrb[3].mxu0  ;;  %14419 = vst [vmem:[#allocation44_spill] sm:$0xff] %v11642_v33  ;;  %v11645_v28 = vpop.f32.mrb[17].mxu1 }
 0x23c   : > { %v11647_v47 = vpop.f32.mrb[18].mxu1 }
 0x23d   : > { %2420 = vmatmul.mubr.bf16.gmra.mrb[108].mxu0 %v11398_v17  ;;  %14420 = vst [vmem:[#allocation45_spill] sm:$0xff] %v11647_v47  ;;  %v11651_v7 = vpop.f32.mrb[19].mxu1 }
 0x23e   : > { %2427 = vmatprep.mubr.bf16.mxu0 %v11371_v1  ;;  %14422 = vst [vmem:[#allocation47_spill] sm:$0xff] %v11651_v7 }
 0x23f   : > { %3094 = vmatmul.mubr.bf16.gmra.mrb[124].mxu1 %v11297_v8 }
 0x240   : > { %v11649_v21 = vpop.f32.mrb[4].mxu0  ;;  %3101 = vmatprep.mubr.bf16.mxu1 %v11259_v60 }
 0x241   : > { %14421 = vst [vmem:[#allocation46_spill] sm:$0xff] %v11649_v21  ;;  %v2215_v54 = vpop.f32.mrb[5].mxu0 }
 0x242   : > { %v11653_v19 = vpop.f32.mrb[6].mxu0  ;;  %v11660_v39 = vpop.f32.mrb[20].mxu1 }
 0x243   : > { %14423 = vst [vmem:[#allocation48_spill] sm:$0xff] %v11653_v19  ;;  %v2218_v58 = vpop.f32.mrb[7].mxu0  ;;  %14424 = vst [vmem:[#allocation49_spill] sm:$0xff] %v11660_v39  ;;  %v11663_v47 = vpop.f32.mrb[21].mxu1 }
 0x244   : > { %v11665_v21 = vpop.f32.mrb[22].mxu1 }
 0x245   : > { %2428 = vmatmul.mubr.bf16.gmra.mrb[112].mxu0 %v11655_v57  ;;  %14425 = vst [vmem:[#allocation50_spill] sm:$0xff] %v11665_v21  ;;  %v11669_v19 = vpop.f32.mrb[23].mxu1 }
 0x246   : > { %2435 = vmatprep.mubr.bf16.mxu0 %v11414_v53 }
 0x247   : > { %3102 = vmatmul.mubr.bf16.gmra.mrb[128].mxu1 %v11544_v0  ;;  %v1972_v0 = vld [vmem:[#allocation2 + $0x300] sm:$0xff] }
 0x248   : > { %v11667_v54 = vpop.f32.mrb[8].mxu0  ;;  %3109 = vmatprep.mubr.bf16.mxu1 %v11273_v20 }
 0x249   : > { %14426 = vst [vmem:[#allocation51_spill] sm:$0xff] %v11667_v54  ;;  %v2223_v33 = vpop.f32.mrb[9].mxu0 }
 0x24a   : > { %v11671_v7 = vpop.f32.mrb[10].mxu0  ;;  %v11676_v8 = vpop.f32.mrb[24].mxu1 }
 0x24b   : > { %14427 = vst [vmem:[#allocation52_spill] sm:$0xff] %v11671_v7  ;;  %v2226_v60 = vpop.f32.mrb[11].mxu0  ;;  %14428 = vst [vmem:[#allocation53_spill] sm:$0xff] %v11676_v8  ;;  %v11679_v58 = vpop.f32.mrb[25].mxu1 }
 0x24c   : > { %v11681_v21 = vpop.f32.mrb[26].mxu1 }
 0x24d   : > { %2436 = vmatmul.mubr.bf16.gmra.mrb[116].mxu0 %v11424_v27  ;;  %14429 = vst [vmem:[#allocation54_spill] sm:$0xff] %v11681_v21  ;;  %v11685_v33 = vpop.f32.mrb[27].mxu1 }
 0x24e   : > { %2443 = vmatprep.mubr.bf16.mxu0 %v11402_v32 }
 0x24f   : > { %3110 = vmatmul.mubr.bf16.gmra.mrb[132].mxu1 %v11309_v29 }
 0x250   : > { %v11683_v54 = vpop.f32.mrb[12].mxu0  ;;  %3117 = vmatprep.mubr.bf16.mxu1 %v11275_v50 }
 0x251   : > { %14430 = vst [vmem:[#allocation55_spill] sm:$0xff] %v11683_v54  ;;  %v2231_v7 = vpop.f32.mrb[13].mxu0 }
 0x252   : > { %v11687_v39 = vpop.f32.mrb[14].mxu0  ;;  %v11691_v60 = vpop.f32.mrb[28].mxu1 }
 0x253   : > { %14431 = vst [vmem:[#allocation56_spill] sm:$0xff] %v11687_v39  ;;  %v2234_v20 = vpop.f32.mrb[15].mxu0  ;;  %v11694_v32 = vpop.f32.mrb[29].mxu1 }
 0x254   : > { %v11696_v21 = vpop.f32.mrb[30].mxu1 }
 0x255   : > { %2444 = vmatmul.mubr.bf16.gmra.mrb[120].mxu0 %v1972_v0  ;;  %v11700_v7 = vpop.f32.mrb[31].mxu1 }
 0x256   : > { %2451 = vmatprep.mubr.bf16.mxu0 %v11439_v16 }
 0x257   : > { %3118 = vmatmul.mubr.bf16.gmra.mrb[136].mxu1 %v11574_v56  ;;  %v11720_v56 = vld [vmem:[#allocation2 + $0x58] sm:$0xff] }
 0x258   : > { %v11698_v54 = vpop.f32.mrb[16].mxu0  ;;  %3125 = vmatprep.mubr.bf16.mxu1 %v11317_v38 }
 0x259   : > { %14432 = vst [vmem:[#allocation57_spill] sm:$0xff] %v11698_v54  ;;  %v2239_v39 = vpop.f32.mrb[17].mxu0 }
 0x25a   : > { %v11702_v8 = vpop.f32.mrb[18].mxu0  ;;  %v11707_v50 = vpop.f32.mrb[32].mxu1 }
 0x25b   : > { %14433 = vst [vmem:[#allocation58_spill] sm:$0xff] %v11702_v8  ;;  %v2242_v29 = vpop.f32.mrb[19].mxu0  ;;  %14434 = vst [vmem:[#allocation59_spill] sm:$0xff] %v11707_v50  ;;  %v11710_v16 = vpop.f32.mrb[33].mxu1 }
 0x25c   : > { %v11712_v0 = vpop.f32.mrb[34].mxu1  ;;  %v10006_v29 = vld [vmem:[#allocation2 + $0x278] sm:$0xff] }
 0x25d   : > { %2452 = vmatmul.mubr.bf16.gmra.mrb[124].mxu0 %v11453_v49  ;;  %14435 = vst [vmem:[#allocation60_spill] sm:$0xff] %v11712_v0  ;;  %v11716_v39 = vpop.f32.mrb[35].mxu1  ;;  %v9978_v49 = vld [vmem:[#allocation9 + $0x88] sm:$0xff]  }
 0x25e   : > { %9478 = vmatprep.mubr.bf16.mxu0 %v11469_v26  ;;  %14437 = vst [vmem:[#allocation62_spill] sm:$0xff] %v11716_v39  ;;  %v11738_v39 = vld [vmem:[#allocation2 + $0x88] sm:$0xff] }
 0x25f   : > { %3126 = vmatmul.mubr.bf16.gmra.mrb[140].mxu1 %v11333_v43 }
 0x260   : > { %v11714_v20 = vpop.f32.mrb[20].mxu0  ;;  %3133 = vmatprep.mubr.bf16.mxu1 %v10006_v29 }
 0x261   : > { %14436 = vst [vmem:[#allocation61_spill] sm:$0xff] %v11714_v20  ;;  %v2247_v8 = vpop.f32.mrb[21].mxu0 }
 0x262   : > { %v11718_v54 = vpop.f32.mrb[22].mxu0  ;;  %v11724_v50 = vpop.f32.mrb[36].mxu1  ;;  %v9979_v8 = vld [vmem:[#allocation9 + $0x90] sm:$0xff]  }
 0x263   : > { %14438 = vst [vmem:[#allocation63_spill] sm:$0xff] %v11718_v54  ;;  %v2250_v38 = vpop.f32.mrb[23].mxu0  ;;  %14439 = vst [vmem:[#allocation64_spill] sm:$0xff] %v11724_v50  ;;  %v11728_v20 = vpop.f32.mrb[37].mxu1  ;;  %v9980_v50 = vld [vmem:[#allocation9 + $0x98] sm:$0xff]  }
 0x264   : > { %14440 = vst [vmem:[#allocation65_spill] sm:$0xff] %v11728_v20  ;;  %v11730_v54 = vpop.f32.mrb[38].mxu1  ;;  %v11752_v20 = vld [vmem:[#allocation2 + $0xb8] sm:$0xff] }
 0x265   : > { %9479 = vmatmul.mubr.bf16.vlgmr.msra.gmra.mrb[128].mxu0 %v11720_v56  ;;  %14441 = vst [vmem:[#allocation66_spill] sm:$0xff] %v11730_v54  ;;  %v11734_v43 = vpop.f32.mrb[39].mxu1 }
 0x266   : > { %9543 = vmatpush3.bf16.msra.mxu0 %v11473_v48  ;;  %9482 = vmatprep.mubr.bf16.mxu0 %v11492_v18  ;;  %14443 = vst [vmem:[#allocation68_spill] sm:$0xff] %v11734_v43 }
 0x267   : > { %9544 = vmatprep.subr.bf16.mxu0 %v9978_v49  ;;  %3134 = vmatmul.mubr.bf16.gmra.mrb[144].mxu1 %v11595_v15 }
 0x268   : > { %v11732_v0 = vpop.f32.mrb[24].mxu0  ;;  %3141 = vmatprep.mubr.bf16.mxu1 %v11356_v3 }
 0x269   : > { %14442 = vst [vmem:[#allocation67_spill] sm:$0xff] %v11732_v0  ;;  %v2255_v38 = vpop.f32.mrb[25].mxu0 }
 0x26a   : > { %v11736_v29 = vpop.f32.mrb[26].mxu0  ;;  %9545 = vmatpush3.bf16.msra.mxu0 %v9978_v49  ;;  %v11743_v54 = vpop.f32.mrb[40].mxu1 }
 0x26b   : > { %14444 = vst [vmem:[#allocation69_spill] sm:$0xff] %v11736_v29  ;;  %v2258_v48 = vpop.f32.mrb[27].mxu0  ;;  %9546 = vmatprep.subr.bf16.mxu0 %v9979_v8  ;;  %14445 = vst [vmem:[#allocation70_spill] sm:$0xff] %v11743_v54  ;;  %v2929_v38 = vpop.f32.mrb[41].mxu1  ;;  %v9982_v29 = vld [vmem:[#allocation9 + $0xa0] sm:$0xff]   ;;  %v9986_v54 = vld [vmem:[#allocation9 + $0xb8] sm:$0xff]  }
 0x26c   : > { %v11746_v49 = vpop.f32.mrb[42].mxu1 }
 0x26d   : > { %9483 = vmatmul.mubr.bf16.gmra.mrb[132].mxu0 %v11738_v39  ;;  %14446 = vst [vmem:[#allocation71_spill] sm:$0xff] %v11746_v49  ;;  %v2932_v15 = vpop.f32.mrb[43].mxu1  ;;  %v11766_v49 = vld [vmem:[#allocation2 + $0xe8] sm:$0xff] }
 0x26e   : > { %9547 = vmatpush3.bf16.msra.mxu0 %v9979_v8  ;;  %9486 = vmatprep.mubr.bf16.mxu0 %v11514_v2  ;;  %v9983_v8 = vld [vmem:[#allocation9 + $0xa8] sm:$0xff]  }
 0x26f   : > { %9548 = vmatprep.subr.bf16.mxu0 %v9980_v50  ;;  %3142 = vmatmul.mubr.bf16.gmra.mrb[148].mxu1 %v11367_v12 }
 0x270   : > { %v11748_v0 = vpop.f32.mrb[28].mxu0  ;;  %3149 = vmatprep.mubr.bf16.mxu1 %v11335_v46 }
 0x271   : > { %14447 = vst [vmem:[#allocation72_spill] sm:$0xff] %v11748_v0  ;;  %v2263_v48 = vpop.f32.mrb[29].mxu0 }
 0x272   : > { %v11750_v43 = vpop.f32.mrb[30].mxu0  ;;  %9549 = vmatpush3.bf16.msra.mxu0 %v9980_v50  ;;  %v11757_v38 = vpop.f32.mrb[44].mxu1  ;;  %v9985_v48 = vld [vmem:[#allocation9 + $0xb0] sm:$0xff]  }
 0x273   : > { %14448 = vst [vmem:[#allocation73_spill] sm:$0xff] %v11750_v43  ;;  %v2266_v3 = vpop.f32.mrb[31].mxu0  ;;  %9550 = vmatprep.subr.bf16.mxu0 %v9982_v29  ;;  %v2937_v15 = vpop.f32.mrb[45].mxu1 }
 0x274   : > { %v11760_v43 = vpop.f32.mrb[46].mxu1 }
 0x275   : > { %9487 = vmatmul.mubr.bf16.gmra.mrb[136].mxu0 %v11752_v20  ;;  %v2940_v12 = vpop.f32.mrb[47].mxu1 }
 0x276   : > { %9490 = vmatprep.mubr.bf16.mxu0 %v11535_v41  ;;  %9551 = vmatpush3.bf16.msra.mxu0 %v9982_v29  ;;  %v9987_v12 = vld [vmem:[#allocation9 + $0x200] sm:$0xff]  }
 0x277   : > { %9552 = vmatprep.subr.bf16.mxu0 %v9983_v8  ;;  %3150 = vmatmul.mubr.bf16.gmra.mrb[152].mxu1 %v11621_v42 }
 0x278   : > { %v11762_v50 = vpop.f32.mrb[32].mxu0  ;;  %3157 = vmatprep.mubr.bf16.mxu1 %v11387_v52 }
 0x279   : > { %14449 = vst [vmem:[#allocation74_spill] sm:$0xff] %v11762_v50  ;;  %v2271_v3 = vpop.f32.mrb[33].mxu0  ;;  %v11780_v50 = vld [vmem:[#allocation2 + $0x118] sm:$0xff] }
 0x27a   : > { %v11764_v0 = vpop.f32.mrb[34].mxu0  ;;  %9553 = vmatpush3.bf16.msra.mxu0 %v9983_v8  ;;  %v11771_v29 = vpop.f32.mrb[48].mxu1 }
 0x27b   : > { %14450 = vst [vmem:[#allocation75_spill] sm:$0xff] %v11764_v0  ;;  %v2274_v46 = vpop.f32.mrb[35].mxu0  ;;  %9554 = vmatprep.subr.bf16.mxu0 %v9985_v48  ;;  %v2945_v15 = vpop.f32.mrb[49].mxu1 }
 0x27c   : > { %v11774_v3 = vpop.f32.mrb[50].mxu1 }
 0x27d   : > { %9491 = vmatmul.mubr.bf16.gmra.mrb[140].mxu0 %v11766_v49  ;;  %14451 = vst [vmem:[#allocation76_spill] sm:$0xff] %v11774_v3  ;;  %v2948_v42 = vpop.f32.mrb[51].mxu1 }
 0x27e   : > { %9494 = vmatprep.mubr.bf16.mxu0 %v11553_v62  ;;  %9555 = vmatpush3.bf16.msra.mxu0 %v9985_v48 }
 0x27f   : > { %9556 = vmatprep.subr.bf16.mxu0 %v9986_v54  ;;  %3158 = vmatmul.mubr.bf16.gmra.mrb[156].mxu1 %v11398_v17  ;;  %v11794_v17 = vld [vmem:[#allocation2 + $0x148] sm:$0xff] }
 0x280   : > { %v11776_v8 = vpop.f32.mrb[36].mxu0  ;;  %3165 = vmatprep.mubr.bf16.mxu1 %v11371_v1 }
 0x281   : > { %14452 = vst [vmem:[#allocation77_spill] sm:$0xff] %v11776_v8  ;;  %v2279_v46 = vpop.f32.mrb[37].mxu0 }
 0x282   : > { %v11778_v0 = vpop.f32.mrb[38].mxu0  ;;  %9557 = vmatpush3.bf16.msra.mxu0 %v9986_v54  ;;  %v11785_v48 = vpop.f32.mrb[52].mxu1 }
 0x283   : > { %14453 = vst [vmem:[#allocation78_spill] sm:$0xff] %v11778_v0  ;;  %v2282_v52 = vpop.f32.mrb[39].mxu0  ;;  %9622 = vmatprep.subr.bf16.mxu0 %v9987_v12  ;;  %v2953_v15 = vpop.f32.mrb[53].mxu1 }
 0x284   : > { %v11788_v42 = vpop.f32.mrb[54].mxu1 }
 0x285   : > { %9495 = vmatmul.mubr.bf16.gmra.mrb[144].mxu0 %v11780_v50  ;;  %14454 = vst [vmem:[#allocation79_spill] sm:$0xff] %v11788_v42  ;;  %v2956_v0 = vpop.f32.mrb[55].mxu1  ;;  %v1743_v42 = vld [vmem:[#allocation2 + $0x28] sm:$0xff] }
 0x286   : > { %9498 = vmatprep.mubr.bf16.mxu0 %v11569_v11 }
 0x287   : > { %3166 = vmatmul.mubr.bf16.gmra.mrb[160].mxu1 %v11655_v57 }
 0x288   : > { %v11790_v46 = vpop.f32.mrb[40].mxu0  ;;  %3173 = vmatprep.mubr.bf16.mxu1 %v11414_v53  ;;  %v9988_v53 = vld [vmem:[#allocation9 + $0x208] sm:$0xff]  }
 0x289   : > { %14455 = vst [vmem:[#allocation80_spill] sm:$0xff] %v11790_v46  ;;  %v2287_v8 = vpop.f32.mrb[41].mxu0 }
 0x28a   : > { %v11792_v54 = vpop.f32.mrb[42].mxu0  ;;  %v11799_v52 = vpop.f32.mrb[56].mxu1 }
 0x28b   : > { %14456 = vst [vmem:[#allocation81_spill] sm:$0xff] %v11792_v54  ;;  %v2290_v1 = vpop.f32.mrb[43].mxu0  ;;  %v2961_v15 = vpop.f32.mrb[57].mxu1 }
 0x28c   : > { %v11802_v3 = vpop.f32.mrb[58].mxu1  ;;  %v9989_v15 = vld [vmem:[#allocation9 + $0x210] sm:$0xff]  }
 0x28d   : > { %9499 = vmatmul.mubr.bf16.gmra.mrb[148].mxu0 %v11794_v17  ;;  %14457 = vst [vmem:[#allocation82_spill] sm:$0xff] %v11802_v3  ;;  %v2964_v8 = vpop.f32.mrb[59].mxu1 }
 0x28e   : > { %9558 = vmatprep.mubr.bf16.mxu0 %v11581_v6 }
 0x28f   : > { %3174 = vmatmul.mubr.bf16.gmra.mrb[164].mxu1 %v11424_v27 }
 0x290   : > { %v11804_v0 = vpop.f32.mrb[44].mxu0  ;;  %3793 = vmatprep.mubr.bf16.mxu1 %v11475_v25 }
 0x291   : > { %14458 = vst [vmem:[#allocation83_spill] sm:$0xff] %v11804_v0  ;;  %v2295_v54 = vpop.f32.mrb[45].mxu0 }
 0x292   : > { %v11806_v46 = vpop.f32.mrb[46].mxu0  ;;  %v11810_v1 = vpop.f32.mrb[60].mxu1  ;;  %v3472_v54 = vld [vmem:[#allocation2 + $0x60] sm:$0xff] }
 0x293   : > { %14459 = vst [vmem:[#allocation84_spill] sm:$0xff] %v11806_v46  ;;  %v2298_v57 = vpop.f32.mrb[47].mxu0  ;;  %v2969_v6 = vpop.f32.mrb[61].mxu1 }
 0x294   : > { %v11813_v8 = vpop.f32.mrb[62].mxu1 }
 0x295   : > { %9559 = vmatmul.mubr.bf16.vlgmr.msra.gmra.mrb[152].mxu0 %v1743_v42  ;;  %v2972_v0 = vpop.f32.mrb[63].mxu1 }
 0x296   : > { %9623 = vmatpush3.bf16.msra.mxu0 %v9987_v12  ;;  %9562 = vmatprep.mubr.bf16.mxu0 %v11469_v26  ;;  %v9990_v26 = vld [vmem:[#allocation9 + $0x218] sm:$0xff]  }
 0x297   : > { %9624 = vmatprep.subr.bf16.mxu0 %v9988_v53  ;;  %3794 = vmatmul.mubr.bf16.vlgmr.msra.gmra.mrb[168].mxu1 %v3472_v54 }
 0x298   : > { %v2301_v46 = vpop.f32.mrb[48].mxu0  ;;  %3801 = vmatprep.mubr.bf16.mxu1 %v11437_v35 }
 0x299   : > { %v11816_v27 = vadd.f32 %v11589_v63, %v2301_v46  ;;  %v2303_v57 = vpop.f32.mrb[49].mxu0  ;;  %v9991_v46 = vld [vmem:[#allocation9 + $0x220] sm:$0xff]  }
 0x29a   : > { %v2304_v3 = vpop.f32.mrb[50].mxu0  ;;  %9625 = vmatpush3.bf16.msra.mxu0 %v9988_v53  ;;  %v11823_v42 = vpop.f32.mrb[64].mxu1  ;;  %v3475_v53 = vld [vmem:[#allocation2 + $0x78] sm:$0xff] }
 0x29b   : > { %v11819_v25 = vadd.f32 %v11593_v30, %v2304_v3  ;;  %v2306_v12 = vpop.f32.mrb[51].mxu0  ;;  %9626 = vmatprep.subr.bf16.mxu0 %v9989_v15  ;;  %v2977_v63 = vpop.f32.mrb[65].mxu1 }
 0x29c   : > { %v11826_v0 = vpop.f32.mrb[66].mxu1  ;;  %v9993_v12 = vld [vmem:[#allocation9 + $0x230] sm:$0xff]  }
 0x29d   : > { %9563 = vmatmul.mubr.bf16.gmra.mrb[156].mxu0 %v11720_v56  ;;  %v2980_v3 = vpop.f32.mrb[67].mxu1  ;;  %v3478_v63 = vld [vmem:[#allocation2 + $0x90] sm:$0xff] }
 0x29e   : > { %9566 = vmatprep.mubr.bf16.mxu0 %v11492_v18  ;;  %9627 = vmatpush3.bf16.msra.mxu0 %v9989_v15  ;;  %v9992_v15 = vld [vmem:[#allocation9 + $0x228] sm:$0xff]  }
 0x29f   : > { %9628 = vmatprep.subr.bf16.mxu0 %v9990_v26  ;;  %3802 = vmatmul.mubr.bf16.gmra.mrb[172].mxu1 %v3475_v53 }
 0x2a0   : > { %v2309_v30 = vpop.f32.mrb[52].mxu0  ;;  %3809 = vmatprep.mubr.bf16.mxu1 %v11495_v4 }
 0x2a1   : > { %v11829_v6 = vadd.f32 %v11586_v14, %v2309_v30  ;;  %v2311_v54 = vpop.f32.mrb[53].mxu0 }
 0x2a2   : > { %v2312_v35 = vpop.f32.mrb[54].mxu0  ;;  %9629 = vmatpush3.bf16.msra.mxu0 %v9990_v26  ;;  %v11836_v57 = vpop.f32.mrb[68].mxu1 }
 0x2a3   : > { %v11832_v56 = vadd.f32 %v11591_v45, %v2312_v35  ;;  %v2314_v18 = vpop.f32.mrb[55].mxu0  ;;  %9630 = vmatprep.subr.bf16.mxu0 %v9991_v46  ;;  %v2985_v14 = vpop.f32.mrb[69].mxu1 }
 0x2a4   : > { %v11839_v26 = vpop.f32.mrb[70].mxu1  ;;  %v3481_v18 = vld [vmem:[#allocation2 + $0xa8] sm:$0xff] }
 0x2a5   : > { %9567 = vmatmul.mubr.bf16.gmra.mrb[160].mxu0 %v11738_v39  ;;  %v2988_v53 = vpop.f32.mrb[71].mxu1 }
 0x2a6   : > { %9570 = vmatprep.mubr.bf16.mxu0 %v11514_v2  ;;  %9631 = vmatpush3.bf16.msra.mxu0 %v9991_v46  ;;  %v9994_v46 = vld [vmem:[#allocation9 + $0x238] sm:$0xff]  }
 0x2a7   : > { %9632 = vmatprep.subr.bf16.mxu0 %v9992_v15  ;;  %3810 = vmatmul.mubr.bf16.gmra.mrb[176].mxu1 %v3478_v63 }
 0x2a8   : > { %v2317_v45 = vpop.f32.mrb[56].mxu0  ;;  %3817 = vmatprep.mubr.bf16.mxu1 %v11457_v36 }
 0x2a9   : > { %v11842_v30 = vadd.f32 %v11603_v5, %v2317_v45  ;;  %v2319_v3 = vpop.f32.mrb[57].mxu0 }
 0x2aa   : > { %v2320_v4 = vpop.f32.mrb[58].mxu0  ;;  %9633 = vmatpush3.bf16.msra.mxu0 %v9992_v15  ;;  %v11849_v54 = vpop.f32.mrb[72].mxu1 }
 0x2ab   : > { %v11845_v39 = vadd.f32 %v11607_v23, %v2320_v4  ;;  %v2322_v2 = vpop.f32.mrb[59].mxu0  ;;  %9634 = vmatprep.subr.bf16.mxu0 %v9993_v12  ;;  %14460 = vst [vmem:[#allocation85_spill] sm:$0xff] %v11849_v54  ;;  %v2993_v5 = vpop.f32.mrb[73].mxu1 }
 0x2ac   : > { %v11852_v35 = vpop.f32.mrb[74].mxu1 }
 0x2ad   : > { %9571 = vmatmul.mubr.bf16.gmra.mrb[164].mxu0 %v11752_v20  ;;  %14461 = vst [vmem:[#allocation86_spill] sm:$0xff] %v11852_v35  ;;  %v2996_v23 = vpop.f32.mrb[75].mxu1  ;;  %v12004_v35 = vld [vmem:[#allocation2 + $0x268] sm:$0xff] }
 0x2ae   : > { %9574 = vmatprep.mubr.bf16.mxu0 %v11535_v41  ;;  %9635 = vmatpush3.bf16.msra.mxu0 %v9993_v12 }
 0x2af   : > { %9636 = vmatprep.subr.bf16.mxu0 %v9994_v46  ;;  %3818 = vmatmul.mubr.bf16.gmra.mrb[180].mxu1 %v3481_v18 }
 0x2b0   : > { %v2325_v15 = vpop.f32.mrb[60].mxu0  ;;  %3825 = vmatprep.mubr.bf16.mxu1 %v11519_v34 }
 0x2b1   : > { %v11855_v14 = vadd.f32 %v11600_v13, %v2325_v15  ;;  %v2327_v63 = vpop.f32.mrb[61].mxu0  ;;  %v3484_v13 = vld [vmem:[#allocation2 + $0xc0] sm:$0xff] }
 0x2b2   : > { %v2328_v45 = vpop.f32.mrb[62].mxu0  ;;  %9637 = vmatpush3.bf16.msra.mxu0 %v9994_v46  ;;  %v11862_v41 = vpop.f32.mrb[76].mxu1 }
 0x2b3   : > { %v11858_v36 = vadd.f32 %v11605_v9, %v2328_v45  ;;  %v2330_v20 = vpop.f32.mrb[63].mxu0  ;;  %v3001_v12 = vpop.f32.mrb[77].mxu1 }
 0x2b4   : > { %v11865_v53 = vpop.f32.mrb[78].mxu1  ;;  %v11886_v12 = vld [vmem:[#allocation2 + $0x160] sm:$0xff] }
 0x2b5   : > { %9575 = vmatmul.mubr.bf16.gmra.mrb[168].mxu0 %v11766_v49  ;;  %14462 = vst [vmem:[#allocation87_spill] sm:$0xff] %v11865_v53  ;;  %v3004_v4 = vpop.f32.mrb[79].mxu1 }
 0x2b6   : > { %9578 = vmatprep.mubr.bf16.mxu0 %v11553_v62 }
 0x2b7   : > { %3826 = vmatmul.mubr.bf16.gmra.mrb[184].mxu1 %v3484_v13 }
 0x2b8   : > { %v2333_v3 = vpop.f32.mrb[64].mxu0  ;;  %3833 = vmatprep.mubr.bf16.mxu1 %v11480_v31 }
 0x2b9   : > { %v11868_v2 = vadd.f32 %v11615_v24, %v2333_v3  ;;  %v2335_v9 = vpop.f32.mrb[65].mxu0  ;;  %v3487_v24 = vld [vmem:[#allocation2 + $0xd8] sm:$0xff]  ;;  %v3490_v3 = vld [vmem:[#allocation2 + $0xf0] sm:$0xff] }
 0x2ba   : > { %v2336_v46 = vpop.f32.mrb[66].mxu0  ;;  %v11875_v62 = vpop.f32.mrb[80].mxu1 }
 0x2bb   : > { %v11871_v34 = vadd.f32 %v11619_v44, %v2336_v46  ;;  %v2338_v49 = vpop.f32.mrb[67].mxu0  ;;  %14463 = vst [vmem:[#allocation88_spill] sm:$0xff] %v11875_v62  ;;  %v3009_v5 = vpop.f32.mrb[81].mxu1 }
 0x2bc   : > { %v11878_v18 = vpop.f32.mrb[82].mxu1  ;;  %v11898_v5 = vld [vmem:[#allocation2 + $0x178] sm:$0xff] }
 0x2bd   : > { %9579 = vmatmul.mubr.bf16.gmra.mrb[172].mxu0 %v11780_v50  ;;  %14464 = vst [vmem:[#allocation89_spill] sm:$0xff] %v11878_v18  ;;  %v3012_v23 = vpop.f32.mrb[83].mxu1  ;;  %v11955_v18 = vld [vmem:[#allocation2 + $0x208] sm:$0xff] }
 0x2be   : > { %9582 = vmatprep.mubr.bf16.mxu0 %v11569_v11  ;;  %v14467_v23 = vld [vmem:[#allocation40_spill] sm:$0xff] }
 0x2bf   : > { %3834 = vmatmul.mubr.bf16.gmra.mrb[188].mxu1 %v3487_v24 }
 0x2c0   : > { %v2341_v15 = vpop.f32.mrb[68].mxu0  ;;  %3841 = vmatprep.mubr.bf16.mxu1 %v11538_v55 }
 0x2c1   : > { %v11881_v63 = vadd.f32 %v11612_v59, %v2341_v15  ;;  %v2343_v44 = vpop.f32.mrb[69].mxu0  ;;  %v11903_v15 = vld [vmem:[#allocation2 + $0x190] sm:$0xff] }
 0x2c2   : > { %v2344_v45 = vpop.f32.mrb[70].mxu0  ;;  %v11890_v11 = vpop.f32.mrb[84].mxu1 }
 0x2c3   : > { %v11884_v31 = vadd.f32 %v11617_v37, %v2344_v45  ;;  %v2346_v20 = vpop.f32.mrb[71].mxu0  ;;  %14465 = vst [vmem:[#allocation90_spill] sm:$0xff] %v11890_v11  ;;  %v3017_v13 = vpop.f32.mrb[85].mxu1 }
 0x2c4   : > { %v11893_v59 = vpop.f32.mrb[86].mxu1  ;;  %v3493_v13 = vld [vmem:[#allocation2 + $0x108] sm:$0xff] }
 0x2c5   : > { %9583 = vmatmul.mubr.bf16.gmra.mrb[176].mxu0 %v11794_v17  ;;  %14466 = vst [vmem:[#allocation91_spill] sm:$0xff] %v11893_v59  ;;  %v3020_v9 = vpop.f32.mrb[87].mxu1  ;;  %v14477_v59 = vld [vmem:[#allocation45_spill] sm:$0xff] }
 0x2c6   : > { %9586 = vmatprep.mubr.bf16.mxu0 %v11886_v12 }
 0x2c7   : > { %3842 = vmatmul.mubr.bf16.gmra.mrb[192].mxu1 %v3490_v3 }
 0x2c8   : > { %v2349_v4 = vpop.f32.mrb[72].mxu0  ;;  %3849 = vmatprep.mubr.bf16.mxu1 %v14467_v23 }
 0x2c9   : > { %v11896_v37 = vadd.f32 %v11629_v61, %v2349_v4  ;;  %v2351_v46 = vpop.f32.mrb[73].mxu0 }
 0x2ca   : > { %v2352_v49 = vpop.f32.mrb[74].mxu0  ;;  %v3023_v44 = vpop.f32.mrb[88].mxu1 }
 0x2cb   : > { %v11901_v55 = vadd.f32 %v11635_v10, %v2352_v49  ;;  %v2354_v24 = vpop.f32.mrb[75].mxu0  ;;  %v11909_v61 = vadd.f32 %v3023_v44, %v11816_v27  ;;  %v3025_v45 = vpop.f32.mrb[89].mxu1  ;;  %v11922_v44 = vld [vmem:[#allocation2 + $0x1c0] sm:$0xff] }
 0x2cc   : > { %v3026_v20 = vpop.f32.mrb[90].mxu1  ;;  %v11917_v24 = vld [vmem:[#allocation2 + $0x1a8] sm:$0xff] }
 0x2cd   : > { %9587 = vmatmul.mubr.bf16.gmra.mrb[180].mxu0 %v11898_v5  ;;  %14468 = vst [vmem:[#allocation40_spill] sm:$0xff] %v11909_v61  ;;  %v11912_v10 = vadd.f32 %v3026_v20, %v11819_v25  ;;  %v3028_v4 = vpop.f32.mrb[91].mxu1 }
 0x2ce   : > { %9590 = vmatprep.mubr.bf16.mxu0 %v11903_v15 }
 0x2cf   : > { %14469 = vst [vmem:[#allocation92_spill] sm:$0xff] %v11912_v10  ;;  %3850 = vmatmul.mubr.bf16.gmra.mrb[196].mxu1 %v3493_v13  ;;  %v14472_v10 = vld [vmem:[#allocation47_spill] sm:$0xff] }
 0x2d0   : > { %v2357_v3 = vpop.f32.mrb[76].mxu0  ;;  %3857 = vmatprep.mubr.bf16.mxu1 %v11558_v51 }
 0x2d1   : > { %v11915_v9 = vadd.f32 %v11626_v40, %v2357_v3  ;;  %v2359_v46 = vpop.f32.mrb[77].mxu0  ;;  %v3496_v3 = vld [vmem:[#allocation2 + $0x120] sm:$0xff] }
 0x2d2   : > { %v2360_v49 = vpop.f32.mrb[78].mxu0  ;;  %v3031_v25 = vpop.f32.mrb[92].mxu1 }
 0x2d3   : > { %v11920_v23 = vadd.f32 %v11631_v22, %v2360_v49  ;;  %v2362_v27 = vpop.f32.mrb[79].mxu0  ;;  %v11928_v40 = vadd.f32 %v3031_v25, %v11829_v6  ;;  %v3033_v45 = vpop.f32.mrb[93].mxu1  ;;  %v11941_v25 = vld [vmem:[#allocation2 + $0x1f0] sm:$0xff] }
 0x2d4   : > { %v3034_v20 = vpop.f32.mrb[94].mxu1  ;;  %v11936_v27 = vld [vmem:[#allocation2 + $0x1d8] sm:$0xff]  ;;  %v14473_v45 = vld [vmem:[#allocation41_spill] sm:$0xff] }
 0x2d5   : > { %9591 = vmatmul.mubr.bf16.gmra.mrb[184].mxu0 %v11917_v24  ;;  %14470 = vst [vmem:[#allocation93_spill] sm:$0xff] %v11928_v40  ;;  %v11931_v22 = vadd.f32 %v3034_v20, %v11832_v56  ;;  %v3036_v4 = vpop.f32.mrb[95].mxu1 }
 0x2d6   : > { %9594 = vmatprep.mubr.bf16.mxu0 %v11922_v44  ;;  %v3499_v4 = vld [vmem:[#allocation2 + $0x138] sm:$0xff] }
 0x2d7   : > { %14471 = vst [vmem:[#allocation94_spill] sm:$0xff] %v11931_v22  ;;  %3858 = vmatmul.mubr.bf16.gmra.mrb[200].mxu1 %v3496_v3  ;;  %v3503_v22 = vld [vmem:[#allocation2 + $0x158] sm:$0xff] }
 0x2d8   : > { %v2365_v13 = vpop.f32.mrb[80].mxu0  ;;  %3865 = vmatprep.mubr.bf16.mxu1 %v14473_v45 }
 0x2d9   : > { %v11934_v46 = vadd.f32 %v11645_v28, %v2365_v13  ;;  %v2367_v51 = vpop.f32.mrb[81].mxu0 }
 0x2da   : > { %v2368_v49 = vpop.f32.mrb[82].mxu0  ;;  %v3039_v56 = vpop.f32.mrb[96].mxu1 }
 0x2db   : > { %v11939_v61 = vadd.f32 %v14472_v10, %v2368_v49  ;;  %v2370_v6 = vpop.f32.mrb[83].mxu0  ;;  %v11947_v28 = vadd.f32 %v3039_v56, %v11842_v30  ;;  %v3041_v20 = vpop.f32.mrb[97].mxu1  ;;  %v14476_v49 = vld [vmem:[#allocation44_spill] sm:$0xff] }
 0x2dc   : > { %v3042_v13 = vpop.f32.mrb[98].mxu1  ;;  %v11960_v20 = vld [vmem:[#allocation2 + $0x220] sm:$0xff] }
 0x2dd   : > { %9595 = vmatmul.mubr.bf16.gmra.mrb[188].mxu0 %v11936_v27  ;;  %14474 = vst [vmem:[#allocation47_spill] sm:$0xff] %v11947_v28  ;;  %v11950_v10 = vadd.f32 %v3042_v13, %v11845_v39  ;;  %v3044_v51 = vpop.f32.mrb[99].mxu1  ;;  %v11973_v28 = vld [vmem:[#allocation2 + $0x238] sm:$0xff] }
 0x2de   : > { %9598 = vmatprep.mubr.bf16.mxu0 %v11941_v25  ;;  %14480 = vst [vmem:[#allocation95_spill] sm:$0xff] %v11973_v28 }
 0x2df   : > { %14475 = vst [vmem:[#allocation41_spill] sm:$0xff] %v11950_v10  ;;  %3866 = vmatmul.mubr.bf16.gmra.mrb[204].mxu1 %v3499_v4 }
 0x2e0   : > { %v2373_v3 = vpop.f32.mrb[84].mxu0  ;;  %3873 = vmatprep.mubr.bf16.mxu1 %v3503_v22 }
 0x2e1   : > { %v11953_v6 = vadd.f32 %v14476_v49, %v2373_v3  ;;  %v2375_v45 = vpop.f32.mrb[85].mxu0  ;;  %v3502_v49 = vld [vmem:[#allocation2 + $0x150] sm:$0xff] }
 0x2e2   : > { %v2376_v40 = vpop.f32.mrb[86].mxu0  ;;  %v3047_v39 = vpop.f32.mrb[100].mxu1 }
 0x2e3   : > { %v11958_v30 = vadd.f32 %v14477_v59, %v2376_v40  ;;  %v2378_v56 = vpop.f32.mrb[87].mxu0  ;;  %v11965_v13 = vadd.f32 %v3047_v39, %v11855_v14  ;;  %v3049_v3 = vpop.f32.mrb[101].mxu1 }
 0x2e4   : > { %v3050_v51 = vpop.f32.mrb[102].mxu1  ;;  %v3506_v56 = vld [vmem:[#allocation2 + $0x170] sm:$0xff] }
 0x2e5   : > { %9599 = vmatmul.mubr.bf16.gmra.mrb[192].mxu0 %v11955_v18  ;;  %14478 = vst [vmem:[#allocation44_spill] sm:$0xff] %v11965_v13  ;;  %v11968_v59 = vadd.f32 %v3050_v51, %v11858_v36  ;;  %v3052_v40 = vpop.f32.mrb[103].mxu1  ;;  %v11979_v3 = vld [vmem:[#allocation2 + $0x250] sm:$0xff]  ;;  %v467_v36 = vstv %s466_s22 }
 0x2e6   : > { %9602 = vmatprep.mubr.bf16.mxu0 %v11960_v20  ;;  %14481 = vst [vmem:[#allocation96_spill] sm:$0xff] %v11979_v3  ;;  %v453_v40 = vld [vmem:[%s10830_s2] sm:$0xf]  ;;  %vm11988_vm12 = vcmp.eq.s32.totalorder %v467_v36, 1 }
 0x2e7   : > { %14479 = vst [vmem:[#allocation45_spill] sm:$0xff] %v11968_v59  ;;  %3874 = vmatmul.mubr.bf16.gmra.mrb[208].mxu1 %v3502_v49  ;;  %v454_v49 = vld [vmem:[%s10830_s2 + $0x4] sm:$0xf] }
 0x2e8   : > { %v2381_v4 = vpop.f32.mrb[88].mxu0  ;;  %3881 = vmatprep.mubr.bf16.mxu1 %v3506_v56  ;;  %v470_v59 = vsel %vm11988_vm12, 0, %v454_v49 }
 0x2e9   : > { %v11971_v45 = vadd.f32 %v11663_v47, %v2381_v4  ;;  %v2383_v22 = vpop.f32.mrb[89].mxu0 }
 0x2ea   : > { %v2384_v10 = vpop.f32.mrb[90].mxu0  ;;  %v3055_v47 = vpop.f32.mrb[104].mxu1  ;;  %v3505_v22 = vld [vmem:[#allocation2 + $0x168] sm:$0xff] }
 0x2eb   : > { %v11977_v14 = vadd.f32 %v11669_v19, %v2384_v10  ;;  %v2386_v39 = vpop.f32.mrb[91].mxu0  ;;  %v11984_v51 = vadd.f32 %v3055_v47, %v11868_v2  ;;  %v3057_v4 = vpop.f32.mrb[105].mxu1  ;;  %v14486_v47 = vld [vmem:[#allocation49_spill] sm:$0xff]  ;;  %v3512_v19 = vld [vmem:[#allocation2 + $0x1a0] sm:$0xff] }
 0x2ec   : > { %v3058_v10 = vpop.f32.mrb[106].mxu1  ;;  %v469_v39 = vsel %vm11988_vm12, 0, %v453_v40  ;;  %14487 = vst [vmem:[#allocation49_spill] sm:$0xff] %v12004_v35  ;;  %v14488_v40 = vld [vmem:[#allocation50_spill] sm:$0xff] }
 0x2ed   : > { %9603 = vmatmul.mubr.bf16.gmra.mrb[196].mxu0 %v11973_v28  ;;  %14482 = vst [vmem:[#allocation97_spill] sm:$0xff] %v11984_v51  ;;  %v11997_v13 = vadd.f32 %v3058_v10, %v11871_v34  ;;  %v3060_v2 = vpop.f32.mrb[107].mxu1  ;;  %v3509_v51 = vld [vmem:[#allocation2 + $0x188] sm:$0xff]  ;;  %v12002_v62 = vcombine.low %v469_v39, %v470_v59  ;;  %v12009_v34 = vld [vmem:[#allocation2 + $0x280] sm:$0xff]  ;;  %v3515_v28 = vld [vmem:[#allocation2 + $0x1b8] sm:$0xff] }
 0x2ee   : > { %9606 = vmatprep.mubr.bf16.mxu0 %v11979_v3  ;;  %14489 = vst [vmem:[#allocation50_spill] sm:$0xff] %v12009_v34 }
 0x2ef   : > { %14485 = vst [vmem:[#allocation98_spill] sm:$0xff] %v11997_v13  ;;  %3882 = vmatmul.mubr.bf16.gmra.mrb[212].mxu1 %v3505_v22  ;;  %v14321_v10 = vshrl.u32 %v12002_v62, 16  ;;  %v14324_v59 = vshll.u32 %v12002_v62, 16  ;;  %v455_v22 = vld [vmem:[%s10830_s2 + $0x8] sm:$0xf] }
 0x2f0   : > { %v2389_v56 = vpop.f32.mrb[92].mxu0  ;;  %3889 = vmatprep.mubr.bf16.mxu1 %v3509_v51  ;;  %v471_v51 = vsel %vm11988_vm12, 0, %v455_v22 }
 0x2f1   : > { %v12000_v4 = vadd.f32 %v14486_v47, %v2389_v56  ;;  %v2391_v36 = vpop.f32.mrb[93].mxu0  ;;  %v12015_v56 = vrot.slane %v14321_v10, 7  ;;  %v3508_v10 = vld [vmem:[#allocation2 + $0x180] sm:$0xff] }
 0x2f2   : > { %v2392_v11 = vpop.f32.mrb[94].mxu0  ;;  %v3063_v39 = vpop.f32.mrb[108].mxu1 }
 0x2f3   : > { %v12007_v3 = vadd.f32 %v14488_v40, %v2392_v11  ;;  %v2394_v49 = vpop.f32.mrb[95].mxu0  ;;  %v456_v11 = vld [vmem:[%s10830_s2 + $0xc] sm:$0xf]  ;;  %v12022_v2 = vadd.f32 %v3063_v39, %v11881_v63  ;;  %v3065_v47 = vpop.f32.mrb[109].mxu1  ;;  %v1089_v40 = vor.u32 %v14324_v59, %v12015_v56  ;;  %s10199_s2 = scalar_lea.vmem %s10198_s6, 2048 }
 0x2f4   : > { %v472_v36 = vsel %vm11988_vm12, 0, %v456_v11  ;;  %v3066_v49 = vpop.f32.mrb[110].mxu1  ;;  %v12041_v59 = vld [vmem:[#allocation2 + $0x298] sm:$0xff]  ;;  %p10201_p7 = scmp.lt.s32.totalorder %s10199_s2, %s10193_s4 }
 0x2f5   : > { %9607 = vmatmul.mubr.bf16.gmra.mrb[200].mxu0 %v12004_v35  ;;  %14490 = vst [vmem:[#allocation99_spill] sm:$0xff] %v12022_v2  ;;  %v1205_v35 = vld [vmem:[#allocation2 + $0x330] sm:$0xff]  ;;  %v12034_v63 = vadd.f32 %v3066_v49, %v11884_v31  ;;  %v3068_v39 = vpop.f32.mrb[111].mxu1  ;;  %14493 = vst [vmem:[#allocation38_spill] sm:$0xff] %v12041_v59 }
 0x2f6   : > { %9610 = vmatprep.mubr.bf16.mxu0 %v12009_v34  ;;  %v12031_v34 = vcombine.low %v471_v51, %v472_v36  ;;  %v1206_v2 = vsel %vm10943_vm8, %v1089_v40, %v1205_v35  ;;  %v12047_v49 = vld [vmem:[#allocation2 + $0x2b0] sm:$0xff]  ;;  %v3511_v39 = vld [vmem:[#allocation2 + $0x198] sm:$0xff]  ;;  %p10202_p6 = por %p10201_p7, %p10200_p9 }
 0x2f7   : > { %14491 = vst [vmem:[#allocation100_spill] sm:$0xff] %v12034_v63  ;;  %1207 = vst [vmem:[#allocation2 + $0x330] sm:$0xff] %v1206_v2  ;;  %3890 = vmatmul.mubr.bf16.gmra.mrb[216].mxu1 %v3508_v10  ;;  %v1678_v2 = vld [vmem:[#allocation2 + $0x358] sm:$0xff]  ;;  %v14498_v63 = vld [vmem:[#allocation53_spill] sm:$0xff] }
 0x2f8   : > { %v2397_v13 = vpop.f32.mrb[96].mxu0  ;;  %v14325_v51 = vshll.u32 %v12031_v34, 16  ;;  %14494 = vst [vmem:[#allocation101_spill] sm:$0xff] %v12047_v49  ;;  %3897 = vmatprep.mubr.bf16.mxu1 %v3512_v19  ;;  %v1569_v35 = vshrl.u32 %v12031_v34, 16  ;;  %v14500_v19 = vld [vmem:[#allocation54_spill] sm:$0xff]  ;;  %p10203_p13 = pnand %p10202_p6, %p10196_p2 }
 0x2f9   : > { %v12037_v47 = vadd.f32 %v11679_v58, %v2397_v13  ;;  %v2399_v22 = vpop.f32.mrb[97].mxu0 }
 0x2fa   : > { %v2400_v53 = vpop.f32.mrb[98].mxu0  ;;  %v12051_v58 = vrot.slane %v14325_v51, 1  ;;  %v3071_v13 = vpop.f32.mrb[112].mxu1 }
 0x2fb   : > { %v12045_v36 = vadd.f32 %v11685_v33, %v2400_v53  ;;  %v2402_v31 = vpop.f32.mrb[99].mxu0  ;;  %v12058_v33 = vadd.f32 %v3071_v13, %v11896_v37  ;;  %v3073_v53 = vpop.f32.mrb[113].mxu1  ;;  %v12068_v13 = vld [vmem:[#allocation2 + $0x2c8] sm:$0xff] }
 0x2fc   : > { %v1571_v10 = vor.u32 %v1569_v35, %v12051_v58  ;;  %v3074_v40 = vpop.f32.mrb[114].mxu1  ;;  %v3518_v53 = vld [vmem:[#allocation2 + $0x1d0] sm:$0xff] }
 0x2fd   : > { %9611 = vmatmul.mubr.bf16.gmra.mrb[204].mxu0 %v12041_v59  ;;  %14495 = vst [vmem:[#allocation102_spill] sm:$0xff] %v12058_v33  ;;  %v12063_v31 = vadd.f32 %v3074_v40, %v11901_v55  ;;  %v3076_v51 = vpop.f32.mrb[115].mxu1 }
 0x2fe   : > { %9614 = vmatprep.mubr.bf16.mxu0 %v12047_v49  ;;  %v1679_v11 = vsel %vm10875_vm2, %v1571_v10, %v1678_v2  ;;  %v1262_v54 = vld [vmem:[#allocation2 + $0x330] sm:$0x1]  ;;  %v12075_v2 = vld [vmem:[#allocation2 + $0x2e0] sm:$0xff]  ;;  %vm8586_vm2 = vcmask 1045509  }
 0x2ff   : > { %14497 = vst [vmem:[#allocation36_spill] sm:$0xff] %v12063_v31  ;;  %1680 = vst [vmem:[#allocation2 + $0x358] sm:$0xff] %v1679_v11  ;;  %v1263_v33 = vsel %vm10973_vm10, 0, %v1262_v54  ;;  %3898 = vmatmul.mubr.bf16.gmra.mrb[220].mxu1 %v3511_v39  ;;  %v3514_v54 = vld [vmem:[#allocation2 + $0x1b0] sm:$0xff] }
 0x300   : > { %v2405_v22 = vpop.f32.mrb[100].mxu0  ;;  %1264 = vst [vmem:[#allocation2 + $0x330] sm:$0x1] %v1263_v33  ;;  %3905 = vmatprep.mubr.bf16.mxu1 %v3515_v28 }
 0x301   : > { %v12066_v59 = vadd.f32 %v14498_v63, %v2405_v22  ;;  %v2407_v49 = vpop.f32.mrb[101].mxu0 }
 0x302   : > { %v2408_v37 = vpop.f32.mrb[102].mxu0  ;;  %v3079_v63 = vpop.f32.mrb[116].mxu1 }
 0x303   : > { %v12073_v10 = vadd.f32 %v14500_v19, %v2408_v37  ;;  %v2410_v55 = vpop.f32.mrb[103].mxu0  ;;  %v12080_v51 = vadd.f32 %v3079_v63, %v11915_v9  ;;  %v3081_v49 = vpop.f32.mrb[117].mxu1  ;;  %v12090_v9 = vld [vmem:[#allocation2 + $0x2f8] sm:$0xff] }
 0x304   : > { %v3082_v40 = vpop.f32.mrb[118].mxu1 }
 0x305   : > { %9615 = vmatmul.mubr.bf16.gmra.mrb[208].mxu0 %v12068_v13  ;;  %v12083_v11 = vadd.f32 %v3082_v40, %v11920_v23  ;;  %v3084_v37 = vpop.f32.mrb[119].mxu1  ;;  %v3474_v23 = vld [vmem:[#allocation2 + $0x70] sm:$0xff]  ;;  %v14503_v40 = vshll.u32 %v12002_v62, 16 }
 0x306   : > { %9618 = vmatprep.mubr.bf16.mxu0 %v12075_v2  ;;  %v1735_v22 = vld [vmem:[#allocation2 + $0x358] sm:$0x80] }
 0x307   : > { %14501 = vst [vmem:[#allocation53_spill] sm:$0xff] %v12083_v11  ;;  %v1736_v55 = vsel %vm10898_vm5, 0, %v1735_v22  ;;  %3906 = vmatmul.mubr.bf16.gmra.mrb[224].mxu1 %v3514_v54  ;;  %v14504_v22 = vshrl.u32 %v12002_v62, 16 }
 0x308   : > { %v2413_v39 = vpop.f32.mrb[104].mxu0  ;;  %1737 = vst [vmem:[#allocation2 + $0x358] sm:$0x80] %v1736_v55  ;;  %3913 = vmatprep.mubr.bf16.mxu1 %v3518_v53 }
 0x309   : > { %v12086_v33 = vadd.f32 %v11694_v32, %v2413_v39  ;;  %v2415_v28 = vpop.f32.mrb[105].mxu0  ;;  %v1562_v32 = vrot.slane %v14503_v40, 1 }
 0x30a   : > { %v2416_v31 = vpop.f32.mrb[106].mxu0  ;;  %v3087_v39 = vpop.f32.mrb[120].mxu1  ;;  %v1093_v28 = vrot.slane %v1569_v35, 7 }
 0x30b   : > { %v12093_v63 = vadd.f32 %v11700_v7, %v2416_v31  ;;  %v2418_v49 = vpop.f32.mrb[107].mxu0  ;;  %v1563_v37 = vor.u32 %v1562_v32, %v14504_v22  ;;  %v12101_v19 = vadd.f32 %v3087_v39, %v11934_v46  ;;  %v3089_v54 = vpop.f32.mrb[121].mxu1  ;;  %v3517_v31 = vld [vmem:[#allocation2 + $0x1c8] sm:$0xff] }
 0x30c   : > { %v3090_v7 = vpop.f32.mrb[122].mxu1  ;;  %v14505_v49 = vshll.u32 %v12031_v34, 16  ;;  %v3521_v32 = vld [vmem:[#allocation2 + $0x1e8] sm:$0xff] }
 0x30d   : > { %9619 = vmatmul.mubr.bf16.gmra.mrb[212].mxu0 %v12090_v9  ;;  %v12105_v53 = vsel %vm1301_vm0, %v1563_v37, %v12051_v58  ;;  %v3092_v11 = vpop.f32.mrb[123].mxu1  ;;  %v3477_v22 = vld [vmem:[#allocation2 + $0x88] sm:$0xff]  ;;  %vm8582_vm0 = vcmask 1043459  }
 0x30e   : > { %9638 = vmatprep.mubr.bf16.mxu0 %v3474_v23  ;;  %v1096_v40 = vor.u32 %v14505_v49, %v1093_v28  ;;  %v12110_v23 = vadd.f32 %v3090_v7, %v11939_v61  ;;  %v3480_v28 = vld [vmem:[#allocation2 + $0xa0] sm:$0xff] }
 0x30f   : > { %3914 = vmatmul.mubr.bf16.gmra.mrb[228].mxu1 %v3517_v31 }
 0x310   : > { %v2421_v55 = vpop.f32.mrb[108].mxu0  ;;  %14506 = vst [vmem:[#allocation39_spill] sm:$0xff] %v12110_v23  ;;  %v12117_v54 = vsel %vm827_vm7, %v12015_v56, %v1096_v40  ;;  %3921 = vmatprep.mubr.bf16.mxu1 %v3521_v32 }
 0x311   : > { %v12113_v35 = vadd.f32 %v11691_v60, %v2421_v55  ;;  %v2423_v46 = vpop.f32.mrb[109].mxu0  ;;  %v3520_v55 = vld [vmem:[#allocation2 + $0x1e0] sm:$0xff] }
 0x312   : > { %v2424_v39 = vpop.f32.mrb[110].mxu0  ;;  %v3095_v61 = vpop.f32.mrb[124].mxu1  ;;  %v3524_v46 = vld [vmem:[#allocation2 + $0x200] sm:$0xff] }
 0x313   : > { %v12120_v58 = vadd.f32 %v11696_v21, %v2424_v39  ;;  %v2426_v37 = vpop.f32.mrb[111].mxu0  ;;  %v12123_v60 = vadd.f32 %v3095_v61, %v11953_v6  ;;  %v3097_v11 = vpop.f32.mrb[125].mxu1  ;;  %v3483_v39 = vld [vmem:[#allocation2 + $0xb8] sm:$0xff] }
 0x314   : > { %v3098_v7 = vpop.f32.mrb[126].mxu1 }
 0x315   : > { %9639 = vmatmul.mubr.bf16.vlgmr.msra.gmra.mrb[216].mxu0 %v3477_v22  ;;  %v12126_v56 = vadd.f32 %v3098_v7, %v11958_v30  ;;  %v3100_v31 = vpop.f32.mrb[127].mxu1  ;;  %v14507_v22 = vld [vmem:[#allocation62_spill] sm:$0xff] }
 0x316   : > { %9642 = vmatprep.mubr.bf16.mxu0 %v3480_v28  ;;  %v3486_v28 = vld [vmem:[#allocation2 + $0xd0] sm:$0xff]  ;;  %v3523_v7 = vld [vmem:[#allocation2 + $0x1f8] sm:$0xff] }
 0x317   : > { %3922 = vmatmul.mubr.bf16.gmra.mrb[232].mxu1 %v3520_v55 }
 0x318   : > { %v2429_v49 = vpop.f32.mrb[112].mxu0  ;;  %3929 = vmatprep.mubr.bf16.mxu1 %v3524_v46 }
 0x319   : > { %v12129_v21 = vadd.f32 %v11710_v16, %v2429_v49  ;;  %v2431_v40 = vpop.f32.mrb[113].mxu0 }
 0x31a   : > { %v2432_v32 = vpop.f32.mrb[114].mxu0  ;;  %v3103_v61 = vpop.f32.mrb[128].mxu1  ;;  %v14509_v40 = vld [vmem:[#allocation59_spill] sm:$0xff] }
 0x31b   : > { %v12132_v37 = vadd.f32 %v14507_v22, %v2432_v32  ;;  %v2434_v6 = vpop.f32.mrb[115].mxu0  ;;  %v12135_v30 = vadd.f32 %v3103_v61, %v11971_v45  ;;  %v3105_v11 = vpop.f32.mrb[129].mxu1 }
 0x31c   : > { %v3106_v16 = vpop.f32.mrb[130].mxu1  ;;  %v3527_v6 = vld [vmem:[#allocation2 + $0x218] sm:$0xff]  ;;  %v10007_v11 = vld [vmem:[#allocation2 + $0x100] sm:$0xff] }
 0x31d   : > { %9643 = vmatmul.mubr.bf16.gmra.mrb[220].mxu0 %v3483_v39  ;;  %v12138_v31 = vadd.f32 %v3106_v16, %v11977_v14  ;;  %v3108_v55 = vpop.f32.mrb[131].mxu1  ;;  %v3489_v39 = vld [vmem:[#allocation2 + $0xe8] sm:$0xff] }
 0x31e   : > { %9646 = vmatprep.mubr.bf16.mxu0 %v3486_v28  ;;  %v14510_v28 = vld [vmem:[#allocation60_spill] sm:$0xff]  ;;  %v3526_v55 = vld [vmem:[#allocation2 + $0x210] sm:$0xff] }
 0x31f   : > { %14508 = vst [vmem:[#allocation54_spill] sm:$0xff] %v12138_v31  ;;  %3930 = vmatmul.mubr.bf16.gmra.mrb[236].mxu1 %v3523_v7  ;;  %v14512_v31 = vld [vmem:[#allocation65_spill] sm:$0xff] }
 0x320   : > { %v2437_v49 = vpop.f32.mrb[116].mxu0  ;;  %3937 = vmatprep.mubr.bf16.mxu1 %v3527_v6  ;;  %v3530_v6 = vld [vmem:[#allocation2 + $0x230] sm:$0xff] }
 0x321   : > { %v12141_v32 = vadd.f32 %v14509_v40, %v2437_v49  ;;  %v2439_v22 = vpop.f32.mrb[117].mxu0 }
 0x322   : > { %v2440_v46 = vpop.f32.mrb[118].mxu0  ;;  %v3111_v61 = vpop.f32.mrb[132].mxu1 }
 0x323   : > { %v12144_v23 = vadd.f32 %v14510_v28, %v2440_v46  ;;  %v2442_v45 = vpop.f32.mrb[119].mxu0  ;;  %v12147_v14 = vadd.f32 %v3111_v61, %v12000_v4  ;;  %v3113_v16 = vpop.f32.mrb[133].mxu1 }
 0x324   : > { %v3114_v49 = vpop.f32.mrb[134].mxu1  ;;  %v14513_v45 = vld [vmem:[#allocation68_spill] sm:$0xff]  ;;  %v10008_v16 = vld [vmem:[#allocation2 + $0x130] sm:$0xff] }
 0x325   : > { %9647 = vmatmul.mubr.bf16.gmra.mrb[224].mxu0 %v3489_v39  ;;  %v12150_v22 = vadd.f32 %v3114_v49, %v12007_v3  ;;  %v3116_v7 = vpop.f32.mrb[135].mxu1 }
 0x326   : > { %9650 = vmatprep.mubr.bf16.mxu0 %v10007_v11 }
 0x327   : > { %14511 = vst [vmem:[#allocation37_spill] sm:$0xff] %v12150_v22  ;;  %3938 = vmatmul.mubr.bf16.gmra.mrb[240].mxu1 %v3526_v55  ;;  %v14517_v22 = vld [vmem:[#allocation66_spill] sm:$0xff] }
 0x328   : > { %v2445_v40 = vpop.f32.mrb[120].mxu0  ;;  %3945 = vmatprep.mubr.bf16.mxu1 %v3530_v6 }
 0x329   : > { %v12153_v46 = vadd.f32 %v14512_v31, %v2445_v40  ;;  %v2447_v28 = vpop.f32.mrb[121].mxu0  ;;  %v3529_v40 = vld [vmem:[#allocation2 + $0x228] sm:$0xff] }
 0x32a   : > { %v2448_v39 = vpop.f32.mrb[122].mxu0  ;;  %v3119_v61 = vpop.f32.mrb[136].mxu1 }
 0x32b   : > { %v12156_v11 = vadd.f32 %v14513_v45, %v2448_v39  ;;  %v2450_v4 = vpop.f32.mrb[123].mxu0  ;;  %v12160_v3 = vadd.f32 %v3119_v61, %v12037_v47  ;;  %v3121_v49 = vpop.f32.mrb[137].mxu1  ;;  %v14516_v39 = vld [vmem:[#allocation64_spill] sm:$0xff] }
 0x32c   : > { %v3122_v31 = vpop.f32.mrb[138].mxu1  ;;  %v3533_v4 = vld [vmem:[#allocation2 + $0x248] sm:$0xff] }
 0x32d   : > { %9651 = vmatmul.mubr.bf16.gmra.mrb[228].mxu0 %v11780_v50  ;;  %14514 = vst [vmem:[#allocation62_spill] sm:$0xff] %v12160_v3  ;;  %v12163_v28 = vadd.f32 %v3122_v31, %v12045_v36  ;;  %v3124_v55 = vpop.f32.mrb[139].mxu1 }
 0x32e   : > { %9654 = vmatprep.mubr.bf16.mxu0 %v10008_v16 }
 0x32f   : > { %14515 = vst [vmem:[#allocation59_spill] sm:$0xff] %v12163_v28  ;;  %3946 = vmatmul.mubr.bf16.gmra.mrb[244].mxu1 %v3529_v40 }
 0x330   : > { %v2453_v7 = vpop.f32.mrb[124].mxu0  ;;  %3953 = vmatprep.mubr.bf16.mxu1 %v3533_v4  ;;  %v3536_v4 = vld [vmem:[#allocation2 + $0x260] sm:$0xff] }
 0x331   : > { %v12166_v45 = vadd.f32 %v14516_v39, %v2453_v7  ;;  %v2455_v6 = vpop.f32.mrb[125].mxu0  ;;  %v3532_v7 = vld [vmem:[#allocation2 + $0x240] sm:$0xff] }
 0x332   : > { %v2456_v50 = vpop.f32.mrb[126].mxu0  ;;  %v3127_v61 = vpop.f32.mrb[140].mxu1 }
 0x333   : > { %v12169_v16 = vadd.f32 %v14517_v22, %v2456_v50  ;;  %v2458_v47 = vpop.f32.mrb[127].mxu0  ;;  %v12174_v36 = vadd.f32 %v3127_v61, %v12066_v59  ;;  %v3129_v49 = vpop.f32.mrb[141].mxu1  ;;  %v14519_v22 = vld [vmem:[#allocation46_spill] sm:$0xff] }
 0x334   : > { %v3130_v31 = vpop.f32.mrb[142].mxu1  ;;  %v14520_v47 = vld [vmem:[#allocation42_spill] sm:$0xff]  ;;  %v14522_v49 = vld [vmem:[#allocation43_spill] sm:$0xff] }
 0x335   : > { %9655 = vmatmul.mubr.bf16.gmra.mrb[232].mxu0 %v11794_v17  ;;  %14518 = vst [vmem:[#allocation60_spill] sm:$0xff] %v12174_v36  ;;  %v12177_v39 = vadd.f32 %v3130_v31, %v12073_v10  ;;  %v3132_v40 = vpop.f32.mrb[143].mxu1  ;;  %v14523_v10 = vld [vmem:[#allocation70_spill] sm:$0xff] }
 0x336   : > { %9658 = vmatprep.mubr.bf16.mxu0 %v11886_v12  ;;  %v14521_v12 = vld [vmem:[#allocation48_spill] sm:$0xff] }
 0x337   : > { %3954 = vmatmul.mubr.bf16.gmra.mrb[248].mxu1 %v3532_v7  ;;  %v14524_v7 = vld [vmem:[#allocation71_spill] sm:$0xff] }
 0x338   : > { %v9480_v55 = vpop.f32.mrb[128].mxu0  ;;  %3961 = vmatprep.mubr.bf16.mxu1 %v3536_v4 }
 0x339   : > { %v2503_v6 = vadd.f32 %v9480_v55, %v14519_v22  ;;  %v2494_v50 = vpop.f32.mrb[129].mxu0 }
 0x33a   : > { %v2495_v17 = vadd.f32 %v2494_v50, %v14520_v47  ;;  %v9481_v28 = vpop.f32.mrb[130].mxu0  ;;  %v3135_v40 = vpop.f32.mrb[144].mxu1  ;;  %v3535_v50 = vld [vmem:[#allocation2 + $0x258] sm:$0xff] }
 0x33b   : > { %v2506_v3 = vadd.f32 %v9481_v28, %v14521_v12  ;;  %v2497_v59 = vpop.f32.mrb[131].mxu0  ;;  %v12183_v61 = vadd.f32 %v11757_v38, %v2503_v6  ;;  %v12198_v38 = vadd.f32 %v3135_v40, %v12086_v33  ;;  %v3137_v22 = vpop.f32.mrb[145].mxu1  ;;  %v3539_v12 = vld [vmem:[#allocation2 + $0x278] sm:$0xff] }
 0x33c   : > { %v2498_v36 = vadd.f32 %v2497_v59, %v14522_v49  ;;  %v12187_v31 = vadd.f32 %v14523_v10, %v2495_v17  ;;  %v3138_v6 = vpop.f32.mrb[146].mxu1  ;;  %v14525_v17 = vld [vmem:[#allocation55_spill] sm:$0xff] }
 0x33d   : > { %9659 = vmatmul.mubr.bf16.gmra.mrb[236].mxu0 %v11898_v5  ;;  %v12191_v55 = vadd.f32 %v11760_v43, %v2506_v3  ;;  %v12201_v47 = vadd.f32 %v3138_v6, %v12093_v63  ;;  %v3140_v5 = vpop.f32.mrb[147].mxu1  ;;  %v14526_v59 = vld [vmem:[#allocation51_spill] sm:$0xff] }
 0x33e   : > { %9662 = vmatprep.mubr.bf16.mxu0 %v11903_v15  ;;  %v12195_v28 = vadd.f32 %v14524_v7, %v2498_v36  ;;  %v14527_v36 = vld [vmem:[#allocation56_spill] sm:$0xff]  ;;  %v14529_v6 = vld [vmem:[#allocation79_spill] sm:$0xff] }
 0x33f   : > { %3962 = vmatmul.mubr.bf16.gmra.mrb[252].mxu1 %v3535_v50  ;;  %v14528_v7 = vld [vmem:[#allocation52_spill] sm:$0xff] }
 0x340   : > { %v9484_v4 = vpop.f32.mrb[132].mxu0  ;;  %3969 = vmatprep.mubr.bf16.mxu1 %v3539_v12  ;;  %v14530_v50 = vld [vmem:[#allocation76_spill] sm:$0xff]  ;;  %v3538_v12 = vld [vmem:[#allocation2 + $0x270] sm:$0xff] }
 0x341   : > { %v2519_v43 = vadd.f32 %v9484_v4, %v14525_v17  ;;  %v2510_v3 = vpop.f32.mrb[133].mxu0 }
 0x342   : > { %v2511_v15 = vadd.f32 %v2510_v3, %v14526_v59  ;;  %v9485_v49 = vpop.f32.mrb[134].mxu0  ;;  %v3143_v5 = vpop.f32.mrb[148].mxu1 }
 0x343   : > { %v2522_v10 = vadd.f32 %v9485_v49, %v14527_v36  ;;  %v2513_v33 = vpop.f32.mrb[135].mxu0  ;;  %v12207_v40 = vadd.f32 %v11785_v48, %v2519_v43  ;;  %v12222_v48 = vadd.f32 %v3143_v5, %v12113_v35  ;;  %v3145_v43 = vpop.f32.mrb[149].mxu1 }
 0x344   : > { %v2514_v22 = vadd.f32 %v2513_v33, %v14528_v7  ;;  %v12211_v63 = vadd.f32 %v11771_v29, %v2511_v15  ;;  %v3146_v3 = vpop.f32.mrb[150].mxu1  ;;  %v14531_v15 = vld [vmem:[#allocation61_spill] sm:$0xff] }
 0x345   : > { %9663 = vmatmul.mubr.bf16.gmra.mrb[240].mxu0 %v11917_v24  ;;  %v12215_v4 = vadd.f32 %v14529_v6, %v2522_v10  ;;  %v12225_v29 = vadd.f32 %v3146_v3, %v12120_v58  ;;  %v3148_v24 = vpop.f32.mrb[151].mxu1  ;;  %v3542_v10 = vld [vmem:[#allocation2 + $0x290] sm:$0xff] }
 0x346   : > { %9666 = vmatprep.mubr.bf16.mxu0 %v11922_v44  ;;  %v12219_v17 = vadd.f32 %v14530_v50, %v2514_v22  ;;  %v14532_v33 = vld [vmem:[#allocation57_spill] sm:$0xff]  ;;  %v14533_v22 = vld [vmem:[#allocation63_spill] sm:$0xff]  ;;  %v14534_v50 = vld [vmem:[#allocation58_spill] sm:$0xff] }
 0x347   : > { %3970 = vmatmul.mubr.bf16.gmra.mrb[0].mxu1 %v3538_v12  ;;  %v14535_v12 = vld [vmem:[#allocation82_spill] sm:$0xff] }
 0x348   : > { %v9488_v59 = vpop.f32.mrb[136].mxu0  ;;  %3977 = vmatprep.mubr.bf16.mxu1 %v3542_v10 }
 0x349   : > { %v2535_v49 = vadd.f32 %v9488_v59, %v14531_v15  ;;  %v2526_v36 = vpop.f32.mrb[137].mxu0 }
 0x34a   : > { %v2527_v44 = vadd.f32 %v2526_v36, %v14532_v33  ;;  %v9489_v7 = vpop.f32.mrb[138].mxu0  ;;  %v3151_v59 = vpop.f32.mrb[152].mxu1  ;;  %v3541_v36 = vld [vmem:[#allocation2 + $0x288] sm:$0xff] }
 0x34b   : > { %v2538_v6 = vadd.f32 %v9489_v7, %v14533_v22  ;;  %v2529_v35 = vpop.f32.mrb[139].mxu0  ;;  %v12231_v5 = vadd.f32 %v11810_v1, %v2535_v49  ;;  %v12246_v1 = vadd.f32 %v3151_v59, %v12129_v21  ;;  %v3153_v15 = vpop.f32.mrb[153].mxu1  ;;  %v14536_v33 = vld [vmem:[#allocation72_spill] sm:$0xff]  ;;  %v14537_v22 = vld [vmem:[#allocation67_spill] sm:$0xff]  ;;  %v14539_v59 = vld [vmem:[#allocation69_spill] sm:$0xff] }
 0x34c   : > { %v2530_v43 = vadd.f32 %v2529_v35, %v14534_v50  ;;  %v12235_v58 = vadd.f32 %v11799_v52, %v2527_v44  ;;  %v3154_v49 = vpop.f32.mrb[154].mxu1  ;;  %v3545_v7 = vld [vmem:[#allocation2 + $0x2a8] sm:$0xff] }
 0x34d   : > { %9667 = vmatmul.mubr.bf16.gmra.mrb[244].mxu0 %v11936_v27  ;;  %v12239_v3 = vadd.f32 %v11813_v8, %v2538_v6  ;;  %v12249_v52 = vadd.f32 %v3154_v49, %v12132_v37  ;;  %v3156_v27 = vpop.f32.mrb[155].mxu1  ;;  %v14538_v35 = vld [vmem:[#allocation73_spill] sm:$0xff] }
 0x34e   : > { %9670 = vmatprep.mubr.bf16.mxu0 %v11941_v25  ;;  %v12243_v24 = vadd.f32 %v14535_v12, %v2530_v43 }
 0x34f   : > { %3978 = vmatmul.mubr.bf16.gmra.mrb[4].mxu1 %v3541_v36 }
 0x350   : > { %v9492_v10 = vpop.f32.mrb[140].mxu0  ;;  %3985 = vmatprep.mubr.bf16.mxu1 %v3545_v7 }
 0x351   : > { %v2551_v8 = vadd.f32 %v9492_v10, %v14536_v33  ;;  %v2542_v44 = vpop.f32.mrb[141].mxu0  ;;  %v3544_v33 = vld [vmem:[#allocation2 + $0x2a0] sm:$0xff] }
 0x352   : > { %v2543_v25 = vadd.f32 %v2542_v44, %v14537_v22  ;;  %v9493_v6 = vpop.f32.mrb[142].mxu0  ;;  %v3159_v49 = vpop.f32.mrb[156].mxu1  ;;  %v14540_v44 = vld [vmem:[#allocation77_spill] sm:$0xff]  ;;  %v3548_v22 = vld [vmem:[#allocation2 + $0x2c0] sm:$0xff] }
 0x353   : > { %v2554_v50 = vadd.f32 %v9493_v6, %v14538_v35  ;;  %v2545_v21 = vpop.f32.mrb[143].mxu0  ;;  %v12255_v43 = vadd.f32 %v11836_v57, %v2551_v8  ;;  %v12270_v57 = vadd.f32 %v3159_v49, %v12141_v32  ;;  %v3161_v10 = vpop.f32.mrb[157].mxu1  ;;  %v14545_v49 = vld [vmem:[#allocation95_spill] sm:$0xff] }
 0x354   : > { %v2546_v12 = vadd.f32 %v2545_v21, %v14539_v59  ;;  %v12259_v37 = vadd.f32 %v11823_v42, %v2543_v25  ;;  %v3162_v27 = vpop.f32.mrb[158].mxu1  ;;  %v14541_v25 = vld [vmem:[#allocation74_spill] sm:$0xff]  ;;  %v14543_v21 = vld [vmem:[#allocation75_spill] sm:$0xff] }
 0x355   : > { %9671 = vmatmul.mubr.bf16.gmra.mrb[248].mxu0 %v11955_v18  ;;  %v12263_v15 = vadd.f32 %v11839_v26, %v2554_v50  ;;  %v12273_v42 = vadd.f32 %v3162_v27, %v12144_v23  ;;  %v3164_v18 = vpop.f32.mrb[159].mxu1  ;;  %v14544_v23 = vld [vmem:[#allocation85_spill] sm:$0xff]  ;;  %v14546_v10 = vld [vmem:[#allocation87_spill] sm:$0xff] }
 0x356   : > { %9674 = vmatprep.mubr.bf16.mxu0 %v11960_v20  ;;  %v12267_v36 = vadd.f32 %v11826_v0, %v2546_v12  ;;  %v14542_v0 = vld [vmem:[#allocation78_spill] sm:$0xff]  ;;  %v14547_v18 = vld [vmem:[#allocation96_spill] sm:$0xff] }
 0x357   : > { %3986 = vmatmul.mubr.bf16.gmra.mrb[8].mxu1 %v3544_v33  ;;  %v14548_v33 = vld [vmem:[#allocation86_spill] sm:$0xff] }
 0x358   : > { %v9496_v8 = vpop.f32.mrb[144].mxu0  ;;  %3993 = vmatprep.mubr.bf16.mxu1 %v3548_v22  ;;  %v3547_v22 = vld [vmem:[#allocation2 + $0x2b8] sm:$0xff] }
 0x359   : > { %v2567_v26 = vadd.f32 %v9496_v8, %v14540_v44  ;;  %v2558_v7 = vpop.f32.mrb[145].mxu0 }
 0x35a   : > { %v2559_v20 = vadd.f32 %v2558_v7, %v14541_v25  ;;  %v9497_v6 = vpop.f32.mrb[146].mxu0  ;;  %v3167_v8 = vpop.f32.mrb[160].mxu1 }
 0x35b   : > { %v2570_v35 = vadd.f32 %v9497_v6, %v14542_v0  ;;  %v2561_v32 = vpop.f32.mrb[147].mxu0  ;;  %v12279_v50 = vadd.f32 %v11862_v41, %v2567_v26  ;;  %v12294_v41 = vadd.f32 %v3167_v8, %v12153_v46  ;;  %v3169_v26 = vpop.f32.mrb[161].mxu1  ;;  %v14550_v0 = vld [vmem:[#allocation83_spill] sm:$0xff]  ;;  %v14553_v8 = vld [vmem:[#allocation90_spill] sm:$0xff] }
 0x35c   : > { %v2562_v59 = vadd.f32 %v2561_v32, %v14543_v21  ;;  %v12283_v12 = vadd.f32 %v14544_v23, %v2559_v20  ;;  %v3170_v7 = vpop.f32.mrb[162].mxu1  ;;  %v3551_v21 = vld [vmem:[#allocation2 + $0x2d8] sm:$0xff]  ;;  %v14551_v23 = vld [vmem:[#allocation80_spill] sm:$0xff]  ;;  %v14554_v26 = vld [vmem:[#allocation81_spill] sm:$0xff] }
 0x35d   : > { %9675 = vmatmul.mubr.bf16.gmra.mrb[252].mxu0 %v14545_v49  ;;  %v12287_v27 = vadd.f32 %v14546_v10, %v2570_v35  ;;  %14549 = vst [vmem:[#allocation65_spill] sm:$0xff] %v12294_v41  ;;  %v12297_v20 = vadd.f32 %v3170_v7, %v12156_v11  ;;  %v3172_v6 = vpop.f32.mrb[163].mxu1  ;;  %v14555_v11 = vld [vmem:[#allocation88_spill] sm:$0xff] }
 0x35e   : > { %9678 = vmatprep.mubr.bf16.mxu0 %v14547_v18  ;;  %v12291_v44 = vadd.f32 %v14548_v33, %v2562_v59  ;;  %v14552_v59 = vld [vmem:[#allocation84_spill] sm:$0xff]  ;;  %v14556_v6 = vld [vmem:[#allocation49_spill] sm:$0xff] }
 0x35f   : > { %3994 = vmatmul.mubr.bf16.gmra.mrb[12].mxu1 %v3547_v22  ;;  %v14559_v22 = vld [vmem:[#allocation89_spill] sm:$0xff] }
 0x360   : > { %v9500_v25 = vpop.f32.mrb[148].mxu0  ;;  %4001 = vmatprep.mubr.bf16.mxu1 %v3551_v21  ;;  %v3550_v21 = vld [vmem:[#allocation2 + $0x2d0] sm:$0xff] }
 0x361   : > { %v2583_v35 = vadd.f32 %v9500_v25, %v14550_v0  ;;  %v2574_v32 = vpop.f32.mrb[149].mxu0  ;;  %v14557_v25 = vld [vmem:[#allocation91_spill] sm:$0xff] }
 0x362   : > { %v2575_v49 = vadd.f32 %v2574_v32, %v14551_v23  ;;  %v9501_v10 = vpop.f32.mrb[150].mxu0  ;;  %v3175_v32 = vpop.f32.mrb[164].mxu1  ;;  %v14558_v23 = vld [vmem:[#allocation50_spill] sm:$0xff] }
 0x363   : > { %v2586_v18 = vadd.f32 %v9501_v10, %v14552_v59  ;;  %v2577_v46 = vpop.f32.mrb[151].mxu0  ;;  %v12303_v33 = vadd.f32 %v14553_v8, %v2583_v35  ;;  %v12318_v35 = vadd.f32 %v3175_v32, %v12166_v45  ;;  %v3177_v59 = vpop.f32.mrb[165].mxu1 }
 0x364   : > { %v2578_v41 = vadd.f32 %v2577_v46, %v14554_v26  ;;  %v12307_v7 = vadd.f32 %v14555_v11, %v2575_v49  ;;  %v3178_v46 = vpop.f32.mrb[166].mxu1 }
 0x365   : > { %9679 = vmatmul.mubr.bf16.gmra.mrb[0].mxu0 %v14556_v6  ;;  %v12311_v0 = vadd.f32 %v14557_v25, %v2586_v18  ;;  %v12321_v49 = vadd.f32 %v3178_v46, %v12169_v16  ;;  %v3180_v26 = vpop.f32.mrb[167].mxu1  ;;  %v3554_v6 = vld [vmem:[#allocation2 + $0x2f0] sm:$0xff] }
 0x366   : > { %9682 = vmatprep.mubr.bf16.mxu0 %v14558_v23  ;;  %v12315_v10 = vadd.f32 %v14559_v22, %v2578_v41  ;;  %v14560_v16 = vld [vmem:[#allocation38_spill] sm:$0xff] }
 0x367   : > { %4002 = vmatmul.mubr.bf16.gmra.mrb[16].mxu1 %v3550_v21 }
 0x368   : > { %v9560_v8 = vpop.f32.mrb[152].mxu0  ;;  %4009 = vmatprep.mubr.bf16.mxu1 %v3554_v6 }
 0x369   : > { %v12324_v18 = vadd.f32 %v9560_v8, %v12183_v61  ;;  %v3216_v11 = vpop.f32.mrb[153].mxu0  ;;  %v14561_v61 = vld [vmem:[#allocation101_spill] sm:$0xff] }
 0x36a   : > { %v12327_v25 = vadd.f32 %v3216_v11, %v12187_v31  ;;  %v9561_v41 = vpop.f32.mrb[154].mxu0  ;;  %v12336_v22 = vpop.f32.mrb[168].mxu1  ;;  %v3553_v31 = vld [vmem:[#allocation2 + $0x2e8] sm:$0xff] }
 0x36b   : > { %v12330_v45 = vadd.f32 %v9561_v41, %v12191_v55  ;;  %v3219_v32 = vpop.f32.mrb[155].mxu0  ;;  %v3797_v59 = vpop.f32.mrb[169].mxu1  ;;  %v3557_v11 = vld [vmem:[#allocation2 + $0x308] sm:$0xff] }
 0x36c   : > { %v12333_v23 = vadd.f32 %v3219_v32, %v12195_v28  ;;  %v12339_v46 = vpop.f32.mrb[170].mxu1 }
 0x36d   : > { %9683 = vmatmul.mubr.bf16.gmra.mrb[4].mxu0 %v14560_v16  ;;  %v3800_v21 = vpop.f32.mrb[171].mxu1 }
 0x36e   : > { %9686 = vmatprep.mubr.bf16.mxu0 %v14561_v61 }
 0x36f   : > { %4010 = vmatmul.mubr.bf16.gmra.mrb[20].mxu1 %v3553_v31 }
 0x370   : > { %v9564_v8 = vpop.f32.mrb[156].mxu0  ;;  %4017 = vmatprep.mubr.bf16.mxu1 %v3557_v11 }
 0x371   : > { %v12342_v55 = vadd.f32 %v9564_v8, %v12207_v40  ;;  %v3232_v26 = vpop.f32.mrb[157].mxu0 }
 0x372   : > { %v12345_v28 = vadd.f32 %v3232_v26, %v12211_v63  ;;  %v9565_v6 = vpop.f32.mrb[158].mxu0  ;;  %v12354_v61 = vpop.f32.mrb[172].mxu1  ;;  %v3556_v63 = vld [vmem:[#allocation2 + $0x300] sm:$0xff] }
 0x373   : > { %v12348_v41 = vadd.f32 %v9565_v6, %v12215_v4  ;;  %v3235_v32 = vpop.f32.mrb[159].mxu0  ;;  %v3805_v40 = vpop.f32.mrb[173].mxu1  ;;  %v3560_v26 = vld [vmem:[#allocation2 + $0x320] sm:$0xff]  ;;  %v3558_v6 = vld [vmem:[#allocation2 + $0x310] sm:$0xff] }
 0x374   : > { %v12351_v16 = vadd.f32 %v3235_v32, %v12219_v17  ;;  %v12357_v59 = vpop.f32.mrb[174].mxu1 }
 0x375   : > { %9687 = vmatmul.mubr.bf16.gmra.mrb[8].mxu0 %v12068_v13  ;;  %v3808_v31 = vpop.f32.mrb[175].mxu1 }
 0x376   : > { %9690 = vmatprep.mubr.bf16.mxu0 %v12075_v2 }
 0x377   : > { %4018 = vmatmul.mubr.bf16.gmra.mrb[24].mxu1 %v3556_v63 }
 0x378   : > { %v9568_v8 = vpop.f32.mrb[160].mxu0  ;;  %4025 = vmatprep.mubr.bf16.mxu1 %v3560_v26  ;;  %v3561_v26 = vld [vmem:[#allocation2 + $0x328] sm:$0xff] }
 0x379   : > { %v12360_v4 = vadd.f32 %v9568_v8, %v12231_v5  ;;  %v3248_v21 = vpop.f32.mrb[161].mxu0 }
 0x37a   : > { %v12363_v17 = vadd.f32 %v3248_v21, %v12235_v58  ;;  %v9569_v11 = vpop.f32.mrb[162].mxu0  ;;  %v12372_v5 = vpop.f32.mrb[176].mxu1  ;;  %v3559_v58 = vld [vmem:[#allocation2 + $0x318] sm:$0xff] }
 0x37b   : > { %v12366_v13 = vadd.f32 %v9569_v11, %v12239_v3  ;;  %v3251_v2 = vpop.f32.mrb[163].mxu0  ;;  %v3813_v40 = vpop.f32.mrb[177].mxu1 }
 0x37c   : > { %v12369_v32 = vadd.f32 %v3251_v2, %v12243_v24  ;;  %v12374_v8 = vpop.f32.mrb[178].mxu1 }
 0x37d   : > { %9691 = vmatmul.mubr.bf16.gmra.mrb[12].mxu0 %v12090_v9  ;;  %v3816_v63 = vpop.f32.mrb[179].mxu1 }
 0x37e   : > { %9694 = vmatprep.mubr.bf16.mxu0 %v3558_v6 }
 0x37f   : > { %4026 = vmatmul.mubr.bf16.gmra.mrb[28].mxu1 %v3559_v58 }
 0x380   : > { %v9572_v31 = vpop.f32.mrb[164].mxu0  ;;  %4033 = vmatprep.mubr.bf16.mxu1 %v12002_v62  ;;  %v3567_v62 = vld [vmem:[#allocation2 + $0x358] sm:$0xff] }
 0x381   : > { %v12377_v3 = vadd.f32 %v9572_v31, %v12255_v43  ;;  %v3264_v21 = vpop.f32.mrb[165].mxu0  ;;  %v3562_v31 = vld [vmem:[#allocation2 + $0x330] sm:$0xff] }
 0x382   : > { %v12380_v11 = vadd.f32 %v3264_v21, %v12259_v37  ;;  %v9573_v24 = vpop.f32.mrb[166].mxu0  ;;  %v12389_v40 = vpop.f32.mrb[180].mxu1 }
 0x383   : > { %14562 = vst [vmem:[#allocation68_spill] sm:$0xff] %v12377_v3  ;;  %v12383_v9 = vadd.f32 %v9573_v24, %v12263_v15  ;;  %v3267_v2 = vpop.f32.mrb[167].mxu0  ;;  %v3821_v43 = vpop.f32.mrb[181].mxu1 }
 0x384   : > { %14563 = vst [vmem:[#allocation64_spill] sm:$0xff] %v12380_v11  ;;  %v12386_v6 = vadd.f32 %v3267_v2, %v12267_v36  ;;  %v12392_v37 = vpop.f32.mrb[182].mxu1 }
 0x385   : > { %14564 = vst [vmem:[#allocation66_spill] sm:$0xff] %v12383_v9  ;;  %9695 = vmatmul.mubr.bf16.gmra.mrb[16].mxu0 %v3561_v26  ;;  %v3824_v58 = vpop.f32.mrb[183].mxu1 }
 0x386   : > { %14565 = vst [vmem:[#allocation46_spill] sm:$0xff] %v12386_v6  ;;  %9698 = vmatprep.mubr.bf16.mxu0 %v12105_v53 }
 0x387   : > { %4034 = vmatmul.mubr.bf16.gmra.mrb[32].mxu1 %v3562_v31 }
 0x388   : > { %v9576_v63 = vpop.f32.mrb[168].mxu0  ;;  %4041 = vmatprep.mubr.bf16.mxu1 %v12031_v34 }
 0x389   : > { %v12395_v15 = vadd.f32 %v9576_v63, %v12279_v50  ;;  %v3280_v21 = vpop.f32.mrb[169].mxu0 }
 0x38a   : > { %v12398_v36 = vadd.f32 %v3280_v21, %v12283_v12  ;;  %v9577_v24 = vpop.f32.mrb[170].mxu0  ;;  %v12407_v43 = vpop.f32.mrb[184].mxu1 }
 0x38b   : > { %14566 = vst [vmem:[#allocation42_spill] sm:$0xff] %v12395_v15  ;;  %v12401_v26 = vadd.f32 %v9577_v24, %v12287_v27  ;;  %v3283_v53 = vpop.f32.mrb[171].mxu0  ;;  %v3829_v50 = vpop.f32.mrb[185].mxu1 }
 0x38c   : > { %14567 = vst [vmem:[#allocation48_spill] sm:$0xff] %v12398_v36  ;;  %v12404_v2 = vadd.f32 %v3283_v53, %v12291_v44  ;;  %v12409_v63 = vpop.f32.mrb[186].mxu1 }
 0x38d   : > { %14568 = vst [vmem:[#allocation43_spill] sm:$0xff] %v12401_v26  ;;  %9699 = vmatmul.mubr.bf16.gmra.mrb[20].mxu0 %v3567_v62  ;;  %v3832_v58 = vpop.f32.mrb[187].mxu1 }
 0x38e   : > { %14569 = vst [vmem:[#allocation70_spill] sm:$0xff] %v12404_v2 }
 0x38f   : > { %4042 = vmatmul.mubr.bf16.gmra.mrb[36].mxu1 %v12117_v54 }
 0x390   : > { %v9580_v12 = vpop.f32.mrb[172].mxu0 }
 0x391   : > { %v12412_v21 = vadd.f32 %v9580_v12, %v12303_v33  ;;  %v3296_v31 = vpop.f32.mrb[173].mxu0 }
 0x392   : > { %v12415_v27 = vadd.f32 %v3296_v31, %v12307_v7  ;;  %v9581_v24 = vpop.f32.mrb[174].mxu0  ;;  %v12424_v53 = vpop.f32.mrb[188].mxu1 }
 0x393   : > { %14570 = vst [vmem:[#allocation71_spill] sm:$0xff] %v12412_v21  ;;  %v12419_v34 = vadd.f32 %v9581_v24, %v12311_v0  ;;  %v3299_v44 = vpop.f32.mrb[175].mxu0  ;;  %v3837_v50 = vpop.f32.mrb[189].mxu1  ;;  %v14574_v21 = vld [vmem:[#allocation93_spill] sm:$0xff]  ;;  %v14578_v24 = vld [vmem:[#allocation94_spill] sm:$0xff] }
 0x394   : > { %14571 = vst [vmem:[#allocation55_spill] sm:$0xff] %v12415_v27  ;;  %v12422_v62 = vadd.f32 %v3299_v44, %v12315_v10  ;;  %v12426_v58 = vpop.f32.mrb[190].mxu1  ;;  %v14576_v27 = vld [vmem:[#allocation40_spill] sm:$0xff] }
 0x395   : > { %14572 = vst [vmem:[#allocation51_spill] sm:$0xff] %v12419_v34  ;;  %v3840_v12 = vpop.f32.mrb[191].mxu1  ;;  %v14580_v44 = vld [vmem:[#allocation92_spill] sm:$0xff] }
 0x396   : > { %14573 = vst [vmem:[#allocation56_spill] sm:$0xff] %v12422_v62 }
 0x398   : > { %v9584_v33 = vpop.f32.mrb[176].mxu0 }
 0x399   : > { %v12429_v7 = vadd.f32 %v9584_v33, %v14574_v21  ;;  %v3312_v31 = vpop.f32.mrb[177].mxu0  ;;  %v14584_v33 = vld [vmem:[#allocation44_spill] sm:$0xff] }
 0x39a   : > { %v12432_v54 = vadd.f32 %v3312_v31, %v14576_v27  ;;  %v9585_v0 = vpop.f32.mrb[178].mxu0  ;;  %v12440_v50 = vpop.f32.mrb[192].mxu1  ;;  %v14586_v31 = vld [vmem:[#allocation47_spill] sm:$0xff] }
 0x39b   : > { %14575 = vst [vmem:[#allocation52_spill] sm:$0xff] %v12429_v7  ;;  %v12435_v34 = vadd.f32 %v9585_v0, %v14578_v24  ;;  %v3315_v10 = vpop.f32.mrb[179].mxu0  ;;  %14582 = vst [vmem:[#allocation57_spill] sm:$0xff] %v12440_v50  ;;  %v3845_v2 = vpop.f32.mrb[193].mxu1  ;;  %v14588_v24 = vld [vmem:[#allocation45_spill] sm:$0xff] }
 0x39c   : > { %14577 = vst [vmem:[#allocation79_spill] sm:$0xff] %v12432_v54  ;;  %v12438_v62 = vadd.f32 %v3315_v10, %v14580_v44  ;;  %v12442_v26 = vpop.f32.mrb[194].mxu1  ;;  %v14590_v44 = vld [vmem:[#allocation41_spill] sm:$0xff] }
 0x39d   : > { %14579 = vst [vmem:[#allocation76_spill] sm:$0xff] %v12435_v34  ;;  %14583 = vst [vmem:[#allocation63_spill] sm:$0xff] %v12442_v26  ;;  %v3848_v21 = vpop.f32.mrb[195].mxu1 }
 0x39e   : > { %14581 = vst [vmem:[#allocation61_spill] sm:$0xff] %v12438_v62 }
 0x3a0   : > { %v9588_v12 = vpop.f32.mrb[180].mxu0 }
 0x3a1   : > { %v12445_v7 = vadd.f32 %v9588_v12, %v14584_v33  ;;  %v3328_v27 = vpop.f32.mrb[181].mxu0  ;;  %v14594_v33 = vld [vmem:[#allocation99_spill] sm:$0xff] }
 0x3a2   : > { %v12448_v54 = vadd.f32 %v3328_v27, %v14586_v31  ;;  %v9589_v0 = vpop.f32.mrb[182].mxu0  ;;  %v12456_v2 = vpop.f32.mrb[196].mxu1  ;;  %v14596_v31 = vld [vmem:[#allocation97_spill] sm:$0xff] }
 0x3a3   : > { %14585 = vst [vmem:[#allocation58_spill] sm:$0xff] %v12445_v7  ;;  %v12451_v34 = vadd.f32 %v9589_v0, %v14588_v24  ;;  %v3331_v10 = vpop.f32.mrb[183].mxu0  ;;  %14592 = vst [vmem:[#allocation73_spill] sm:$0xff] %v12456_v2  ;;  %v3853_v36 = vpop.f32.mrb[197].mxu1  ;;  %v14598_v24 = vld [vmem:[#allocation100_spill] sm:$0xff] }
 0x3a4   : > { %14587 = vst [vmem:[#allocation82_spill] sm:$0xff] %v12448_v54  ;;  %v12454_v62 = vadd.f32 %v3331_v10, %v14590_v44  ;;  %v12458_v15 = vpop.f32.mrb[198].mxu1  ;;  %v14600_v44 = vld [vmem:[#allocation98_spill] sm:$0xff] }
 0x3a5   : > { %14589 = vst [vmem:[#allocation72_spill] sm:$0xff] %v12451_v34  ;;  %14593 = vst [vmem:[#allocation69_spill] sm:$0xff] %v12458_v15  ;;  %v3856_v12 = vpop.f32.mrb[199].mxu1 }
 0x3a6   : > { %14591 = vst [vmem:[#allocation67_spill] sm:$0xff] %v12454_v62 }
 0x3a8   : > { %v9592_v21 = vpop.f32.mrb[184].mxu0 }
 0x3a9   : > { %v12461_v7 = vadd.f32 %v9592_v21, %v14594_v33  ;;  %v3344_v27 = vpop.f32.mrb[185].mxu0 }
 0x3aa   : > { %v12464_v54 = vadd.f32 %v3344_v27, %v14596_v31  ;;  %v9593_v0 = vpop.f32.mrb[186].mxu0  ;;  %v12472_v36 = vpop.f32.mrb[200].mxu1  ;;  %v14605_v31 = vld [vmem:[#allocation102_spill] sm:$0xff] }
 0x3ab   : > { %14595 = vst [vmem:[#allocation77_spill] sm:$0xff] %v12461_v7  ;;  %v12467_v34 = vadd.f32 %v9593_v0, %v14598_v24  ;;  %v3347_v10 = vpop.f32.mrb[187].mxu0  ;;  %14602 = vst [vmem:[#allocation85_spill] sm:$0xff] %v12472_v36  ;;  %v3861_v6 = vpop.f32.mrb[201].mxu1  ;;  %v14607_v24 = vld [vmem:[#allocation53_spill] sm:$0xff] }
 0x3ac   : > { %14597 = vst [vmem:[#allocation74_spill] sm:$0xff] %v12464_v54  ;;  %v12470_v62 = vadd.f32 %v3347_v10, %v14600_v44  ;;  %v12474_v26 = vpop.f32.mrb[202].mxu1  ;;  %v14609_v44 = vld [vmem:[#allocation36_spill] sm:$0xff] }
 0x3ad   : > { %14599 = vst [vmem:[#allocation78_spill] sm:$0xff] %v12467_v34  ;;  %14603 = vst [vmem:[#allocation95_spill] sm:$0xff] %v12474_v26  ;;  %v3864_v21 = vpop.f32.mrb[203].mxu1 }
 0x3ae   : > { %14601 = vst [vmem:[#allocation75_spill] sm:$0xff] %v12470_v62 }
 0x3b0   : > { %v9596_v12 = vpop.f32.mrb[188].mxu0 }
 0x3b1   : > { %v12477_v33 = vadd.f32 %v9596_v12, %v12080_v51  ;;  %v3360_v27 = vpop.f32.mrb[189].mxu0 }
 0x3b2   : > { %v12480_v54 = vadd.f32 %v3360_v27, %v14605_v31  ;;  %v9597_v0 = vpop.f32.mrb[190].mxu0  ;;  %v12488_v6 = vpop.f32.mrb[204].mxu1 }
 0x3b3   : > { %14604 = vst [vmem:[#allocation87_spill] sm:$0xff] %v12477_v33  ;;  %v12483_v34 = vadd.f32 %v9597_v0, %v14607_v24  ;;  %v3363_v10 = vpop.f32.mrb[191].mxu0  ;;  %14611 = vst [vmem:[#allocation80_spill] sm:$0xff] %v12488_v6  ;;  %v3869_v7 = vpop.f32.mrb[205].mxu1 }
 0x3b4   : > { %14606 = vst [vmem:[#allocation96_spill] sm:$0xff] %v12480_v54  ;;  %v12486_v62 = vadd.f32 %v3363_v10, %v14609_v44  ;;  %v12490_v26 = vpop.f32.mrb[206].mxu1  ;;  %v14616_v44 = vld [vmem:[#allocation39_spill] sm:$0xff] }
 0x3b5   : > { %14608 = vst [vmem:[#allocation86_spill] sm:$0xff] %v12483_v34  ;;  %14612 = vst [vmem:[#allocation84_spill] sm:$0xff] %v12490_v26  ;;  %v3872_v51 = vpop.f32.mrb[207].mxu1 }
 0x3b6   : > { %14610 = vst [vmem:[#allocation83_spill] sm:$0xff] %v12486_v62 }
 0x3b8   : > { %v9600_v21 = vpop.f32.mrb[192].mxu0 }
 0x3b9   : > { %v12493_v12 = vadd.f32 %v9600_v21, %v12123_v60  ;;  %v3376_v27 = vpop.f32.mrb[193].mxu0 }
 0x3ba   : > { %v12496_v31 = vadd.f32 %v3376_v27, %v12101_v19  ;;  %v9601_v0 = vpop.f32.mrb[194].mxu0  ;;  %v12504_v7 = vpop.f32.mrb[208].mxu1 }
 0x3bb   : > { %14613 = vst [vmem:[#allocation90_spill] sm:$0xff] %v12493_v12  ;;  %v12499_v24 = vadd.f32 %v9601_v0, %v12126_v56  ;;  %v3379_v10 = vpop.f32.mrb[195].mxu0  ;;  %14618 = vst [vmem:[#allocation91_spill] sm:$0xff] %v12504_v7  ;;  %v3877_v34 = vpop.f32.mrb[209].mxu1  ;;  %v14622_v0 = vld [vmem:[#allocation37_spill] sm:$0xff] }
 0x3bc   : > { %14614 = vst [vmem:[#allocation81_spill] sm:$0xff] %v12496_v31  ;;  %v12502_v62 = vadd.f32 %v3379_v10, %v14616_v44  ;;  %v12506_v54 = vpop.f32.mrb[210].mxu1  ;;  %v14624_v44 = vld [vmem:[#allocation54_spill] sm:$0xff] }
 0x3bd   : > { %14615 = vst [vmem:[#allocation88_spill] sm:$0xff] %v12499_v24  ;;  %14619 = vst [vmem:[#allocation50_spill] sm:$0xff] %v12506_v54  ;;  %v3880_v60 = vpop.f32.mrb[211].mxu1 }
 0x3be   : > { %14617 = vst [vmem:[#allocation49_spill] sm:$0xff] %v12502_v62 }
 0x3c0   : > { %v9604_v51 = vpop.f32.mrb[196].mxu0 }
 0x3c1   : > { %v12509_v21 = vadd.f32 %v9604_v51, %v12147_v14  ;;  %v3392_v19 = vpop.f32.mrb[197].mxu0  ;;  %v14628_v51 = vld [vmem:[#allocation60_spill] sm:$0xff] }
 0x3c2   : > { %v12512_v27 = vadd.f32 %v3392_v19, %v12135_v30  ;;  %v9605_v56 = vpop.f32.mrb[198].mxu0  ;;  %v12520_v34 = vpop.f32.mrb[212].mxu1  ;;  %v14630_v19 = vld [vmem:[#allocation62_spill] sm:$0xff] }
 0x3c3   : > { %14620 = vst [vmem:[#allocation89_spill] sm:$0xff] %v12509_v21  ;;  %v12515_v24 = vadd.f32 %v9605_v56, %v14622_v0  ;;  %v3395_v10 = vpop.f32.mrb[199].mxu0  ;;  %14626 = vst [vmem:[#allocation40_spill] sm:$0xff] %v12520_v34  ;;  %v3885_v31 = vpop.f32.mrb[213].mxu1 }
 0x3c4   : > { %14621 = vst [vmem:[#allocation38_spill] sm:$0xff] %v12512_v27  ;;  %v12518_v62 = vadd.f32 %v3395_v10, %v14624_v44  ;;  %v12522_v12 = vpop.f32.mrb[214].mxu1  ;;  %v14633_v44 = vld [vmem:[#allocation59_spill] sm:$0xff] }
 0x3c5   : > { %14623 = vst [vmem:[#allocation101_spill] sm:$0xff] %v12515_v24  ;;  %14627 = vst [vmem:[#allocation94_spill] sm:$0xff] %v12522_v12  ;;  %v3888_v14 = vpop.f32.mrb[215].mxu1 }
 0x3c6   : > { %14625 = vst [vmem:[#allocation93_spill] sm:$0xff] %v12518_v62 }
 0x3c8   : > { %v9608_v60 = vpop.f32.mrb[200].mxu0 }
 0x3c9   : > { %v12525_v21 = vadd.f32 %v9608_v60, %v14628_v51  ;;  %v3408_v30 = vpop.f32.mrb[201].mxu0 }
 0x3ca   : > { %v12528_v27 = vadd.f32 %v3408_v30, %v14630_v19  ;;  %v9609_v56 = vpop.f32.mrb[202].mxu0  ;;  %v12536_v31 = vpop.f32.mrb[216].mxu1 }
 0x3cb   : > { %14629 = vst [vmem:[#allocation92_spill] sm:$0xff] %v12525_v21  ;;  %v12531_v0 = vadd.f32 %v9609_v56, %v12177_v39  ;;  %v3411_v10 = vpop.f32.mrb[203].mxu0  ;;  %14635 = vst [vmem:[#allocation41_spill] sm:$0xff] %v12536_v31  ;;  %v3893_v24 = vpop.f32.mrb[217].mxu1 }
 0x3cc   : > { %14631 = vst [vmem:[#allocation44_spill] sm:$0xff] %v12528_v27  ;;  %v12534_v62 = vadd.f32 %v3411_v10, %v14633_v44  ;;  %v12538_v33 = vpop.f32.mrb[218].mxu1 }
 0x3cd   : > { %14632 = vst [vmem:[#allocation47_spill] sm:$0xff] %v12531_v0  ;;  %14636 = vst [vmem:[#allocation99_spill] sm:$0xff] %v12538_v33  ;;  %v3896_v60 = vpop.f32.mrb[219].mxu1 }
 0x3ce   : > { %14634 = vst [vmem:[#allocation45_spill] sm:$0xff] %v12534_v62 }
 0x3d0   : > { %v9612_v14 = vpop.f32.mrb[204].mxu0 }
 0x3d1   : > { %v12541_v51 = vadd.f32 %v9612_v14, %v12222_v48  ;;  %v3424_v30 = vpop.f32.mrb[205].mxu0 }
 0x3d2   : > { %v12544_v19 = vadd.f32 %v3424_v30, %v12198_v38  ;;  %v9613_v39 = vpop.f32.mrb[206].mxu0  ;;  %v12552_v24 = vpop.f32.mrb[220].mxu1 }
 0x3d3   : > { %14637 = vst [vmem:[#allocation97_spill] sm:$0xff] %v12541_v51  ;;  %v12547_v56 = vadd.f32 %v9613_v39, %v12225_v29  ;;  %v3427_v10 = vpop.f32.mrb[207].mxu0  ;;  %14641 = vst [vmem:[#allocation53_spill] sm:$0xff] %v12552_v24  ;;  %v3901_v62 = vpop.f32.mrb[221].mxu1 }
 0x3d4   : > { %14638 = vst [vmem:[#allocation100_spill] sm:$0xff] %v12544_v19  ;;  %v12550_v44 = vadd.f32 %v3427_v10, %v12201_v47  ;;  %v12554_v0 = vpop.f32.mrb[222].mxu1 }
 0x3d5   : > { %14639 = vst [vmem:[#allocation98_spill] sm:$0xff] %v12547_v56  ;;  %14642 = vst [vmem:[#allocation36_spill] sm:$0xff] %v12554_v0  ;;  %v3904_v48 = vpop.f32.mrb[223].mxu1 }
 0x3d6   : > { %14640 = vst [vmem:[#allocation102_spill] sm:$0xff] %v12550_v44 }
 0x3d8   : > { %v9616_v60 = vpop.f32.mrb[208].mxu0 }
 0x3d9   : > { %v12557_v14 = vadd.f32 %v9616_v60, %v12270_v57  ;;  %v3440_v38 = vpop.f32.mrb[209].mxu0 }
 0x3da   : > { %v12560_v30 = vadd.f32 %v3440_v38, %v12246_v1  ;;  %v9617_v29 = vpop.f32.mrb[210].mxu0  ;;  %v12568_v62 = vpop.f32.mrb[224].mxu1  ;;  %v14650_v38 = vld [vmem:[#allocation65_spill] sm:$0xff] }
 0x3db   : > { %14643 = vst [vmem:[#allocation39_spill] sm:$0xff] %v12557_v14  ;;  %v12563_v39 = vadd.f32 %v9617_v29, %v12273_v42  ;;  %v3443_v47 = vpop.f32.mrb[211].mxu0  ;;  %14647 = vst [vmem:[#allocation62_spill] sm:$0xff] %v12568_v62  ;;  %v3909_v44 = vpop.f32.mrb[225].mxu1  ;;  %v4677_v14 = vlaneseq }
 0x3dc   : > { %14644 = vst [vmem:[#allocation37_spill] sm:$0xff] %v12560_v30  ;;  %v12566_v10 = vadd.f32 %v3443_v47, %v12249_v52  ;;  %v12570_v56 = vpop.f32.mrb[226].mxu1 }
 0x3dd   : > { %14645 = vst [vmem:[#allocation54_spill] sm:$0xff] %v12563_v39  ;;  %14648 = vst [vmem:[#allocation59_spill] sm:$0xff] %v12570_v56  ;;  %v3912_v57 = vpop.f32.mrb[227].mxu1  ;;  %v10366_v39 = vmov 1983009808  }
 0x3de   : > { %14646 = vst [vmem:[#allocation60_spill] sm:$0xff] %v12566_v10  ;;  %v4675_v57 = vunpack.c.l.s4 %v10366_v39 }
 0x3e0   : > { %v9620_v48 = vpop.f32.mrb[212].mxu0 }
 0x3e1   : > { %v12573_v60 = vadd.f32 %v9620_v48, %v12318_v35  ;;  %v3456_v1 = vpop.f32.mrb[213].mxu0 }
 0x3e2   : > { %v12576_v30 = vadd.f32 %v3456_v1, %v14650_v38  ;;  %v9621_v42 = vpop.f32.mrb[214].mxu0  ;;  %v12584_v44 = vpop.f32.mrb[228].mxu1 }
 0x3e3   : > { %14649 = vst [vmem:[#allocation103_spill] sm:$0xff] %v12573_v60  ;;  %v12579_v29 = vadd.f32 %v9621_v42, %v12321_v49  ;;  %v3459_v52 = vpop.f32.mrb[215].mxu0  ;;  %14654 = vst [vmem:[#allocation106_spill] sm:$0xff] %v12584_v44  ;;  %v3917_v10 = vpop.f32.mrb[229].mxu1 }
 0x3e4   : > { %14651 = vst [vmem:[#allocation65_spill] sm:$0xff] %v12576_v30  ;;  %v12582_v47 = vadd.f32 %v3459_v52, %v12297_v20  ;;  %v12586_v35 = vpop.f32.mrb[230].mxu1  ;;  %v12589_v30 = vld [vmem:[#allocation11] ss:$0 sm:$0xff]  ;;  %v4676_v52 = vunpack.c.0.s8 %v4675_v57 }
 0x3e5   : > { %14652 = vst [vmem:[#allocation104_spill] sm:$0xff] %v12579_v29  ;;  %14655 = vst [vmem:[#allocation107_spill] sm:$0xff] %v12586_v35  ;;  %v3920_v60 = vpop.f32.mrb[231].mxu1  ;;  %v12594_v29 = vld [vmem:[#allocation12] ss:$0 sm:$0xff] }
 0x3e6   : > { %14653 = vst [vmem:[#allocation105_spill] sm:$0xff] %v12582_v47  ;;  %v4678_v47 = vshrl.u32 %v4677_v14, 7 }
 0x3e8   : > { %v9640_v48 = vpop.f32.mrb[216].mxu0 }
 0x3e9   : > { %v4093_v1 = vadd.f32 %v9640_v48, %v12354_v61  ;;  %v4084_v38 = vpop.f32.mrb[217].mxu0 }
 0x3ea   : > { %v4085_v49 = vadd.f32 %v4084_v38, %v12336_v22  ;;  %v9641_v42 = vpop.f32.mrb[218].mxu0  ;;  %v12600_v51 = vpop.f32.mrb[232].mxu1 }
 0x3eb   : > { %v4341_v20 = vadd.f32 %v4093_v1, %v12324_v18  ;;  %v4096_v10 = vadd.f32 %v9641_v42, %v12357_v59  ;;  %v4087_v39 = vpop.f32.mrb[219].mxu0  ;;  %14656 = vst [vmem:[#allocation108_spill] sm:$0xff] %v12600_v51  ;;  %v12605_v59 = vsub.s32 %v4676_v52, %v4678_v47  ;;  %v3925_v57 = vpop.f32.mrb[233].mxu1 }
 0x3ec   : > { %v4339_v19 = vadd.f32 %v4085_v49, %v12327_v25  ;;  %v4088_v60 = vadd.f32 %v4087_v39, %v12339_v46  ;;  %v12609_v46 = vpop.f32.mrb[234].mxu1 }
 0x3ed   : > { %v4412_v61 = vmul.f32 %v12589_v30, %v4341_v20  ;;  %v4342_v48 = vadd.f32 %v4096_v10, %v12330_v45  ;;  %14657 = vst [vmem:[#allocation109_spill] sm:$0xff] %v12609_v46 }
 0x3ee   : > { %v4410_v22 = vmul.f32 %v12589_v30, %v4339_v19  ;;  %v4340_v18 = vadd.f32 %v4088_v60, %v12333_v23  ;;  %v3928_v19 = vpop.f32.mrb[235].mxu1 }
 0x3ef   : > { %v4483_v14 = vadd.f32 %v12594_v29, %v4412_v61  ;;  %v4413_v1 = vmul.f32 %v12589_v30, %v4342_v48 }
 0x3f0   : > { %v4481_v25 = vadd.f32 %v12594_v29, %v4410_v22  ;;  %v4411_v38 = vmul.f32 %v12589_v30, %v4340_v18  ;;  %v9644_v45 = vpop.f32.mrb[220].mxu0 }
 0x3f1   : > { %v4547_v49 = vmax.f32 %v4483_v14, 0.0  ;;  %v4484_v42 = vadd.f32 %v12594_v29, %v4413_v1  ;;  %v4109_v23 = vadd.f32 %v9644_v45, %v12389_v40  ;;  %v4100_v20 = vpop.f32.mrb[221].mxu0 }
 0x3f2   : > { %v4545_v47 = vmax.f32 %v4481_v25, 0.0  ;;  %v4482_v52 = vadd.f32 %v12594_v29, %v4411_v38  ;;  %v4101_v10 = vadd.f32 %v4100_v20, %v12372_v5  ;;  %v12616_v39 = vpop.f32.mrb[222].mxu0 }
 0x3f3   : > { %v4707_v60 = vcombine.high %v4547_v49, %v4547_v49  ;;  %v4714_v61 = vrot.slane %v4547_v49, %v12605_v59  ;;  %v12619_v48 = vmax.f32 %v4484_v42, 0.0  ;;  %v12622_v22 = vadd.f32 %v4109_v23, %v12342_v55  ;;  %v12624_v18 = vpop.f32.mrb[223].mxu0  ;;  %v12638_v23 = vpop.f32.mrb[236].mxu1 }
 0x3f4   : > { %v4673_v40 = vcombine.high %v4545_v47, %v4545_v47  ;;  %v4680_v14 = vrot.slane %v4545_v47, %v12605_v59  ;;  %v12627_v57 = vmax.f32 %v4482_v52, 0.0  ;;  %v12630_v1 = vadd.f32 %v4101_v10, %v12345_v28  ;;  %14658 = vst [vmem:[#allocation110_spill] sm:$0xff] %v12638_v23  ;;  %v3933_v10 = vpop.f32.mrb[237].mxu1 }
 0x3f5   : > { %v4721_v5 = vrot.slane %v4707_v60, %v12605_v59  ;;  %v4722_v25 = vcombine.high %v4714_v61, %v4714_v61  ;;  %v6074_v38 = vsel %vm6017_vm13, %v4714_v61, -inf  ;;  %v12642_v45 = vpop.f32.mrb[238].mxu1 }
 0x3f6   : > { %v6075_v55 = vrot.slane %v6074_v38, 4  ;;  %v4687_v49 = vrot.slane %v4673_v40, %v12605_v59  ;;  %v4688_v42 = vcombine.high %v4680_v14, %v4680_v14  ;;  %v6018_v19 = vsel %vm6017_vm13, %v4680_v14, -inf  ;;  %14659 = vst [vmem:[#allocation111_spill] sm:$0xff] %v12642_v45 }
 0x3f7   : > { %v4723_v20 = vcombine.high %v4721_v5, %v4721_v5  ;;  %v6081_v28 = vsel %vm6017_vm13, %v4722_v25, -inf  ;;  %v6088_v47 = vsel %vm6017_vm13, %v4721_v5, -inf  ;;  %v6019_v52 = vrot.slane %v6018_v19, 4  ;;  %v3936_v25 = vpop.f32.mrb[239].mxu1 }
 0x3f8   : > { %v6076_v60 = vmax.f32 %v6074_v38, %v6075_v55  ;;  %v6082_v61 = vrot.slane %v6081_v28, 4  ;;  %v6089_v27 = vrot.slane %v6088_v47, 4  ;;  %v4689_v21 = vcombine.high %v4687_v49, %v4687_v49  ;;  %v12644_v46 = vpop.f32.mrb[224].mxu0 }
 0x3f9   : > { %v6095_v40 = vsel %vm6017_vm13, %v4723_v20, -inf  ;;  %v6020_v14 = vmax.f32 %v6018_v19, %v6019_v52  ;;  %v6025_v51 = vsel %vm6017_vm13, %v4688_v42, -inf  ;;  %v6032_v23 = vsel %vm6017_vm13, %v4687_v49, -inf  ;;  %v12649_v56 = vpop.f32.mrb[225].mxu0 }
 0x3fa   : > { %v6077_v5 = vrot.slane %v6076_v60, 2  ;;  %v6083_v10 = vmax.f32 %v6081_v28, %v6082_v61  ;;  %v6090_v38 = vmax.f32 %v6088_v47, %v6089_v27  ;;  %v6096_v55 = vrot.slane %v6095_v40, 4  ;;  %v12651_v35 = vpop.f32.mrb[226].mxu0  ;;  %v12656_v54 = vpop.f32.mrb[240].mxu1 }
 0x3fb   : > { %v6021_v62 = vrot.slane %v6020_v14, 2  ;;  %v6026_v45 = vrot.slane %v6025_v51, 4  ;;  %v6033_v44 = vrot.slane %v6032_v23, 4  ;;  %v6039_v33 = vsel %vm6017_vm13, %v4689_v21, -inf  ;;  %v12654_v20 = vpop.f32.mrb[227].mxu0  ;;  %14660 = vst [vmem:[#allocation112_spill] sm:$0xff] %v12656_v54 }
 0x3fc   : > { %v6078_v19 = vmax.f32 %v6076_v60, %v6077_v5  ;;  %v6084_v42 = vrot.slane %v6083_v10, 2  ;;  %v6091_v52 = vrot.slane %v6090_v38, 2  ;;  %v6097_v49 = vmax.f32 %v6095_v40, %v6096_v55  ;;  %v3941_v26 = vpop.f32.mrb[241].mxu1 }
 0x3fd   : > { %v6022_v25 = vmax.f32 %v6020_v14, %v6021_v62  ;;  %v6027_v0 = vmax.f32 %v6025_v51, %v6026_v45  ;;  %v6034_v31 = vmax.f32 %v6032_v23, %v6033_v44  ;;  %v6040_v24 = vrot.slane %v6039_v33, 4  ;;  %v12660_v62 = vpop.f32.mrb[242].mxu1 }
 0x3fe   : > { %v6079_v28 = vrot.slane %v6078_v19, 1  ;;  %v6085_v27 = vmax.f32 %v6083_v10, %v6084_v42  ;;  %v6092_v47 = vmax.f32 %v6090_v38, %v6091_v52  ;;  %v6098_v61 = vrot.slane %v6097_v49, 2  ;;  %14661 = vst [vmem:[#allocation113_spill] sm:$0xff] %v12660_v62  ;;  %v3944_v10 = vpop.f32.mrb[243].mxu1 }
 0x3ff   : > { %v6023_v12 = vrot.slane %v6022_v25, 1  ;;  %v6028_v7 = vrot.slane %v6027_v0, 2  ;;  %v6035_v34 = vrot.slane %v6034_v31, 2  ;;  %v6041_v21 = vmax.f32 %v6039_v33, %v6040_v24 }
 0x400   : > { %v12658_v36 = vmax.f32 %v6078_v19, %v6079_v28  ;;  %v6086_v60 = vrot.slane %v6085_v27, 1  ;;  %v6093_v5 = vrot.slane %v6092_v47, 1  ;;  %v6099_v40 = vmax.f32 %v6097_v49, %v6098_v61  ;;  %v12662_v51 = vpop.f32.mrb[228].mxu0 }
 0x401   : > { %14662 = vst [vmem:[#allocation114_spill] sm:$0xff] %v12662_v51  ;;  %v12664_v44 = vmax.f32 %v6022_v25, %v6023_v12  ;;  %v6029_v45 = vmax.f32 %v6027_v0, %v6028_v7  ;;  %v6036_v23 = vmax.f32 %v6034_v31, %v6035_v34  ;;  %v6042_v14 = vrot.slane %v6041_v21, 2  ;;  %v12666_v38 = vpop.f32.mrb[229].mxu0 }
 0x402   : > { %14663 = vst [vmem:[#allocation115_spill] sm:$0xff] %v12666_v38  ;;  %v12668_v55 = vmax.f32 %v6085_v27, %v6086_v60  ;;  %v12670_v26 = vmax.f32 %v6092_v47, %v6093_v5  ;;  %v6100_v33 = vrot.slane %v6099_v40, 1  ;;  %v4731_v24 = vrot.slane %v12619_v48, %v12605_v59  ;;  %v12674_v19 = vpop.f32.mrb[230].mxu0 }
 0x403   : > { %14664 = vst [vmem:[#allocation116_spill] sm:$0xff] %v12674_v19  ;;  %v6030_v42 = vrot.slane %v6029_v45, 1  ;;  %v6037_v52 = vrot.slane %v6036_v23, 1  ;;  %v6043_v12 = vmax.f32 %v6041_v21, %v6042_v14  ;;  %v14665_v7 = vcombine.high %v12619_v48, %v12619_v48  ;;  %v12680_v0 = vpop.f32.mrb[231].mxu0  ;;  %v12695_v14 = vpop.f32.mrb[244].mxu1 }
 0x404   : > { %14666 = vst [vmem:[#allocation117_spill] sm:$0xff] %v12680_v0  ;;  %v12682_v31 = vmax.f32 %v6099_v40, %v6100_v33  ;;  %v4739_v49 = vcombine.high %v4731_v24, %v4731_v24  ;;  %v6102_v25 = vsel %vm6017_vm13, %v4731_v24, -inf  ;;  %v4690_v28 = vcombine.high %v12627_v57, %v12627_v57  ;;  %14667 = vst [vmem:[#allocation118_spill] sm:$0xff] %v12695_v14 }
 0x405   : > { %v4738_v34 = vrot.slane %v14665_v7, %v12605_v59  ;;  %v12687_v27 = vmax.f32 %v6029_v45, %v6030_v42  ;;  %v12689_v47 = vmax.f32 %v6036_v23, %v6037_v52  ;;  %v6044_v61 = vrot.slane %v6043_v12, 1  ;;  %v3949_v23 = vpop.f32.mrb[245].mxu1 }
 0x406   : > { %v6103_v60 = vrot.slane %v6102_v25, 4  ;;  %v6109_v48 = vsel %vm6017_vm13, %v4739_v49, -inf  ;;  %v4697_v40 = vrot.slane %v12627_v57, %v12605_v59  ;;  %v4704_v7 = vrot.slane %v4690_v28, %v12605_v59  ;;  %v12701_v49 = vpop.f32.mrb[246].mxu1 }
 0x407   : > { %v4740_v21 = vcombine.high %v4738_v34, %v4738_v34  ;;  %v6116_v5 = vsel %vm6017_vm13, %v4738_v34, -inf  ;;  %v12697_v10 = vmax.f32 %v6043_v12, %v6044_v61  ;;  %v6110_v33 = vrot.slane %v6109_v48, 4  ;;  %14668 = vst [vmem:[#allocation119_spill] sm:$0xff] %v12701_v49  ;;  %v3952_v61 = vpop.f32.mrb[247].mxu1 }
 0x408   : > { %v6117_v24 = vrot.slane %v6116_v5, 4  ;;  %v6104_v42 = vmax.f32 %v6102_v25, %v6103_v60  ;;  %v4705_v62 = vcombine.high %v4697_v40, %v4697_v40  ;;  %v6046_v57 = vsel %vm6017_vm13, %v4697_v40, -inf }
 0x409   : > { %v6123_v45 = vsel %vm6017_vm13, %v4740_v21, -inf  ;;  %v6111_v34 = vmax.f32 %v6109_v48, %v6110_v33  ;;  %v4416_v12 = vmul.f32 %v12589_v30, %v12622_v22  ;;  %v4706_v0 = vcombine.high %v4704_v7, %v4704_v7 }
 0x40a   : > { %v6124_v52 = vrot.slane %v6123_v45, 4  ;;  %v6118_v54 = vmax.f32 %v6116_v5, %v6117_v24  ;;  %v6105_v14 = vrot.slane %v6104_v42, 2  ;;  %v6047_v21 = vrot.slane %v6046_v57, 4 }
 0x40b   : > { %v6112_v23 = vrot.slane %v6111_v34, 2  ;;  %v6053_v60 = vsel %vm6017_vm13, %v4705_v62, -inf  ;;  %v6060_v28 = vsel %vm6017_vm13, %v4704_v7, -inf  ;;  %v6067_v22 = vsel %vm6017_vm13, %v4706_v0, -inf }
 0x40c   : > { %v6125_v6 = vmax.f32 %v6123_v45, %v6124_v52  ;;  %v6119_v25 = vrot.slane %v6118_v54, 2  ;;  %v6106_v9 = vmax.f32 %v6104_v42, %v6105_v14  ;;  %v6048_v48 = vmax.f32 %v6046_v57, %v6047_v21 }
 0x40d   : > { %v6054_v5 = vrot.slane %v6053_v60, 4  ;;  %v6113_v33 = vmax.f32 %v6111_v34, %v6112_v23  ;;  %v6061_v24 = vrot.slane %v6060_v28, 4  ;;  %v6068_v38 = vrot.slane %v6067_v22, 4 }
 0x40e   : > { %v6126_v49 = vrot.slane %v6125_v6, 2  ;;  %v6120_v40 = vmax.f32 %v6118_v54, %v6119_v25  ;;  %v6107_v61 = vrot.slane %v6106_v9, 1  ;;  %v6049_v45 = vrot.slane %v6048_v48, 2 }
 0x40f   : > { %v6055_v52 = vmax.f32 %v6053_v60, %v6054_v5  ;;  %v6114_v15 = vrot.slane %v6113_v33, 1  ;;  %v6062_v3 = vmax.f32 %v6060_v28, %v6061_v24  ;;  %v6069_v21 = vmax.f32 %v6067_v22, %v6068_v38  ;;  %v12734_v24 = vpop.f32.mrb[248].mxu1 }
 0x410   : > { %v6127_v19 = vmax.f32 %v6125_v6, %v6126_v49  ;;  %v6121_v11 = vrot.slane %v6120_v40, 1  ;;  %v12709_v62 = vmax.f32 %v6106_v9, %v6107_v61  ;;  %v6050_v14 = vmax.f32 %v6048_v48, %v6049_v45  ;;  %14670 = vst [vmem:[#allocation121_spill] sm:$0xff] %v12734_v24 }
 0x411   : > { %v6056_v42 = vrot.slane %v6055_v52, 2  ;;  %v12711_v57 = vmax.f32 %v6113_v33, %v6114_v15  ;;  %v6063_v54 = vrot.slane %v6062_v3, 2  ;;  %v4487_v23 = vadd.f32 %v12594_v29, %v4416_v12 }
 0x412   : > { %v6128_v7 = vrot.slane %v6127_v19, 1  ;;  %v12713_v34 = vmax.f32 %v6120_v40, %v6121_v11  ;;  %v6051_v6 = vrot.slane %v6050_v14, 1  ;;  %v6070_v60 = vrot.slane %v6069_v21, 2 }
 0x413   : > { %v6057_v49 = vmax.f32 %v6055_v52, %v6056_v42  ;;  %v6064_v25 = vmax.f32 %v6062_v3, %v6063_v54  ;;  %v4414_v9 = vmul.f32 %v12589_v30, %v12630_v1  ;;  %v4112_v28 = vadd.f32 %v12616_v39, %v12392_v37  ;;  %v3957_v52 = vpop.f32.mrb[249].mxu1 }
 0x414   : > { %v12715_v0 = vmax.f32 %v6127_v19, %v6128_v7  ;;  %v12722_v15 = vmax.f32 %v6050_v14, %v6051_v6  ;;  %v4551_v48 = vmax.f32 %v4487_v23, 0.0  ;;  %v4104_v38 = vadd.f32 %v12624_v18, %v12374_v8  ;;  %v12726_v19 = vpop.f32.mrb[232].mxu0 }
 0x415   : > { %v6058_v11 = vrot.slane %v6057_v49, 1  ;;  %14669 = vst [vmem:[#allocation120_spill] sm:$0xff] %v12726_v19  ;;  %v6065_v5 = vrot.slane %v6064_v25, 1  ;;  %v6071_v33 = vmax.f32 %v6069_v21, %v6070_v60  ;;  %v4485_v3 = vadd.f32 %v12594_v29, %v4414_v9  ;;  %v12736_v22 = vpop.f32.mrb[233].mxu0 }
 0x416   : > { %v4346_v12 = vadd.f32 %v4112_v28, %v12348_v41  ;;  %v4775_v1 = vcombine.high %v4551_v48, %v4551_v48  ;;  %v4782_v37 = vrot.slane %v4551_v48, %v12605_v59  ;;  %v4344_v39 = vadd.f32 %v4104_v38, %v12351_v16  ;;  %14671 = vst [vmem:[#allocation122_spill] sm:$0xff] %v12736_v22 }
 0x417   : > { %v12730_v40 = vmax.f32 %v6057_v49, %v6058_v11  ;;  %v12738_v8 = vmax.f32 %v6064_v25, %v6065_v5  ;;  %v6072_v18 = vrot.slane %v6071_v33, 1  ;;  %v4549_v61 = vmax.f32 %v4485_v3, 0.0 }
 0x418   : > { %v4417_v45 = vmul.f32 %v12589_v30, %v4346_v12  ;;  %v4789_v41 = vrot.slane %v4775_v1, %v12605_v59  ;;  %v4790_v7 = vcombine.high %v4782_v37, %v4782_v37  ;;  %v6186_v14 = vsel %vm6017_vm13, %v4782_v37, -inf }
 0x419   : > { %v12744_v42 = vmul.f32 %v12589_v30, %v4344_v39  ;;  %v12746_v16 = vmax.f32 %v6071_v33, %v6072_v18  ;;  %v6187_v54 = vrot.slane %v6186_v14, 4  ;;  %v4741_v21 = vcombine.high %v4549_v61, %v4549_v61 }
 0x41a   : > { %v4748_v6 = vrot.slane %v4549_v61, %v12605_v59  ;;  %v4791_v49 = vcombine.high %v4789_v41, %v4789_v41  ;;  %v6193_v23 = vsel %vm6017_vm13, %v4790_v7, -inf  ;;  %v6200_v25 = vsel %vm6017_vm13, %v4789_v41, -inf }
 0x41b   : > { %v4488_v60 = vadd.f32 %v12594_v29, %v4417_v45  ;;  %v6188_v9 = vmax.f32 %v6186_v14, %v6187_v54  ;;  %v6194_v28 = vrot.slane %v6193_v23, 4  ;;  %v6201_v11 = vrot.slane %v6200_v25, 4 }
 0x41c   : > { %v4755_v48 = vrot.slane %v4741_v21, %v12605_v59  ;;  %v6207_v38 = vsel %vm6017_vm13, %v4791_v49, -inf  ;;  %v4756_v5 = vcombine.high %v4748_v6, %v4748_v6  ;;  %v6130_v33 = vsel %vm6017_vm13, %v4748_v6, -inf }
 0x41d   : > { %v12755_v3 = vmax.f32 %v4488_v60, 0.0  ;;  %v6189_v12 = vrot.slane %v6188_v9, 2  ;;  %v6195_v1 = vmax.f32 %v6193_v23, %v6194_v28  ;;  %v6202_v37 = vmax.f32 %v6200_v25, %v6201_v11 }
 0x41e   : > { %v6208_v39 = vrot.slane %v6207_v38, 4  ;;  %v4757_v18 = vcombine.high %v4755_v48, %v4755_v48  ;;  %v6131_v61 = vrot.slane %v6130_v33, 4  ;;  %v6137_v45 = vsel %vm6017_vm13, %v4756_v5, -inf }
 0x41f   : > { %v6144_v52 = vsel %vm6017_vm13, %v4755_v48, -inf  ;;  %v6190_v41 = vmax.f32 %v6188_v9, %v6189_v12  ;;  %v6196_v7 = vrot.slane %v6195_v1, 2  ;;  %v6203_v14 = vrot.slane %v6202_v37, 2 }
 0x420   : > { %v6209_v54 = vmax.f32 %v6207_v38, %v6208_v39  ;;  %v6132_v21 = vmax.f32 %v6130_v33, %v6131_v61  ;;  %v6138_v49 = vrot.slane %v6137_v45, 4  ;;  %v6145_v24 = vrot.slane %v6144_v52, 4 }
 0x421   : > { %v6151_v6 = vsel %vm6017_vm13, %v4757_v18, -inf  ;;  %v6191_v60 = vrot.slane %v6190_v41, 1  ;;  %v6197_v22 = vmax.f32 %v6195_v1, %v6196_v7  ;;  %v6204_v23 = vmax.f32 %v6202_v37, %v6203_v14 }
 0x422   : > { %v6210_v25 = vrot.slane %v6209_v54, 2  ;;  %v6133_v28 = vrot.slane %v6132_v21, 2  ;;  %v6139_v11 = vmax.f32 %v6137_v45, %v6138_v49  ;;  %v6146_v19 = vmax.f32 %v6144_v52, %v6145_v24  ;;  %v12761_v24 = vpop.f32.mrb[234].mxu0 }
 0x423   : > { %v6152_v5 = vrot.slane %v6151_v6, 4  ;;  %v6192_v50 = vmax.f32 %v6190_v41, %v6191_v60  ;;  %v6198_v48 = vrot.slane %v6197_v22, 1  ;;  %v6205_v9 = vrot.slane %v6204_v23, 1 }
 0x424   : > { %v6211_v12 = vmax.f32 %v6209_v54, %v6210_v25  ;;  %v6134_v38 = vmax.f32 %v6132_v21, %v6133_v28  ;;  %v6140_v33 = vrot.slane %v6139_v11, 2  ;;  %v6147_v39 = vrot.slane %v6146_v19, 2 }
 0x425   : > { %v6153_v61 = vmax.f32 %v6151_v6, %v6152_v5  ;;  %v6199_v51 = vmax.f32 %v6197_v22, %v6198_v48  ;;  %v6206_v18 = vmax.f32 %v6204_v23, %v6205_v9  ;;  %v7818_v1 = vmax.f32 %v12658_v36, %v6192_v50 }
 0x426   : > { %v6212_v2 = vrot.slane %v6211_v12, 1  ;;  %v6135_v37 = vrot.slane %v6134_v38, 1  ;;  %v6141_v7 = vmax.f32 %v6139_v11, %v6140_v33  ;;  %v6148_v14 = vmax.f32 %v6146_v19, %v6147_v39 }
 0x427   : > { %v6154_v45 = vrot.slane %v6153_v61, 2  ;;  %v7819_v41 = vmax.f32 %v12668_v55, %v6199_v51  ;;  %v7820_v54 = vmax.f32 %v12670_v26, %v6206_v18  ;;  %v9221_v21 = vpack.c.bf16 %v7818_v1, %v7818_v1 }
 0x428   : > { %v6213_v52 = vmax.f32 %v6211_v12, %v6212_v2  ;;  %v6136_v49 = vmax.f32 %v6134_v38, %v6135_v37  ;;  %v6142_v6 = vrot.slane %v6141_v7, 1  ;;  %v6149_v22 = vrot.slane %v6148_v14, 1 }
 0x429   : > { %v6155_v60 = vmax.f32 %v6153_v61, %v6154_v45  ;;  %v9222_v50 = vpack.c.bf16 %v7819_v41, %v7819_v41  ;;  %v9223_v36 = vpack.c.bf16 %v7820_v54, %v7820_v54  ;;  %v8458_v25 = vunpack.c.l.b16 %v9221_v21 }
 0x42a   : > { %v7821_v23 = vmax.f32 %v12682_v31, %v6213_v52  ;;  %v6143_v19 = vmax.f32 %v6141_v7, %v6142_v6  ;;  %v6150_v28 = vmax.f32 %v6148_v14, %v6149_v22  ;;  %v7810_v5 = vmax.f32 %v12664_v44, %v6136_v49  ;;  %v12777_v7 = vpop.f32.mrb[250].mxu1 }
 0x42b   : > { %v6156_v11 = vrot.slane %v6155_v60, 1  ;;  %v8459_v48 = vunpack.c.l.b16 %v9222_v50  ;;  %v8460_v51 = vunpack.c.l.b16 %v9223_v36  ;;  %v4792_v55 = vcombine.high %v12755_v3, %v12755_v3  ;;  %v3960_v41 = vpop.f32.mrb[251].mxu1 }
 0x42c   : > { %v9224_v2 = vpack.c.bf16 %v7821_v23, %v7821_v23  ;;  %v7811_v9 = vmax.f32 %v12687_v27, %v6143_v19  ;;  %v7812_v12 = vmax.f32 %v12689_v47, %v6150_v28  ;;  %v9213_v31 = vpack.c.bf16 %v7810_v5, %v7810_v5  ;;  %v12779_v27 = vpop.f32.mrb[235].mxu0 }
 0x42d   : > { %v6157_v26 = vmax.f32 %v6155_v60, %v6156_v11  ;;  %v8592_v33 = vsel %vm8578_vm14, %v8459_v48, %v8458_v25  ;;  %v4799_v39 = vrot.slane %v12755_v3, %v12605_v59  ;;  %v4806_v44 = vrot.slane %v4792_v55, %v12605_v59 }
 0x42e   : > { %v8461_v38 = vunpack.c.l.b16 %v9224_v2  ;;  %v8593_v61 = vsel %vm8580_vm15, %v8460_v51, %v8592_v33  ;;  %v9214_v1 = vpack.c.bf16 %v7811_v9, %v7811_v9  ;;  %v9215_v37 = vpack.c.bf16 %v7812_v12, %v7812_v12 }
 0x42f   : > { %v7813_v18 = vmax.f32 %v12697_v10, %v6157_v26  ;;  %v8450_v47 = vunpack.c.l.b16 %v9213_v31  ;;  %v4807_v14 = vcombine.high %v4799_v39, %v4799_v39  ;;  %v4808_v45 = vcombine.high %v4806_v44, %v4806_v44 }
 0x430   : > { %v6214_v52 = vsel %vm6017_vm13, %v4799_v39, -inf  ;;  %v8451_v3 = vunpack.c.l.b16 %v9214_v1  ;;  %v8452_v21 = vunpack.c.l.b16 %v9215_v37  ;;  %v6228_v10 = vsel %vm6017_vm13, %v4806_v44, -inf }
 0x431   : > { %v9216_v54 = vpack.c.bf16 %v7813_v18, %v7813_v18  ;;  %v6215_v49 = vrot.slane %v6214_v52, 4  ;;  %v6221_v6 = vsel %vm6017_vm13, %v4807_v14, -inf  ;;  %v6235_v22 = vsel %vm6017_vm13, %v4808_v45, -inf }
 0x432   : > { %v12786_v60 = vsel %vm8582_vm0, %v8461_v38, %v8593_v61  ;;  %v8579_v50 = vsel %vm8578_vm14, %v8451_v3, %v8450_v47  ;;  %v6222_v25 = vrot.slane %v6221_v6, 4  ;;  %v6229_v28 = vrot.slane %v6228_v10, 4 }
 0x433   : > { %v8453_v23 = vunpack.c.l.b16 %v9216_v54  ;;  %v6216_v36 = vmax.f32 %v6214_v52, %v6215_v49  ;;  %v8581_v19 = vsel %vm8580_vm15, %v8452_v21, %v8579_v50  ;;  %v6236_v11 = vrot.slane %v6235_v22, 4  ;;  %v12810_v49 = vpop.f32.mrb[236].mxu0 }
 0x434   : > { %v4486_v5 = vadd.f32 %v12594_v29, %v12744_v42  ;;  %v6223_v48 = vmax.f32 %v6221_v6, %v6222_v25  ;;  %v4125_v55 = vadd.f32 %v12644_v46, %v12424_v53  ;;  %v6230_v26 = vmax.f32 %v6228_v10, %v6229_v28 }
 0x435   : > { %v6217_v2 = vrot.slane %v6216_v36, 2  ;;  %v12793_v51 = vsel %vm8582_vm0, %v8453_v23, %v8581_v19  ;;  %v6237_v9 = vmax.f32 %v6235_v22, %v6236_v11  ;;  %v4117_v31 = vadd.f32 %v12649_v56, %v12407_v43 }
 0x436   : > { %v4550_v12 = vmax.f32 %v4486_v5, 0.0  ;;  %v6224_v33 = vrot.slane %v6223_v48, 2  ;;  %v4349_v39 = vadd.f32 %v4125_v55, %v12360_v4  ;;  %v12802_v42 = vadd.f32 %v12651_v35, %v12426_v58 }
 0x437   : > { %v6218_v38 = vmax.f32 %v6216_v36, %v6217_v2  ;;  %v6231_v44 = vrot.slane %v6230_v26, 2  ;;  %v6238_v61 = vrot.slane %v6237_v9, 2  ;;  %v4347_v43 = vadd.f32 %v4117_v31, %v12363_v17 }
 0x438   : > { %v4758_v18 = vcombine.high %v4550_v12, %v4550_v12  ;;  %v4765_v53 = vrot.slane %v4550_v12, %v12605_v59  ;;  %v6225_v1 = vmax.f32 %v6223_v48, %v6224_v33  ;;  %v4420_v37 = vmul.f32 %v12589_v30, %v4349_v39 }
 0x439   : > { %v6219_v46 = vrot.slane %v6218_v38, 1  ;;  %v6232_v56 = vmax.f32 %v6230_v26, %v6231_v44  ;;  %v6239_v47 = vmax.f32 %v6237_v9, %v6238_v61 }
 0x43a   : > { %v4772_v4 = vrot.slane %v4758_v18, %v12605_v59  ;;  %v4773_v14 = vcombine.high %v4765_v53, %v4765_v53  ;;  %v6226_v35 = vrot.slane %v6225_v1, 1  ;;  %v6158_v45 = vsel %vm6017_vm13, %v4765_v53, -inf }
 0x43b   : > { %v6220_v58 = vmax.f32 %v6218_v38, %v6219_v46  ;;  %v4491_v52 = vadd.f32 %v12594_v29, %v4420_v37  ;;  %v6233_v41 = vrot.slane %v6232_v56, 1  ;;  %v6240_v54 = vrot.slane %v6239_v47, 1  ;;  %v12822_v37 = vpop.f32.mrb[252].mxu1 }
 0x43c   : > { %v4774_v3 = vcombine.high %v4772_v4, %v4772_v4  ;;  %v6159_v21 = vrot.slane %v6158_v45, 4  ;;  %v6227_v17 = vmax.f32 %v6225_v1, %v6226_v35  ;;  %v6165_v10 = vsel %vm6017_vm13, %v4773_v14, -inf  ;;  %v3965_v35 = vpop.f32.mrb[253].mxu1 }
 0x43d   : > { %v7822_v6 = vmax.f32 %v12709_v62, %v6220_v58  ;;  %v6172_v22 = vsel %vm6017_vm13, %v4772_v4, -inf  ;;  %v6234_v23 = vmax.f32 %v6232_v56, %v6233_v41  ;;  %v6241_v50 = vmax.f32 %v6239_v47, %v6240_v54  ;;  %v12824_v56 = vpop.f32.mrb[237].mxu0 }
 0x43e   : > { %v6160_v36 = vmax.f32 %v6158_v45, %v6159_v21  ;;  %v6166_v25 = vrot.slane %v6165_v10, 4  ;;  %v7823_v19 = vmax.f32 %v12711_v57, %v6227_v17  ;;  %v6173_v11 = vrot.slane %v6172_v22, 4 }
 0x43f   : > { %v9225_v28 = vpack.c.bf16 %v7822_v6, %v7822_v6  ;;  %v6179_v5 = vsel %vm6017_vm13, %v4774_v3, -inf  ;;  %v7824_v2 = vmax.f32 %v12713_v34, %v6234_v23  ;;  %v7825_v48 = vmax.f32 %v12715_v0, %v6241_v50 }
 0x440   : > { %v6161_v62 = vrot.slane %v6160_v36, 2  ;;  %v6167_v55 = vmax.f32 %v6165_v10, %v6166_v25  ;;  %v9226_v26 = vpack.c.bf16 %v7823_v19, %v7823_v19  ;;  %v6174_v12 = vmax.f32 %v6172_v22, %v6173_v11 }
 0x441   : > { %v8462_v9 = vunpack.c.l.b16 %v9225_v28  ;;  %v6180_v31 = vrot.slane %v6179_v5, 4  ;;  %v9227_v38 = vpack.c.bf16 %v7824_v2, %v7824_v2  ;;  %v9228_v33 = vpack.c.bf16 %v7825_v48, %v7825_v48 }
 0x442   : > { %v6162_v39 = vmax.f32 %v6160_v36, %v6161_v62  ;;  %v6168_v44 = vrot.slane %v6167_v55, 2  ;;  %v8463_v57 = vunpack.c.l.b16 %v9226_v26  ;;  %v6175_v18 = vrot.slane %v6174_v12, 2 }
 0x443   : > { %v8595_v61 = vsel %vm8584_vm1, %v8462_v9, %v12786_v60  ;;  %v6181_v53 = vmax.f32 %v6179_v5, %v6180_v31  ;;  %v8464_v34 = vunpack.c.l.b16 %v9227_v38  ;;  %v8465_v46 = vunpack.c.l.b16 %v9228_v33  ;;  %v12842_v31 = vpop.f32.mrb[238].mxu0 }
 0x444   : > { %v6163_v0 = vrot.slane %v6162_v39, 1  ;;  %v6169_v1 = vmax.f32 %v6167_v55, %v6168_v44  ;;  %v8596_v47 = vsel %vm8586_vm2, %v8463_v57, %v8595_v61  ;;  %v6176_v4 = vmax.f32 %v6174_v12, %v6175_v18 }
 0x445   : > { %v6182_v14 = vrot.slane %v6181_v53, 2  ;;  %v4555_v58 = vmax.f32 %v4491_v52, 0.0  ;;  %v8597_v45 = vsel %vm8588_vm4, %v8464_v34, %v8596_v47  ;;  %v4418_v54 = vmul.f32 %v12589_v30, %v4347_v43 }
 0x446   : > { %v6164_v60 = vmax.f32 %v6162_v39, %v6163_v0  ;;  %v6170_v41 = vrot.slane %v6169_v1, 1  ;;  %v8598_v3 = vsel %vm1681_vm3, %v8465_v46, %v8597_v45  ;;  %v6177_v21 = vrot.slane %v6176_v4, 1 }
 0x447   : > { %v6183_v17 = vmax.f32 %v6181_v53, %v6182_v14  ;;  %v4843_v6 = vcombine.high %v4555_v58, %v4555_v58  ;;  %v8698_v10 = vpack.c.b16 %v8598_v3, %v8598_v3  ;;  %v4850_v50 = vrot.slane %v4555_v58, %v12605_v59 }
 0x448   : > { %v6171_v22 = vmax.f32 %v6169_v1, %v6170_v41  ;;  %v7814_v23 = vmax.f32 %v12722_v15, %v6164_v60  ;;  %v6178_v36 = vmax.f32 %v6176_v4, %v6177_v21  ;;  %v4489_v19 = vadd.f32 %v12594_v29, %v4418_v54 }
 0x449   : > { %v6184_v52 = vrot.slane %v6183_v17, 1  ;;  %v4857_v25 = vrot.slane %v4843_v6, %v12605_v59  ;;  %8730 = vst [vmem:[%s12834_s30 + $0x4] sm:$0xf] %v8698_v10  ;;  %v4858_v11 = vcombine.high %v4850_v50, %v4850_v50  ;;  %v6298_v5 = vsel %vm6017_vm13, %v4850_v50, -inf }
 0x44a   : > { %v7815_v43 = vmax.f32 %v12730_v40, %v6171_v22  ;;  %v9217_v28 = vpack.c.bf16 %v7814_v23, %v7814_v23  ;;  %v7816_v15 = vmax.f32 %v12738_v8, %v6178_v36  ;;  %v6299_v62 = vrot.slane %v6298_v5, 4 }
 0x44b   : > { %v6185_v2 = vmax.f32 %v6183_v17, %v6184_v52  ;;  %v4859_v48 = vcombine.high %v4857_v25, %v4857_v25  ;;  %v6305_v9 = vsel %vm6017_vm13, %v4858_v11, -inf  ;;  %v6312_v12 = vsel %vm6017_vm13, %v4857_v25, -inf }
 0x44c   : > { %v9218_v55 = vpack.c.bf16 %v7815_v43, %v7815_v43  ;;  %v8454_v26 = vunpack.c.l.b16 %v9217_v28  ;;  %v9219_v40 = vpack.c.bf16 %v7816_v15, %v7816_v15  ;;  %v6300_v33 = vmax.f32 %v6298_v5, %v6299_v62 }
 0x44d   : > { %v7817_v38 = vmax.f32 %v12746_v16, %v6185_v2  ;;  %v6306_v39 = vrot.slane %v6305_v9, 4  ;;  %v6313_v8 = vrot.slane %v6312_v12, 4  ;;  %v6319_v61 = vsel %vm6017_vm13, %v4859_v48, -inf }
 0x44e   : > { %v8455_v44 = vunpack.c.l.b16 %v9218_v55  ;;  %v8585_v57 = vsel %vm8584_vm1, %v8454_v26, %v12793_v51  ;;  %v8456_v53 = vunpack.c.l.b16 %v9219_v40  ;;  %v6301_v34 = vrot.slane %v6300_v33, 2 }
 0x44f   : > { %v9220_v18 = vpack.c.bf16 %v7817_v38, %v7817_v38  ;;  %v6307_v46 = vmax.f32 %v6305_v9, %v6306_v39  ;;  %v6314_v1 = vmax.f32 %v6312_v12, %v6313_v8  ;;  %v6320_v47 = vrot.slane %v6319_v61, 4 }
 0x450   : > { %v8587_v0 = vsel %vm8586_vm2, %v8455_v44, %v8585_v57  ;;  %v4553_v4 = vmax.f32 %v4489_v19, 0.0  ;;  %v6302_v58 = vmax.f32 %v6300_v33, %v6301_v34  ;;  %v4350_v17 = vadd.f32 %v12802_v42, %v12366_v13 }
 0x451   : > { %v8457_v16 = vunpack.c.l.b16 %v9220_v18  ;;  %v8589_v14 = vsel %vm8588_vm4, %v8456_v53, %v8587_v0  ;;  %v6308_v35 = vrot.slane %v6307_v46, 2  ;;  %v6315_v45 = vrot.slane %v6314_v1, 2  ;;  %v14672_v18 = vld [vmem:[#allocation73_spill] sm:$0xff]  ;;  %v14673_v53 = vld [vmem:[#allocation114_spill] sm:$0xff]  ;;  %v12877_v0 = vpop.f32.mrb[239].mxu0 }
 0x452   : > { %v6321_v51 = vmax.f32 %v6319_v61, %v6320_v47  ;;  %v4809_v60 = vcombine.high %v4553_v4, %v4553_v4  ;;  %v4816_v41 = vrot.slane %v4553_v4, %v12605_v59  ;;  %v6303_v3 = vrot.slane %v6302_v58, 1 }
 0x453   : > { %v8591_v54 = vsel %vm1681_vm3, %v8457_v16, %v8589_v14  ;;  %v6309_v21 = vmax.f32 %v6307_v46, %v6308_v35  ;;  %v6316_v10 = vmax.f32 %v6314_v1, %v6315_v45  ;;  %v4421_v2 = vmul.f32 %v12589_v30, %v4350_v17  ;;  %v12875_v46 = vpop.f32.mrb[254].mxu1 }
 0x454   : > { %v8697_v6 = vpack.c.b16 %v8591_v54, %v8591_v54  ;;  %v6322_v22 = vrot.slane %v6321_v51, 2  ;;  %v4823_v23 = vrot.slane %v4809_v60, %v12605_v59  ;;  %v12855_v50 = vmax.f32 %v6302_v58, %v6303_v3  ;;  %v3968_v16 = vpop.f32.mrb[255].mxu1 }
 0x455   : > { %v6310_v36 = vrot.slane %v6309_v21, 1  ;;  %v4824_v52 = vcombine.high %v4816_v41, %v4816_v41  ;;  %v6242_v25 = vsel %vm6017_vm13, %v4816_v41, -inf  ;;  %v6317_v19 = vrot.slane %v6316_v10, 1  ;;  %v14676_v41 = vld [vmem:[#allocation68_spill] sm:$0xff] }
 0x456   : > { %8729 = vst [vmem:[%s12834_s30] sm:$0xf] %v8697_v6  ;;  %v6323_v43 = vmax.f32 %v6321_v51, %v6322_v22  ;;  %v4825_v28 = vcombine.high %v4823_v23, %v4823_v23  ;;  %v6243_v11 = vrot.slane %v6242_v25, 4  ;;  %v6256_v42 = vsel %vm6017_vm13, %v4823_v23, -inf }
 0x457   : > { %v12859_v5 = vmax.f32 %v6309_v21, %v6310_v36  ;;  %v6249_v13 = vsel %vm6017_vm13, %v4824_v52, -inf  ;;  %v12864_v15 = vmax.f32 %v6316_v10, %v6317_v19  ;;  %v6257_v26 = vrot.slane %v6256_v42, 4 }
 0x458   : > { %v6324_v48 = vrot.slane %v6323_v43, 1  ;;  %v6244_v62 = vmax.f32 %v6242_v25, %v6243_v11  ;;  %v6250_v55 = vrot.slane %v6249_v13, 4  ;;  %v6263_v9 = vsel %vm6017_vm13, %v4825_v28, -inf }
 0x459   : > { %v4492_v12 = vadd.f32 %v12594_v29, %v4421_v2  ;;  %v4120_v38 = vadd.f32 %v12654_v20, %v12409_v63  ;;  %v6264_v44 = vrot.slane %v6263_v9, 4  ;;  %v6258_v57 = vmax.f32 %v6256_v42, %v6257_v26  ;;  %v14674_v63 = vld [vmem:[#allocation57_spill] sm:$0xff]  ;;  %v14675_v20 = vld [vmem:[#allocation115_spill] sm:$0xff] }
 0x45a   : > { %v12870_v40 = vmax.f32 %v6323_v43, %v6324_v48  ;;  %v6245_v33 = vrot.slane %v6244_v62, 2  ;;  %v6251_v39 = vmax.f32 %v6249_v13, %v6250_v55  ;;  %v4141_v34 = vadd.f32 %v14673_v53, %v14672_v18 }
 0x45b   : > { %v4556_v8 = vmax.f32 %v4492_v12, 0.0  ;;  %v4348_v61 = vadd.f32 %v4120_v38, %v12369_v32  ;;  %v6265_v47 = vmax.f32 %v6263_v9, %v6264_v44  ;;  %v4133_v4 = vadd.f32 %v14675_v20, %v14674_v63  ;;  %v12900_v44 = vld [vmem:[#allocation11] ss:$0 sm:$0xff] }
 0x45c   : > { %v6246_v29 = vmax.f32 %v6244_v62, %v6245_v33  ;;  %v6252_v1 = vrot.slane %v6251_v39, 2  ;;  %v6259_v14 = vrot.slane %v6258_v57, 2  ;;  %v4353_v54 = vadd.f32 %v4141_v34, %v14676_v41  ;;  %v12895_v62 = vld [vmem:[#allocation12] ss:$0 sm:$0xff] }
 0x45d   : > { %v4860_v58 = vcombine.high %v4556_v8, %v4556_v8  ;;  %v4867_v35 = vrot.slane %v4556_v8, %v12605_v59  ;;  %v4419_v32 = vmul.f32 %v12589_v30, %v4348_v61  ;;  %v6266_v60 = vrot.slane %v6265_v47, 2  ;;  %v14677_v8 = vld [vmem:[#allocation64_spill] sm:$0xff] }
 0x45e   : > { %v6247_v45 = vrot.slane %v6246_v29, 1  ;;  %v6253_v51 = vmax.f32 %v6251_v39, %v6252_v1  ;;  %v6260_v3 = vmax.f32 %v6258_v57, %v6259_v14  ;;  %v4424_v57 = vmul.f32 %v12900_v44, %v4353_v54  ;;  %v14679_v1 = vld [vmem:[#allocation116_spill] sm:$0xff] }
 0x45f   : > { %v4874_v21 = vrot.slane %v4860_v58, %v12605_v59  ;;  %v4875_v17 = vcombine.high %v4867_v35, %v4867_v35  ;;  %v6326_v6 = vsel %vm6017_vm13, %v4867_v35, -inf  ;;  %v6267_v23 = vmax.f32 %v6265_v47, %v6266_v60 }
 0x460   : > { %v12886_v10 = vmax.f32 %v6246_v29, %v6247_v45  ;;  %v6254_v22 = vrot.slane %v6253_v51, 1  ;;  %v6327_v36 = vrot.slane %v6326_v6, 4  ;;  %v6261_v52 = vrot.slane %v6260_v3, 1  ;;  %v14678_v29 = vld [vmem:[#allocation69_spill] sm:$0xff] }
 0x461   : > { %v4876_v25 = vcombine.high %v4874_v21, %v4874_v21  ;;  %v6333_v30 = vsel %vm6017_vm13, %v4875_v17, -inf  ;;  %v6340_v19 = vsel %vm6017_vm13, %v4874_v21, -inf  ;;  %v6268_v28 = vrot.slane %v6267_v23, 1 }
 0x462   : > { %v12890_v43 = vmax.f32 %v6253_v51, %v6254_v22  ;;  %v6328_v11 = vmax.f32 %v6326_v6, %v6327_v36  ;;  %v6334_v13 = vrot.slane %v6333_v30, 4  ;;  %v12892_v42 = vmax.f32 %v6260_v3, %v6261_v52 }
 0x463   : > { %v6341_v2 = vrot.slane %v6340_v19, 4  ;;  %v6347_v48 = vsel %vm6017_vm13, %v4876_v25, -inf  ;;  %v4490_v55 = vadd.f32 %v12895_v62, %v4419_v32  ;;  %v12898_v26 = vmax.f32 %v6267_v23, %v6268_v28 }
 0x464   : > { %v6329_v9 = vrot.slane %v6328_v11, 2  ;;  %v6335_v12 = vmax.f32 %v6333_v30, %v6334_v13  ;;  %v6348_v38 = vrot.slane %v6347_v48, 4  ;;  %v4351_v61 = vadd.f32 %v4133_v4, %v14677_v8  ;;  %v12924_v8 = vpop.f32.mrb[240].mxu0 }
 0x465   : > { %v6342_v33 = vmax.f32 %v6340_v19, %v6341_v2  ;;  %v4554_v39 = vmax.f32 %v4490_v55, 0.0  ;;  %v4144_v47 = vadd.f32 %v14679_v1, %v14678_v29  ;;  %v4495_v14 = vadd.f32 %v12895_v62, %v4424_v57 }
 0x466   : > { %v6330_v18 = vmax.f32 %v6328_v11, %v6329_v9  ;;  %v6336_v53 = vrot.slane %v6335_v12, 2  ;;  %v6349_v34 = vmax.f32 %v6347_v48, %v6348_v38  ;;  %v4422_v45 = vmul.f32 %v12900_v44, %v4351_v61 }
 0x467   : > { %v6343_v63 = vrot.slane %v6342_v33, 2  ;;  %v4826_v20 = vcombine.high %v4554_v39, %v4554_v39  ;;  %v4833_v16 = vrot.slane %v4554_v39, %v12605_v59  ;;  %v4559_v2 = vmax.f32 %v4495_v14, 0.0 }
 0x468   : > { %v6331_v58 = vrot.slane %v6330_v18, 1  ;;  %v6337_v35 = vmax.f32 %v6335_v12, %v6336_v53  ;;  %v6350_v32 = vrot.slane %v6349_v34, 2  ;;  %v4493_v57 = vadd.f32 %v12895_v62, %v4422_v45 }
 0x469   : > { %v6344_v51 = vmax.f32 %v6342_v33, %v6343_v63  ;;  %v4840_v4 = vrot.slane %v4826_v20, %v12605_v59  ;;  %v4841_v60 = vcombine.high %v4833_v16, %v4833_v16  ;;  %v6270_v41 = vsel %vm6017_vm13, %v4833_v16, -inf }
 0x46a   : > { %v12911_v54 = vmax.f32 %v6330_v18, %v6331_v58  ;;  %v6338_v3 = vrot.slane %v6337_v35, 1  ;;  %v6351_v21 = vmax.f32 %v6349_v34, %v6350_v32  ;;  %v6271_v17 = vrot.slane %v6270_v41, 4  ;;  %v14680_v34 = vld [vmem:[#allocation66_spill] sm:$0xff] }
 0x46b   : > { %v6345_v6 = vrot.slane %v6344_v51, 1  ;;  %v4842_v22 = vcombine.high %v4840_v4, %v4840_v4  ;;  %v6277_v23 = vsel %vm6017_vm13, %v4841_v60, -inf  ;;  %v6284_v36 = vsel %vm6017_vm13, %v4840_v4, -inf }
 0x46c   : > { %v12915_v52 = vmax.f32 %v6337_v35, %v6338_v3  ;;  %v6352_v25 = vrot.slane %v6351_v21, 1  ;;  %v6272_v30 = vmax.f32 %v6270_v41, %v6271_v17  ;;  %v6278_v19 = vrot.slane %v6277_v23, 4 }
 0x46d   : > { %v12917_v28 = vmax.f32 %v6344_v51, %v6345_v6  ;;  %v6285_v11 = vrot.slane %v6284_v36, 4  ;;  %v6291_v13 = vsel %vm6017_vm13, %v4842_v22, -inf  ;;  %v4911_v33 = vcombine.high %v4559_v2, %v4559_v2 }
 0x46e   : > { %v12920_v48 = vmax.f32 %v6351_v21, %v6352_v25  ;;  %v6273_v55 = vrot.slane %v6272_v30, 2  ;;  %v6279_v9 = vmax.f32 %v6277_v23, %v6278_v19  ;;  %v6292_v12 = vrot.slane %v6291_v13, 4 }
 0x46f   : > { %v6286_v38 = vmax.f32 %v6284_v36, %v6285_v11  ;;  %v4918_v39 = vrot.slane %v4559_v2, %v12605_v59  ;;  %v4354_v29 = vadd.f32 %v4144_v47, %v14680_v34  ;;  %v4925_v63 = vrot.slane %v4911_v33, %v12605_v59  ;;  %v12936_v11 = vpop.f32.mrb[0].mxu1 }
 0x470   : > { %v6274_v61 = vmax.f32 %v6272_v30, %v6273_v55  ;;  %v6280_v18 = vrot.slane %v6279_v9, 2  ;;  %v6293_v53 = vmax.f32 %v6291_v13, %v6292_v12  ;;  %14681 = vst [vmem:[#allocation73_spill] sm:$0xff] %v12936_v11  ;;  %v12938_v13 = vpop.f32.mrb[241].mxu0  ;;  %v4557_v12 = vmax.f32 %v4493_v57, 0.0 }
 0x471   : > { %v6287_v1 = vrot.slane %v6286_v38, 2  ;;  %v4926_v20 = vcombine.high %v4918_v39, %v4918_v39  ;;  %v6410_v16 = vsel %vm6017_vm13, %v4918_v39, -inf  ;;  %v4927_v4 = vcombine.high %v4925_v63, %v4925_v63 }
 0x472   : > { %v6275_v14 = vrot.slane %v6274_v61, 1  ;;  %v6281_v58 = vmax.f32 %v6279_v9, %v6280_v18  ;;  %v6294_v35 = vrot.slane %v6293_v53, 2  ;;  %v6411_v32 = vrot.slane %v6410_v16, 4 }
 0x473   : > { %v6288_v51 = vmax.f32 %v6286_v38, %v6287_v1  ;;  %v6417_v45 = vsel %vm6017_vm13, %v4926_v20, -inf  ;;  %v6424_v60 = vsel %vm6017_vm13, %v4925_v63, -inf  ;;  %v6431_v23 = vsel %vm6017_vm13, %v4927_v4, -inf  ;;  %v3973_v38 = vpop.f32.mrb[1].mxu1 }
 0x474   : > { %v12931_v41 = vmax.f32 %v6274_v61, %v6275_v14  ;;  %v6282_v3 = vrot.slane %v6281_v58, 1  ;;  %v6295_v47 = vmax.f32 %v6293_v53, %v6294_v35  ;;  %v6412_v21 = vmax.f32 %v6410_v16, %v6411_v32  ;;  %v14683_v35 = vld [vmem:[#allocation117_spill] sm:$0xff] }
 0x475   : > { %v6289_v17 = vrot.slane %v6288_v51, 1  ;;  %v6418_v6 = vrot.slane %v6417_v45, 4  ;;  %v6425_v22 = vrot.slane %v6424_v60, 4  ;;  %v6432_v19 = vrot.slane %v6431_v23, 4 }
 0x476   : > { %v12934_v36 = vmax.f32 %v6281_v58, %v6282_v3  ;;  %v6296_v25 = vrot.slane %v6295_v47, 1  ;;  %v6413_v30 = vrot.slane %v6412_v21, 2  ;;  %v4425_v18 = vmul.f32 %v12900_v44, %v4354_v29  ;;  %v14682_v58 = vld [vmem:[#allocation63_spill] sm:$0xff] }
 0x477   : > { %v12940_v2 = vmax.f32 %v6288_v51, %v6289_v17  ;;  %v6419_v55 = vmax.f32 %v6417_v45, %v6418_v6  ;;  %v6426_v9 = vmax.f32 %v6424_v60, %v6425_v22  ;;  %v6433_v61 = vmax.f32 %v6431_v23, %v6432_v19 }
 0x478   : > { %v12942_v33 = vmax.f32 %v6295_v47, %v6296_v25  ;;  %v6414_v39 = vmax.f32 %v6412_v21, %v6413_v30  ;;  %v4877_v1 = vcombine.high %v4557_v12, %v4557_v12  ;;  %v4884_v63 = vrot.slane %v4557_v12, %v12605_v59 }
 0x479   : > { %v6420_v53 = vrot.slane %v6419_v55, 2  ;;  %v6427_v34 = vrot.slane %v6426_v9, 2  ;;  %v6434_v16 = vrot.slane %v6433_v61, 2  ;;  %v4496_v14 = vadd.f32 %v12895_v62, %v4425_v18 }
 0x47a   : > { %v6415_v20 = vrot.slane %v6414_v39, 1  ;;  %v12949_v32 = vadd.f32 %v14683_v35, %v14682_v58  ;;  %v4891_v4 = vrot.slane %v4877_v1, %v12605_v59  ;;  %v4892_v45 = vcombine.high %v4884_v63, %v4884_v63  ;;  %v12960_v35 = vpop.f32.mrb[242].mxu0 }
 0x47b   : > { %v6421_v57 = vmax.f32 %v6419_v55, %v6420_v53  ;;  %v6428_v51 = vmax.f32 %v6426_v9, %v6427_v34  ;;  %v6435_v29 = vmax.f32 %v6433_v61, %v6434_v16  ;;  %v6354_v3 = vsel %vm6017_vm13, %v4884_v63, -inf }
 0x47c   : > { %v6416_v60 = vmax.f32 %v6414_v39, %v6415_v20  ;;  %v4560_v47 = vmax.f32 %v4496_v14, 0.0  ;;  %v4893_v6 = vcombine.high %v4891_v4, %v4891_v4  ;;  %v6355_v22 = vrot.slane %v6354_v3, 4 }
 0x47d   : > { %v6422_v21 = vrot.slane %v6421_v57, 1  ;;  %v6429_v17 = vrot.slane %v6428_v51, 1  ;;  %v6436_v23 = vrot.slane %v6435_v29, 1  ;;  %v6361_v30 = vsel %vm6017_vm13, %v4892_v45, -inf }
 0x47e   : > { %v7834_v25 = vmax.f32 %v12855_v50, %v6416_v60  ;;  %v6368_v19 = vsel %vm6017_vm13, %v4891_v4, -inf  ;;  %v6356_v12 = vmax.f32 %v6354_v3, %v6355_v22  ;;  %v6362_v38 = vrot.slane %v6361_v30, 4 }
 0x47f   : > { %v6423_v55 = vmax.f32 %v6421_v57, %v6422_v21  ;;  %v6430_v9 = vmax.f32 %v6428_v51, %v6429_v17  ;;  %v6437_v39 = vmax.f32 %v6435_v29, %v6436_v23  ;;  %v6369_v18 = vrot.slane %v6368_v19, 4 }
 0x480   : > { %v9237_v61 = vpack.c.bf16 %v7834_v25, %v7834_v25  ;;  %v6375_v53 = vsel %vm6017_vm13, %v4893_v6, -inf  ;;  %v6357_v63 = vrot.slane %v6356_v12, 2  ;;  %v6363_v20 = vmax.f32 %v6361_v30, %v6362_v38 }
 0x481   : > { %v7835_v34 = vmax.f32 %v12859_v5, %v6423_v55  ;;  %v7836_v1 = vmax.f32 %v12864_v15, %v6430_v9  ;;  %v7837_v50 = vmax.f32 %v12870_v40, %v6437_v39  ;;  %v6370_v14 = vmax.f32 %v6368_v19, %v6369_v18 }
 0x482   : > { %v8474_v16 = vunpack.c.l.b16 %v9237_v61  ;;  %v6376_v58 = vrot.slane %v6375_v53, 4  ;;  %v6358_v4 = vmax.f32 %v6356_v12, %v6357_v63  ;;  %v6364_v45 = vrot.slane %v6363_v20, 2 }
 0x483   : > { %v9238_v57 = vpack.c.bf16 %v7835_v34, %v7835_v34  ;;  %v9239_v51 = vpack.c.bf16 %v7836_v1, %v7836_v1  ;;  %v9240_v60 = vpack.c.bf16 %v7837_v50, %v7837_v50  ;;  %v6371_v29 = vrot.slane %v6370_v14, 2 }
 0x484   : > { %v6377_v3 = vmax.f32 %v6375_v53, %v6376_v58  ;;  %v4928_v21 = vcombine.high %v4560_v47, %v4560_v47  ;;  %v6359_v15 = vrot.slane %v6358_v4, 1  ;;  %v6365_v6 = vmax.f32 %v6363_v20, %v6364_v45 }
 0x485   : > { %v8475_v5 = vunpack.c.l.b16 %v9238_v57  ;;  %v8476_v17 = vunpack.c.l.b16 %v9239_v51  ;;  %v8477_v22 = vunpack.c.l.b16 %v9240_v60  ;;  %v6372_v23 = vmax.f32 %v6370_v14, %v6371_v29 }
 0x486   : > { %v6378_v40 = vrot.slane %v6377_v3, 2  ;;  %v4935_v25 = vrot.slane %v4560_v47, %v12605_v59  ;;  %v6360_v19 = vmax.f32 %v6358_v4, %v6359_v15  ;;  %v6366_v55 = vrot.slane %v6365_v6, 1 }
 0x487   : > { %v8606_v30 = vsel %vm8578_vm14, %v8475_v5, %v8474_v16  ;;  %v4942_v9 = vrot.slane %v4928_v21, %v12605_v59  ;;  %v6373_v38 = vrot.slane %v6372_v23, 1  ;;  %v12973_v5 = vpop.f32.mrb[2].mxu1 }
 0x488   : > { %v8607_v12 = vsel %vm8580_vm15, %v8476_v17, %v8606_v30  ;;  %v6379_v39 = vmax.f32 %v6377_v3, %v6378_v40  ;;  %v4943_v61 = vcombine.high %v4935_v25, %v4935_v25  ;;  %v6367_v18 = vmax.f32 %v6365_v6, %v6366_v55  ;;  %14684 = vst [vmem:[#allocation114_spill] sm:$0xff] %v12973_v5  ;;  %v12975_v17 = vpop.f32.mrb[243].mxu0  ;;  %v3976_v40 = vpop.f32.mrb[3].mxu1 }
 0x489   : > { %v7826_v53 = vmax.f32 %v12886_v10, %v6360_v19  ;;  %v4944_v34 = vcombine.high %v4942_v9, %v4942_v9  ;;  %v6438_v1 = vsel %vm6017_vm13, %v4935_v25, -inf  ;;  %v6374_v63 = vmax.f32 %v6372_v23, %v6373_v38 }
 0x48a   : > { %v6380_v20 = vrot.slane %v6379_v39, 1  ;;  %v6439_v47 = vrot.slane %v6438_v1, 4  ;;  %v6445_v50 = vsel %vm6017_vm13, %v4943_v61, -inf  ;;  %v7827_v16 = vmax.f32 %v12890_v43, %v6367_v18 }
 0x48b   : > { %v9229_v14 = vpack.c.bf16 %v7826_v53, %v7826_v53  ;;  %v6446_v58 = vrot.slane %v6445_v50, 4  ;;  %v6452_v57 = vsel %vm6017_vm13, %v4942_v9, -inf  ;;  %v7828_v4 = vmax.f32 %v12892_v42, %v6374_v63 }
 0x48c   : > { %v6381_v51 = vmax.f32 %v6379_v39, %v6380_v20  ;;  %v6440_v45 = vmax.f32 %v6438_v1, %v6439_v47  ;;  %v6453_v60 = vrot.slane %v6452_v57, 4  ;;  %v9230_v10 = vpack.c.bf16 %v7827_v16, %v7827_v16 }
 0x48d   : > { %v8466_v29 = vunpack.c.l.b16 %v9229_v14  ;;  %v6447_v3 = vmax.f32 %v6445_v50, %v6446_v58  ;;  %v6459_v21 = vsel %vm6017_vm13, %v4944_v34, -inf  ;;  %v9231_v15 = vpack.c.bf16 %v7828_v4, %v7828_v4  ;;  %v14685_v34 = vld [vmem:[#allocation46_spill] sm:$0xff]  ;;  %v14687_v14 = vld [vmem:[#allocation120_spill] sm:$0xff] }
 0x48e   : > { %v7829_v43 = vmax.f32 %v12898_v26, %v6381_v51  ;;  %v6441_v6 = vrot.slane %v6440_v45, 2  ;;  %v6454_v23 = vmax.f32 %v6452_v57, %v6453_v60  ;;  %v8467_v25 = vunpack.c.l.b16 %v9230_v10  ;;  %v14689_v60 = vld [vmem:[#allocation122_spill] sm:$0xff] }
 0x48f   : > { %v6448_v30 = vrot.slane %v6447_v3, 2  ;;  %v6460_v42 = vrot.slane %v6459_v21, 4  ;;  %v8608_v19 = vsel %vm8582_vm0, %v8477_v22, %v8607_v12  ;;  %v8468_v9 = vunpack.c.l.b16 %v9231_v15  ;;  %v14686_v12 = vld [vmem:[#allocation80_spill] sm:$0xff] }
 0x490   : > { %v9232_v55 = vpack.c.bf16 %v7829_v43, %v7829_v43  ;;  %v6442_v38 = vmax.f32 %v6440_v45, %v6441_v6  ;;  %v6455_v39 = vrot.slane %v6454_v23, 2  ;;  %v8599_v61 = vsel %vm8578_vm14, %v8467_v25, %v8466_v29  ;;  %v14688_v45 = vld [vmem:[#allocation85_spill] sm:$0xff]  ;;  %v14692_v25 = vld [vmem:[#allocation84_spill] sm:$0xff] }
 0x491   : > { %v6449_v18 = vmax.f32 %v6447_v3, %v6448_v30  ;;  %v6461_v53 = vmax.f32 %v6459_v21, %v6460_v42  ;;  %v4352_v26 = vadd.f32 %v12949_v32, %v14685_v34  ;;  %v8600_v63 = vsel %vm8580_vm15, %v8468_v9, %v8599_v61  ;;  %v14690_v21 = vld [vmem:[#allocation42_spill] sm:$0xff] }
 0x492   : > { %v8469_v1 = vunpack.c.l.b16 %v9232_v55  ;;  %v6443_v20 = vrot.slane %v6442_v38, 1  ;;  %v6456_v47 = vmax.f32 %v6454_v23, %v6455_v39  ;;  %v4157_v58 = vadd.f32 %v14687_v14, %v14686_v12  ;;  %v14691_v23 = vld [vmem:[#allocation48_spill] sm:$0xff]  ;;  %v13009_v12 = vpop.f32.mrb[244].mxu0 }
 0x493   : > { %v6450_v50 = vrot.slane %v6449_v18, 1  ;;  %v6462_v16 = vrot.slane %v6461_v53, 2  ;;  %v4423_v22 = vmul.f32 %v12900_v44, %v4352_v26  ;;  %v4149_v32 = vadd.f32 %v14689_v60, %v14688_v45 }
 0x494   : > { %v6444_v57 = vmax.f32 %v6442_v38, %v6443_v20  ;;  %v6457_v51 = vrot.slane %v6456_v47, 1  ;;  %v12987_v4 = vsel %vm8582_vm0, %v8469_v1, %v8600_v63  ;;  %v4357_v43 = vadd.f32 %v4157_v58, %v14690_v21 }
 0x495   : > { %v6451_v10 = vmax.f32 %v6449_v18, %v6450_v50  ;;  %v6463_v29 = vmax.f32 %v6461_v53, %v6462_v16  ;;  %v4494_v3 = vadd.f32 %v12895_v62, %v4423_v22  ;;  %v4355_v40 = vadd.f32 %v4149_v32, %v14691_v23  ;;  %v14693_v53 = vld [vmem:[#allocation43_spill] sm:$0xff] }
 0x496   : > { %v6458_v15 = vmax.f32 %v6456_v47, %v6457_v51  ;;  %v7838_v6 = vmax.f32 %v12911_v54, %v6444_v57  ;;  %v4160_v30 = vadd.f32 %v12761_v24, %v14692_v25  ;;  %v4428_v38 = vmul.f32 %v12900_v44, %v4357_v43 }
 0x497   : > { %v6464_v42 = vrot.slane %v6463_v29, 1  ;;  %v7839_v55 = vmax.f32 %v12915_v52, %v6451_v10  ;;  %v4558_v9 = vmax.f32 %v4494_v3, 0.0  ;;  %v4426_v18 = vmul.f32 %v12900_v44, %v4355_v40 }
 0x498   : > { %v7840_v39 = vmax.f32 %v12917_v28, %v6458_v15  ;;  %v9241_v61 = vpack.c.bf16 %v7838_v6, %v7838_v6  ;;  %v13002_v34 = vadd.f32 %v4160_v30, %v14693_v53  ;;  %v4499_v52 = vadd.f32 %v12895_v62, %v4428_v38 }
 0x499   : > { %v6465_v54 = vmax.f32 %v6463_v29, %v6464_v42  ;;  %v9242_v26 = vpack.c.bf16 %v7839_v55, %v7839_v55  ;;  %v4894_v1 = vcombine.high %v4558_v9, %v4558_v9  ;;  %v4901_v63 = vrot.slane %v4558_v9, %v12605_v59  ;;  %v13014_v29 = vpop.f32.mrb[4].mxu1 }
 0x49a   : > { %v9243_v24 = vpack.c.bf16 %v7840_v39, %v7840_v39  ;;  %v8478_v20 = vunpack.c.l.b16 %v9241_v61  ;;  %v4497_v47 = vadd.f32 %v12895_v62, %v4426_v18  ;;  %v4563_v51 = vmax.f32 %v4499_v52, 0.0 }
 0x49b   : > { %v7841_v50 = vmax.f32 %v12920_v48, %v6465_v54  ;;  %v8479_v28 = vunpack.c.l.b16 %v9242_v26  ;;  %v4908_v16 = vrot.slane %v4894_v1, %v12605_v59  ;;  %v4909_v22 = vcombine.high %v4901_v63, %v4901_v63  ;;  %v13016_v48 = vpop.f32.mrb[245].mxu0 }
 0x49c   : > { %v8480_v14 = vunpack.c.l.b16 %v9243_v24  ;;  %v8609_v58 = vsel %vm8584_vm1, %v8478_v20, %v8608_v19  ;;  %v6382_v57 = vsel %vm6017_vm13, %v4901_v63, -inf  ;;  %v4979_v15 = vcombine.high %v4563_v51, %v4563_v51  ;;  %v3981_v19 = vpop.f32.mrb[5].mxu1 }
 0x49d   : > { %v9244_v45 = vpack.c.bf16 %v7841_v50, %v7841_v50  ;;  %v8610_v60 = vsel %vm8586_vm2, %v8479_v28, %v8609_v58  ;;  %v4910_v32 = vcombine.high %v4908_v16, %v4908_v16  ;;  %v6383_v10 = vrot.slane %v6382_v57, 4 }
 0x49e   : > { %v8611_v3 = vsel %vm8588_vm4, %v8480_v14, %v8610_v60  ;;  %v6389_v21 = vsel %vm6017_vm13, %v4909_v22, -inf  ;;  %v6396_v43 = vsel %vm6017_vm13, %v4908_v16, -inf  ;;  %v4986_v42 = vrot.slane %v4563_v51, %v12605_v59 }
 0x49f   : > { %v8481_v6 = vunpack.c.l.b16 %v9244_v45  ;;  %v6384_v23 = vmax.f32 %v6382_v57, %v6383_v10  ;;  %v6390_v40 = vrot.slane %v6389_v21, 4  ;;  %v6397_v25 = vrot.slane %v6396_v43, 4 }
 0x4a0   : > { %v6403_v30 = vsel %vm6017_vm13, %v4910_v32, -inf  ;;  %v4993_v55 = vrot.slane %v4979_v15, %v12605_v59  ;;  %v13024_v9 = vmax.f32 %v4497_v47, 0.0  ;;  %v4994_v26 = vcombine.high %v4986_v42, %v4986_v42 }
 0x4a1   : > { %v8612_v38 = vsel %vm1681_vm3, %v8481_v6, %v8611_v3  ;;  %v6385_v39 = vrot.slane %v6384_v23, 2  ;;  %v6391_v61 = vmax.f32 %v6389_v21, %v6390_v40  ;;  %v6398_v18 = vmax.f32 %v6396_v43, %v6397_v25  ;;  %v13032_v40 = vpop.f32.mrb[246].mxu0 }
 0x4a2   : > { %v8700_v53 = vpack.c.b16 %v8612_v38, %v8612_v38  ;;  %v6404_v54 = vrot.slane %v6403_v30, 4  ;;  %v4995_v1 = vcombine.high %v4993_v55, %v4993_v55  ;;  %v6522_v52 = vsel %vm6017_vm13, %v4986_v42, -inf }
 0x4a3   : > { %v6386_v63 = vmax.f32 %v6384_v23, %v6385_v39  ;;  %v6392_v24 = vrot.slane %v6391_v61, 2  ;;  %v6399_v20 = vrot.slane %v6398_v18, 2  ;;  %v6523_v28 = vrot.slane %v6522_v52, 4 }
 0x4a4   : > { %8732 = vst [vmem:[%s12834_s30 + $0xc] sm:$0xf] %v8700_v53  ;;  %v6405_v50 = vmax.f32 %v6403_v30, %v6404_v54  ;;  %v6529_v47 = vsel %vm6017_vm13, %v4994_v26, -inf  ;;  %v6536_v16 = vsel %vm6017_vm13, %v4993_v55, -inf  ;;  %v6543_v32 = vsel %vm6017_vm13, %v4995_v1, -inf }
 0x4a5   : > { %v6387_v22 = vrot.slane %v6386_v63, 1  ;;  %v6393_v14 = vmax.f32 %v6391_v61, %v6392_v24  ;;  %v6400_v58 = vmax.f32 %v6398_v18, %v6399_v20  ;;  %v6530_v57 = vrot.slane %v6529_v47, 4 }
 0x4a6   : > { %v6406_v51 = vrot.slane %v6405_v50, 2  ;;  %v6524_v45 = vmax.f32 %v6522_v52, %v6523_v28  ;;  %v6537_v60 = vrot.slane %v6536_v16, 4  ;;  %v6544_v23 = vrot.slane %v6543_v32, 4 }
 0x4a7   : > { %v6388_v10 = vmax.f32 %v6386_v63, %v6387_v22  ;;  %v6394_v3 = vrot.slane %v6393_v14, 1  ;;  %v6401_v21 = vrot.slane %v6400_v58, 1  ;;  %v6531_v43 = vmax.f32 %v6529_v47, %v6530_v57 }
 0x4a8   : > { %v6407_v15 = vmax.f32 %v6405_v50, %v6406_v51  ;;  %v6525_v19 = vrot.slane %v6524_v45, 2  ;;  %v6538_v6 = vmax.f32 %v6536_v16, %v6537_v60  ;;  %v6545_v18 = vmax.f32 %v6543_v32, %v6544_v23 }
 0x4a9   : > { %v6395_v25 = vmax.f32 %v6393_v14, %v6394_v3  ;;  %v6402_v30 = vmax.f32 %v6400_v58, %v6401_v21  ;;  %v7830_v42 = vmax.f32 %v12931_v41, %v6388_v10  ;;  %v6532_v55 = vrot.slane %v6531_v43, 2 }
 0x4aa   : > { %v6408_v38 = vrot.slane %v6407_v15, 1  ;;  %v6526_v39 = vmax.f32 %v6524_v45, %v6525_v19  ;;  %v6539_v61 = vrot.slane %v6538_v6, 2  ;;  %v6546_v52 = vrot.slane %v6545_v18, 2 }
 0x4ab   : > { %v7831_v53 = vmax.f32 %v12934_v36, %v6395_v25  ;;  %v7832_v54 = vmax.f32 %v12940_v2, %v6402_v30  ;;  %v9233_v26 = vpack.c.bf16 %v7830_v42, %v7830_v42  ;;  %v6533_v1 = vmax.f32 %v6531_v43, %v6532_v55  ;;  %v14694_v43 = vld [vmem:[#allocation95_spill] sm:$0xff] }
 0x4ac   : > { %v6409_v63 = vmax.f32 %v6407_v15, %v6408_v38  ;;  %v6527_v24 = vrot.slane %v6526_v39, 1  ;;  %v6540_v20 = vmax.f32 %v6538_v6, %v6539_v61  ;;  %v6547_v58 = vmax.f32 %v6545_v18, %v6546_v52 }
 0x4ad   : > { %v9234_v50 = vpack.c.bf16 %v7831_v53, %v7831_v53  ;;  %v9235_v28 = vpack.c.bf16 %v7832_v54, %v7832_v54  ;;  %v8470_v47 = vunpack.c.l.b16 %v9233_v26  ;;  %v6534_v16 = vrot.slane %v6533_v1, 1 }
 0x4ae   : > { %v7833_v41 = vmax.f32 %v12942_v33, %v6409_v63  ;;  %v13038_v22 = vmax.f32 %v6526_v39, %v6527_v24  ;;  %v6541_v14 = vrot.slane %v6540_v20, 1  ;;  %v6548_v32 = vrot.slane %v6547_v58, 1 }
 0x4af   : > { %v8471_v57 = vunpack.c.l.b16 %v9234_v50  ;;  %v8472_v36 = vunpack.c.l.b16 %v9235_v28  ;;  %v8602_v2 = vsel %vm8584_vm1, %v8470_v47, %v12987_v4  ;;  %v13042_v51 = vmax.f32 %v6533_v1, %v6534_v16 }
 0x4b0   : > { %v9236_v45 = vpack.c.bf16 %v7833_v41, %v7833_v41  ;;  %v13044_v60 = vmax.f32 %v6540_v20, %v6541_v14  ;;  %v4945_v10 = vcombine.high %v13024_v9, %v13024_v9  ;;  %v4952_v3 = vrot.slane %v13024_v9, %v12605_v59  ;;  %v14695_v9 = vld [vmem:[#allocation70_spill] sm:$0xff]  ;;  %v14696_v14 = vld [vmem:[#allocation40_spill] sm:$0xff] }
 0x4b1   : > { %v8603_v33 = vsel %vm8586_vm2, %v8471_v57, %v8602_v2  ;;  %v4429_v21 = vmul.f32 %v12900_v44, %v13002_v34  ;;  %v4152_v4 = vadd.f32 %v12779_v27, %v14694_v43  ;;  %v13056_v6 = vmax.f32 %v6547_v58, %v6548_v32  ;;  %v13073_v32 = vpop.f32.mrb[6].mxu1 }
 0x4b2   : > { %v8473_v15 = vunpack.c.l.b16 %v9236_v45  ;;  %v8604_v19 = vsel %vm8588_vm4, %v8472_v36, %v8603_v33  ;;  %v4959_v23 = vrot.slane %v4945_v10, %v12605_v59  ;;  %v4960_v25 = vcombine.high %v4952_v3, %v4952_v3  ;;  %14697 = vst [vmem:[#allocation57_spill] sm:$0xff] %v13073_v32  ;;  %v13075_v10 = vpop.f32.mrb[247].mxu0 }
 0x4b3   : > { %v6466_v30 = vsel %vm6017_vm13, %v4952_v3, -inf  ;;  %v4500_v42 = vadd.f32 %v12895_v62, %v4429_v21  ;;  %v4356_v55 = vadd.f32 %v4152_v4, %v14695_v9  ;;  %v4173_v58 = vadd.f32 %v12810_v49, %v14696_v14  ;;  %v3984_v4 = vpop.f32.mrb[7].mxu1 }
 0x4b4   : > { %v8605_v34 = vsel %vm1681_vm3, %v8473_v15, %v8604_v19  ;;  %v4961_v38 = vcombine.high %v4959_v23, %v4959_v23  ;;  %v6467_v39 = vrot.slane %v6466_v30, 4  ;;  %v6480_v27 = vsel %vm6017_vm13, %v4959_v23, -inf }
 0x4b5   : > { %v8699_v61 = vpack.c.b16 %v8605_v34, %v8605_v34  ;;  %v6473_v18 = vsel %vm6017_vm13, %v4960_v25, -inf  ;;  %v6481_v53 = vrot.slane %v6480_v27, 4  ;;  %v4564_v54 = vmax.f32 %v4500_v42, 0.0 }
 0x4b6   : > { %v6468_v26 = vmax.f32 %v6466_v30, %v6467_v39  ;;  %v6474_v1 = vrot.slane %v6473_v18, 4  ;;  %v6487_v63 = vsel %vm6017_vm13, %v4961_v38, -inf  ;;  %v4427_v24 = vmul.f32 %v12900_v44, %v4356_v55 }
 0x4b7   : > { %8731 = vst [vmem:[%s12834_s30 + $0x8] sm:$0xf] %v8699_v61  ;;  %v6482_v20 = vmax.f32 %v6480_v27, %v6481_v53  ;;  %v6488_v52 = vrot.slane %v6487_v63, 4  ;;  %v4996_v50 = vcombine.high %v4564_v54, %v4564_v54  ;;  %v5003_v28 = vrot.slane %v4564_v54, %v12605_v59 }
 0x4b8   : > { %v6469_v47 = vrot.slane %v6468_v26, 2  ;;  %v6475_v16 = vmax.f32 %v6473_v18, %v6474_v1  ;;  %v4498_v41 = vadd.f32 %v12895_v62, %v4427_v24 }
 0x4b9   : > { %v6483_v57 = vrot.slane %v6482_v20, 2  ;;  %v6489_v36 = vmax.f32 %v6487_v63, %v6488_v52  ;;  %v5010_v2 = vrot.slane %v4996_v50, %v12605_v59  ;;  %v5011_v45 = vcombine.high %v5003_v28, %v5003_v28 }
 0x4ba   : > { %v6470_v33 = vmax.f32 %v6468_v26, %v6469_v47  ;;  %v6476_v3 = vrot.slane %v6475_v16, 2  ;;  %v6550_v21 = vsel %vm6017_vm13, %v5003_v28, -inf  ;;  %v4562_v43 = vmax.f32 %v4498_v41, 0.0 }
 0x4bb   : > { %v6484_v15 = vmax.f32 %v6482_v20, %v6483_v57  ;;  %v6490_v19 = vrot.slane %v6489_v36, 2  ;;  %v5012_v23 = vcombine.high %v5010_v2, %v5010_v2  ;;  %v6551_v25 = vrot.slane %v6550_v21, 4 }
 0x4bc   : > { %v6471_v49 = vrot.slane %v6470_v33, 1  ;;  %v6477_v30 = vmax.f32 %v6475_v16, %v6476_v3  ;;  %v6557_v42 = vsel %vm6017_vm13, %v5011_v45, -inf  ;;  %v6564_v9 = vsel %vm6017_vm13, %v5010_v2, -inf  ;;  %v14698_v2 = vld [vmem:[#allocation71_spill] sm:$0xff] }
 0x4bd   : > { %v6485_v55 = vrot.slane %v6484_v15, 1  ;;  %v6491_v34 = vmax.f32 %v6489_v36, %v6490_v19  ;;  %v6552_v38 = vmax.f32 %v6550_v21, %v6551_v25  ;;  %v6558_v39 = vrot.slane %v6557_v42, 4 }
 0x4be   : > { %v13080_v27 = vmax.f32 %v6470_v33, %v6471_v49  ;;  %v6478_v61 = vrot.slane %v6477_v30, 1  ;;  %v6565_v18 = vrot.slane %v6564_v9, 4  ;;  %v6571_v53 = vsel %vm6017_vm13, %v5012_v23, -inf }
 0x4bf   : > { %v13083_v54 = vmax.f32 %v6484_v15, %v6485_v55  ;;  %v6492_v26 = vrot.slane %v6491_v34, 1  ;;  %v6553_v1 = vrot.slane %v6552_v38, 2  ;;  %v6559_v63 = vmax.f32 %v6557_v42, %v6558_v39 }
 0x4c0   : > { %v13085_v24 = vmax.f32 %v6477_v30, %v6478_v61  ;;  %v6566_v20 = vmax.f32 %v6564_v9, %v6565_v18  ;;  %v6572_v52 = vrot.slane %v6571_v53, 4  ;;  %v4962_v50 = vcombine.high %v4562_v43, %v4562_v43 }
 0x4c1   : > { %v13087_v28 = vmax.f32 %v6491_v34, %v6492_v26  ;;  %v6554_v47 = vmax.f32 %v6552_v38, %v6553_v1  ;;  %v6560_v16 = vrot.slane %v6559_v63, 2  ;;  %v4969_v41 = vrot.slane %v4562_v43, %v12605_v59  ;;  %v13097_v38 = vpop.f32.mrb[248].mxu0 }
 0x4c2   : > { %v6567_v14 = vrot.slane %v6566_v20, 2  ;;  %v6573_v57 = vmax.f32 %v6571_v53, %v6572_v52  ;;  %v4976_v36 = vrot.slane %v4962_v50, %v12605_v59  ;;  %v4361_v45 = vadd.f32 %v4173_v58, %v14698_v2  ;;  %v14700_v2 = vld [vmem:[#allocation94_spill] sm:$0xff] }
 0x4c3   : > { %v6555_v33 = vrot.slane %v6554_v47, 1  ;;  %v6561_v3 = vmax.f32 %v6559_v63, %v6560_v16  ;;  %v4977_v21 = vcombine.high %v4969_v41, %v4969_v41  ;;  %v6494_v4 = vsel %vm6017_vm13, %v4969_v41, -inf  ;;  %v14699_v16 = vld [vmem:[#allocation91_spill] sm:$0xff] }
 0x4c4   : > { %v6568_v15 = vmax.f32 %v6566_v20, %v6567_v14  ;;  %v6574_v19 = vrot.slane %v6573_v57, 2  ;;  %v4978_v23 = vcombine.high %v4976_v36, %v4976_v36  ;;  %v6495_v25 = vrot.slane %v6494_v4, 4 }
 0x4c5   : > { %v13093_v49 = vmax.f32 %v6554_v47, %v6555_v33  ;;  %v6562_v30 = vrot.slane %v6561_v3, 1  ;;  %v6501_v43 = vsel %vm6017_vm13, %v4977_v21, -inf  ;;  %v6508_v42 = vsel %vm6017_vm13, %v4976_v36, -inf }
 0x4c6   : > { %v6569_v9 = vrot.slane %v6568_v15, 1  ;;  %v6575_v55 = vmax.f32 %v6573_v57, %v6574_v19  ;;  %v6496_v34 = vmax.f32 %v6494_v4, %v6495_v25  ;;  %v6502_v58 = vrot.slane %v6501_v43, 4  ;;  %v14701_v4 = vld [vmem:[#allocation55_spill] sm:$0xff] }
 0x4c7   : > { %v13099_v39 = vmax.f32 %v6561_v3, %v6562_v30  ;;  %v6509_v61 = vrot.slane %v6508_v42, 4  ;;  %v6515_v18 = vsel %vm6017_vm13, %v4978_v23, -inf  ;;  %v4432_v53 = vmul.f32 %v12900_v44, %v4361_v45  ;;  %v14702_v25 = vld [vmem:[#allocation51_spill] sm:$0xff] }
 0x4c8   : > { %v13103_v26 = vmax.f32 %v6568_v15, %v6569_v9  ;;  %v6576_v1 = vrot.slane %v6575_v55, 1  ;;  %v6497_v63 = vrot.slane %v6496_v34, 2  ;;  %v6503_v20 = vmax.f32 %v6501_v43, %v6502_v58  ;;  %v14703_v43 = vld [vmem:[#allocation50_spill] sm:$0xff] }
 0x4c9   : > { %v6510_v52 = vmax.f32 %v6508_v42, %v6509_v61  ;;  %v6516_v50 = vrot.slane %v6515_v18, 4  ;;  %v4503_v47 = vadd.f32 %v12895_v62, %v4432_v53  ;;  %v4165_v41 = vadd.f32 %v12824_v56, %v14699_v16 }
 0x4ca   : > { %v13108_v14 = vmax.f32 %v6575_v55, %v6576_v1  ;;  %v6498_v57 = vmax.f32 %v6496_v34, %v6497_v63  ;;  %v6504_v36 = vrot.slane %v6503_v20, 2  ;;  %v4176_v33 = vadd.f32 %v12842_v31, %v14700_v2 }
 0x4cb   : > { %v6511_v45 = vrot.slane %v6510_v52, 2  ;;  %v6517_v3 = vmax.f32 %v6515_v18, %v6516_v50  ;;  %v4567_v21 = vmax.f32 %v4503_v47, 0.0  ;;  %v4359_v15 = vadd.f32 %v4165_v41, %v14701_v4 }
 0x4cc   : > { %v6499_v19 = vrot.slane %v6498_v57, 1  ;;  %v6505_v23 = vmax.f32 %v6503_v20, %v6504_v36  ;;  %v4362_v30 = vadd.f32 %v4176_v33, %v14702_v25  ;;  %v13116_v42 = vadd.f32 %v12877_v0, %v14703_v43 }
 0x4cd   : > { %v6512_v56 = vmax.f32 %v6510_v52, %v6511_v45  ;;  %v6518_v9 = vrot.slane %v6517_v3, 2  ;;  %v5047_v55 = vcombine.high %v4567_v21, %v4567_v21  ;;  %v5054_v34 = vrot.slane %v4567_v21, %v12605_v59 }
 0x4ce   : > { %v13119_v58 = vmax.f32 %v6498_v57, %v6499_v19  ;;  %v6506_v31 = vrot.slane %v6505_v23, 1  ;;  %v4430_v61 = vmul.f32 %v12900_v44, %v4359_v15  ;;  %v4433_v18 = vmul.f32 %v12900_v44, %v4362_v30  ;;  %v13137_v19 = vpop.f32.mrb[8].mxu1 }
 0x4cf   : > { %v6513_v53 = vrot.slane %v6512_v56, 1  ;;  %v6519_v1 = vmax.f32 %v6517_v3, %v6518_v9  ;;  %v5061_v63 = vrot.slane %v5047_v55, %v12605_v59  ;;  %v5062_v20 = vcombine.high %v5054_v34, %v5054_v34  ;;  %14704 = vst [vmem:[#allocation115_spill] sm:$0xff] %v13137_v19 }
 0x4d0   : > { %v13124_v50 = vmax.f32 %v6505_v23, %v6506_v31  ;;  %v6634_v0 = vsel %vm6017_vm13, %v5054_v34, -inf  ;;  %v4501_v52 = vadd.f32 %v12895_v62, %v4430_v61  ;;  %v4504_v47 = vadd.f32 %v12895_v62, %v4433_v18  ;;  %v13139_v62 = vpop.f32.mrb[249].mxu0 }
 0x4d1   : > { %v13129_v16 = vmax.f32 %v6512_v56, %v6513_v53  ;;  %v6520_v41 = vrot.slane %v6519_v1, 1  ;;  %v5063_v57 = vcombine.high %v5061_v63, %v5061_v63  ;;  %v6635_v36 = vrot.slane %v6634_v0, 4  ;;  %v3989_v56 = vpop.f32.mrb[9].mxu1 }
 0x4d2   : > { %v6641_v44 = vsel %vm6017_vm13, %v5062_v20, -inf  ;;  %v6648_v2 = vsel %vm6017_vm13, %v5061_v63, -inf  ;;  %v4565_v33 = vmax.f32 %v4501_v52, 0.0  ;;  %v13133_v45 = vmax.f32 %v4504_v47, 0.0 }
 0x4d3   : > { %v13135_v3 = vmax.f32 %v6519_v1, %v6520_v41  ;;  %v6636_v21 = vmax.f32 %v6634_v0, %v6635_v36  ;;  %v6642_v4 = vrot.slane %v6641_v44, 4  ;;  %v6649_v15 = vrot.slane %v6648_v2, 4 }
 0x4d4   : > { %v6655_v23 = vsel %vm6017_vm13, %v5063_v57, -inf  ;;  %v5013_v25 = vcombine.high %v4565_v33, %v4565_v33  ;;  %v5020_v30 = vrot.slane %v4565_v33, %v12605_v59  ;;  %v5064_v43 = vcombine.high %v13133_v45, %v13133_v45 }
 0x4d5   : > { %v6637_v9 = vrot.slane %v6636_v21, 2  ;;  %v6643_v55 = vmax.f32 %v6641_v44, %v6642_v4  ;;  %v6650_v34 = vmax.f32 %v6648_v2, %v6649_v15  ;;  %v6656_v31 = vrot.slane %v6655_v23, 4 }
 0x4d6   : > { %v5027_v61 = vrot.slane %v5013_v25, %v12605_v59  ;;  %v5028_v18 = vcombine.high %v5020_v30, %v5020_v30  ;;  %v6578_v53 = vsel %vm6017_vm13, %v5020_v30, -inf  ;;  %v13149_v1 = vrot.slane %v13133_v45, %v12605_v59 }
 0x4d7   : > { %v6638_v63 = vmax.f32 %v6636_v21, %v6637_v9  ;;  %v6644_v20 = vrot.slane %v6643_v55, 2  ;;  %v6651_v0 = vrot.slane %v6650_v34, 2  ;;  %v6657_v52 = vmax.f32 %v6655_v23, %v6656_v31 }
 0x4d8   : > { %v5029_v47 = vcombine.high %v5027_v61, %v5027_v61  ;;  %v6579_v41 = vrot.slane %v6578_v53, 4  ;;  %v6585_v57 = vsel %vm6017_vm13, %v5028_v18, -inf  ;;  %v6592_v36 = vsel %vm6017_vm13, %v5027_v61, -inf }
 0x4d9   : > { %v6639_v44 = vrot.slane %v6638_v63, 1  ;;  %v6645_v2 = vmax.f32 %v6643_v55, %v6644_v20  ;;  %v6652_v33 = vmax.f32 %v6650_v34, %v6651_v0  ;;  %v6658_v4 = vrot.slane %v6657_v52, 2 }
 0x4da   : > { %v6580_v15 = vmax.f32 %v6578_v53, %v6579_v41  ;;  %v6586_v25 = vrot.slane %v6585_v57, 4  ;;  %v6593_v30 = vrot.slane %v6592_v36, 4  ;;  %v6599_v45 = vsel %vm6017_vm13, %v5029_v47, -inf }
 0x4db   : > { %v6640_v56 = vmax.f32 %v6638_v63, %v6639_v44  ;;  %v6646_v21 = vrot.slane %v6645_v2, 1  ;;  %v6653_v9 = vrot.slane %v6652_v33, 1  ;;  %v6659_v19 = vmax.f32 %v6657_v52, %v6658_v4 }
 0x4dc   : > { %v6581_v23 = vrot.slane %v6580_v15, 2  ;;  %v6587_v31 = vmax.f32 %v6585_v57, %v6586_v25  ;;  %v6594_v5 = vmax.f32 %v6592_v36, %v6593_v30  ;;  %v6600_v32 = vrot.slane %v6599_v45, 4 }
 0x4dd   : > { %v6647_v18 = vmax.f32 %v6645_v2, %v6646_v21  ;;  %v6654_v11 = vmax.f32 %v6652_v33, %v6653_v9  ;;  %v6660_v61 = vrot.slane %v6659_v19, 1  ;;  %v7850_v55 = vmax.f32 %v13038_v22, %v6640_v56  ;;  %v13158_v22 = vpop.f32.mrb[250].mxu0 }
 0x4de   : > { %v6582_v34 = vmax.f32 %v6580_v15, %v6581_v23  ;;  %v6588_v20 = vrot.slane %v6587_v31, 2  ;;  %v6595_v53 = vrot.slane %v6594_v5, 2  ;;  %v6601_v0 = vmax.f32 %v6599_v45, %v6600_v32 }
 0x4df   : > { %v6661_v41 = vmax.f32 %v6659_v19, %v6660_v61  ;;  %v7851_v47 = vmax.f32 %v13042_v51, %v6647_v18  ;;  %v7852_v63 = vmax.f32 %v13044_v60, %v6654_v11  ;;  %v9253_v44 = vpack.c.bf16 %v7850_v55, %v7850_v55 }
 0x4e0   : > { %v6583_v52 = vrot.slane %v6582_v34, 1  ;;  %v6589_v4 = vmax.f32 %v6587_v31, %v6588_v20  ;;  %v6596_v57 = vmax.f32 %v6594_v5, %v6595_v53  ;;  %v6602_v36 = vrot.slane %v6601_v0, 2 }
 0x4e1   : > { %v7853_v2 = vmax.f32 %v13056_v6, %v6661_v41  ;;  %v9254_v33 = vpack.c.bf16 %v7851_v47, %v7851_v47  ;;  %v9255_v25 = vpack.c.bf16 %v7852_v63, %v7852_v63  ;;  %v8490_v30 = vunpack.c.l.b16 %v9253_v44  ;;  %v13172_v47 = vpop.f32.mrb[10].mxu1  ;;  %v13174_v63 = vpop.f32.mrb[251].mxu0 }
 0x4e2   : > { %v6584_v15 = vmax.f32 %v6582_v34, %v6583_v52  ;;  %v6590_v56 = vrot.slane %v6589_v4, 1  ;;  %v6597_v32 = vrot.slane %v6596_v57, 1  ;;  %v6603_v19 = vmax.f32 %v6601_v0, %v6602_v36  ;;  %14705 = vst [vmem:[#allocation68_spill] sm:$0xff] %v13172_v47 }
 0x4e3   : > { %v9256_v45 = vpack.c.bf16 %v7853_v2, %v7853_v2  ;;  %v8491_v51 = vunpack.c.l.b16 %v9254_v33  ;;  %v8492_v21 = vunpack.c.l.b16 %v9255_v25  ;;  %v5078_v11 = vrot.slane %v5064_v43, %v12605_v59 }
 0x4e4   : > { %v6591_v60 = vmax.f32 %v6589_v4, %v6590_v56  ;;  %v6598_v9 = vmax.f32 %v6596_v57, %v6597_v32  ;;  %v6604_v5 = vrot.slane %v6603_v19, 1  ;;  %v7842_v23 = vmax.f32 %v13080_v27, %v6584_v15 }
 0x4e5   : > { %v8493_v6 = vunpack.c.l.b16 %v9256_v45  ;;  %v8620_v31 = vsel %vm8578_vm14, %v8491_v51, %v8490_v30  ;;  %v5079_v18 = vcombine.high %v13149_v1, %v13149_v1  ;;  %v5080_v61 = vcombine.high %v5078_v11, %v5078_v11 }
 0x4e6   : > { %v8621_v55 = vsel %vm8580_vm15, %v8492_v21, %v8620_v31  ;;  %v6605_v34 = vmax.f32 %v6603_v19, %v6604_v5  ;;  %v7843_v20 = vmax.f32 %v13085_v24, %v6591_v60  ;;  %v7844_v53 = vmax.f32 %v13083_v54, %v6598_v9  ;;  %v3992_v24 = vpop.f32.mrb[11].mxu1 }
 0x4e7   : > { %v9245_v43 = vpack.c.bf16 %v7842_v23, %v7842_v23  ;;  %v6662_v0 = vsel %vm6017_vm13, %v13149_v1, -inf  ;;  %v6669_v27 = vsel %vm6017_vm13, %v5079_v18, -inf  ;;  %v6676_v41 = vsel %vm6017_vm13, %v5078_v11, -inf  ;;  %v14706_v11 = vld [vmem:[#allocation56_spill] sm:$0xff] }
 0x4e8   : > { %v7845_v44 = vmax.f32 %v13087_v28, %v6605_v34  ;;  %v9246_v52 = vpack.c.bf16 %v7843_v20, %v7843_v20  ;;  %v9247_v4 = vpack.c.bf16 %v7844_v53, %v7844_v53  ;;  %v6663_v57 = vrot.slane %v6662_v0, 4  ;;  %v14710_v24 = vld [vmem:[#allocation36_spill] sm:$0xff] }
 0x4e9   : > { %v8482_v36 = vunpack.c.l.b16 %v9245_v43  ;;  %v6670_v54 = vrot.slane %v6669_v27, 4  ;;  %v6677_v2 = vrot.slane %v6676_v41, 4  ;;  %v6683_v33 = vsel %vm6017_vm13, %v5080_v61, -inf  ;;  %v13183_v61 = vld [vmem:[#allocation11] ss:$0 sm:$0xff] }
 0x4ea   : > { %v9248_v1 = vpack.c.bf16 %v7845_v44, %v7845_v44  ;;  %v8483_v25 = vunpack.c.l.b16 %v9246_v52  ;;  %v8484_v30 = vunpack.c.l.b16 %v9247_v4  ;;  %v6664_v15 = vmax.f32 %v6662_v0, %v6663_v57  ;;  %v13193_v44 = vld [vmem:[#allocation12] ss:$0 sm:$0xff]  ;;  %v14709_v4 = vld [vmem:[#allocation52_spill] sm:$0xff] }
 0x4eb   : > { %v6671_v56 = vmax.f32 %v6669_v27, %v6670_v54  ;;  %v6678_v32 = vmax.f32 %v6676_v41, %v6677_v2  ;;  %v6684_v19 = vrot.slane %v6683_v33, 4  ;;  %v8622_v45 = vsel %vm8582_vm0, %v8493_v6, %v8621_v55  ;;  %v14707_v6 = vld [vmem:[#allocation53_spill] sm:$0xff] }
 0x4ec   : > { %v8485_v51 = vunpack.c.l.b16 %v9248_v1  ;;  %v8613_v28 = vsel %vm8578_vm14, %v8483_v25, %v8482_v36  ;;  %v6665_v21 = vrot.slane %v6664_v15, 2  ;;  %v4360_v60 = vadd.f32 %v13116_v42, %v14706_v11  ;;  %v14708_v42 = vld [vmem:[#allocation41_spill] sm:$0xff] }
 0x4ed   : > { %v8614_v9 = vsel %vm8580_vm15, %v8484_v30, %v8613_v28  ;;  %v6672_v5 = vrot.slane %v6671_v56, 2  ;;  %v6679_v23 = vrot.slane %v6678_v32, 2  ;;  %v6685_v31 = vmax.f32 %v6683_v33, %v6684_v19 }
 0x4ee   : > { %v6666_v18 = vmax.f32 %v6664_v15, %v6665_v21  ;;  %v4431_v34 = vmul.f32 %v13183_v61, %v4360_v60  ;;  %v13187_v20 = vsel %vm8582_vm0, %v8485_v51, %v8614_v9  ;;  %v4189_v55 = vadd.f32 %v12924_v8, %v14707_v6  ;;  %v14711_v8 = vld [vmem:[#allocation79_spill] sm:$0xff]  ;;  %v13208_v9 = vpop.f32.mrb[252].mxu0 }
 0x4ef   : > { %v6673_v53 = vmax.f32 %v6671_v56, %v6672_v5  ;;  %v6680_v43 = vmax.f32 %v6678_v32, %v6679_v23  ;;  %v6686_v0 = vrot.slane %v6685_v31, 2  ;;  %v4181_v27 = vadd.f32 %v12938_v13, %v14708_v42  ;;  %v14712_v13 = vld [vmem:[#allocation76_spill] sm:$0xff] }
 0x4f0   : > { %v6667_v41 = vrot.slane %v6666_v18, 1  ;;  %v4502_v52 = vadd.f32 %v13193_v44, %v4431_v34  ;;  %v4365_v57 = vadd.f32 %v4189_v55, %v14709_v4  ;;  %v4192_v36 = vadd.f32 %v12960_v35, %v14710_v24 }
 0x4f1   : > { %v6674_v54 = vrot.slane %v6673_v53, 1  ;;  %v6681_v2 = vrot.slane %v6680_v43, 1  ;;  %v6687_v33 = vmax.f32 %v6685_v31, %v6686_v0  ;;  %v4363_v1 = vadd.f32 %v4181_v27, %v14711_v8 }
 0x4f2   : > { %v6668_v25 = vmax.f32 %v6666_v18, %v6667_v41  ;;  %v4566_v30 = vmax.f32 %v4502_v52, 0.0  ;;  %v4436_v15 = vmul.f32 %v13183_v61, %v4365_v57  ;;  %v13202_v56 = vadd.f32 %v4192_v36, %v14712_v13 }
 0x4f3   : > { %v6675_v32 = vmax.f32 %v6673_v53, %v6674_v54  ;;  %v6682_v19 = vmax.f32 %v6680_v43, %v6681_v2  ;;  %v6688_v51 = vrot.slane %v6687_v33, 1  ;;  %v4434_v28 = vmul.f32 %v13183_v61, %v4363_v1 }
 0x4f4   : > { %v7854_v21 = vmax.f32 %v13093_v49, %v6668_v25  ;;  %v5030_v35 = vcombine.high %v4566_v30, %v4566_v30  ;;  %v5037_v11 = vrot.slane %v4566_v30, %v12605_v59  ;;  %v4507_v60 = vadd.f32 %v13193_v44, %v4436_v15 }
 0x4f5   : > { %v6689_v5 = vmax.f32 %v6687_v33, %v6688_v51  ;;  %v7855_v23 = vmax.f32 %v13099_v39, %v6675_v32  ;;  %v7856_v31 = vmax.f32 %v13103_v26, %v6682_v19  ;;  %v4505_v18 = vadd.f32 %v13193_v44, %v4434_v28  ;;  %v13222_v19 = vpop.f32.mrb[12].mxu1  ;;  %v13224_v51 = vpop.f32.mrb[253].mxu0 }
 0x4f6   : > { %v9257_v34 = vpack.c.bf16 %v7854_v21, %v7854_v21  ;;  %v5044_v6 = vrot.slane %v5030_v35, %v12605_v59  ;;  %v5045_v55 = vcombine.high %v5037_v11, %v5037_v11  ;;  %v6606_v49 = vsel %vm6017_vm13, %v5037_v11, -inf  ;;  %v3997_v11 = vpop.f32.mrb[13].mxu1 }
 0x4f7   : > { %v7857_v53 = vmax.f32 %v13108_v14, %v6689_v5  ;;  %v9258_v43 = vpack.c.bf16 %v7855_v23, %v7855_v23  ;;  %v9259_v0 = vpack.c.bf16 %v7856_v31, %v7856_v31  ;;  %v6607_v42 = vrot.slane %v6606_v49, 4 }
 0x4f8   : > { %v8494_v27 = vunpack.c.l.b16 %v9257_v34  ;;  %v5046_v41 = vcombine.high %v5044_v6, %v5044_v6  ;;  %v6613_v52 = vsel %vm6017_vm13, %v5045_v55, -inf  ;;  %v6620_v39 = vsel %vm6017_vm13, %v5044_v6, -inf }
 0x4f9   : > { %v9260_v26 = vpack.c.bf16 %v7857_v53, %v7857_v53  ;;  %v8495_v4 = vunpack.c.l.b16 %v9258_v43  ;;  %v8496_v57 = vunpack.c.l.b16 %v9259_v0  ;;  %v6608_v24 = vmax.f32 %v6606_v49, %v6607_v42 }
 0x4fa   : > { %v8623_v36 = vsel %vm8584_vm1, %v8494_v27, %v8622_v45  ;;  %v6614_v54 = vrot.slane %v6613_v52, 4  ;;  %v6621_v2 = vrot.slane %v6620_v39, 4  ;;  %v6627_v33 = vsel %vm6017_vm13, %v5046_v41, -inf }
 0x4fb   : > { %v8497_v14 = vunpack.c.l.b16 %v9260_v26  ;;  %v8624_v8 = vsel %vm8586_vm2, %v8495_v4, %v8623_v36  ;;  %v6609_v1 = vrot.slane %v6608_v24, 2  ;;  %v6628_v25 = vrot.slane %v6627_v33, 4 }
 0x4fc   : > { %v8625_v30 = vsel %vm8588_vm4, %v8496_v57, %v8624_v8  ;;  %v6615_v15 = vmax.f32 %v6613_v52, %v6614_v54  ;;  %v6622_v13 = vmax.f32 %v6620_v39, %v6621_v2  ;;  %v4571_v32 = vmax.f32 %v4507_v60, 0.0 }
 0x4fd   : > { %v8626_v45 = vsel %vm1681_vm3, %v8497_v14, %v8625_v30  ;;  %v6610_v28 = vmax.f32 %v6608_v24, %v6609_v1  ;;  %v6629_v21 = vmax.f32 %v6627_v33, %v6628_v25  ;;  %v4569_v35 = vmax.f32 %v4505_v18, 0.0  ;;  %v13235_v25 = vpop.f32.mrb[254].mxu0 }
 0x4fe   : > { %v8702_v5 = vpack.c.b16 %v8626_v45, %v8626_v45  ;;  %v6616_v23 = vrot.slane %v6615_v15, 2  ;;  %v6623_v31 = vrot.slane %v6622_v13, 2  ;;  %v5115_v34 = vcombine.high %v4571_v32, %v4571_v32 }
 0x4ff   : > { %v6611_v6 = vrot.slane %v6610_v28, 1  ;;  %v6630_v55 = vrot.slane %v6629_v21, 2  ;;  %v5122_v49 = vrot.slane %v4571_v32, %v12605_v59  ;;  %v5081_v60 = vcombine.high %v4569_v35, %v4569_v35 }
 0x500   : > { %8734 = vst [vmem:[%s12834_s30 + $0x14] sm:$0xf] %v8702_v5  ;;  %v6617_v53 = vmax.f32 %v6615_v15, %v6616_v23  ;;  %v6624_v43 = vmax.f32 %v6622_v13, %v6623_v31  ;;  %v5129_v0 = vrot.slane %v5115_v34, %v12605_v59  ;;  %v5088_v42 = vrot.slane %v4569_v35, %v12605_v59 }
 0x501   : > { %v6612_v27 = vmax.f32 %v6610_v28, %v6611_v6  ;;  %v6631_v41 = vmax.f32 %v6629_v21, %v6630_v55  ;;  %v5130_v18 = vcombine.high %v5122_v49, %v5122_v49  ;;  %v6746_v52 = vsel %vm6017_vm13, %v5122_v49, -inf }
 0x502   : > { %v6618_v39 = vrot.slane %v6617_v53, 1  ;;  %v6625_v26 = vrot.slane %v6624_v43, 1  ;;  %v5131_v4 = vcombine.high %v5129_v0, %v5129_v0  ;;  %v6747_v57 = vrot.slane %v6746_v52, 4 }
 0x503   : > { %v6632_v24 = vrot.slane %v6631_v41, 1  ;;  %v7846_v36 = vmax.f32 %v13119_v58, %v6612_v27  ;;  %v6753_v54 = vsel %vm6017_vm13, %v5130_v18, -inf  ;;  %v6760_v2 = vsel %vm6017_vm13, %v5129_v0, -inf }
 0x504   : > { %v6619_v33 = vmax.f32 %v6617_v53, %v6618_v39  ;;  %v6626_v14 = vmax.f32 %v6624_v43, %v6625_v26  ;;  %v6748_v8 = vmax.f32 %v6746_v52, %v6747_v57  ;;  %v6754_v1 = vrot.slane %v6753_v54, 4 }
 0x505   : > { %v6633_v30 = vmax.f32 %v6631_v41, %v6632_v24  ;;  %v9249_v15 = vpack.c.bf16 %v7846_v36, %v7846_v36  ;;  %v6761_v13 = vrot.slane %v6760_v2, 4  ;;  %v6767_v32 = vsel %vm6017_vm13, %v5131_v4, -inf }
 0x506   : > { %v7847_v45 = vmax.f32 %v13124_v50, %v6619_v33  ;;  %v7848_v28 = vmax.f32 %v13129_v16, %v6626_v14  ;;  %v6749_v58 = vrot.slane %v6748_v8, 2  ;;  %v6755_v21 = vmax.f32 %v6753_v54, %v6754_v1 }
 0x507   : > { %v7849_v35 = vmax.f32 %v13135_v3, %v6633_v30  ;;  %v8486_v11 = vunpack.c.l.b16 %v9249_v15  ;;  %v6762_v5 = vmax.f32 %v6760_v2, %v6761_v13  ;;  %v6768_v23 = vrot.slane %v6767_v32, 4 }
 0x508   : > { %v9250_v31 = vpack.c.bf16 %v7847_v45, %v7847_v45  ;;  %v9251_v34 = vpack.c.bf16 %v7848_v28, %v7848_v28  ;;  %v6750_v6 = vmax.f32 %v6748_v8, %v6749_v58  ;;  %v6756_v55 = vrot.slane %v6755_v21, 2 }
 0x509   : > { %v9252_v49 = vpack.c.bf16 %v7849_v35, %v7849_v35  ;;  %v8616_v53 = vsel %vm8584_vm1, %v8486_v11, %v13187_v20  ;;  %v6763_v43 = vrot.slane %v6762_v5, 2  ;;  %v6769_v0 = vmax.f32 %v6767_v32, %v6768_v23 }
 0x50a   : > { %v8487_v50 = vunpack.c.l.b16 %v9250_v31  ;;  %v8488_v27 = vunpack.c.l.b16 %v9251_v34  ;;  %v6751_v16 = vrot.slane %v6750_v6, 1  ;;  %v6757_v41 = vmax.f32 %v6755_v21, %v6756_v55  ;;  %v14713_v31 = vld [vmem:[#allocation99_spill] sm:$0xff] }
 0x50b   : > { %v8489_v18 = vunpack.c.l.b16 %v9252_v49  ;;  %v6764_v52 = vmax.f32 %v6762_v5, %v6763_v43  ;;  %v6770_v3 = vrot.slane %v6769_v0, 2  ;;  %v5095_v39 = vrot.slane %v5081_v60, %v12605_v59 }
 0x50c   : > { %v8617_v26 = vsel %vm8586_vm2, %v8487_v50, %v8616_v53  ;;  %v13245_v4 = vmax.f32 %v6750_v6, %v6751_v16  ;;  %v6758_v57 = vrot.slane %v6757_v41, 1  ;;  %v5096_v24 = vcombine.high %v5088_v42, %v5088_v42  ;;  %v14714_v6 = vld [vmem:[#allocation106_spill] sm:$0xff]  ;;  %v13269_v50 = vpop.f32.mrb[14].mxu1 }
 0x50d   : > { %v8618_v36 = vsel %vm8588_vm4, %v8488_v27, %v8617_v26  ;;  %v6765_v20 = vrot.slane %v6764_v52, 1  ;;  %v6771_v54 = vmax.f32 %v6769_v0, %v6770_v3  ;;  %v5097_v2 = vcombine.high %v5095_v39, %v5095_v39  ;;  %v14715_v0 = vld [vmem:[#allocation62_spill] sm:$0xff]  ;;  %14716 = vst [vmem:[#allocation64_spill] sm:$0xff] %v13269_v50  ;;  %v13271_v27 = vpop.f32.mrb[255].mxu0 }
 0x50e   : > { %v8619_v33 = vsel %vm1681_vm3, %v8489_v18, %v8618_v36  ;;  %v13249_v14 = vmax.f32 %v6757_v41, %v6758_v57  ;;  %v6690_v8 = vsel %vm6017_vm13, %v5088_v42, -inf  ;;  %v6697_v60 = vsel %vm6017_vm13, %v5096_v24, -inf  ;;  %v14717_v18 = vld [vmem:[#allocation61_spill] sm:$0xff]  ;;  %v14718_v3 = vld [vmem:[#allocation58_spill] sm:$0xff] }
 0x50f   : > { %v8701_v1 = vpack.c.b16 %v8619_v33, %v8619_v33  ;;  %v13253_v30 = vmax.f32 %v6764_v52, %v6765_v20  ;;  %v6772_v15 = vrot.slane %v6771_v54, 1  ;;  %v6691_v13 = vrot.slane %v6690_v8, 4  ;;  %v14719_v24 = vld [vmem:[#allocation82_spill] sm:$0xff] }
 0x510   : > { %v6698_v32 = vrot.slane %v6697_v60, 4  ;;  %v6704_v45 = vsel %vm6017_vm13, %v5095_v39, -inf  ;;  %v6711_v28 = vsel %vm6017_vm13, %v5097_v2, -inf  ;;  %v4437_v58 = vmul.f32 %v13183_v61, %v13202_v56 }
 0x511   : > { %8733 = vst [vmem:[%s12834_s30 + $0x10] sm:$0xf] %v8701_v1  ;;  %v13260_v21 = vmax.f32 %v6771_v54, %v6772_v15  ;;  %v6692_v35 = vmax.f32 %v6690_v8, %v6691_v13  ;;  %v6705_v42 = vrot.slane %v6704_v45, 4  ;;  %v6712_v11 = vrot.slane %v6711_v28, 4 }
 0x512   : > { %v6699_v5 = vmax.f32 %v6697_v60, %v6698_v32  ;;  %v4508_v23 = vadd.f32 %v13193_v44, %v4437_v58  ;;  %v4184_v34 = vadd.f32 %v12975_v17, %v14713_v31  ;;  %v4205_v55 = vadd.f32 %v13009_v12, %v14714_v6  ;;  %v4000_v17 = vpop.f32.mrb[15].mxu1 }
 0x513   : > { %v6693_v49 = vrot.slane %v6692_v35, 2  ;;  %v6706_v53 = vmax.f32 %v6704_v45, %v6705_v42  ;;  %v6713_v43 = vmax.f32 %v6711_v28, %v6712_v11  ;;  %v4197_v56 = vadd.f32 %v13016_v48, %v14715_v0 }
 0x514   : > { %v6700_v16 = vrot.slane %v6699_v5, 2  ;;  %v4572_v41 = vmax.f32 %v4508_v23, 0.0  ;;  %v4364_v52 = vadd.f32 %v4184_v34, %v14717_v18  ;;  %v4369_v39 = vadd.f32 %v4205_v55, %v14718_v3 }
 0x515   : > { %v6694_v26 = vmax.f32 %v6692_v35, %v6693_v49  ;;  %v6707_v57 = vrot.slane %v6706_v53, 2  ;;  %v6714_v12 = vrot.slane %v6713_v43, 2  ;;  %v4367_v36 = vadd.f32 %v4197_v56, %v14719_v24 }
 0x516   : > { %v6701_v20 = vmax.f32 %v6699_v5, %v6700_v16  ;;  %v5132_v54 = vcombine.high %v4572_v41, %v4572_v41  ;;  %v5139_v48 = vrot.slane %v4572_v41, %v12605_v59  ;;  %v4435_v2 = vmul.f32 %v13183_v61, %v4364_v52 }
 0x517   : > { %v6695_v33 = vrot.slane %v6694_v26, 1  ;;  %v6708_v8 = vmax.f32 %v6706_v53, %v6707_v57  ;;  %v6715_v60 = vmax.f32 %v6713_v43, %v6714_v12  ;;  %v4440_v1 = vmul.f32 %v13183_v61, %v4369_v39 }
 0x518   : > { %v6702_v15 = vrot.slane %v6701_v20, 1  ;;  %v5146_v13 = vrot.slane %v5132_v54, %v12605_v59  ;;  %v5147_v32 = vcombine.high %v5139_v48, %v5139_v48  ;;  %v6774_v45 = vsel %vm6017_vm13, %v5139_v48, -inf }
 0x519   : > { %v13281_v28 = vmax.f32 %v6694_v26, %v6695_v33  ;;  %v6709_v58 = vrot.slane %v6708_v8, 1  ;;  %v6716_v35 = vrot.slane %v6715_v60, 1  ;;  %v6775_v42 = vrot.slane %v6774_v45, 4  ;;  %v14720_v26 = vld [vmem:[#allocation107_spill] sm:$0xff] }
 0x51a   : > { %v13283_v11 = vmax.f32 %v6701_v20, %v6702_v15  ;;  %v5148_v5 = vcombine.high %v5146_v13, %v5146_v13  ;;  %v6781_v23 = vsel %vm6017_vm13, %v5147_v32, -inf  ;;  %v6788_v31 = vsel %vm6017_vm13, %v5146_v13, -inf }
 0x51b   : > { %v13287_v34 = vmax.f32 %v6708_v8, %v6709_v58  ;;  %v13289_v6 = vmax.f32 %v6715_v60, %v6716_v35  ;;  %v6776_v55 = vmax.f32 %v6774_v45, %v6775_v42  ;;  %v6782_v49 = vrot.slane %v6781_v23, 4 }
 0x51c   : > { %v6789_v53 = vrot.slane %v6788_v31, 4  ;;  %v6795_v43 = vsel %vm6017_vm13, %v5148_v5, -inf  ;;  %v4506_v0 = vadd.f32 %v13193_v44, %v4435_v2  ;;  %v4511_v56 = vadd.f32 %v13193_v44, %v4440_v1 }
 0x51d   : > { %v6777_v16 = vrot.slane %v6776_v55, 2  ;;  %v6783_v41 = vmax.f32 %v6781_v23, %v6782_v49  ;;  %v6796_v18 = vrot.slane %v6795_v43, 4  ;;  %v4438_v52 = vmul.f32 %v13183_v61, %v4367_v36 }
 0x51e   : > { %v6790_v3 = vmax.f32 %v6788_v31, %v6789_v53  ;;  %v4570_v39 = vmax.f32 %v4506_v0, 0.0  ;;  %v4575_v17 = vmax.f32 %v4511_v56, 0.0  ;;  %v13297_v57 = vadd.f32 %v13032_v40, %v14720_v26 }
 0x51f   : > { %v6778_v12 = vmax.f32 %v6776_v55, %v6777_v16  ;;  %v6784_v24 = vrot.slane %v6783_v41, 2  ;;  %v6797_v20 = vmax.f32 %v6795_v43, %v6796_v18  ;;  %v13300_v54 = vadd.f32 %v13193_v44, %v4438_v52 }
 0x520   : > { %v6791_v48 = vrot.slane %v6790_v3, 2  ;;  %v5098_v2 = vcombine.high %v4570_v39, %v4570_v39  ;;  %v5105_v33 = vrot.slane %v4570_v39, %v12605_v59  ;;  %v5183_v8 = vcombine.high %v4575_v17, %v4575_v17 }
 0x521   : > { %v6779_v60 = vrot.slane %v6778_v12, 1  ;;  %v6785_v36 = vmax.f32 %v6783_v41, %v6784_v24  ;;  %v6798_v1 = vrot.slane %v6797_v20, 2  ;;  %v5190_v15 = vrot.slane %v4575_v17, %v12605_v59 }
 0x522   : > { %v6792_v13 = vmax.f32 %v6790_v3, %v6791_v48  ;;  %v5112_v40 = vrot.slane %v5098_v2, %v12605_v59  ;;  %v5113_v32 = vcombine.high %v5105_v33, %v5105_v33  ;;  %v6718_v45 = vsel %vm6017_vm13, %v5105_v33, -inf  ;;  %v13316_v3 = vpop.f32.mrb[0].mxu0 }
 0x523   : > { %v13306_v58 = vmax.f32 %v6778_v12, %v6779_v60  ;;  %v6786_v35 = vrot.slane %v6785_v36, 1  ;;  %v6799_v42 = vmax.f32 %v6797_v20, %v6798_v1  ;;  %v6719_v5 = vrot.slane %v6718_v45, 4 }
 0x524   : > { %v6793_v23 = vrot.slane %v6792_v13, 1  ;;  %v5114_v31 = vcombine.high %v5112_v40, %v5112_v40  ;;  %v6725_v55 = vsel %vm6017_vm13, %v5113_v32, -inf  ;;  %v6732_v49 = vsel %vm6017_vm13, %v5112_v40, -inf }
 0x525   : > { %v13310_v53 = vmax.f32 %v6785_v36, %v6786_v35  ;;  %v6800_v43 = vrot.slane %v6799_v42, 1  ;;  %v6720_v0 = vmax.f32 %v6718_v45, %v6719_v5  ;;  %v6726_v56 = vrot.slane %v6725_v55, 4 }
 0x526   : > { %v13312_v16 = vmax.f32 %v6792_v13, %v6793_v23  ;;  %v6733_v41 = vrot.slane %v6732_v49, 4  ;;  %v6739_v18 = vsel %vm6017_vm13, %v5114_v31, -inf  ;;  %v5197_v52 = vrot.slane %v5183_v8, %v12605_v59 }
 0x527   : > { %v13318_v39 = vmax.f32 %v6799_v42, %v6800_v43  ;;  %v6721_v17 = vrot.slane %v6720_v0, 2  ;;  %v6727_v26 = vmax.f32 %v6725_v55, %v6726_v56  ;;  %v6740_v12 = vrot.slane %v6739_v18, 4 }
 0x528   : > { %v6734_v24 = vmax.f32 %v6732_v49, %v6733_v41  ;;  %v5198_v20 = vcombine.high %v5190_v15, %v5190_v15  ;;  %v5199_v48 = vcombine.high %v5197_v52, %v5197_v52  ;;  %v6858_v2 = vsel %vm6017_vm13, %v5190_v15, -inf  ;;  %v13326_v41 = vpop.f32.mrb[16].mxu1 }
 0x529   : > { %v6722_v33 = vmax.f32 %v6720_v0, %v6721_v17  ;;  %v6728_v60 = vrot.slane %v6727_v26, 2  ;;  %v6741_v36 = vmax.f32 %v6739_v18, %v6740_v12  ;;  %v6859_v1 = vrot.slane %v6858_v2, 4  ;;  %14721 = vst [vmem:[#allocation69_spill] sm:$0xff] %v13326_v41  ;;  %v13328_v18 = vpop.f32.mrb[1].mxu0 }
 0x52a   : > { %v6735_v13 = vrot.slane %v6734_v24, 2  ;;  %v6865_v40 = vsel %vm6017_vm13, %v5198_v20, -inf  ;;  %v6872_v8 = vsel %vm6017_vm13, %v5197_v52, -inf  ;;  %v6879_v32 = vsel %vm6017_vm13, %v5199_v48, -inf }
 0x52b   : > { %v6723_v45 = vrot.slane %v6722_v33, 1  ;;  %v6729_v35 = vmax.f32 %v6727_v26, %v6728_v60  ;;  %v6742_v42 = vrot.slane %v6741_v36, 2  ;;  %v6860_v5 = vmax.f32 %v6858_v2, %v6859_v1  ;;  %v4005_v26 = vpop.f32.mrb[17].mxu1 }
 0x52c   : > { %v6736_v23 = vmax.f32 %v6734_v24, %v6735_v13  ;;  %v6866_v31 = vrot.slane %v6865_v40, 4  ;;  %v6873_v55 = vrot.slane %v6872_v8, 4  ;;  %v6880_v49 = vrot.slane %v6879_v32, 4 }
 0x52d   : > { %v13324_v15 = vmax.f32 %v6722_v33, %v6723_v45  ;;  %v6730_v43 = vrot.slane %v6729_v35, 1  ;;  %v6743_v0 = vmax.f32 %v6741_v36, %v6742_v42  ;;  %v6861_v56 = vrot.slane %v6860_v5, 2 }
 0x52e   : > { %v6737_v52 = vrot.slane %v6736_v23, 1  ;;  %v6867_v17 = vmax.f32 %v6865_v40, %v6866_v31  ;;  %v6874_v12 = vmax.f32 %v6872_v8, %v6873_v55  ;;  %v6881_v20 = vmax.f32 %v6879_v32, %v6880_v49 }
 0x52f   : > { %v13330_v48 = vmax.f32 %v6729_v35, %v6730_v43  ;;  %v6744_v24 = vrot.slane %v6743_v0, 1  ;;  %v6862_v2 = vmax.f32 %v6860_v5, %v6861_v56  ;;  %v4573_v60 = vmax.f32 %v13300_v54, 0.0  ;;  %v14722_v35 = vld [vmem:[#allocation72_spill] sm:$0xff] }
 0x530   : > { %v13333_v33 = vmax.f32 %v6736_v23, %v6737_v52  ;;  %v6868_v1 = vrot.slane %v6867_v17, 2  ;;  %v6875_v36 = vrot.slane %v6874_v12, 2  ;;  %v6882_v13 = vrot.slane %v6881_v20, 2 }
 0x531   : > { %v13335_v45 = vmax.f32 %v6743_v0, %v6744_v24  ;;  %v6863_v42 = vrot.slane %v6862_v2, 1  ;;  %v5149_v41 = vcombine.high %v4573_v60, %v4573_v60  ;;  %v5156_v40 = vrot.slane %v4573_v60, %v12605_v59 }
 0x532   : > { %v6869_v8 = vmax.f32 %v6867_v17, %v6868_v1  ;;  %v6876_v32 = vmax.f32 %v6874_v12, %v6875_v36  ;;  %v6883_v31 = vmax.f32 %v6881_v20, %v6882_v13  ;;  %v4370_v55 = vadd.f32 %v13297_v57, %v14722_v35 }
 0x533   : > { %v6864_v5 = vmax.f32 %v6862_v2, %v6863_v42  ;;  %v5163_v54 = vrot.slane %v5149_v41, %v12605_v59  ;;  %v5164_v23 = vcombine.high %v5156_v40, %v5156_v40  ;;  %v6802_v49 = vsel %vm6017_vm13, %v5156_v40, -inf }
 0x534   : > { %v6870_v43 = vrot.slane %v6869_v8, 1  ;;  %v6877_v56 = vrot.slane %v6876_v32, 1  ;;  %v6884_v0 = vrot.slane %v6883_v31, 1  ;;  %v6803_v52 = vrot.slane %v6802_v49, 4 }
 0x535   : > { %v7866_v26 = vmax.f32 %v13245_v4, %v6864_v5  ;;  %v5165_v24 = vcombine.high %v5163_v54, %v5163_v54  ;;  %v6809_v17 = vsel %vm6017_vm13, %v5164_v23, -inf  ;;  %v6816_v12 = vsel %vm6017_vm13, %v5163_v54, -inf }
 0x536   : > { %v6871_v20 = vmax.f32 %v6869_v8, %v6870_v43  ;;  %v6878_v60 = vmax.f32 %v6876_v32, %v6877_v56  ;;  %v6885_v57 = vmax.f32 %v6883_v31, %v6884_v0  ;;  %v6804_v2 = vmax.f32 %v6802_v49, %v6803_v52 }
 0x537   : > { %v9269_v1 = vpack.c.bf16 %v7866_v26, %v7866_v26  ;;  %v6810_v41 = vrot.slane %v6809_v17, 4  ;;  %v6817_v36 = vrot.slane %v6816_v12, 4  ;;  %v6823_v13 = vsel %vm6017_vm13, %v5165_v24, -inf  ;;  %v13350_v26 = vpop.f32.mrb[2].mxu0 }
 0x538   : > { %v7867_v42 = vmax.f32 %v13249_v14, %v6871_v20  ;;  %v7868_v40 = vmax.f32 %v13253_v30, %v6878_v60  ;;  %v7869_v4 = vmax.f32 %v13260_v21, %v6885_v57  ;;  %v6805_v35 = vrot.slane %v6804_v2, 2 }
 0x539   : > { %v8506_v5 = vunpack.c.l.b16 %v9269_v1  ;;  %v6811_v23 = vmax.f32 %v6809_v17, %v6810_v41  ;;  %v6818_v47 = vmax.f32 %v6816_v12, %v6817_v36  ;;  %v6824_v54 = vrot.slane %v6823_v13, 4  ;;  %v14724_v36 = vld [vmem:[#allocation110_spill] sm:$0xff] }
 0x53a   : > { %v9270_v8 = vpack.c.bf16 %v7867_v42, %v7867_v42  ;;  %v9271_v32 = vpack.c.bf16 %v7868_v40, %v7868_v40  ;;  %v9272_v31 = vpack.c.bf16 %v7869_v4, %v7869_v4  ;;  %v6806_v49 = vmax.f32 %v6804_v2, %v6805_v35  ;;  %v14723_v2 = vld [vmem:[#allocation59_spill] sm:$0xff] }
 0x53b   : > { %v6812_v43 = vrot.slane %v6811_v23, 2  ;;  %v6819_v56 = vrot.slane %v6818_v47, 2  ;;  %v6825_v0 = vmax.f32 %v6823_v13, %v6824_v54  ;;  %v4441_v52 = vmul.f32 %v13183_v61, %v4370_v55  ;;  %v14725_v54 = vld [vmem:[#allocation67_spill] sm:$0xff] }
 0x53c   : > { %v8507_v14 = vunpack.c.l.b16 %v9270_v8  ;;  %v8508_v30 = vunpack.c.l.b16 %v9271_v32  ;;  %v8509_v24 = vunpack.c.l.b16 %v9272_v31  ;;  %v6807_v21 = vrot.slane %v6806_v49, 1 }
 0x53d   : > { %v6813_v20 = vmax.f32 %v6811_v23, %v6812_v43  ;;  %v6820_v60 = vmax.f32 %v6818_v47, %v6819_v56  ;;  %v6826_v17 = vrot.slane %v6825_v0, 2  ;;  %v4512_v12 = vadd.f32 %v13193_v44, %v4441_v52 }
 0x53e   : > { %v8634_v57 = vsel %vm8578_vm14, %v8507_v14, %v8506_v5  ;;  %v6808_v1 = vmax.f32 %v6806_v49, %v6807_v21  ;;  %v4200_v41 = vadd.f32 %v13075_v10, %v14723_v2  ;;  %v4221_v55 = vadd.f32 %v13097_v38, %v14724_v36  ;;  %v14726_v10 = vld [vmem:[#allocation77_spill] sm:$0xff]  ;;  %v13373_v2 = vpop.f32.mrb[18].mxu1 }
 0x53f   : > { %v8635_v13 = vsel %vm8580_vm15, %v8508_v30, %v8634_v57  ;;  %v6814_v42 = vrot.slane %v6813_v20, 1  ;;  %v6821_v40 = vrot.slane %v6820_v60, 1  ;;  %v6827_v4 = vmax.f32 %v6825_v0, %v6826_v17  ;;  %14727 = vst [vmem:[#allocation116_spill] sm:$0xff] %v13373_v2 }
 0x540   : > { %v7858_v35 = vmax.f32 %v13281_v28, %v6808_v1  ;;  %v4576_v47 = vmax.f32 %v4512_v12, 0.0  ;;  %v13361_v23 = vsel %vm8582_vm0, %v8509_v24, %v8635_v13  ;;  %v4368_v5 = vadd.f32 %v4200_v41, %v14725_v54  ;;  %v13375_v41 = vpop.f32.mrb[3].mxu0  ;;  %v4008_v13 = vpop.f32.mrb[19].mxu1 }
 0x541   : > { %v6815_v8 = vmax.f32 %v6813_v20, %v6814_v42  ;;  %v6822_v32 = vmax.f32 %v6820_v60, %v6821_v40  ;;  %v6828_v31 = vrot.slane %v6827_v4, 1  ;;  %v4373_v49 = vadd.f32 %v4221_v55, %v14726_v10 }
 0x542   : > { %v9261_v43 = vpack.c.bf16 %v7858_v35, %v7858_v35  ;;  %v5200_v38 = vcombine.high %v4576_v47, %v4576_v47  ;;  %v5207_v56 = vrot.slane %v4576_v47, %v12605_v59  ;;  %v4439_v52 = vmul.f32 %v13183_v61, %v4368_v5 }
 0x543   : > { %v6829_v0 = vmax.f32 %v6827_v4, %v6828_v31  ;;  %v7859_v28 = vmax.f32 %v13283_v11, %v6815_v8  ;;  %v7860_v14 = vmax.f32 %v13287_v34, %v6822_v32  ;;  %v4444_v30 = vmul.f32 %v13183_v61, %v4373_v49 }
 0x544   : > { %v8498_v24 = vunpack.c.l.b16 %v9261_v43  ;;  %v5214_v21 = vrot.slane %v5200_v38, %v12605_v59  ;;  %v5215_v20 = vcombine.high %v5207_v56, %v5207_v56  ;;  %v6886_v60 = vsel %vm6017_vm13, %v5207_v56, -inf }
 0x545   : > { %v7861_v17 = vmax.f32 %v13289_v6, %v6829_v0  ;;  %v9262_v12 = vpack.c.bf16 %v7859_v28, %v7859_v28  ;;  %v9263_v57 = vpack.c.bf16 %v7860_v14, %v7860_v14  ;;  %v6887_v1 = vrot.slane %v6886_v60, 4 }
 0x546   : > { %v5216_v11 = vcombine.high %v5214_v21, %v5214_v21  ;;  %v6893_v34 = vsel %vm6017_vm13, %v5215_v20, -inf  ;;  %v6900_v36 = vsel %vm6017_vm13, %v5214_v21, -inf  ;;  %v4510_v55 = vadd.f32 %v13193_v44, %v4439_v52 }
 0x547   : > { %v9264_v42 = vpack.c.bf16 %v7861_v17, %v7861_v17  ;;  %v8499_v40 = vunpack.c.l.b16 %v9262_v12  ;;  %v8500_v4 = vunpack.c.l.b16 %v9263_v57  ;;  %v6888_v35 = vmax.f32 %v6886_v60, %v6887_v1 }
 0x548   : > { %v6894_v6 = vrot.slane %v6893_v34, 4  ;;  %v6901_v47 = vrot.slane %v6900_v36, 4  ;;  %v6907_v54 = vsel %vm6017_vm13, %v5216_v11, -inf  ;;  %v4574_v5 = vmax.f32 %v4510_v55, 0.0 }
 0x549   : > { %v8501_v8 = vunpack.c.l.b16 %v9264_v42  ;;  %v8627_v32 = vsel %vm8578_vm14, %v8499_v40, %v8498_v24  ;;  %v6889_v31 = vrot.slane %v6888_v35, 2  ;;  %v6908_v10 = vrot.slane %v6907_v54, 4 }
 0x54a   : > { %v8628_v49 = vsel %vm8580_vm15, %v8500_v4, %v8627_v32  ;;  %v6895_v43 = vmax.f32 %v6893_v34, %v6894_v6  ;;  %v6902_v38 = vmax.f32 %v6900_v36, %v6901_v47  ;;  %v5166_v56 = vcombine.high %v4574_v5, %v4574_v5 }
 0x54b   : > { %v6890_v52 = vmax.f32 %v6888_v35, %v6889_v31  ;;  %v6909_v0 = vmax.f32 %v6907_v54, %v6908_v10  ;;  %v5173_v28 = vrot.slane %v4574_v5, %v12605_v59  ;;  %v13385_v14 = vsel %vm8582_vm0, %v8501_v8, %v8628_v49  ;;  %v13392_v35 = vpop.f32.mrb[4].mxu0 }
 0x54c   : > { %v6896_v21 = vrot.slane %v6895_v43, 2  ;;  %v6903_v20 = vrot.slane %v6902_v38, 2  ;;  %v5180_v60 = vrot.slane %v5166_v56, %v12605_v59  ;;  %v4515_v24 = vadd.f32 %v13193_v44, %v4444_v30 }
 0x54d   : > { %v6891_v17 = vrot.slane %v6890_v52, 1  ;;  %v6910_v12 = vrot.slane %v6909_v0, 2  ;;  %v5181_v57 = vcombine.high %v5173_v28, %v5173_v28  ;;  %v6830_v1 = vsel %vm6017_vm13, %v5173_v28, -inf }
 0x54e   : > { %v6897_v11 = vmax.f32 %v6895_v43, %v6896_v21  ;;  %v6904_v34 = vmax.f32 %v6902_v38, %v6903_v20  ;;  %v5182_v36 = vcombine.high %v5180_v60, %v5180_v60  ;;  %v6831_v55 = vrot.slane %v6830_v1, 4 }
 0x54f   : > { %v6892_v13 = vmax.f32 %v6890_v52, %v6891_v17  ;;  %v6911_v42 = vmax.f32 %v6909_v0, %v6910_v12  ;;  %v6837_v40 = vsel %vm6017_vm13, %v5181_v57, -inf  ;;  %v6844_v4 = vsel %vm6017_vm13, %v5180_v60, -inf }
 0x550   : > { %v6898_v6 = vrot.slane %v6897_v11, 1  ;;  %v6905_v47 = vrot.slane %v6904_v34, 1  ;;  %v6832_v30 = vmax.f32 %v6830_v1, %v6831_v55  ;;  %v6838_v54 = vrot.slane %v6837_v40, 4 }
 0x551   : > { %v6912_v5 = vrot.slane %v6911_v42, 1  ;;  %v7870_v8 = vmax.f32 %v13306_v58, %v6892_v13  ;;  %v6845_v32 = vrot.slane %v6844_v4, 4  ;;  %v6851_v31 = vsel %vm6017_vm13, %v5182_v36, -inf }
 0x552   : > { %v6899_v10 = vmax.f32 %v6897_v11, %v6898_v6  ;;  %v6906_v49 = vmax.f32 %v6904_v34, %v6905_v47  ;;  %v6833_v43 = vrot.slane %v6832_v30, 2  ;;  %v6839_v38 = vmax.f32 %v6837_v40, %v6838_v54 }
 0x553   : > { %v6913_v56 = vmax.f32 %v6911_v42, %v6912_v5  ;;  %v9273_v52 = vpack.c.bf16 %v7870_v8, %v7870_v8  ;;  %v6846_v0 = vmax.f32 %v6844_v4, %v6845_v32  ;;  %v6852_v28 = vrot.slane %v6851_v31, 4 }
 0x554   : > { %v7871_v21 = vmax.f32 %v13310_v53, %v6899_v10  ;;  %v7872_v20 = vmax.f32 %v13312_v16, %v6906_v49  ;;  %v6834_v60 = vmax.f32 %v6832_v30, %v6833_v43  ;;  %v6840_v17 = vrot.slane %v6839_v38, 2  ;;  %v13401_v53 = vpop.f32.mrb[20].mxu1  ;;  %v13403_v16 = vpop.f32.mrb[5].mxu0  ;;  %v14729_v43 = vld [vmem:[#allocation108_spill] sm:$0xff] }
 0x555   : > { %v7873_v12 = vmax.f32 %v13318_v39, %v6913_v56  ;;  %v8510_v58 = vunpack.c.l.b16 %v9273_v52  ;;  %v6847_v57 = vrot.slane %v6846_v0, 2  ;;  %v6853_v1 = vmax.f32 %v6851_v31, %v6852_v28  ;;  %14728 = vst [vmem:[#allocation66_spill] sm:$0xff] %v13401_v53  ;;  %v4013_v54 = vpop.f32.mrb[21].mxu1 }
 0x556   : > { %v9274_v36 = vpack.c.bf16 %v7871_v21, %v7871_v21  ;;  %v9275_v11 = vpack.c.bf16 %v7872_v20, %v7872_v20  ;;  %v6835_v34 = vrot.slane %v6834_v60, 1  ;;  %v6841_v55 = vmax.f32 %v6839_v38, %v6840_v17 }
 0x557   : > { %v9276_v13 = vpack.c.bf16 %v7873_v12, %v7873_v12  ;;  %v8637_v42 = vsel %vm8584_vm1, %v8510_v58, %v13361_v23  ;;  %v6848_v40 = vmax.f32 %v6846_v0, %v6847_v57  ;;  %v6854_v4 = vrot.slane %v6853_v1, 2 }
 0x558   : > { %v8511_v6 = vunpack.c.l.b16 %v9274_v36  ;;  %v8512_v47 = vunpack.c.l.b16 %v9275_v11  ;;  %v6836_v39 = vmax.f32 %v6834_v60, %v6835_v34  ;;  %v6842_v30 = vrot.slane %v6841_v55, 1 }
 0x559   : > { %v8513_v5 = vunpack.c.l.b16 %v9276_v13  ;;  %v6849_v8 = vrot.slane %v6848_v40, 1  ;;  %v6855_v32 = vmax.f32 %v6853_v1, %v6854_v4  ;;  %v4579_v31 = vmax.f32 %v4515_v24, 0.0  ;;  %v13418_v13 = vpop.f32.mrb[6].mxu0 }
 0x55a   : > { %v8638_v10 = vsel %vm8586_vm2, %v8511_v6, %v8637_v42  ;;  %v6843_v49 = vmax.f32 %v6841_v55, %v6842_v30  ;;  %v7862_v23 = vmax.f32 %v13324_v15, %v6836_v39  ;;  %v4213_v38 = vadd.f32 %v13139_v62, %v14729_v43 }
 0x55b   : > { %v8639_v56 = vsel %vm8588_vm4, %v8512_v47, %v8638_v10  ;;  %v6850_v52 = vmax.f32 %v6848_v40, %v6849_v8  ;;  %v6856_v0 = vrot.slane %v6855_v32, 1  ;;  %v5251_v28 = vcombine.high %v4579_v31, %v4579_v31  ;;  %v14730_v8 = vld [vmem:[#allocation74_spill] sm:$0xff] }
 0x55c   : > { %v8640_v21 = vsel %vm1681_vm3, %v8513_v5, %v8639_v56  ;;  %v7863_v20 = vmax.f32 %v13330_v48, %v6843_v49  ;;  %v9265_v60 = vpack.c.bf16 %v7862_v23, %v7862_v23  ;;  %v5258_v24 = vrot.slane %v4579_v31, %v12605_v59 }
 0x55d   : > { %v8704_v17 = vpack.c.b16 %v8640_v21, %v8640_v21  ;;  %v6857_v12 = vmax.f32 %v6855_v32, %v6856_v0  ;;  %v7864_v15 = vmax.f32 %v13333_v33, %v6850_v52  ;;  %v5265_v58 = vrot.slane %v5251_v28, %v12605_v59  ;;  %v14731_v52 = vld [vmem:[#allocation111_spill] sm:$0xff] }
 0x55e   : > { %v9266_v62 = vpack.c.bf16 %v7863_v20, %v7863_v20  ;;  %v8502_v57 = vunpack.c.l.b16 %v9265_v60  ;;  %v5266_v1 = vcombine.high %v5258_v24, %v5258_v24  ;;  %v6970_v36 = vsel %vm6017_vm13, %v5258_v24, -inf  ;;  %v14732_v60 = vld [vmem:[#allocation109_spill] sm:$0xff] }
 0x55f   : > { %8736 = vst [vmem:[%s12834_s30 + $0x1c] sm:$0xf] %v8704_v17  ;;  %v7865_v11 = vmax.f32 %v13335_v45, %v6857_v12  ;;  %v9267_v34 = vpack.c.bf16 %v7864_v15, %v7864_v15  ;;  %v5267_v55 = vcombine.high %v5265_v58, %v5265_v58  ;;  %v6971_v48 = vrot.slane %v6970_v36, 4 }
 0x560   : > { %v8503_v42 = vunpack.c.l.b16 %v9266_v62  ;;  %v8630_v40 = vsel %vm8584_vm1, %v8502_v57, %v13385_v14  ;;  %v6977_v33 = vsel %vm6017_vm13, %v5266_v1, -inf  ;;  %v6984_v4 = vsel %vm6017_vm13, %v5265_v58, -inf  ;;  %v14733_v57 = vld [vmem:[#allocation78_spill] sm:$0xff] }
 0x561   : > { %v9268_v6 = vpack.c.bf16 %v7865_v11, %v7865_v11  ;;  %v8504_v47 = vunpack.c.l.b16 %v9267_v34  ;;  %v6972_v39 = vmax.f32 %v6970_v36, %v6971_v48  ;;  %v6978_v30 = vrot.slane %v6977_v33, 4 }
 0x562   : > { %v8631_v54 = vsel %vm8586_vm2, %v8503_v42, %v8630_v40  ;;  %v6985_v45 = vrot.slane %v6984_v4, 4  ;;  %v6991_v5 = vsel %vm6017_vm13, %v5267_v55, -inf  ;;  %v4371_v32 = vadd.f32 %v4213_v38, %v14730_v8  ;;  %v14735_v55 = vld [vmem:[#allocation118_spill] sm:$0xff]  ;;  %v13442_v40 = vld [vmem:[#allocation11] ss:$0 sm:$0xff] }
 0x563   : > { %v8505_v31 = vunpack.c.l.b16 %v9268_v6  ;;  %v8632_v10 = vsel %vm8588_vm4, %v8504_v47, %v8631_v54  ;;  %v6973_v49 = vrot.slane %v6972_v39, 2  ;;  %v6979_v14 = vmax.f32 %v6977_v33, %v6978_v30  ;;  %v13449_v54 = vld [vmem:[#allocation12] ss:$0 sm:$0xff] }
 0x564   : > { %v6986_v23 = vmax.f32 %v6984_v4, %v6985_v45  ;;  %v6992_v43 = vrot.slane %v6991_v5, 4  ;;  %v4442_v56 = vmul.f32 %v13183_v61, %v4371_v32  ;;  %v4224_v0 = vadd.f32 %v13158_v22, %v14731_v52  ;;  %v14734_v61 = vld [vmem:[#allocation75_spill] sm:$0xff] }
 0x565   : > { %v8633_v28 = vsel %vm1681_vm3, %v8505_v31, %v8632_v10  ;;  %v6974_v21 = vmax.f32 %v6972_v39, %v6973_v49  ;;  %v6980_v20 = vrot.slane %v6979_v14, 2  ;;  %v4216_v38 = vadd.f32 %v13174_v63, %v14732_v60 }
 0x566   : > { %v8703_v24 = vpack.c.b16 %v8633_v28, %v8633_v28  ;;  %v6987_v17 = vrot.slane %v6986_v23, 2  ;;  %v6993_v12 = vmax.f32 %v6991_v5, %v6992_v43  ;;  %v4513_v15 = vadd.f32 %v13193_v44, %v4442_v56  ;;  %v14736_v5 = vld [vmem:[#allocation87_spill] sm:$0xff] }
 0x567   : > { %v6975_v58 = vrot.slane %v6974_v21, 1  ;;  %v6981_v62 = vmax.f32 %v6979_v14, %v6980_v20  ;;  %v4374_v1 = vadd.f32 %v4224_v0, %v14733_v57  ;;  %v4372_v36 = vadd.f32 %v4216_v38, %v14734_v61 }
 0x568   : > { %8735 = vst [vmem:[%s12834_s30 + $0x18] sm:$0xf] %v8703_v24  ;;  %v6988_v22 = vmax.f32 %v6986_v23, %v6987_v17  ;;  %v6994_v11 = vrot.slane %v6993_v12, 2  ;;  %v4577_v34 = vmax.f32 %v4513_v15, 0.0  ;;  %v4237_v48 = vadd.f32 %v13208_v9, %v14735_v55  ;;  %v13466_v17 = vpop.f32.mrb[22].mxu1 }
 0x569   : > { %v13440_v42 = vmax.f32 %v6974_v21, %v6975_v58  ;;  %v6982_v63 = vrot.slane %v6981_v62, 1  ;;  %v4445_v44 = vmul.f32 %v13442_v40, %v4374_v1  ;;  %v4443_v33 = vmul.f32 %v13442_v40, %v4372_v36  ;;  %14737 = vst [vmem:[#allocation63_spill] sm:$0xff] %v13466_v17  ;;  %v4016_v1 = vpop.f32.mrb[23].mxu1 }
 0x56a   : > { %v6989_v4 = vrot.slane %v6988_v22, 1  ;;  %v6995_v6 = vmax.f32 %v6993_v12, %v6994_v11  ;;  %v5217_v47 = vcombine.high %v4577_v34, %v4577_v34  ;;  %v5224_v39 = vrot.slane %v4577_v34, %v12605_v59  ;;  %v13468_v12 = vpop.f32.mrb[7].mxu0 }
 0x56b   : > { %v13447_v30 = vmax.f32 %v6981_v62, %v6982_v63  ;;  %v4516_v9 = vadd.f32 %v13449_v54, %v4445_v44  ;;  %v4514_v45 = vadd.f32 %v13449_v54, %v4443_v33  ;;  %v4377_v8 = vadd.f32 %v4237_v48, %v14736_v5 }
 0x56c   : > { %v13454_v32 = vmax.f32 %v6988_v22, %v6989_v4  ;;  %v6996_v31 = vrot.slane %v6995_v6, 1  ;;  %v5231_v10 = vrot.slane %v5217_v47, %v12605_v59  ;;  %v5232_v49 = vcombine.high %v5224_v39, %v5224_v39 }
 0x56d   : > { %v6914_v14 = vsel %vm6017_vm13, %v5224_v39, -inf  ;;  %v4580_v23 = vmax.f32 %v4516_v9, 0.0  ;;  %v4578_v43 = vmax.f32 %v4514_v45, 0.0  ;;  %v13459_v56 = vmul.f32 %v13442_v40, %v4377_v8 }
 0x56e   : > { %v13461_v52 = vmax.f32 %v6995_v6, %v6996_v31  ;;  %v5233_v0 = vcombine.high %v5231_v10, %v5231_v10  ;;  %v6915_v28 = vrot.slane %v6914_v14, 4  ;;  %v6921_v21 = vsel %vm6017_vm13, %v5232_v49, -inf }
 0x56f   : > { %v6922_v20 = vrot.slane %v6921_v21, 4  ;;  %v6928_v60 = vsel %vm6017_vm13, %v5231_v10, -inf  ;;  %v5268_v38 = vcombine.high %v4580_v23, %v4580_v23  ;;  %v5275_v24 = vrot.slane %v4580_v23, %v12605_v59 }
 0x570   : > { %v6916_v15 = vmax.f32 %v6914_v14, %v6915_v28  ;;  %v6929_v58 = vrot.slane %v6928_v60, 4  ;;  %v6935_v62 = vsel %vm6017_vm13, %v5233_v0, -inf  ;;  %v5234_v57 = vcombine.high %v4578_v43, %v4578_v43 }
 0x571   : > { %v6923_v61 = vmax.f32 %v6921_v21, %v6922_v20  ;;  %v6936_v36 = vrot.slane %v6935_v62, 4  ;;  %v5282_v22 = vrot.slane %v5268_v38, %v12605_v59  ;;  %v5283_v11 = vcombine.high %v5275_v24, %v5275_v24 }
 0x572   : > { %v6917_v34 = vrot.slane %v6916_v15, 2  ;;  %v6930_v55 = vmax.f32 %v6928_v60, %v6929_v58  ;;  %v6998_v48 = vsel %vm6017_vm13, %v5275_v24, -inf  ;;  %v5241_v63 = vrot.slane %v4578_v43, %v12605_v59 }
 0x573   : > { %v6924_v44 = vrot.slane %v6923_v61, 2  ;;  %v6937_v33 = vmax.f32 %v6935_v62, %v6936_v36  ;;  %v5284_v4 = vcombine.high %v5282_v22, %v5282_v22  ;;  %v6999_v6 = vrot.slane %v6998_v48, 4 }
 0x574   : > { %v6918_v47 = vmax.f32 %v6916_v15, %v6917_v34  ;;  %v6931_v39 = vrot.slane %v6930_v55, 2  ;;  %v7005_v9 = vsel %vm6017_vm13, %v5283_v11, -inf  ;;  %v7012_v45 = vsel %vm6017_vm13, %v5282_v22, -inf }
 0x575   : > { %v6925_v5 = vmax.f32 %v6923_v61, %v6924_v44  ;;  %v6938_v8 = vrot.slane %v6937_v33, 2  ;;  %v7000_v31 = vmax.f32 %v6998_v48, %v6999_v6  ;;  %v7006_v10 = vrot.slane %v7005_v9, 4 }
 0x576   : > { %v6919_v49 = vrot.slane %v6918_v47, 1  ;;  %v6932_v14 = vmax.f32 %v6930_v55, %v6931_v39  ;;  %v7013_v23 = vrot.slane %v7012_v45, 4  ;;  %v7019_v0 = vsel %vm6017_vm13, %v5284_v4, -inf }
 0x577   : > { %v6926_v43 = vrot.slane %v6925_v5, 1  ;;  %v6939_v28 = vmax.f32 %v6937_v33, %v6938_v8  ;;  %v7001_v21 = vrot.slane %v7000_v31, 2  ;;  %v7007_v20 = vmax.f32 %v7005_v9, %v7006_v10 }
 0x578   : > { %v13477_v60 = vmax.f32 %v6918_v47, %v6919_v49  ;;  %v6933_v38 = vrot.slane %v6932_v14, 1  ;;  %v7014_v24 = vmax.f32 %v7012_v45, %v7013_v23  ;;  %v7020_v15 = vrot.slane %v7019_v0, 4 }
 0x579   : > { %v13479_v58 = vmax.f32 %v6925_v5, %v6926_v43  ;;  %v6940_v62 = vrot.slane %v6939_v28, 1  ;;  %v7002_v1 = vmax.f32 %v7000_v31, %v7001_v21  ;;  %v7008_v61 = vrot.slane %v7007_v20, 2 }
 0x57a   : > { %v13481_v36 = vmax.f32 %v6932_v14, %v6933_v38  ;;  %v7015_v22 = vrot.slane %v7014_v24, 2  ;;  %v7021_v11 = vmax.f32 %v7019_v0, %v7020_v15  ;;  %v5248_v34 = vrot.slane %v5234_v57, %v12605_v59 }
 0x57b   : > { %v13484_v55 = vmax.f32 %v6939_v28, %v6940_v62  ;;  %v7003_v48 = vrot.slane %v7002_v1, 1  ;;  %v7009_v44 = vmax.f32 %v7007_v20, %v7008_v61  ;;  %v5249_v33 = vcombine.high %v5241_v63, %v5241_v63  ;;  %v14738_v62 = vld [vmem:[#allocation112_spill] sm:$0xff] }
 0x57c   : > { %v7016_v4 = vmax.f32 %v7014_v24, %v7015_v22  ;;  %v7022_v6 = vrot.slane %v7021_v11, 2  ;;  %v5250_v47 = vcombine.high %v5248_v34, %v5248_v34  ;;  %v6942_v39 = vsel %vm6017_vm13, %v5241_v63, -inf }
 0x57d   : > { %v13487_v9 = vmax.f32 %v7002_v1, %v7003_v48  ;;  %v7010_v45 = vrot.slane %v7009_v44, 1  ;;  %v6943_v5 = vrot.slane %v6942_v39, 4  ;;  %v6949_v8 = vsel %vm6017_vm13, %v5249_v33, -inf }
 0x57e   : > { %v7017_v31 = vrot.slane %v7016_v4, 1  ;;  %v7023_v10 = vmax.f32 %v7021_v11, %v7022_v6  ;;  %v6950_v49 = vrot.slane %v6949_v8, 4  ;;  %v6956_v57 = vsel %vm6017_vm13, %v5248_v34, -inf  ;;  %v14739_v34 = vld [vmem:[#allocation119_spill] sm:$0xff]  ;;  %v14740_v6 = vld [vmem:[#allocation96_spill] sm:$0xff] }
 0x57f   : > { %v13491_v14 = vmax.f32 %v7009_v44, %v7010_v45  ;;  %v6944_v23 = vmax.f32 %v6942_v39, %v6943_v5  ;;  %v6957_v0 = vrot.slane %v6956_v57, 4  ;;  %v6963_v43 = vsel %vm6017_vm13, %v5250_v47, -inf  ;;  %v14741_v5 = vld [vmem:[#allocation86_spill] sm:$0xff] }
 0x580   : > { %v13494_v28 = vmax.f32 %v7016_v4, %v7017_v31  ;;  %v7024_v63 = vrot.slane %v7023_v10, 1  ;;  %v6951_v21 = vmax.f32 %v6949_v8, %v6950_v49  ;;  %v6964_v20 = vrot.slane %v6963_v43, 4 }
 0x581   : > { %v6945_v38 = vrot.slane %v6944_v23, 2  ;;  %v6958_v24 = vmax.f32 %v6956_v57, %v6957_v0  ;;  %v4519_v15 = vadd.f32 %v13449_v54, %v13459_v56  ;;  %v4229_v1 = vadd.f32 %v13224_v51, %v14738_v62  ;;  %v14742_v56 = vld [vmem:[#allocation113_spill] sm:$0xff] }
 0x582   : > { %v13500_v61 = vmax.f32 %v7023_v10, %v7024_v63  ;;  %v6952_v22 = vrot.slane %v6951_v21, 2  ;;  %v6965_v11 = vmax.f32 %v6963_v43, %v6964_v20  ;;  %v4240_v48 = vadd.f32 %v13235_v25, %v14739_v34  ;;  %v13511_v63 = vpop.f32.mrb[8].mxu0 }
 0x583   : > { %v6946_v44 = vmax.f32 %v6944_v23, %v6945_v38  ;;  %v6959_v33 = vrot.slane %v6958_v24, 2  ;;  %v4583_v4 = vmax.f32 %v4519_v15, 0.0  ;;  %v4375_v47 = vadd.f32 %v4229_v1, %v14740_v6  ;;  %14743 = vst [vmem:[#allocation117_spill] sm:$0xff] %v13511_v63 }
 0x584   : > { %v6953_v39 = vmax.f32 %v6951_v21, %v6952_v22  ;;  %v6966_v45 = vrot.slane %v6965_v11, 2  ;;  %v4378_v8 = vadd.f32 %v4240_v48, %v14741_v5  ;;  %v4232_v31 = vadd.f32 %v13271_v27, %v14742_v56  ;;  %v13520_v22 = vpop.f32.mrb[24].mxu1 }
 0x585   : > { %v6947_v51 = vrot.slane %v6946_v44, 1  ;;  %v6960_v10 = vmax.f32 %v6958_v24, %v6959_v33  ;;  %v5319_v49 = vcombine.high %v4583_v4, %v4583_v4  ;;  %v5326_v57 = vrot.slane %v4583_v4, %v12605_v59  ;;  %14744 = vst [vmem:[#allocation46_spill] sm:$0xff] %v13520_v22  ;;  %v4021_v4 = vpop.f32.mrb[25].mxu1 }
 0x586   : > { %v6954_v0 = vrot.slane %v6953_v39, 1  ;;  %v6967_v43 = vmax.f32 %v6965_v11, %v6966_v45  ;;  %v4446_v25 = vmul.f32 %v13442_v40, %v4375_v47  ;;  %v4449_v23 = vmul.f32 %v13442_v40, %v4378_v8  ;;  %v13522_v11 = vpop.f32.mrb[9].mxu0 }
 0x587   : > { %v13513_v21 = vmax.f32 %v6946_v44, %v6947_v51  ;;  %v6961_v20 = vrot.slane %v6960_v10, 1  ;;  %v5333_v38 = vrot.slane %v5319_v49, %v12605_v59  ;;  %v5334_v15 = vcombine.high %v5326_v57, %v5326_v57  ;;  %14745 = vst [vmem:[#allocation80_spill] sm:$0xff] %v13522_v11 }
 0x588   : > { %v13516_v27 = vmax.f32 %v6953_v39, %v6954_v0  ;;  %v6968_v24 = vrot.slane %v6967_v43, 1  ;;  %v7082_v62 = vsel %vm6017_vm13, %v5326_v57, -inf  ;;  %v4517_v1 = vadd.f32 %v13449_v54, %v4446_v25 }
 0x589   : > { %v13524_v34 = vmax.f32 %v6960_v10, %v6961_v20  ;;  %v5335_v48 = vcombine.high %v5333_v38, %v5333_v38  ;;  %v7083_v44 = vrot.slane %v7082_v62, 4  ;;  %v7089_v33 = vsel %vm6017_vm13, %v5334_v15, -inf }
 0x58a   : > { %v13527_v6 = vmax.f32 %v6967_v43, %v6968_v24  ;;  %v7090_v47 = vrot.slane %v7089_v33, 4  ;;  %v7096_v39 = vsel %vm6017_vm13, %v5333_v38, -inf  ;;  %v4581_v45 = vmax.f32 %v4517_v1, 0.0  ;;  %v14746_v43 = vld [vmem:[#allocation83_spill] sm:$0xff] }
 0x58b   : > { %v7084_v5 = vmax.f32 %v7082_v62, %v7083_v44  ;;  %v7097_v8 = vrot.slane %v7096_v39, 4  ;;  %v7103_v56 = vsel %vm6017_vm13, %v5335_v48, -inf  ;;  %v4520_v51 = vadd.f32 %v13449_v54, %v4449_v23 }
 0x58c   : > { %v7091_v49 = vmax.f32 %v7089_v33, %v7090_v47  ;;  %v7104_v10 = vrot.slane %v7103_v56, 4  ;;  %v5285_v57 = vcombine.high %v4581_v45, %v4581_v45  ;;  %v5292_v0 = vrot.slane %v4581_v45, %v12605_v59 }
 0x58d   : > { %v7085_v25 = vrot.slane %v7084_v5, 2  ;;  %v7098_v20 = vmax.f32 %v7096_v39, %v7097_v8  ;;  %v13533_v15 = vmax.f32 %v4520_v51, 0.0  ;;  %v13536_v24 = vadd.f32 %v4232_v31, %v14746_v43 }
 0x58e   : > { %v7092_v38 = vrot.slane %v7091_v49, 2  ;;  %v7105_v1 = vmax.f32 %v7103_v56, %v7104_v10  ;;  %v5299_v62 = vrot.slane %v5285_v57, %v12605_v59  ;;  %v5300_v44 = vcombine.high %v5292_v0, %v5292_v0 }
 0x58f   : > { %v7086_v48 = vmax.f32 %v7084_v5, %v7085_v25  ;;  %v7099_v4 = vrot.slane %v7098_v20, 2  ;;  %v7026_v23 = vsel %vm6017_vm13, %v5292_v0, -inf  ;;  %v5336_v33 = vcombine.high %v13533_v15, %v13533_v15 }
 0x590   : > { %v7093_v47 = vmax.f32 %v7091_v49, %v7092_v38  ;;  %v7106_v45 = vrot.slane %v7105_v1, 2  ;;  %v5301_v39 = vcombine.high %v5299_v62, %v5299_v62  ;;  %v7027_v8 = vrot.slane %v7026_v23, 4 }
 0x591   : > { %v7087_v51 = vrot.slane %v7086_v48, 1  ;;  %v7100_v22 = vmax.f32 %v7098_v20, %v7099_v4  ;;  %v7033_v31 = vsel %vm6017_vm13, %v5300_v44, -inf  ;;  %v7040_v56 = vsel %vm6017_vm13, %v5299_v62, -inf }
 0x592   : > { %v7094_v10 = vrot.slane %v7093_v47, 1  ;;  %v7107_v57 = vmax.f32 %v7105_v1, %v7106_v45  ;;  %v7028_v43 = vmax.f32 %v7026_v23, %v7027_v8  ;;  %v7034_v5 = vrot.slane %v7033_v31, 4 }
 0x593   : > { %v7088_v25 = vmax.f32 %v7086_v48, %v7087_v51  ;;  %v7101_v2 = vrot.slane %v7100_v22, 1  ;;  %v7041_v0 = vrot.slane %v7040_v56, 4  ;;  %v7047_v17 = vsel %vm6017_vm13, %v5301_v39, -inf }
 0x594   : > { %v7095_v53 = vmax.f32 %v7093_v47, %v7094_v10  ;;  %v7108_v49 = vrot.slane %v7107_v57, 1  ;;  %v7029_v38 = vrot.slane %v7028_v43, 2  ;;  %v7035_v50 = vmax.f32 %v7033_v31, %v7034_v5 }
 0x595   : > { %v7102_v11 = vmax.f32 %v7100_v22, %v7101_v2  ;;  %v7882_v20 = vmax.f32 %v13440_v42, %v7088_v25  ;;  %v7042_v4 = vmax.f32 %v7040_v56, %v7041_v0  ;;  %v7048_v44 = vrot.slane %v7047_v17, 4  ;;  %v13549_v2 = vpop.f32.mrb[10].mxu0 }
 0x596   : > { %v7109_v63 = vmax.f32 %v7107_v57, %v7108_v49  ;;  %v7883_v62 = vmax.f32 %v13447_v30, %v7095_v53  ;;  %v7030_v1 = vmax.f32 %v7028_v43, %v7029_v38  ;;  %v7036_v23 = vrot.slane %v7035_v50, 2  ;;  %v13555_v49 = vpop.f32.mrb[26].mxu1  ;;  %v13557_v38 = vpop.f32.mrb[11].mxu0 }
 0x597   : > { %v7884_v48 = vmax.f32 %v13454_v32, %v7102_v11  ;;  %v9285_v45 = vpack.c.bf16 %v7882_v20, %v7882_v20  ;;  %v7043_v8 = vrot.slane %v7042_v4, 2  ;;  %v7049_v51 = vmax.f32 %v7047_v17, %v7048_v44 }
 0x598   : > { %v7885_v47 = vmax.f32 %v13461_v52, %v7109_v63  ;;  %v9286_v39 = vpack.c.bf16 %v7883_v62, %v7883_v62  ;;  %v7031_v10 = vrot.slane %v7030_v1, 1  ;;  %v7037_v31 = vmax.f32 %v7035_v50, %v7036_v23 }
 0x599   : > { %v9287_v42 = vpack.c.bf16 %v7884_v48, %v7884_v48  ;;  %v8522_v22 = vunpack.c.l.b16 %v9285_v45  ;;  %v7044_v56 = vmax.f32 %v7042_v4, %v7043_v8  ;;  %v7050_v57 = vrot.slane %v7049_v51, 2 }
 0x59a   : > { %v9288_v5 = vpack.c.bf16 %v7885_v47, %v7885_v47  ;;  %v8523_v53 = vunpack.c.l.b16 %v9286_v39  ;;  %v7032_v30 = vmax.f32 %v7030_v1, %v7031_v10  ;;  %v7038_v43 = vrot.slane %v7037_v31, 1  ;;  %v4024_v1 = vpop.f32.mrb[27].mxu1 }
 0x59b   : > { %v8524_v25 = vunpack.c.l.b16 %v9287_v42  ;;  %v7045_v32 = vrot.slane %v7044_v56, 1  ;;  %v7051_v11 = vmax.f32 %v7049_v51, %v7050_v57  ;;  %v5343_v17 = vrot.slane %v13533_v15, %v12605_v59 }
 0x59c   : > { %v8525_v52 = vunpack.c.l.b16 %v9288_v5  ;;  %v8648_v63 = vsel %vm8578_vm14, %v8523_v53, %v8522_v22  ;;  %v7039_v50 = vmax.f32 %v7037_v31, %v7038_v43  ;;  %v7874_v0 = vmax.f32 %v13477_v60, %v7032_v30 }
 0x59d   : > { %v8649_v20 = vsel %vm8580_vm15, %v8524_v25, %v8648_v63  ;;  %v7046_v4 = vmax.f32 %v7044_v56, %v7045_v32  ;;  %v7052_v44 = vrot.slane %v7051_v11, 1  ;;  %v5350_v62 = vrot.slane %v5336_v33, %v12605_v59 }
 0x59e   : > { %v7875_v23 = vmax.f32 %v13479_v58, %v7039_v50  ;;  %v9277_v15 = vpack.c.bf16 %v7874_v0, %v7874_v0  ;;  %v5351_v48 = vcombine.high %v5343_v17, %v5343_v17  ;;  %v7110_v45 = vsel %vm6017_vm13, %v5343_v17, -inf }
 0x59f   : > { %v7053_v8 = vmax.f32 %v7051_v11, %v7052_v44  ;;  %v7876_v60 = vmax.f32 %v13481_v36, %v7046_v4  ;;  %v5352_v51 = vcombine.high %v5350_v62, %v5350_v62  ;;  %v7111_v47 = vrot.slane %v7110_v45, 4 }
 0x5a0   : > { %v9278_v39 = vpack.c.bf16 %v7875_v23, %v7875_v23  ;;  %v8514_v10 = vunpack.c.l.b16 %v9277_v15  ;;  %v7117_v31 = vsel %vm6017_vm13, %v5351_v48, -inf  ;;  %v7124_v42 = vsel %vm6017_vm13, %v5350_v62, -inf }
 0x5a1   : > { %v7877_v33 = vmax.f32 %v13484_v55, %v7053_v8  ;;  %v9279_v22 = vpack.c.bf16 %v7876_v60, %v7876_v60  ;;  %v7112_v56 = vmax.f32 %v7110_v45, %v7111_v47  ;;  %v7118_v58 = vrot.slane %v7117_v31, 4  ;;  %v14747_v45 = vld [vmem:[#allocation121_spill] sm:$0xff]  ;;  %v14748_v47 = vld [vmem:[#allocation90_spill] sm:$0xff] }
 0x5a2   : > { %v8515_v57 = vunpack.c.l.b16 %v9278_v39  ;;  %v7125_v5 = vrot.slane %v7124_v42, 4  ;;  %v7131_v53 = vsel %vm6017_vm13, %v5352_v51, -inf  ;;  %v8650_v30 = vsel %vm8582_vm0, %v8525_v52, %v8649_v20 }
 0x5a3   : > { %v9280_v36 = vpack.c.bf16 %v7877_v33, %v7877_v33  ;;  %v8516_v43 = vunpack.c.l.b16 %v9279_v22  ;;  %v7113_v25 = vrot.slane %v7112_v56, 2  ;;  %v7119_v32 = vmax.f32 %v7117_v31, %v7118_v58 }
 0x5a4   : > { %v8641_v11 = vsel %vm8578_vm14, %v8515_v57, %v8514_v10  ;;  %v7126_v17 = vmax.f32 %v7124_v42, %v7125_v5  ;;  %v7132_v63 = vrot.slane %v7131_v53, 4  ;;  %v4447_v55 = vmul.f32 %v13442_v40, %v13536_v24  ;;  %v14749_v42 = vld [vmem:[#allocation81_spill] sm:$0xff] }
 0x5a5   : > { %v8517_v50 = vunpack.c.l.b16 %v9280_v36  ;;  %v8642_v0 = vsel %vm8580_vm15, %v8516_v43, %v8641_v11  ;;  %v7114_v4 = vmax.f32 %v7112_v56, %v7113_v25  ;;  %v7120_v44 = vrot.slane %v7119_v32, 2 }
 0x5a6   : > { %v7127_v62 = vrot.slane %v7126_v17, 2  ;;  %v7133_v1 = vmax.f32 %v7131_v53, %v7132_v63  ;;  %v4518_v52 = vadd.f32 %v13449_v54, %v4447_v55  ;;  %v4253_v20 = vadd.f32 %v13316_v3, %v12822_v37 }
 0x5a7   : > { %v7115_v23 = vrot.slane %v7114_v4, 1  ;;  %v7121_v15 = vmax.f32 %v7119_v32, %v7120_v44  ;;  %v13577_v48 = vsel %vm8582_vm0, %v8517_v50, %v8642_v0  ;;  %v4245_v24 = vadd.f32 %v13328_v18, %v14747_v45 }
 0x5a8   : > { %v7128_v8 = vmax.f32 %v7126_v17, %v7127_v62  ;;  %v7134_v60 = vrot.slane %v7133_v1, 2  ;;  %v4582_v51 = vmax.f32 %v4518_v52, 0.0  ;;  %v4381_v39 = vadd.f32 %v4253_v20, %v14748_v47 }
 0x5a9   : > { %v7116_v10 = vmax.f32 %v7114_v4, %v7115_v23  ;;  %v7122_v31 = vrot.slane %v7121_v15, 1  ;;  %v4379_v33 = vadd.f32 %v4245_v24, %v14749_v42  ;;  %v13585_v37 = vadd.f32 %v13350_v26, %v12875_v46  ;;  %v13602_v42 = vpop.f32.mrb[12].mxu0 }
 0x5aa   : > { %v7129_v3 = vrot.slane %v7128_v8, 1  ;;  %v7135_v22 = vmax.f32 %v7133_v1, %v7134_v60  ;;  %v5302_v56 = vcombine.high %v4582_v51, %v4582_v51  ;;  %v5309_v58 = vrot.slane %v4582_v51, %v12605_v59 }
 0x5ab   : > { %v7123_v57 = vmax.f32 %v7121_v15, %v7122_v31  ;;  %v7886_v18 = vmax.f32 %v13487_v9, %v7116_v10  ;;  %v4452_v5 = vmul.f32 %v13442_v40, %v4381_v39  ;;  %v4450_v53 = vmul.f32 %v13442_v40, %v4379_v33 }
 0x5ac   : > { %v7130_v36 = vmax.f32 %v7128_v8, %v7129_v3  ;;  %v7136_v43 = vrot.slane %v7135_v22, 1  ;;  %v5316_v25 = vrot.slane %v5302_v56, %v12605_v59  ;;  %v5317_v32 = vcombine.high %v5309_v58, %v5309_v58  ;;  %v13607_v56 = vpop.f32.mrb[13].mxu0 }
 0x5ad   : > { %v7887_v46 = vmax.f32 %v13491_v14, %v7123_v57  ;;  %v9289_v26 = vpack.c.bf16 %v7886_v18, %v7886_v18  ;;  %v7054_v11 = vsel %vm6017_vm13, %v5309_v58, -inf  ;;  %v4523_v17 = vadd.f32 %v13449_v54, %v4452_v5 }
 0x5ae   : > { %v7137_v63 = vmax.f32 %v7135_v22, %v7136_v43  ;;  %v7888_v55 = vmax.f32 %v13494_v28, %v7130_v36  ;;  %v5318_v9 = vcombine.high %v5316_v25, %v5316_v25  ;;  %v7055_v50 = vrot.slane %v7054_v11, 4 }
 0x5af   : > { %v9290_v0 = vpack.c.bf16 %v7887_v46, %v7887_v46  ;;  %v8526_v4 = vunpack.c.l.b16 %v9289_v26  ;;  %v7061_v44 = vsel %vm6017_vm13, %v5317_v32, -inf  ;;  %v7068_v62 = vsel %vm6017_vm13, %v5316_v25, -inf }
 0x5b0   : > { %v7889_v1 = vmax.f32 %v13500_v61, %v7137_v63  ;;  %v9291_v52 = vpack.c.bf16 %v7888_v55, %v7888_v55  ;;  %v7056_v14 = vmax.f32 %v7054_v11, %v7055_v50  ;;  %v7062_v20 = vrot.slane %v7061_v44, 4 }
 0x5b1   : > { %v8527_v23 = vunpack.c.l.b16 %v9290_v0  ;;  %v8651_v15 = vsel %vm8584_vm1, %v8526_v4, %v8650_v30  ;;  %v7069_v45 = vrot.slane %v7068_v62, 4  ;;  %v7075_v24 = vsel %vm6017_vm13, %v5318_v9, -inf  ;;  %v13605_v30 = vpop.f32.mrb[28].mxu1 }
 0x5b2   : > { %v9292_v28 = vpack.c.bf16 %v7889_v1, %v7889_v1  ;;  %v8528_v8 = vunpack.c.l.b16 %v9291_v52  ;;  %v7057_v60 = vrot.slane %v7056_v14, 2  ;;  %v7063_v51 = vmax.f32 %v7061_v44, %v7062_v20  ;;  %v4029_v36 = vpop.f32.mrb[29].mxu1 }
 0x5b3   : > { %v8652_v47 = vsel %vm8586_vm2, %v8527_v23, %v8651_v15  ;;  %v7070_v39 = vmax.f32 %v7068_v62, %v7069_v45  ;;  %v7076_v10 = vrot.slane %v7075_v24, 4  ;;  %v4587_v31 = vmax.f32 %v4523_v17, 0.0 }
 0x5b4   : > { %v8529_v61 = vunpack.c.l.b16 %v9292_v28  ;;  %v8653_v33 = vsel %vm8588_vm4, %v8528_v8, %v8652_v47  ;;  %v7058_v3 = vmax.f32 %v7056_v14, %v7057_v60  ;;  %v7064_v22 = vrot.slane %v7063_v51, 2 }
 0x5b5   : > { %v7071_v58 = vrot.slane %v7070_v39, 2  ;;  %v7077_v57 = vmax.f32 %v7075_v24, %v7076_v10  ;;  %v5387_v18 = vcombine.high %v4587_v31, %v4587_v31  ;;  %v5394_v5 = vrot.slane %v4587_v31, %v12605_v59 }
 0x5b6   : > { %v8654_v43 = vsel %vm1681_vm3, %v8529_v61, %v8653_v33  ;;  %v7059_v25 = vrot.slane %v7058_v3, 1  ;;  %v7065_v32 = vmax.f32 %v7063_v51, %v7064_v22  ;;  %v4521_v46 = vadd.f32 %v13449_v54, %v4450_v53 }
 0x5b7   : > { %v8706_v26 = vpack.c.b16 %v8654_v43, %v8654_v43  ;;  %v7072_v11 = vmax.f32 %v7070_v39, %v7071_v58  ;;  %v7078_v17 = vrot.slane %v7077_v57, 2  ;;  %v5401_v63 = vrot.slane %v5387_v18, %v12605_v59 }
 0x5b8   : > { %v7060_v55 = vmax.f32 %v7058_v3, %v7059_v25  ;;  %v7066_v9 = vrot.slane %v7065_v32, 1  ;;  %v5402_v50 = vcombine.high %v5394_v5, %v5394_v5  ;;  %v7194_v0 = vsel %vm6017_vm13, %v5394_v5, -inf  ;;  %v13622_v5 = vpop.f32.mrb[14].mxu0 }
 0x5b9   : > { %8738 = vst [vmem:[%s12834_s30 + $0x24] sm:$0xf] %v8706_v26  ;;  %v7073_v4 = vrot.slane %v7072_v11, 1  ;;  %v7079_v44 = vmax.f32 %v7077_v57, %v7078_v17  ;;  %v5403_v62 = vcombine.high %v5401_v63, %v5401_v63  ;;  %v7195_v1 = vrot.slane %v7194_v0, 4 }
 0x5ba   : > { %v7067_v52 = vmax.f32 %v7065_v32, %v7066_v9  ;;  %v7878_v14 = vmax.f32 %v13513_v21, %v7060_v55  ;;  %v7201_v53 = vsel %vm6017_vm13, %v5402_v50, -inf  ;;  %v7208_v20 = vsel %vm6017_vm13, %v5401_v63, -inf }
 0x5bb   : > { %v7074_v23 = vmax.f32 %v7072_v11, %v7073_v4  ;;  %v7080_v15 = vrot.slane %v7079_v44, 1  ;;  %v7196_v45 = vmax.f32 %v7194_v0, %v7195_v1  ;;  %v7202_v24 = vrot.slane %v7201_v53, 4 }
 0x5bc   : > { %v7879_v28 = vmax.f32 %v13516_v27, %v7067_v52  ;;  %v9281_v8 = vpack.c.bf16 %v7878_v14, %v7878_v14  ;;  %v7209_v60 = vrot.slane %v7208_v20, 4  ;;  %v7215_v51 = vsel %vm6017_vm13, %v5403_v62, -inf  ;;  %v14750_v52 = vld [vmem:[#allocation88_spill] sm:$0xff] }
 0x5bd   : > { %v7081_v47 = vmax.f32 %v7079_v44, %v7080_v15  ;;  %v7880_v39 = vmax.f32 %v13524_v34, %v7074_v23  ;;  %v7197_v10 = vrot.slane %v7196_v45, 2  ;;  %v7203_v31 = vmax.f32 %v7201_v53, %v7202_v24 }
 0x5be   : > { %v9282_v21 = vpack.c.bf16 %v7879_v28, %v7879_v28  ;;  %v8518_v61 = vunpack.c.l.b16 %v9281_v8  ;;  %v7210_v33 = vmax.f32 %v7208_v20, %v7209_v60  ;;  %v7216_v3 = vrot.slane %v7215_v51, 4  ;;  %v14751_v8 = vld [vmem:[#allocation49_spill] sm:$0xff] }
 0x5bf   : > { %v7881_v22 = vmax.f32 %v13527_v6, %v7081_v47  ;;  %v9283_v58 = vpack.c.bf16 %v7880_v39, %v7880_v39  ;;  %v7198_v57 = vmax.f32 %v7196_v45, %v7197_v10  ;;  %v7204_v18 = vrot.slane %v7203_v31, 2 }
 0x5c0   : > { %v8519_v27 = vunpack.c.l.b16 %v9282_v21  ;;  %v8644_v36 = vsel %vm8584_vm1, %v8518_v61, %v13577_v48  ;;  %v7211_v43 = vrot.slane %v7210_v33, 2  ;;  %v7217_v25 = vmax.f32 %v7215_v51, %v7216_v3 }
 0x5c1   : > { %v9284_v34 = vpack.c.bf16 %v7881_v22, %v7881_v22  ;;  %v8520_v32 = vunpack.c.l.b16 %v9283_v58  ;;  %v7199_v26 = vrot.slane %v7198_v57, 1  ;;  %v7205_v11 = vmax.f32 %v7203_v31, %v7204_v18 }
 0x5c2   : > { %v8645_v17 = vsel %vm8586_vm2, %v8519_v27, %v8644_v36  ;;  %v7212_v63 = vmax.f32 %v7210_v33, %v7211_v43  ;;  %v7218_v55 = vrot.slane %v7217_v25, 2  ;;  %v4585_v6 = vmax.f32 %v4521_v46, 0.0  ;;  %v14752_v43 = vld [vmem:[#allocation89_spill] sm:$0xff] }
 0x5c3   : > { %v8521_v9 = vunpack.c.l.b16 %v9284_v34  ;;  %v8646_v50 = vsel %vm8588_vm4, %v8520_v32, %v8645_v17  ;;  %v7206_v0 = vrot.slane %v7205_v11, 1  ;;  %v13630_v1 = vmax.f32 %v7198_v57, %v7199_v26  ;;  %v14753_v34 = vld [vmem:[#allocation73_spill] sm:$0xff]  ;;  %v13656_v26 = vpop.f32.mrb[30].mxu1 }
 0x5c4   : > { %v7219_v4 = vmax.f32 %v7217_v25, %v7218_v55  ;;  %v5353_v44 = vcombine.high %v4585_v6, %v4585_v6  ;;  %v5360_v48 = vrot.slane %v4585_v6, %v12605_v59  ;;  %v4382_v14 = vadd.f32 %v13585_v37, %v14750_v52  ;;  %v4032_v6 = vpop.f32.mrb[31].mxu1 }
 0x5c5   : > { %v8647_v62 = vsel %vm1681_vm3, %v8521_v9, %v8646_v50  ;;  %v4248_v53 = vadd.f32 %v13375_v41, %v12777_v7  ;;  %v13636_v20 = vmax.f32 %v7205_v11, %v7206_v0  ;;  %v7213_v23 = vrot.slane %v7212_v63, 1  ;;  %v13658_v11 = vpop.f32.mrb[15].mxu0 }
 0x5c6   : > { %v8705_v46 = vpack.c.b16 %v8647_v62, %v8647_v62  ;;  %v5367_v15 = vrot.slane %v5353_v44, %v12605_v59  ;;  %v5368_v45 = vcombine.high %v5360_v48, %v5360_v48  ;;  %v7138_v24 = vsel %vm6017_vm13, %v5360_v48, -inf }
 0x5c7   : > { %v4453_v28 = vmul.f32 %v13442_v40, %v4382_v14  ;;  %v4380_v60 = vadd.f32 %v4248_v53, %v14751_v8  ;;  %v7220_v51 = vrot.slane %v7219_v4, 1  ;;  %v7139_v37 = vrot.slane %v7138_v24, 4 }
 0x5c8   : > { %8737 = vst [vmem:[%s12834_s30 + $0x20] sm:$0xf] %v8705_v46  ;;  %v5369_v47 = vcombine.high %v5367_v15, %v5367_v15  ;;  %v7152_v39 = vsel %vm6017_vm13, %v5367_v15, -inf  ;;  %v7145_v7 = vsel %vm6017_vm13, %v5368_v45, -inf  ;;  %v4269_v3 = vadd.f32 %v13392_v35, %v13014_v29 }
 0x5c9   : > { %v7153_v41 = vrot.slane %v7152_v39, 4  ;;  %v4524_v10 = vadd.f32 %v13449_v54, %v4453_v28  ;;  %v4451_v31 = vmul.f32 %v13442_v40, %v4380_v60  ;;  %v7140_v21 = vmax.f32 %v7138_v24, %v7139_v37 }
 0x5ca   : > { %v7146_v61 = vrot.slane %v7145_v7, 4  ;;  %v7159_v33 = vsel %vm6017_vm13, %v5369_v47, -inf  ;;  %v4385_v25 = vadd.f32 %v4269_v3, %v14752_v43  ;;  %v13654_v32 = vadd.f32 %v13403_v16, %v14753_v34 }
 0x5cb   : > { %v7154_v22 = vmax.f32 %v7152_v39, %v7153_v41  ;;  %v7160_v58 = vrot.slane %v7159_v33, 4  ;;  %v4588_v57 = vmax.f32 %v4524_v10, 0.0  ;;  %v4522_v18 = vadd.f32 %v13449_v54, %v4451_v31 }
 0x5cc   : > { %v7141_v27 = vrot.slane %v7140_v21, 2  ;;  %v7147_v36 = vmax.f32 %v7145_v7, %v7146_v61  ;;  %v13661_v9 = vmax.f32 %v7212_v63, %v7213_v23  ;;  %v13664_v14 = vmax.f32 %v7219_v4, %v7220_v51 }
 0x5cd   : > { %v7155_v17 = vrot.slane %v7154_v22, 2  ;;  %v7161_v55 = vmax.f32 %v7159_v33, %v7160_v58  ;;  %v5404_v29 = vcombine.high %v4588_v57, %v4588_v57  ;;  %v5411_v35 = vrot.slane %v4588_v57, %v12605_v59 }
 0x5ce   : > { %v7142_v50 = vmax.f32 %v7140_v21, %v7141_v27  ;;  %v7148_v0 = vrot.slane %v7147_v36, 2  ;;  %v4586_v44 = vmax.f32 %v4522_v18, 0.0  ;;  %v4456_v47 = vmul.f32 %v13442_v40, %v4385_v25 }
 0x5cf   : > { %v7156_v48 = vmax.f32 %v7154_v22, %v7155_v17  ;;  %v7162_v62 = vrot.slane %v7161_v55, 2  ;;  %v5418_v16 = vrot.slane %v5404_v29, %v12605_v59  ;;  %v5419_v52 = vcombine.high %v5411_v35, %v5411_v35 }
 0x5d0   : > { %v7143_v53 = vrot.slane %v7142_v50, 1  ;;  %v7149_v46 = vmax.f32 %v7147_v36, %v7148_v0  ;;  %v7222_v15 = vsel %vm6017_vm13, %v5411_v35, -inf  ;;  %v5370_v60 = vcombine.high %v4586_v44, %v4586_v44 }
 0x5d1   : > { %v7157_v45 = vrot.slane %v7156_v48, 1  ;;  %v7163_v24 = vmax.f32 %v7161_v55, %v7162_v62  ;;  %v5420_v28 = vcombine.high %v5418_v16, %v5418_v16  ;;  %v7223_v8 = vrot.slane %v7222_v15, 4 }
 0x5d2   : > { %v7229_v63 = vsel %vm6017_vm13, %v5419_v52, -inf  ;;  %v7236_v23 = vsel %vm6017_vm13, %v5418_v16, -inf  ;;  %v13670_v37 = vmax.f32 %v7142_v50, %v7143_v53  ;;  %v7150_v39 = vrot.slane %v7149_v46, 1 }
 0x5d3   : > { %v7224_v4 = vmax.f32 %v7222_v15, %v7223_v8  ;;  %v7230_v51 = vrot.slane %v7229_v63, 4  ;;  %v13672_v7 = vmax.f32 %v7156_v48, %v7157_v45  ;;  %v7237_v41 = vrot.slane %v7236_v23, 4 }
 0x5d4   : > { %v7243_v10 = vsel %vm6017_vm13, %v5420_v28, -inf  ;;  %v5377_v31 = vrot.slane %v4586_v44, %v12605_v59  ;;  %v7164_v21 = vrot.slane %v7163_v24, 1  ;;  %v5384_v58 = vrot.slane %v5370_v60, %v12605_v59 }
 0x5d5   : > { %v7225_v61 = vrot.slane %v7224_v4, 2  ;;  %v7231_v33 = vmax.f32 %v7229_v63, %v7230_v51  ;;  %v7244_v3 = vrot.slane %v7243_v10, 4  ;;  %v7238_v22 = vmax.f32 %v7236_v23, %v7237_v41 }
 0x5d6   : > { %v5385_v57 = vcombine.high %v5377_v31, %v5377_v31  ;;  %v7166_v18 = vsel %vm6017_vm13, %v5377_v31, -inf  ;;  %v5386_v17 = vcombine.high %v5384_v58, %v5384_v58  ;;  %v7180_v29 = vsel %vm6017_vm13, %v5384_v58, -inf }
 0x5d7   : > { %v7226_v27 = vmax.f32 %v7224_v4, %v7225_v61  ;;  %v7232_v36 = vrot.slane %v7231_v33, 2  ;;  %v7245_v43 = vmax.f32 %v7243_v10, %v7244_v3  ;;  %v7167_v25 = vrot.slane %v7166_v18, 4  ;;  %v13688_v10 = vpop.f32.mrb[16].mxu0 }
 0x5d8   : > { %v7239_v34 = vrot.slane %v7238_v22, 2  ;;  %v7173_v55 = vsel %vm6017_vm13, %v5385_v57, -inf  ;;  %v7181_v62 = vrot.slane %v7180_v29, 4  ;;  %v7187_v16 = vsel %vm6017_vm13, %v5386_v17, -inf }
 0x5d9   : > { %v7227_v35 = vrot.slane %v7226_v27, 1  ;;  %v7233_v6 = vmax.f32 %v7231_v33, %v7232_v36  ;;  %v7246_v50 = vrot.slane %v7245_v43, 2  ;;  %v7168_v0 = vmax.f32 %v7166_v18, %v7167_v25 }
 0x5da   : > { %v7240_v44 = vmax.f32 %v7238_v22, %v7239_v34  ;;  %v7174_v48 = vrot.slane %v7173_v55, 4  ;;  %v13681_v52 = vmax.f32 %v7149_v46, %v7150_v39  ;;  %v13683_v28 = vmax.f32 %v7163_v24, %v7164_v21  ;;  %v14754_v21 = vld [vmem:[#allocation38_spill] sm:$0xff] }
 0x5db   : > { %v7234_v53 = vrot.slane %v7233_v6, 1  ;;  %v7247_v15 = vmax.f32 %v7245_v43, %v7246_v50  ;;  %v7169_v45 = vrot.slane %v7168_v0, 2  ;;  %v7182_v63 = vmax.f32 %v7180_v29, %v7181_v62 }
 0x5dc   : > { %v7175_v8 = vmax.f32 %v7173_v55, %v7174_v48  ;;  %v7188_v23 = vrot.slane %v7187_v16, 4  ;;  %v13685_v60 = vmax.f32 %v7226_v27, %v7227_v35  ;;  %v7241_v4 = vrot.slane %v7240_v44, 1  ;;  %v14755_v27 = vld [vmem:[#allocation57_spill] sm:$0xff] }
 0x5dd   : > { %v7170_v51 = vmax.f32 %v7168_v0, %v7169_v45  ;;  %v4527_v41 = vadd.f32 %v13449_v54, %v4456_v47  ;;  %v7248_v31 = vrot.slane %v7247_v15, 1  ;;  %v7183_v46 = vrot.slane %v7182_v63, 2  ;;  %v14756_v35 = vld [vmem:[#allocation101_spill] sm:$0xff] }
 0x5de   : > { %v7176_v61 = vrot.slane %v7175_v8, 2  ;;  %v7189_v39 = vmax.f32 %v7187_v16, %v7188_v23  ;;  %v13690_v33 = vmax.f32 %v7233_v6, %v7234_v53  ;;  %v4383_v22 = vadd.f32 %v13654_v32, %v14754_v21 }
 0x5df   : > { %v7171_v3 = vrot.slane %v7170_v51, 1  ;;  %v4591_v24 = vmax.f32 %v4527_v41, 0.0  ;;  %v7184_v57 = vmax.f32 %v7182_v63, %v7183_v46  ;;  %v4272_v36 = vadd.f32 %v13418_v13, %v14755_v27  ;;  %v13716_v41 = vpop.f32.mrb[32].mxu1  ;;  %v13722_v46 = vld [vmem:[#allocation11] ss:$0 sm:$0xff] }
 0x5e0   : > { %v7177_v58 = vmax.f32 %v7175_v8, %v7176_v61  ;;  %v7190_v18 = vrot.slane %v7189_v39, 2  ;;  %v13696_v47 = vmax.f32 %v7240_v44, %v7241_v4  ;;  %v4454_v34 = vmul.f32 %v13442_v40, %v4383_v22 }
 0x5e1   : > { %v5455_v43 = vcombine.high %v4591_v24, %v4591_v24  ;;  %v5462_v25 = vrot.slane %v4591_v24, %v12605_v59  ;;  %v13700_v17 = vmax.f32 %v7247_v15, %v7248_v31  ;;  %v7185_v29 = vrot.slane %v7184_v57, 1 }
 0x5e2   : > { %v7178_v55 = vrot.slane %v7177_v58, 1  ;;  %v4386_v6 = vadd.f32 %v4272_v36, %v14756_v35  ;;  %v4525_v13 = vadd.f32 %v13449_v54, %v4454_v34  ;;  %v13706_v44 = vmax.f32 %v7170_v51, %v7171_v3  ;;  %v13718_v54 = vpop.f32.mrb[17].mxu0  ;;  %v4037_v3 = vpop.f32.mrb[33].mxu1  ;;  %v13727_v36 = vld [vmem:[#allocation12] ss:$0 sm:$0xff] }
 0x5e3   : > { %v5469_v32 = vrot.slane %v5455_v43, %v12605_v59  ;;  %v5470_v50 = vcombine.high %v5462_v25, %v5462_v25  ;;  %v7306_v0 = vsel %vm6017_vm13, %v5462_v25, -inf  ;;  %v13710_v62 = vmax.f32 %v7189_v39, %v7190_v18 }
 0x5e4   : > { %v13708_v48 = vmax.f32 %v7177_v58, %v7178_v55  ;;  %v7307_v40 = vrot.slane %v7306_v0, 4  ;;  %v4589_v45 = vmax.f32 %v4525_v13, 0.0  ;;  %v13714_v8 = vmax.f32 %v7184_v57, %v7185_v29 }
 0x5e5   : > { %v5471_v16 = vcombine.high %v5469_v32, %v5469_v32  ;;  %v7313_v53 = vsel %vm6017_vm13, %v5470_v50, -inf  ;;  %v7320_v15 = vsel %vm6017_vm13, %v5469_v32, -inf  ;;  %v4457_v39 = vmul.f32 %v13722_v46, %v4386_v6 }
 0x5e6   : > { %v7308_v63 = vmax.f32 %v7306_v0, %v7307_v40  ;;  %v7314_v23 = vrot.slane %v7313_v53, 4  ;;  %v7321_v4 = vrot.slane %v7320_v15, 4  ;;  %v5421_v31 = vcombine.high %v4589_v45, %v4589_v45 }
 0x5e7   : > { %v7327_v51 = vsel %vm6017_vm13, %v5471_v16, -inf  ;;  %v5428_v61 = vrot.slane %v4589_v45, %v12605_v59  ;;  %v4528_v43 = vadd.f32 %v13727_v36, %v4457_v39 }
 0x5e8   : > { %v7309_v24 = vrot.slane %v7308_v63, 2  ;;  %v7315_v21 = vmax.f32 %v7313_v53, %v7314_v23  ;;  %v7322_v22 = vmax.f32 %v7320_v15, %v7321_v4  ;;  %v7328_v58 = vrot.slane %v7327_v51, 4 }
 0x5e9   : > { %v5435_v57 = vrot.slane %v5421_v31, %v12605_v59  ;;  %v5436_v18 = vcombine.high %v5428_v61, %v5428_v61  ;;  %v7250_v27 = vsel %vm6017_vm13, %v5428_v61, -inf }
 0x5ea   : > { %v7310_v25 = vmax.f32 %v7308_v63, %v7309_v24  ;;  %v7316_v34 = vrot.slane %v7315_v21, 2  ;;  %v7323_v55 = vrot.slane %v7322_v22, 2  ;;  %v7329_v29 = vmax.f32 %v7327_v51, %v7328_v58 }
 0x5eb   : > { %v5437_v35 = vcombine.high %v5435_v57, %v5435_v57  ;;  %v7251_v6 = vrot.slane %v7250_v27, 4  ;;  %v7257_v32 = vsel %vm6017_vm13, %v5436_v18, -inf  ;;  %v7264_v50 = vsel %vm6017_vm13, %v5435_v57, -inf }
 0x5ec   : > { %v7311_v0 = vrot.slane %v7310_v25, 1  ;;  %v7317_v13 = vmax.f32 %v7315_v21, %v7316_v34  ;;  %v7324_v40 = vmax.f32 %v7322_v22, %v7323_v55  ;;  %v7330_v16 = vrot.slane %v7329_v29, 2 }
 0x5ed   : > { %v7252_v53 = vmax.f32 %v7250_v27, %v7251_v6  ;;  %v7258_v15 = vrot.slane %v7257_v32, 4  ;;  %v7265_v45 = vrot.slane %v7264_v50, 4  ;;  %v7271_v23 = vsel %vm6017_vm13, %v5437_v35, -inf }
 0x5ee   : > { %v7312_v4 = vmax.f32 %v7310_v25, %v7311_v0  ;;  %v7318_v63 = vrot.slane %v7317_v13, 1  ;;  %v7325_v31 = vrot.slane %v7324_v40, 1  ;;  %v7331_v61 = vmax.f32 %v7329_v29, %v7330_v16  ;;  %v13736_v29 = vpop.f32.mrb[18].mxu0 }
 0x5ef   : > { %v7253_v51 = vrot.slane %v7252_v53, 2  ;;  %v7259_v39 = vmax.f32 %v7257_v32, %v7258_v15  ;;  %v7266_v3 = vmax.f32 %v7264_v50, %v7265_v45  ;;  %v7272_v24 = vrot.slane %v7271_v23, 4 }
 0x5f0   : > { %v7319_v58 = vmax.f32 %v7317_v13, %v7318_v63  ;;  %v7326_v18 = vmax.f32 %v7324_v40, %v7325_v31  ;;  %v7332_v57 = vrot.slane %v7331_v61, 1  ;;  %v7898_v21 = vmax.f32 %v13630_v1, %v7312_v4 }
 0x5f1   : > { %v7254_v22 = vmax.f32 %v7252_v53, %v7253_v51  ;;  %v7260_v34 = vrot.slane %v7259_v39, 2  ;;  %v7267_v27 = vrot.slane %v7266_v3, 2  ;;  %v7273_v55 = vmax.f32 %v7271_v23, %v7272_v24 }
 0x5f2   : > { %v7333_v6 = vmax.f32 %v7331_v61, %v7332_v57  ;;  %v7899_v35 = vmax.f32 %v13636_v20, %v7319_v58  ;;  %v7900_v25 = vmax.f32 %v13661_v9, %v7326_v18  ;;  %v9301_v0 = vpack.c.bf16 %v7898_v21, %v7898_v21 }
 0x5f3   : > { %v7255_v32 = vrot.slane %v7254_v22, 1  ;;  %v7261_v50 = vmax.f32 %v7259_v39, %v7260_v34  ;;  %v7268_v16 = vmax.f32 %v7266_v3, %v7267_v27  ;;  %v7274_v13 = vrot.slane %v7273_v55, 2 }
 0x5f4   : > { %v7901_v40 = vmax.f32 %v13664_v14, %v7333_v6  ;;  %v9302_v15 = vpack.c.bf16 %v7899_v35, %v7899_v35  ;;  %v9303_v1 = vpack.c.bf16 %v7900_v25, %v7900_v25  ;;  %v8538_v53 = vunpack.c.l.b16 %v9301_v0 }
 0x5f5   : > { %v7256_v45 = vmax.f32 %v7254_v22, %v7255_v32  ;;  %v7262_v4 = vrot.slane %v7261_v50, 1  ;;  %v7269_v23 = vrot.slane %v7268_v16, 1  ;;  %v7275_v63 = vmax.f32 %v7273_v55, %v7274_v13 }
 0x5f6   : > { %v9304_v31 = vpack.c.bf16 %v7901_v40, %v7901_v40  ;;  %v8539_v20 = vunpack.c.l.b16 %v9302_v15  ;;  %v8540_v61 = vunpack.c.l.b16 %v9303_v1  ;;  %v4592_v9 = vmax.f32 %v4528_v43, 0.0 }
 0x5f7   : > { %v7263_v51 = vmax.f32 %v7261_v50, %v7262_v4  ;;  %v7270_v24 = vmax.f32 %v7268_v16, %v7269_v23  ;;  %v7276_v58 = vrot.slane %v7275_v63, 1  ;;  %v7890_v39 = vmax.f32 %v13670_v37, %v7256_v45  ;;  %v13752_v45 = vpop.f32.mrb[19].mxu0 }
 0x5f8   : > { %v8541_v3 = vunpack.c.l.b16 %v9304_v31  ;;  %v8662_v18 = vsel %vm8578_vm14, %v8539_v20, %v8538_v53  ;;  %v5472_v14 = vcombine.high %v4592_v9, %v4592_v9  ;;  %v5479_v57 = vrot.slane %v4592_v9, %v12605_v59  ;;  %v13750_v53 = vpop.f32.mrb[34].mxu1 }
 0x5f9   : > { %v8663_v21 = vsel %vm8580_vm15, %v8540_v61, %v8662_v18  ;;  %v7277_v22 = vmax.f32 %v7275_v63, %v7276_v58  ;;  %v7891_v34 = vmax.f32 %v13681_v52, %v7263_v51  ;;  %v7892_v27 = vmax.f32 %v13672_v7, %v7270_v24  ;;  %v4040_v31 = vpop.f32.mrb[35].mxu1  ;;  %v14757_v18 = vld [vmem:[#allocation114_spill] sm:$0xff] }
 0x5fa   : > { %v9293_v55 = vpack.c.bf16 %v7890_v39, %v7890_v39  ;;  %v5486_v43 = vrot.slane %v5472_v14, %v12605_v59  ;;  %v5487_v6 = vcombine.high %v5479_v57, %v5479_v57  ;;  %v7334_v35 = vsel %vm6017_vm13, %v5479_v57, -inf }
 0x5fb   : > { %v7893_v37 = vmax.f32 %v13683_v28, %v7277_v22  ;;  %v9294_v25 = vpack.c.bf16 %v7891_v34, %v7891_v34  ;;  %v9295_v0 = vpack.c.bf16 %v7892_v27, %v7892_v27  ;;  %v7335_v32 = vrot.slane %v7334_v35, 4 }
 0x5fc   : > { %v8530_v50 = vunpack.c.l.b16 %v9293_v55  ;;  %v5488_v16 = vcombine.high %v5486_v43, %v5486_v43  ;;  %v7341_v13 = vsel %vm6017_vm13, %v5487_v6, -inf  ;;  %v7348_v40 = vsel %vm6017_vm13, %v5486_v43, -inf  ;;  %v14759_v43 = vld [vmem:[#allocation93_spill] sm:$0xff] }
 0x5fd   : > { %v9296_v52 = vpack.c.bf16 %v7893_v37, %v7893_v37  ;;  %v8531_v15 = vunpack.c.l.b16 %v9294_v25  ;;  %v8532_v7 = vunpack.c.l.b16 %v9295_v0  ;;  %v7336_v1 = vmax.f32 %v7334_v35, %v7335_v32  ;;  %v14760_v35 = vld [vmem:[#allocation115_spill] sm:$0xff]  ;;  %v14761_v37 = vld [vmem:[#allocation80_spill] sm:$0xff] }
 0x5fe   : > { %v7342_v4 = vrot.slane %v7341_v13, 4  ;;  %v7349_v23 = vrot.slane %v7348_v40, 4  ;;  %v7355_v28 = vsel %vm6017_vm13, %v5488_v16, -inf  ;;  %v13756_v63 = vsel %vm8582_vm0, %v8541_v3, %v8663_v21  ;;  %v14758_v3 = vld [vmem:[#allocation117_spill] sm:$0xff] }
 0x5ff   : > { %v8533_v20 = vunpack.c.l.b16 %v9296_v52  ;;  %v8655_v61 = vsel %vm8578_vm14, %v8531_v15, %v8530_v50  ;;  %v7337_v9 = vrot.slane %v7336_v1, 2  ;;  %v7356_v51 = vrot.slane %v7355_v28, 4  ;;  %v14762_v50 = vld [vmem:[#allocation92_spill] sm:$0xff] }
 0x600   : > { %v8656_v24 = vsel %vm8580_vm15, %v8532_v7, %v8655_v61  ;;  %v7343_v58 = vmax.f32 %v7341_v13, %v7342_v4  ;;  %v7350_v39 = vmax.f32 %v7348_v40, %v7349_v23  ;;  %v4264_v14 = vadd.f32 %v13468_v12, %v14757_v18  ;;  %v14763_v12 = vld [vmem:[#allocation64_spill] sm:$0xff] }
 0x601   : > { %v7338_v57 = vmax.f32 %v7336_v1, %v7337_v9  ;;  %v7357_v22 = vmax.f32 %v7355_v28, %v7356_v51  ;;  %v13763_v34 = vsel %vm8582_vm0, %v8533_v20, %v8656_v24  ;;  %v4285_v21 = vadd.f32 %v14758_v3, %v13222_v19  ;;  %v14764_v7 = vld [vmem:[#allocation44_spill] sm:$0xff]  ;;  %v14765_v28 = vld [vmem:[#allocation47_spill] sm:$0xff]  ;;  %v13785_v3 = vpop.f32.mrb[20].mxu0 }
 0x602   : > { %v7344_v27 = vrot.slane %v7343_v58, 2  ;;  %v7351_v55 = vrot.slane %v7350_v39, 2  ;;  %v4384_v6 = vadd.f32 %v4264_v14, %v14759_v43  ;;  %v4277_v25 = vadd.f32 %v14761_v37, %v14760_v35 }
 0x603   : > { %v7339_v0 = vrot.slane %v7338_v57, 1  ;;  %v7358_v32 = vrot.slane %v7357_v22, 2  ;;  %v4389_v16 = vadd.f32 %v4285_v21, %v14762_v50  ;;  %v4288_v13 = vadd.f32 %v13549_v2, %v14763_v12 }
 0x604   : > { %v7345_v40 = vmax.f32 %v7343_v58, %v7344_v27  ;;  %v7352_v52 = vmax.f32 %v7350_v39, %v7351_v55  ;;  %v4455_v15 = vmul.f32 %v13722_v46, %v4384_v6  ;;  %v4387_v19 = vadd.f32 %v4277_v25, %v14764_v7  ;;  %v13790_v6 = vpop.f32.mrb[36].mxu1 }
 0x605   : > { %v7340_v1 = vmax.f32 %v7338_v57, %v7339_v0  ;;  %v7359_v4 = vmax.f32 %v7357_v22, %v7358_v32  ;;  %v4460_v23 = vmul.f32 %v13722_v46, %v4389_v16  ;;  %v4390_v31 = vadd.f32 %v4288_v13, %v14765_v28  ;;  %v4045_v0 = vpop.f32.mrb[37].mxu1  ;;  %v13802_v28 = vpop.f32.mrb[21].mxu0 }
 0x606   : > { %v7346_v20 = vrot.slane %v7345_v40, 1  ;;  %v7353_v61 = vrot.slane %v7352_v52, 1  ;;  %v4526_v9 = vadd.f32 %v13727_v36, %v4455_v15  ;;  %v4458_v51 = vmul.f32 %v13722_v46, %v4387_v19 }
 0x607   : > { %v7192_v2 = vrot.slane %v13710_v62, 1  ;;  %v7360_v24 = vrot.slane %v7359_v4, 1  ;;  %v7902_v58 = vmax.f32 %v13685_v60, %v7340_v1  ;;  %v4531_v39 = vadd.f32 %v13727_v36, %v4460_v23 }
 0x608   : > { %v7347_v18 = vmax.f32 %v7345_v40, %v7346_v20  ;;  %v7354_v14 = vmax.f32 %v7352_v52, %v7353_v61  ;;  %v4590_v57 = vmax.f32 %v4526_v9, 0.0  ;;  %v13783_v22 = vmul.f32 %v13722_v46, %v4390_v31 }
 0x609   : > { %v7361_v21 = vmax.f32 %v7359_v4, %v7360_v24  ;;  %v9305_v27 = vpack.c.bf16 %v7902_v58, %v7902_v58  ;;  %v4595_v55 = vmax.f32 %v4531_v39, 0.0  ;;  %v13788_v43 = vadd.f32 %v13727_v36, %v4458_v51 }
 0x60a   : > { %v7903_v60 = vmax.f32 %v13690_v33, %v7347_v18  ;;  %v7904_v35 = vmax.f32 %v13696_v47, %v7354_v14  ;;  %v5438_v37 = vcombine.high %v4590_v57, %v4590_v57  ;;  %v5445_v25 = vrot.slane %v4590_v57, %v12605_v59 }
 0x60b   : > { %v7905_v32 = vmax.f32 %v13700_v17, %v7361_v21  ;;  %v8542_v50 = vunpack.c.l.b16 %v9305_v27  ;;  %v5523_v16 = vcombine.high %v4595_v55, %v4595_v55  ;;  %v5530_v12 = vrot.slane %v4595_v55, %v12605_v59 }
 0x60c   : > { %v9306_v13 = vpack.c.bf16 %v7903_v60, %v7903_v60  ;;  %v9307_v40 = vpack.c.bf16 %v7904_v35, %v7904_v35  ;;  %v5452_v52 = vrot.slane %v5438_v37, %v12605_v59  ;;  %v5453_v15 = vcombine.high %v5445_v25, %v5445_v25 }
 0x60d   : > { %v9308_v7 = vpack.c.bf16 %v7905_v32, %v7905_v32  ;;  %v8665_v33 = vsel %vm8584_vm1, %v8542_v50, %v13756_v63  ;;  %v7278_v47 = vsel %vm6017_vm13, %v5445_v25, -inf  ;;  %v5537_v19 = vrot.slane %v5523_v16, %v12605_v59 }
 0x60e   : > { %v8543_v1 = vunpack.c.l.b16 %v9306_v13  ;;  %v8544_v4 = vunpack.c.l.b16 %v9307_v40  ;;  %v5454_v17 = vcombine.high %v5452_v52, %v5452_v52  ;;  %v7279_v23 = vrot.slane %v7278_v47, 4 }
 0x60f   : > { %v8545_v31 = vunpack.c.l.b16 %v9308_v7  ;;  %v7285_v20 = vsel %vm6017_vm13, %v5453_v15, -inf  ;;  %v7292_v61 = vsel %vm6017_vm13, %v5452_v52, -inf  ;;  %v5538_v9 = vcombine.high %v5530_v12, %v5530_v12 }
 0x610   : > { %v8666_v51 = vsel %vm8586_vm2, %v8543_v1, %v8665_v33  ;;  %v7280_v24 = vmax.f32 %v7278_v47, %v7279_v23  ;;  %v7286_v63 = vrot.slane %v7285_v20, 4  ;;  %v7293_v58 = vrot.slane %v7292_v61, 4 }
 0x611   : > { %v8667_v39 = vsel %vm8588_vm4, %v8544_v4, %v8666_v51  ;;  %v7299_v18 = vsel %vm6017_vm13, %v5454_v17, -inf  ;;  %v5539_v14 = vcombine.high %v5537_v19, %v5537_v19  ;;  %v7418_v57 = vsel %vm6017_vm13, %v5530_v12, -inf  ;;  %v13815_v4 = vpop.f32.mrb[22].mxu0 }
 0x612   : > { %v8668_v21 = vsel %vm1681_vm3, %v8545_v31, %v8667_v39  ;;  %v7281_v27 = vrot.slane %v7280_v24, 2  ;;  %v7287_v55 = vmax.f32 %v7285_v20, %v7286_v63  ;;  %v7294_v60 = vmax.f32 %v7292_v61, %v7293_v58  ;;  %v13817_v61 = vpop.f32.mrb[38].mxu1 }
 0x613   : > { %v8708_v35 = vpack.c.b16 %v8668_v21, %v8668_v21  ;;  %v7300_v37 = vrot.slane %v7299_v18, 4  ;;  %v7419_v25 = vrot.slane %v7418_v57, 4  ;;  %v7425_v0 = vsel %vm6017_vm13, %v5538_v9, -inf  ;;  %v4048_v58 = vpop.f32.mrb[39].mxu1 }
 0x614   : > { %v7282_v32 = vmax.f32 %v7280_v24, %v7281_v27  ;;  %v7288_v50 = vrot.slane %v7287_v55, 2  ;;  %v7295_v16 = vrot.slane %v7294_v60, 2  ;;  %v7426_v13 = vrot.slane %v7425_v0, 4 }
 0x615   : > { %8740 = vst [vmem:[%s12834_s30 + $0x2c] sm:$0xf] %v8708_v35  ;;  %v7301_v40 = vmax.f32 %v7299_v18, %v7300_v37  ;;  %v7420_v52 = vmax.f32 %v7418_v57, %v7419_v25  ;;  %v7432_v15 = vsel %vm6017_vm13, %v5537_v19, -inf  ;;  %v7439_v12 = vsel %vm6017_vm13, %v5539_v14, -inf }
 0x616   : > { %v7283_v7 = vrot.slane %v7282_v32, 1  ;;  %v7289_v33 = vmax.f32 %v7287_v55, %v7288_v50  ;;  %v7296_v47 = vmax.f32 %v7294_v60, %v7295_v16  ;;  %v7427_v1 = vmax.f32 %v7425_v0, %v7426_v13 }
 0x617   : > { %v7302_v17 = vrot.slane %v7301_v40, 2  ;;  %v7421_v23 = vrot.slane %v7420_v52, 2  ;;  %v7433_v31 = vrot.slane %v7432_v15, 4  ;;  %v7440_v20 = vrot.slane %v7439_v12, 4 }
 0x618   : > { %v7284_v9 = vmax.f32 %v7282_v32, %v7283_v7  ;;  %v7290_v51 = vrot.slane %v7289_v33, 1  ;;  %v7297_v24 = vrot.slane %v7296_v47, 1  ;;  %v7428_v63 = vrot.slane %v7427_v1, 2 }
 0x619   : > { %v7303_v19 = vmax.f32 %v7301_v40, %v7302_v17  ;;  %v7422_v39 = vmax.f32 %v7420_v52, %v7421_v23  ;;  %v7434_v18 = vmax.f32 %v7432_v15, %v7433_v31  ;;  %v7441_v14 = vmax.f32 %v7439_v12, %v7440_v20 }
 0x61a   : > { %v7291_v57 = vmax.f32 %v7289_v33, %v7290_v51  ;;  %v7298_v21 = vmax.f32 %v7296_v47, %v7297_v24  ;;  %v7894_v27 = vmax.f32 %v13706_v44, %v7284_v9  ;;  %v13820_v55 = vmax.f32 %v7427_v1, %v7428_v63 }
 0x61b   : > { %v7304_v60 = vrot.slane %v7303_v19, 1  ;;  %v7423_v35 = vrot.slane %v7422_v39, 1  ;;  %v7435_v37 = vrot.slane %v7434_v18, 2  ;;  %v7442_v25 = vrot.slane %v7441_v14, 2 }
 0x61c   : > { %v7895_v0 = vmax.f32 %v13708_v48, %v7291_v57  ;;  %v7896_v32 = vmax.f32 %v13714_v8, %v7298_v21  ;;  %v9297_v50 = vpack.c.bf16 %v7894_v27, %v7894_v27  ;;  %v4532_v16 = vadd.f32 %v13727_v36, %v13783_v22 }
 0x61d   : > { %v7193_v13 = vmax.f32 %v13710_v62, %v7192_v2  ;;  %v7305_v40 = vmax.f32 %v7303_v19, %v7304_v60  ;;  %v13829_v44 = vmax.f32 %v7434_v18, %v7435_v37  ;;  %v13831_v52 = vmax.f32 %v7441_v14, %v7442_v25  ;;  %v14766_v19 = vld [vmem:[#allocation68_spill] sm:$0xff] }
 0x61e   : > { %v9298_v15 = vpack.c.bf16 %v7895_v0, %v7895_v0  ;;  %v9299_v12 = vpack.c.bf16 %v7896_v32, %v7896_v32  ;;  %v8534_v7 = vunpack.c.l.b16 %v9297_v50  ;;  %v13833_v48 = vmax.f32 %v7422_v39, %v7423_v35 }
 0x61f   : > { %v7897_v33 = vmax.f32 %v7193_v13, %v7305_v40  ;;  %v7430_v8 = vrot.slane %v13820_v55, 1  ;;  %v4593_v47 = vmax.f32 %v13788_v43, 0.0  ;;  %v7437_v62 = vrot.slane %v13829_v44, 1 }
 0x620   : > { %v8535_v22 = vunpack.c.l.b16 %v9298_v15  ;;  %v8658_v1 = vsel %vm8584_vm1, %v8534_v7, %v13763_v34  ;;  %v4596_v2 = vmax.f32 %v4532_v16, 0.0  ;;  %v8536_v23 = vunpack.c.l.b16 %v9299_v12 }
 0x621   : > { %v9300_v17 = vpack.c.bf16 %v7897_v33, %v7897_v33  ;;  %v7444_v31 = vrot.slane %v13831_v52, 1  ;;  %v5489_v20 = vcombine.high %v4593_v47, %v4593_v47  ;;  %v5496_v51 = vrot.slane %v4593_v47, %v12605_v59 }
 0x622   : > { %v8659_v9 = vsel %vm8586_vm2, %v8535_v22, %v8658_v1  ;;  %v5540_v24 = vcombine.high %v4596_v2, %v4596_v2  ;;  %v5547_v63 = vrot.slane %v4596_v2, %v12605_v59  ;;  %v4280_v39 = vadd.f32 %v13557_v38, %v14766_v19 }
 0x623   : > { %v8537_v43 = vunpack.c.l.b16 %v9300_v17  ;;  %v8660_v58 = vsel %vm8588_vm4, %v8536_v23, %v8659_v9  ;;  %v5503_v34 = vrot.slane %v5489_v20, %v12605_v59  ;;  %v5504_v18 = vcombine.high %v5496_v51, %v5496_v51  ;;  %v13858_v17 = vpop.f32.mrb[23].mxu0 }
 0x624   : > { %v7362_v14 = vsel %vm6017_vm13, %v5496_v51, -inf  ;;  %v5554_v57 = vrot.slane %v5540_v24, %v12605_v59  ;;  %v5555_v21 = vcombine.high %v5547_v63, %v5547_v63  ;;  %v7446_v40 = vsel %vm6017_vm13, %v5547_v63, -inf }
 0x625   : > { %v8661_v27 = vsel %vm1681_vm3, %v8537_v43, %v8660_v58  ;;  %v5505_v60 = vcombine.high %v5503_v34, %v5503_v34  ;;  %v7363_v35 = vrot.slane %v7362_v14, 4  ;;  %v7376_v37 = vsel %vm6017_vm13, %v5503_v34, -inf }
 0x626   : > { %v8707_v25 = vpack.c.b16 %v8661_v27, %v8661_v27  ;;  %v7369_v0 = vsel %vm6017_vm13, %v5504_v18, -inf  ;;  %v7377_v32 = vrot.slane %v7376_v37, 4  ;;  %v5556_v50 = vcombine.high %v5554_v57, %v5554_v57 }
 0x627   : > { %v7364_v16 = vmax.f32 %v7362_v14, %v7363_v35  ;;  %v7370_v38 = vrot.slane %v7369_v0, 4  ;;  %v7383_v13 = vsel %vm6017_vm13, %v5505_v60, -inf  ;;  %v7447_v7 = vrot.slane %v7446_v40, 4 }
 0x628   : > { %8739 = vst [vmem:[%s12834_s30 + $0x28] sm:$0xf] %v8707_v25  ;;  %v7378_v15 = vmax.f32 %v7376_v37, %v7377_v32  ;;  %v7384_v12 = vrot.slane %v7383_v13, 4  ;;  %v7453_v33 = vsel %vm6017_vm13, %v5555_v21, -inf  ;;  %v7460_v2 = vsel %vm6017_vm13, %v5554_v57, -inf }
 0x629   : > { %v7365_v47 = vrot.slane %v7364_v16, 2  ;;  %v7371_v22 = vmax.f32 %v7369_v0, %v7370_v38  ;;  %v7454_v1 = vrot.slane %v7453_v33, 4  ;;  %v7448_v9 = vmax.f32 %v7446_v40, %v7447_v7 }
 0x62a   : > { %v7379_v23 = vrot.slane %v7378_v15, 2  ;;  %v7385_v20 = vmax.f32 %v7383_v13, %v7384_v12  ;;  %v7461_v51 = vrot.slane %v7460_v2, 4  ;;  %v7467_v58 = vsel %vm6017_vm13, %v5556_v50, -inf }
 0x62b   : > { %v7366_v24 = vmax.f32 %v7364_v16, %v7365_v47  ;;  %v7372_v43 = vrot.slane %v7371_v22, 2  ;;  %v7455_v63 = vmax.f32 %v7453_v33, %v7454_v1  ;;  %v7449_v18 = vrot.slane %v7448_v9, 2 }
 0x62c   : > { %v7380_v34 = vmax.f32 %v7378_v15, %v7379_v23  ;;  %v7386_v19 = vrot.slane %v7385_v20, 2  ;;  %v7462_v14 = vmax.f32 %v7460_v2, %v7461_v51  ;;  %v7468_v35 = vrot.slane %v7467_v58, 4  ;;  %v14768_v23 = vld [vmem:[#allocation66_spill] sm:$0xff] }
 0x62d   : > { %v7367_v21 = vrot.slane %v7366_v24, 1  ;;  %v7373_v27 = vmax.f32 %v7371_v22, %v7372_v43  ;;  %v7456_v60 = vrot.slane %v7455_v63, 2  ;;  %v7450_v25 = vmax.f32 %v7448_v9, %v7449_v18  ;;  %v14773_v18 = vld [vmem:[#allocation100_spill] sm:$0xff] }
 0x62e   : > { %v7381_v57 = vrot.slane %v7380_v34, 1  ;;  %v7387_v37 = vmax.f32 %v7385_v20, %v7386_v19  ;;  %v7463_v0 = vrot.slane %v7462_v14, 2  ;;  %v13864_v32 = vmax.f32 %v13820_v55, %v7430_v8  ;;  %v14767_v55 = vld [vmem:[#allocation45_spill] sm:$0xff] }
 0x62f   : > { %v7374_v16 = vrot.slane %v7373_v27, 1  ;;  %v7457_v38 = vmax.f32 %v7455_v63, %v7456_v60  ;;  %v7469_v50 = vmax.f32 %v7467_v58, %v7468_v35  ;;  %v13869_v13 = vmax.f32 %v13829_v44, %v7437_v62  ;;  %v14769_v20 = vld [vmem:[#allocation69_spill] sm:$0xff]  ;;  %v14771_v63 = vld [vmem:[#allocation63_spill] sm:$0xff]  ;;  %v14772_v58 = vld [vmem:[#allocation116_spill] sm:$0xff] }
 0x630   : > { %v13872_v40 = vmax.f32 %v13831_v52, %v7444_v31  ;;  %v7388_v15 = vrot.slane %v7387_v37, 1  ;;  %v7464_v12 = vmax.f32 %v7462_v14, %v7463_v0  ;;  %v13874_v7 = vmax.f32 %v7366_v24, %v7367_v21  ;;  %v14770_v24 = vld [vmem:[#allocation97_spill] sm:$0xff]  ;;  %v14775_v35 = vld [vmem:[#allocation102_spill] sm:$0xff] }
 0x631   : > { %v13876_v33 = vmax.f32 %v7380_v34, %v7381_v57  ;;  %v7470_v47 = vrot.slane %v7469_v50, 2  ;;  %v4388_v8 = vadd.f32 %v4280_v39, %v14767_v55  ;;  %v13879_v22 = vmax.f32 %v7373_v27, %v7374_v16  ;;  %v14778_v55 = vld [vmem:[#allocation37_spill] sm:$0xff] }
 0x632   : > { %v7451_v1 = vrot.slane %v7450_v25, 1  ;;  %v7458_v2 = vrot.slane %v7457_v38, 1  ;;  %v4301_v44 = vadd.f32 %v13602_v42, %v14768_v23  ;;  %v13883_v62 = vmax.f32 %v7387_v37, %v7388_v15  ;;  %v14776_v37 = vld [vmem:[#allocation46_spill] sm:$0xff] }
 0x633   : > { %v7471_v52 = vmax.f32 %v7469_v50, %v7470_v47  ;;  %v4459_v31 = vmul.f32 %v13722_v46, %v4388_v8  ;;  %v4293_v9 = vadd.f32 %v13607_v56, %v14769_v20  ;;  %v7465_v51 = vrot.slane %v7464_v12, 1  ;;  %v14774_v56 = vld [vmem:[#allocation98_spill] sm:$0xff]  ;;  %v14777_v50 = vld [vmem:[#allocation39_spill] sm:$0xff] }
 0x634   : > { %v4393_v43 = vadd.f32 %v4301_v44, %v14770_v24  ;;  %v4304_v39 = vadd.f32 %v13622_v5, %v14771_v63  ;;  %v4296_v34 = vadd.f32 %v13658_v11, %v14772_v58  ;;  %v4317_v21 = vadd.f32 %v13688_v10, %v13605_v30 }
 0x635   : > { %v7472_v19 = vrot.slane %v7471_v52, 1  ;;  %v4530_v42 = vadd.f32 %v13727_v36, %v4459_v31  ;;  %v4391_v14 = vadd.f32 %v4293_v9, %v14773_v18  ;;  %v4309_v5 = vadd.f32 %v13718_v54, %v14776_v37 }
 0x636   : > { %v4464_v27 = vmul.f32 %v13722_v46, %v4393_v43  ;;  %v4394_v60 = vadd.f32 %v4304_v39, %v14774_v56  ;;  %v4392_v57 = vadd.f32 %v4296_v34, %v14775_v35  ;;  %v13902_v0 = vmax.f32 %v7450_v25, %v7451_v1 }
 0x637   : > { %v4594_v11 = vmax.f32 %v4530_v42, 0.0  ;;  %v4462_v16 = vmul.f32 %v13722_v46, %v4391_v14  ;;  %v4397_v15 = vadd.f32 %v4317_v21, %v14777_v50  ;;  %v13906_v47 = vmax.f32 %v7457_v38, %v7458_v2 }
 0x638   : > { %v4535_v30 = vadd.f32 %v13727_v36, %v4464_v27  ;;  %v4465_v10 = vmul.f32 %v13722_v46, %v4394_v60  ;;  %v4395_v8 = vadd.f32 %v4309_v5, %v14778_v55  ;;  %v4463_v25 = vmul.f32 %v13722_v46, %v4392_v57 }
 0x639   : > { %v5506_v23 = vcombine.high %v4594_v11, %v4594_v11  ;;  %v5513_v44 = vrot.slane %v4594_v11, %v12605_v59  ;;  %v4533_v54 = vadd.f32 %v13727_v36, %v4462_v16  ;;  %v13914_v1 = vmax.f32 %v7464_v12, %v7465_v51 }
 0x63a   : > { %v13916_v31 = vmax.f32 %v7471_v52, %v7472_v19  ;;  %v4599_v20 = vmax.f32 %v4535_v30, 0.0  ;;  %v13919_v38 = vmul.f32 %v13722_v46, %v4397_v15  ;;  %v4536_v34 = vadd.f32 %v13727_v36, %v4465_v10 }
 0x63b   : > { %v5520_v2 = vrot.slane %v5506_v23, %v12605_v59  ;;  %v5521_v9 = vcombine.high %v5513_v44, %v5513_v44  ;;  %v7390_v24 = vsel %vm6017_vm13, %v5513_v44, -inf  ;;  %v4597_v43 = vmax.f32 %v4533_v54, 0.0 }
 0x63c   : > { %v7391_v63 = vrot.slane %v7390_v24, 4  ;;  %v5591_v39 = vcombine.high %v4599_v20, %v4599_v20  ;;  %v5598_v58 = vrot.slane %v4599_v20, %v12605_v59  ;;  %v13928_v19 = vadd.f32 %v13727_v36, %v4463_v25 }
 0x63d   : > { %v5522_v12 = vcombine.high %v5520_v2, %v5520_v2  ;;  %v7397_v52 = vsel %vm6017_vm13, %v5521_v9, -inf  ;;  %v7404_v51 = vsel %vm6017_vm13, %v5520_v2, -inf  ;;  %v5557_v35 = vcombine.high %v4597_v43, %v4597_v43 }
 0x63e   : > { %v7392_v42 = vmax.f32 %v7390_v24, %v7391_v63  ;;  %v7398_v18 = vrot.slane %v7397_v52, 4  ;;  %v7405_v14 = vrot.slane %v7404_v51, 4  ;;  %v5605_v21 = vrot.slane %v5591_v39, %v12605_v59 }
 0x63f   : > { %v7411_v27 = vsel %vm6017_vm13, %v5522_v12, -inf  ;;  %v5606_v56 = vcombine.high %v5598_v58, %v5598_v58  ;;  %v7530_v60 = vsel %vm6017_vm13, %v5598_v58, -inf }
 0x640   : > { %v7393_v57 = vrot.slane %v7392_v42, 2  ;;  %v7399_v37 = vmax.f32 %v7397_v52, %v7398_v18  ;;  %v7406_v5 = vmax.f32 %v7404_v51, %v7405_v14  ;;  %v7412_v11 = vrot.slane %v7411_v27, 4 }
 0x641   : > { %v5607_v16 = vcombine.high %v5605_v21, %v5605_v21  ;;  %v7531_v50 = vrot.slane %v7530_v60, 4  ;;  %v7537_v15 = vsel %vm6017_vm13, %v5606_v56, -inf  ;;  %v7544_v30 = vsel %vm6017_vm13, %v5605_v21, -inf }
 0x642   : > { %v7394_v10 = vmax.f32 %v7392_v42, %v7393_v57  ;;  %v7400_v55 = vrot.slane %v7399_v37, 2  ;;  %v7407_v23 = vrot.slane %v7406_v5, 2  ;;  %v7413_v44 = vmax.f32 %v7411_v27, %v7412_v11 }
 0x643   : > { %v7532_v54 = vmax.f32 %v7530_v60, %v7531_v50  ;;  %v7538_v25 = vrot.slane %v7537_v15, 4  ;;  %v7545_v20 = vrot.slane %v7544_v30, 4  ;;  %v7551_v2 = vsel %vm6017_vm13, %v5607_v16, -inf }
 0x644   : > { %v7395_v9 = vrot.slane %v7394_v10, 1  ;;  %v7401_v24 = vmax.f32 %v7399_v37, %v7400_v55  ;;  %v13936_v63 = vmax.f32 %v7406_v5, %v7407_v23  ;;  %v7414_v39 = vrot.slane %v7413_v44, 2 }
 0x645   : > { %v7533_v58 = vrot.slane %v7532_v54, 2  ;;  %v7539_v12 = vmax.f32 %v7537_v15, %v7538_v25  ;;  %v7546_v52 = vmax.f32 %v7544_v30, %v7545_v20  ;;  %v7552_v51 = vrot.slane %v7551_v2, 4 }
 0x646   : > { %v7402_v18 = vrot.slane %v7401_v24, 1  ;;  %v5564_v42 = vrot.slane %v4597_v43, %v12605_v59  ;;  %v4600_v14 = vmax.f32 %v4536_v34, 0.0  ;;  %v13940_v21 = vmul.f32 %v13722_v46, %v4395_v8 }
 0x647   : > { %v7534_v27 = vmax.f32 %v7532_v54, %v7533_v58  ;;  %v7540_v56 = vrot.slane %v7539_v12, 2  ;;  %v7547_v60 = vrot.slane %v7546_v52, 2  ;;  %v7553_v57 = vmax.f32 %v7551_v2, %v7552_v51 }
 0x648   : > { %v13942_v11 = vmax.f32 %v7394_v10, %v7395_v9  ;;  %v7409_v37 = vrot.slane %v13936_v63, 1  ;;  %v13945_v5 = vmax.f32 %v7413_v44, %v7414_v39  ;;  %v5571_v16 = vrot.slane %v5557_v35, %v12605_v59 }
 0x649   : > { %v7535_v50 = vrot.slane %v7534_v27, 1  ;;  %v7541_v15 = vmax.f32 %v7539_v12, %v7540_v56  ;;  %v7548_v30 = vmax.f32 %v7546_v52, %v7547_v60  ;;  %v7554_v43 = vrot.slane %v7553_v57, 2 }
 0x64a   : > { %v13948_v34 = vmax.f32 %v7401_v24, %v7402_v18  ;;  %v5572_v46 = vcombine.high %v5564_v42, %v5564_v42  ;;  %v5573_v8 = vcombine.high %v5571_v16, %v5571_v16  ;;  %v7474_v55 = vsel %vm6017_vm13, %v5564_v42, -inf }
 0x64b   : > { %v7536_v23 = vmax.f32 %v7534_v27, %v7535_v50  ;;  %v7542_v54 = vrot.slane %v7541_v15, 1  ;;  %v7549_v10 = vrot.slane %v7548_v30, 1  ;;  %v7555_v25 = vmax.f32 %v7553_v57, %v7554_v43 }
 0x64c   : > { %v7475_v20 = vrot.slane %v7474_v55, 4  ;;  %v7481_v44 = vsel %vm6017_vm13, %v5572_v46, -inf  ;;  %v7488_v2 = vsel %vm6017_vm13, %v5571_v16, -inf  ;;  %v7495_v35 = vsel %vm6017_vm13, %v5573_v8, -inf }
 0x64d   : > { %v7543_v9 = vmax.f32 %v7541_v15, %v7542_v54  ;;  %v7550_v39 = vmax.f32 %v7548_v30, %v7549_v10  ;;  %v7556_v58 = vrot.slane %v7555_v25, 1  ;;  %v7914_v24 = vmax.f32 %v13833_v48, %v7536_v23 }
 0x64e   : > { %v7476_v12 = vmax.f32 %v7474_v55, %v7475_v20  ;;  %v7482_v52 = vrot.slane %v7481_v44, 4  ;;  %v7489_v51 = vrot.slane %v7488_v2, 4  ;;  %v7496_v18 = vrot.slane %v7495_v35, 4 }
 0x64f   : > { %v7557_v42 = vmax.f32 %v7555_v25, %v7556_v58  ;;  %v7915_v27 = vmax.f32 %v13864_v32, %v7543_v9  ;;  %v7916_v56 = vmax.f32 %v13869_v13, %v7550_v39  ;;  %v9317_v60 = vpack.c.bf16 %v7914_v24, %v7914_v24 }
 0x650   : > { %v7477_v57 = vrot.slane %v7476_v12, 2  ;;  %v7483_v50 = vmax.f32 %v7481_v44, %v7482_v52  ;;  %v7490_v16 = vmax.f32 %v7488_v2, %v7489_v51  ;;  %v7497_v43 = vmax.f32 %v7495_v35, %v7496_v18 }
 0x651   : > { %v7917_v15 = vmax.f32 %v13872_v40, %v7557_v42  ;;  %v9318_v30 = vpack.c.bf16 %v7915_v27, %v7915_v27  ;;  %v9319_v46 = vpack.c.bf16 %v7916_v56, %v7916_v56  ;;  %v8554_v8 = vunpack.c.l.b16 %v9317_v60 }
 0x652   : > { %v7478_v48 = vmax.f32 %v7476_v12, %v7477_v57  ;;  %v7484_v55 = vrot.slane %v7483_v50, 2  ;;  %v7491_v23 = vrot.slane %v7490_v16, 2  ;;  %v7498_v54 = vrot.slane %v7497_v43, 2 }
 0x653   : > { %v9320_v10 = vpack.c.bf16 %v7917_v15, %v7917_v15  ;;  %v8555_v25 = vunpack.c.l.b16 %v9318_v30  ;;  %v8556_v20 = vunpack.c.l.b16 %v9319_v46  ;;  %v5608_v32 = vcombine.high %v4600_v14, %v4600_v14 }
 0x654   : > { %v7479_v9 = vrot.slane %v7478_v48, 1  ;;  %v7485_v13 = vmax.f32 %v7483_v50, %v7484_v55  ;;  %v7492_v39 = vmax.f32 %v7490_v16, %v7491_v23  ;;  %v7499_v58 = vmax.f32 %v7497_v43, %v7498_v54 }
 0x655   : > { %v8557_v44 = vunpack.c.l.b16 %v9320_v10  ;;  %v8676_v2 = vsel %vm8578_vm14, %v8555_v25, %v8554_v8  ;;  %v5615_v40 = vrot.slane %v4600_v14, %v12605_v59  ;;  %v5622_v35 = vrot.slane %v5608_v32, %v12605_v59 }
 0x656   : > { %v8677_v24 = vsel %vm8580_vm15, %v8556_v20, %v8676_v2  ;;  %v7480_v12 = vmax.f32 %v7478_v48, %v7479_v9  ;;  %v7486_v52 = vrot.slane %v7485_v13, 1  ;;  %v7493_v51 = vrot.slane %v7492_v39, 1 }
 0x657   : > { %v7500_v18 = vrot.slane %v7499_v58, 1  ;;  %v5623_v42 = vcombine.high %v5615_v40, %v5615_v40  ;;  %v5624_v27 = vcombine.high %v5622_v35, %v5622_v35  ;;  %v7558_v56 = vsel %vm6017_vm13, %v5615_v40, -inf }
 0x658   : > { %v7487_v60 = vmax.f32 %v7485_v13, %v7486_v52  ;;  %v7494_v57 = vmax.f32 %v7492_v39, %v7493_v51  ;;  %v7906_v50 = vmax.f32 %v13874_v7, %v7480_v12  ;;  %v7559_v16 = vrot.slane %v7558_v56, 4 }
 0x659   : > { %v7501_v43 = vmax.f32 %v7499_v58, %v7500_v18  ;;  %v7565_v14 = vsel %vm6017_vm13, %v5623_v42, -inf  ;;  %v7572_v15 = vsel %vm6017_vm13, %v5622_v35, -inf  ;;  %v7579_v30 = vsel %vm6017_vm13, %v5624_v27, -inf }
 0x65a   : > { %v7907_v46 = vmax.f32 %v13879_v22, %v7487_v60  ;;  %v7908_v8 = vmax.f32 %v13876_v33, %v7494_v57  ;;  %v9309_v48 = vpack.c.bf16 %v7906_v50, %v7906_v50  ;;  %v7560_v55 = vmax.f32 %v7558_v56, %v7559_v16 }
 0x65b   : > { %v7909_v23 = vmax.f32 %v13883_v62, %v7501_v43  ;;  %v7566_v54 = vrot.slane %v7565_v14, 4  ;;  %v7573_v10 = vrot.slane %v7572_v15, 4  ;;  %v7580_v25 = vrot.slane %v7579_v30, 4 }
 0x65c   : > { %v9310_v7 = vpack.c.bf16 %v7907_v46, %v7907_v46  ;;  %v9311_v20 = vpack.c.bf16 %v7908_v8, %v7908_v8  ;;  %v8546_v32 = vunpack.c.l.b16 %v9309_v48  ;;  %v7561_v9 = vrot.slane %v7560_v55, 2 }
 0x65d   : > { %v9312_v13 = vpack.c.bf16 %v7909_v23, %v7909_v23  ;;  %v7567_v39 = vmax.f32 %v7565_v14, %v7566_v54  ;;  %v7574_v58 = vmax.f32 %v7572_v15, %v7573_v10  ;;  %v7581_v2 = vmax.f32 %v7579_v30, %v7580_v25 }
 0x65e   : > { %v8547_v40 = vunpack.c.l.b16 %v9310_v7  ;;  %v8548_v35 = vunpack.c.l.b16 %v9311_v20  ;;  %v7562_v22 = vmax.f32 %v7560_v55, %v7561_v9  ;;  %v8678_v33 = vsel %vm8582_vm0, %v8557_v44, %v8677_v24 }
 0x65f   : > { %v8549_v12 = vunpack.c.l.b16 %v9312_v13  ;;  %v7568_v52 = vrot.slane %v7567_v39, 2  ;;  %v7575_v51 = vrot.slane %v7574_v58, 2  ;;  %v7582_v62 = vrot.slane %v7581_v2, 2 }
 0x660   : > { %v8669_v18 = vsel %vm8578_vm14, %v8547_v40, %v8546_v32  ;;  %v7563_v42 = vrot.slane %v7562_v22, 1  ;;  %v4598_v27 = vmax.f32 %v13928_v19, 0.0  ;;  %v4539_v56 = vadd.f32 %v13727_v36, %v13919_v38 }
 0x661   : > { %v8670_v60 = vsel %vm8580_vm15, %v8548_v35, %v8669_v18  ;;  %v7569_v57 = vmax.f32 %v7567_v39, %v7568_v52  ;;  %v7576_v50 = vmax.f32 %v7574_v58, %v7575_v51  ;;  %v7583_v16 = vmax.f32 %v7581_v2, %v7582_v62 }
 0x662   : > { %v7564_v43 = vmax.f32 %v7562_v22, %v7563_v42  ;;  %v5574_v14 = vcombine.high %v4598_v27, %v4598_v27  ;;  %v5581_v44 = vrot.slane %v4598_v27, %v12605_v59  ;;  %v13978_v24 = vsel %vm8582_vm0, %v8549_v12, %v8670_v60 }
 0x663   : > { %v7570_v15 = vrot.slane %v7569_v57, 1  ;;  %v7577_v30 = vrot.slane %v7576_v50, 1  ;;  %v7584_v46 = vrot.slane %v7583_v16, 1  ;;  %v4603_v8 = vmax.f32 %v4539_v56, 0.0 }
 0x664   : > { %v7918_v19 = vmax.f32 %v13902_v0, %v7564_v43  ;;  %v5588_v36 = vrot.slane %v5574_v14, %v12605_v59  ;;  %v5589_v38 = vcombine.high %v5581_v44, %v5581_v44  ;;  %v7502_v48 = vsel %vm6017_vm13, %v5581_v44, -inf }
 0x665   : > { %v7571_v55 = vmax.f32 %v7569_v57, %v7570_v15  ;;  %v7578_v23 = vmax.f32 %v7576_v50, %v7577_v30  ;;  %v7585_v54 = vmax.f32 %v7583_v16, %v7584_v46  ;;  %v7503_v10 = vrot.slane %v7502_v48, 4 }
 0x666   : > { %v9321_v25 = vpack.c.bf16 %v7918_v19, %v7918_v19  ;;  %v5590_v7 = vcombine.high %v5588_v36, %v5588_v36  ;;  %v7509_v20 = vsel %vm6017_vm13, %v5589_v38, -inf  ;;  %v7516_v32 = vsel %vm6017_vm13, %v5588_v36, -inf }
 0x667   : > { %v7919_v9 = vmax.f32 %v13906_v47, %v7571_v55  ;;  %v7920_v13 = vmax.f32 %v13914_v1, %v7578_v23  ;;  %v7921_v0 = vmax.f32 %v13916_v31, %v7585_v54  ;;  %v7504_v39 = vmax.f32 %v7502_v48, %v7503_v10 }
 0x668   : > { %v8558_v58 = vunpack.c.l.b16 %v9321_v25  ;;  %v7510_v2 = vrot.slane %v7509_v20, 4  ;;  %v7517_v40 = vrot.slane %v7516_v32, 4  ;;  %v7523_v35 = vsel %vm6017_vm13, %v5590_v7, -inf }
 0x669   : > { %v9322_v22 = vpack.c.bf16 %v7919_v9, %v7919_v9  ;;  %v9323_v12 = vpack.c.bf16 %v7920_v13, %v7920_v13  ;;  %v9324_v52 = vpack.c.bf16 %v7921_v0, %v7921_v0  ;;  %v7505_v51 = vrot.slane %v7504_v39, 2 }
 0x66a   : > { %v8679_v62 = vsel %vm8584_vm1, %v8558_v58, %v8678_v33  ;;  %v7511_v18 = vmax.f32 %v7509_v20, %v7510_v2  ;;  %v7518_v42 = vmax.f32 %v7516_v32, %v7517_v40  ;;  %v7524_v27 = vrot.slane %v7523_v35, 4 }
 0x66b   : > { %v7416_v47 = vrot.slane %v13945_v5, 1  ;;  %v8559_v1 = vunpack.c.l.b16 %v9322_v22  ;;  %v8560_v56 = vunpack.c.l.b16 %v9323_v12  ;;  %v7506_v31 = vmax.f32 %v7504_v39, %v7505_v51 }
 0x66c   : > { %v7512_v60 = vrot.slane %v7511_v18, 2  ;;  %v7519_v57 = vrot.slane %v7518_v42, 2  ;;  %v7525_v50 = vmax.f32 %v7523_v35, %v7524_v27  ;;  %v5659_v16 = vcombine.high %v4603_v8, %v4603_v8 }
 0x66d   : > { %v8561_v43 = vunpack.c.l.b16 %v9324_v52  ;;  %v8680_v14 = vsel %vm8586_vm2, %v8559_v1, %v8679_v62  ;;  %v7507_v44 = vrot.slane %v7506_v31, 1  ;;  %v5666_v15 = vrot.slane %v4603_v8, %v12605_v59  ;;  %v14006_v52 = vld [vmem:[#allocation12] ss:$0 sm:$0xff] }
 0x66e   : > { %v8681_v33 = vsel %vm8588_vm4, %v8560_v56, %v8680_v14  ;;  %v7513_v30 = vmax.f32 %v7511_v18, %v7512_v60  ;;  %v7520_v46 = vmax.f32 %v7518_v42, %v7519_v57  ;;  %v7526_v19 = vrot.slane %v7525_v50, 2 }
 0x66f   : > { %v8682_v36 = vsel %vm1681_vm3, %v8561_v43, %v8681_v33  ;;  %v7508_v38 = vmax.f32 %v7506_v31, %v7507_v44  ;;  %v5673_v48 = vrot.slane %v5659_v16, %v12605_v59  ;;  %v5674_v55 = vcombine.high %v5666_v15, %v5666_v15 }
 0x670   : > { %v8710_v23 = vpack.c.b16 %v8682_v36, %v8682_v36  ;;  %v7514_v54 = vrot.slane %v7513_v30, 1  ;;  %v7521_v10 = vrot.slane %v7520_v46, 1  ;;  %v7527_v25 = vmax.f32 %v7525_v50, %v7526_v19 }
 0x671   : > { %v7410_v8 = vmax.f32 %v13936_v63, %v7409_v37  ;;  %v7910_v7 = vmax.f32 %v13942_v11, %v7508_v38  ;;  %v7642_v20 = vsel %vm6017_vm13, %v5666_v15, -inf  ;;  %v7649_v32 = vsel %vm6017_vm13, %v5674_v55, -inf }
 0x672   : > { %8742 = vst [vmem:[%s12834_s30 + $0x34] sm:$0xf] %v8710_v23  ;;  %v7515_v9 = vmax.f32 %v7513_v30, %v7514_v54  ;;  %v7522_v13 = vmax.f32 %v7520_v46, %v7521_v10  ;;  %v7528_v0 = vrot.slane %v7527_v25, 1  ;;  %v5675_v39 = vcombine.high %v5673_v48, %v5673_v48  ;;  %v14779_v23 = vld [vmem:[#allocation54_spill] sm:$0xff] }
 0x673   : > { %v9313_v58 = vpack.c.bf16 %v7910_v7, %v7910_v7  ;;  %v7643_v2 = vrot.slane %v7642_v20, 4  ;;  %v7650_v40 = vrot.slane %v7649_v32, 4  ;;  %v7417_v35 = vmax.f32 %v13945_v5, %v7416_v47 }
 0x674   : > { %v7529_v22 = vmax.f32 %v7527_v25, %v7528_v0  ;;  %v7911_v12 = vmax.f32 %v13948_v34, %v7515_v9  ;;  %v7912_v63 = vmax.f32 %v7410_v8, %v7522_v13  ;;  %v7656_v11 = vsel %vm6017_vm13, %v5673_v48, -inf }
 0x675   : > { %v8550_v37 = vunpack.c.l.b16 %v9313_v58  ;;  %v4537_v51 = vadd.f32 %v14006_v52, %v13940_v21  ;;  %v7663_v27 = vsel %vm6017_vm13, %v5675_v39, -inf  ;;  %v7644_v47 = vmax.f32 %v7642_v20, %v7643_v2  ;;  %v14780_v58 = vld [vmem:[#allocation60_spill] sm:$0xff] }
 0x676   : > { %v7913_v62 = vmax.f32 %v7417_v35, %v7529_v22  ;;  %v9314_v18 = vpack.c.bf16 %v7911_v12, %v7911_v12  ;;  %v9315_v42 = vpack.c.bf16 %v7912_v63, %v7912_v63  ;;  %v7651_v1 = vmax.f32 %v7649_v32, %v7650_v40  ;;  %v14029_v32 = vld [vmem:[#allocation11] ss:$0 sm:$0xff] }
 0x677   : > { %v8672_v5 = vsel %vm8584_vm1, %v8550_v37, %v13978_v24  ;;  %v7657_v60 = vrot.slane %v7656_v11, 4  ;;  %v7664_v57 = vrot.slane %v7663_v27, 4  ;;  %v4601_v50 = vmax.f32 %v4537_v51, 0.0 }
 0x678   : > { %v9316_v34 = vpack.c.bf16 %v7913_v62, %v7913_v62  ;;  %v8551_v56 = vunpack.c.l.b16 %v9314_v18  ;;  %v8552_v31 = vunpack.c.l.b16 %v9315_v42  ;;  %v4320_v43 = vadd.f32 %v13736_v29, %v13656_v26  ;;  %v14781_v62 = vld [vmem:[#allocation103_spill] sm:$0xff]  ;;  %v14782_v42 = vld [vmem:[#allocation65_spill] sm:$0xff] }
 0x679   : > { %v7645_v44 = vrot.slane %v7644_v47, 2  ;;  %v7652_v15 = vrot.slane %v7651_v1, 2  ;;  %v5625_v33 = vcombine.high %v4601_v50, %v4601_v50  ;;  %v5632_v30 = vrot.slane %v4601_v50, %v12605_v59 }
 0x67a   : > { %v8553_v16 = vunpack.c.l.b16 %v9316_v34  ;;  %v8673_v21 = vsel %vm8586_vm2, %v8551_v56, %v8672_v5  ;;  %v7658_v19 = vmax.f32 %v7656_v11, %v7657_v60  ;;  %v7665_v36 = vmax.f32 %v7663_v27, %v7664_v57 }
 0x67b   : > { %v8674_v14 = vsel %vm8588_vm4, %v8552_v31, %v8673_v21  ;;  %v5639_v38 = vrot.slane %v5625_v33, %v12605_v59  ;;  %v5640_v48 = vcombine.high %v5632_v30, %v5632_v30  ;;  %v7586_v55 = vsel %vm6017_vm13, %v5632_v30, -inf }
 0x67c   : > { %v8675_v24 = vsel %vm1681_vm3, %v8553_v16, %v8674_v14  ;;  %v4398_v54 = vadd.f32 %v4320_v43, %v14779_v23  ;;  %v7646_v26 = vmax.f32 %v7644_v47, %v7645_v44  ;;  %v14023_v29 = vmax.f32 %v7651_v1, %v7652_v15 }
 0x67d   : > { %v8709_v46 = vpack.c.b16 %v8675_v24, %v8675_v24  ;;  %v7587_v10 = vrot.slane %v7586_v55, 4  ;;  %v4312_v25 = vadd.f32 %v13752_v45, %v13555_v49  ;;  %v5641_v8 = vcombine.high %v5639_v38, %v5639_v38 }
 0x67e   : > { %v7593_v7 = vsel %vm6017_vm13, %v5640_v48, -inf  ;;  %v7600_v20 = vsel %vm6017_vm13, %v5639_v38, -inf  ;;  %v4469_v9 = vmul.f32 %v14029_v32, %v4398_v54  ;;  %v7659_v13 = vrot.slane %v7658_v19, 2 }
 0x67f   : > { %8741 = vst [vmem:[%s12834_s30 + $0x30] sm:$0xf] %v8709_v46  ;;  %v7594_v0 = vrot.slane %v7593_v7, 4  ;;  %v7601_v39 = vrot.slane %v7600_v20, 4  ;;  %v4396_v2 = vadd.f32 %v4312_v25, %v14780_v58  ;;  %v7607_v40 = vsel %vm6017_vm13, %v5641_v8, -inf }
 0x680   : > { %v4540_v35 = vadd.f32 %v14006_v52, %v4469_v9  ;;  %v4333_v49 = vadd.f32 %v13785_v3, %v13790_v6  ;;  %v4325_v45 = vadd.f32 %v13802_v28, %v13716_v41  ;;  %v7666_v22 = vrot.slane %v7665_v36, 2 }
 0x681   : > { %v7588_v12 = vmax.f32 %v7586_v55, %v7587_v10  ;;  %v7595_v63 = vmax.f32 %v7593_v7, %v7594_v0  ;;  %v7608_v37 = vrot.slane %v7607_v40, 4  ;;  %v4467_v51 = vmul.f32 %v14029_v32, %v4396_v2 }
 0x682   : > { %v4604_v11 = vmax.f32 %v4540_v35, 0.0  ;;  %v4401_v18 = vadd.f32 %v4333_v49, %v14781_v62  ;;  %v14042_v27 = vadd.f32 %v4325_v45, %v14782_v42  ;;  %v7647_v5 = vrot.slane %v7646_v26, 1 }
 0x683   : > { %v7660_v47 = vmax.f32 %v7658_v19, %v7659_v13  ;;  %v7602_v1 = vmax.f32 %v7600_v20, %v7601_v39  ;;  %v7609_v34 = vmax.f32 %v7607_v40, %v7608_v37  ;;  %v4538_v41 = vadd.f32 %v14006_v52, %v4467_v51 }
 0x684   : > { %v5676_v3 = vcombine.high %v4604_v11, %v4604_v11  ;;  %v5683_v6 = vrot.slane %v4604_v11, %v12605_v59  ;;  %v7654_v28 = vrot.slane %v14023_v29, 1  ;;  %v7667_v56 = vmax.f32 %v7665_v36, %v7666_v22 }
 0x685   : > { %v7589_v31 = vrot.slane %v7588_v12, 2  ;;  %v7596_v60 = vrot.slane %v7595_v63, 2  ;;  %v4602_v21 = vmax.f32 %v4538_v41, 0.0  ;;  %v14049_v43 = vmax.f32 %v7646_v26, %v7647_v5 }
 0x686   : > { %v5690_v57 = vrot.slane %v5676_v3, %v12605_v59  ;;  %v5691_v50 = vcombine.high %v5683_v6, %v5683_v6  ;;  %v7670_v16 = vsel %vm6017_vm13, %v5683_v6, -inf  ;;  %v7661_v14 = vrot.slane %v7660_v47, 1 }
 0x687   : > { %v7603_v44 = vrot.slane %v7602_v1, 2  ;;  %v7610_v15 = vrot.slane %v7609_v34, 2  ;;  %v7671_v33 = vrot.slane %v7670_v16, 4  ;;  %v7590_v19 = vmax.f32 %v7588_v12, %v7589_v31 }
 0x688   : > { %v5692_v24 = vcombine.high %v5690_v57, %v5690_v57  ;;  %v7677_v30 = vsel %vm6017_vm13, %v5691_v50, -inf  ;;  %v7684_v46 = vsel %vm6017_vm13, %v5690_v57, -inf  ;;  %v7597_v36 = vmax.f32 %v7595_v63, %v7596_v60 }
 0x689   : > { %v7678_v38 = vrot.slane %v7677_v30, 4  ;;  %v4472_v48 = vmul.f32 %v14029_v32, %v4401_v18  ;;  %v7672_v55 = vmax.f32 %v7670_v16, %v7671_v33  ;;  %v7685_v23 = vrot.slane %v7684_v46, 4 }
 0x68a   : > { %v7691_v54 = vsel %vm6017_vm13, %v5692_v24, -inf  ;;  %v5642_v26 = vcombine.high %v4602_v21, %v4602_v21  ;;  %v7604_v10 = vmax.f32 %v7602_v1, %v7603_v44  ;;  %v5649_v7 = vrot.slane %v4602_v21, %v12605_v59 }
 0x68b   : > { %v7679_v25 = vmax.f32 %v7677_v30, %v7678_v38  ;;  %v7692_v8 = vrot.slane %v7691_v54, 4  ;;  %v7611_v20 = vmax.f32 %v7609_v34, %v7610_v15  ;;  %v7673_v9 = vrot.slane %v7672_v55, 2 }
 0x68c   : > { %v7686_v13 = vmax.f32 %v7684_v46, %v7685_v23  ;;  %v5656_v0 = vrot.slane %v5642_v26, %v12605_v59  ;;  %v5657_v2 = vcombine.high %v5649_v7, %v5649_v7  ;;  %v7614_v40 = vsel %vm6017_vm13, %v5649_v7, -inf }
 0x68d   : > { %v7680_v39 = vrot.slane %v7679_v25, 2  ;;  %v7693_v58 = vmax.f32 %v7691_v54, %v7692_v8  ;;  %v7668_v35 = vrot.slane %v7667_v56, 1  ;;  %v7674_v49 = vmax.f32 %v7672_v55, %v7673_v9 }
 0x68e   : > { %v7687_v45 = vrot.slane %v7686_v13, 2  ;;  %v7615_v22 = vrot.slane %v7614_v40, 4  ;;  %v14059_v12 = vmax.f32 %v14023_v29, %v7654_v28  ;;  %v7591_v63 = vrot.slane %v7590_v19, 1 }
 0x68f   : > { %v7598_v37 = vrot.slane %v7597_v36, 1  ;;  %v7694_v11 = vrot.slane %v7693_v58, 2  ;;  %v7605_v51 = vrot.slane %v7604_v10, 1  ;;  %v7681_v62 = vmax.f32 %v7679_v25, %v7680_v39 }
 0x690   : > { %v7621_v18 = vsel %vm6017_vm13, %v5657_v2, -inf  ;;  %v4543_v42 = vadd.f32 %v14006_v52, %v4472_v48  ;;  %v7612_v5 = vrot.slane %v7611_v20, 1  ;;  %v7688_v1 = vmax.f32 %v7686_v13, %v7687_v45 }
 0x691   : > { %v5658_v34 = vcombine.high %v5656_v0, %v5656_v0  ;;  %v7628_v3 = vsel %vm6017_vm13, %v5656_v0, -inf  ;;  %v14064_v6 = vmax.f32 %v7660_v47, %v7661_v14  ;;  %v14066_v41 = vmax.f32 %v7667_v56, %v7668_v35 }
 0x692   : > { %v7675_v29 = vrot.slane %v7674_v49, 1  ;;  %v7616_v28 = vmax.f32 %v7614_v40, %v7615_v22  ;;  %v14068_v31 = vmax.f32 %v7590_v19, %v7591_v63  ;;  %v14070_v60 = vmax.f32 %v7597_v36, %v7598_v37 }
 0x693   : > { %v7695_v57 = vmax.f32 %v7693_v58, %v7694_v11  ;;  %v7622_v50 = vrot.slane %v7621_v18, 4  ;;  %v14072_v16 = vmax.f32 %v7604_v10, %v7605_v51  ;;  %v7682_v21 = vrot.slane %v7681_v62, 1 }
 0x694   : > { %v7629_v44 = vrot.slane %v7628_v3, 4  ;;  %v4607_v15 = vmax.f32 %v4543_v42, 0.0  ;;  %v14074_v24 = vmax.f32 %v7611_v20, %v7612_v5  ;;  %v7689_v33 = vrot.slane %v7688_v1, 1 }
 0x695   : > { %v7635_v47 = vsel %vm6017_vm13, %v5658_v34, -inf  ;;  %v4470_v56 = vmul.f32 %v14029_v32, %v14042_v27  ;;  %v14079_v14 = vmax.f32 %v7674_v49, %v7675_v29  ;;  %v7617_v30 = vrot.slane %v7616_v28, 2 }
 0x696   : > { %v5727_v46 = vcombine.high %v4607_v15, %v4607_v15  ;;  %v5734_v19 = vrot.slane %v4607_v15, %v12605_v59  ;;  %v7696_v36 = vrot.slane %v7695_v57, 1  ;;  %v14082_v38 = vmax.f32 %v7621_v18, %v7622_v50  ;;  %v14783_v18 = vld [vmem:[#allocation104_spill] sm:$0xff] }
 0x697   : > { %v4541_v48 = vadd.f32 %v14006_v52, %v4470_v56  ;;  %v4336_v55 = vadd.f32 %v13815_v4, %v13817_v61  ;;  %v14087_v23 = vmax.f32 %v7681_v62, %v7682_v21  ;;  %v14089_v54 = vmax.f32 %v7628_v3, %v7629_v44 }
 0x698   : > { %v5741_v27 = vrot.slane %v5727_v46, %v12605_v59  ;;  %v5742_v26 = vcombine.high %v5734_v19, %v5734_v19  ;;  %v14092_v10 = vmax.f32 %v7688_v1, %v7689_v33  ;;  %v7636_v25 = vrot.slane %v7635_v47, 4 }
 0x699   : > { %v7754_v8 = vsel %vm6017_vm13, %v5734_v19, -inf  ;;  %v4605_v7 = vmax.f32 %v4541_v48, 0.0  ;;  %v14095_v20 = vmax.f32 %v7616_v28, %v7617_v30  ;;  %v14098_v4 = vmax.f32 %v7695_v57, %v7696_v36 }
 0x69a   : > { %v5743_v9 = vcombine.high %v5741_v27, %v5741_v27  ;;  %v7755_v13 = vrot.slane %v7754_v8, 4  ;;  %v7761_v0 = vsel %vm6017_vm13, %v5742_v26, -inf  ;;  %v7624_v61 = vrot.slane %v14082_v38, 2 }
 0x69b   : > { %v7762_v39 = vrot.slane %v7761_v0, 4  ;;  %v7768_v58 = vsel %vm6017_vm13, %v5741_v27, -inf  ;;  %v5693_v49 = vcombine.high %v4605_v7, %v4605_v7  ;;  %v14103_v45 = vmax.f32 %v7635_v47, %v7636_v25 }
 0x69c   : > { %v7756_v2 = vmax.f32 %v7754_v8, %v7755_v13  ;;  %v7769_v40 = vrot.slane %v7768_v58, 4  ;;  %v7775_v35 = vsel %vm6017_vm13, %v5743_v9, -inf  ;;  %v5700_v37 = vrot.slane %v4605_v7, %v12605_v59 }
 0x69d   : > { %v7763_v22 = vmax.f32 %v7761_v0, %v7762_v39  ;;  %v7776_v63 = vrot.slane %v7775_v35, 4  ;;  %v5707_v62 = vrot.slane %v5693_v49, %v12605_v59  ;;  %v4402_v42 = vadd.f32 %v4336_v55, %v14783_v18 }
 0x69e   : > { %v7757_v11 = vrot.slane %v7756_v2, 2  ;;  %v7770_v51 = vmax.f32 %v7768_v58, %v7769_v40  ;;  %v5708_v34 = vcombine.high %v5700_v37, %v5700_v37  ;;  %v7698_v3 = vsel %vm6017_vm13, %v5700_v37, -inf }
 0x69f   : > { %v7764_v5 = vrot.slane %v7763_v22, 2  ;;  %v7777_v1 = vmax.f32 %v7775_v35, %v7776_v63  ;;  %v5709_v57 = vcombine.high %v5707_v62, %v5707_v62  ;;  %v7699_v50 = vrot.slane %v7698_v3, 4 }
 0x6a0   : > { %v7758_v29 = vmax.f32 %v7756_v2, %v7757_v11  ;;  %v7771_v28 = vrot.slane %v7770_v51, 2  ;;  %v7705_v15 = vsel %vm6017_vm13, %v5708_v34, -inf  ;;  %v7712_v33 = vsel %vm6017_vm13, %v5707_v62, -inf }
 0x6a1   : > { %v7765_v21 = vmax.f32 %v7763_v22, %v7764_v5  ;;  %v7778_v44 = vrot.slane %v7777_v1, 2  ;;  %v7700_v30 = vmax.f32 %v7698_v3, %v7699_v50  ;;  %v7706_v46 = vrot.slane %v7705_v15, 4 }
 0x6a2   : > { %v7759_v47 = vrot.slane %v7758_v29, 1  ;;  %v7772_v56 = vmax.f32 %v7770_v51, %v7771_v28  ;;  %v7713_v48 = vrot.slane %v7712_v33, 4  ;;  %v7719_v55 = vsel %vm6017_vm13, %v5709_v57, -inf }
 0x6a3   : > { %v7766_v19 = vrot.slane %v7765_v21, 1  ;;  %v7779_v36 = vmax.f32 %v7777_v1, %v7778_v44  ;;  %v7701_v25 = vrot.slane %v7700_v30, 2  ;;  %v7707_v8 = vmax.f32 %v7705_v15, %v7706_v46 }
 0x6a4   : > { %v7760_v27 = vmax.f32 %v7758_v29, %v7759_v47  ;;  %v7773_v26 = vrot.slane %v7772_v56, 1  ;;  %v7714_v13 = vmax.f32 %v7712_v33, %v7713_v48  ;;  %v7720_v0 = vrot.slane %v7719_v55, 4 }
 0x6a5   : > { %v7767_v7 = vmax.f32 %v7765_v21, %v7766_v19  ;;  %v7780_v9 = vrot.slane %v7779_v36, 1  ;;  %v7702_v2 = vmax.f32 %v7700_v30, %v7701_v25  ;;  %v7708_v40 = vrot.slane %v7707_v8, 2 }
 0x6a6   : > { %v7774_v39 = vmax.f32 %v7772_v56, %v7773_v26  ;;  %v7930_v58 = vmax.f32 %v14049_v43, %v7760_v27  ;;  %v7715_v22 = vrot.slane %v7714_v13, 2  ;;  %v7721_v63 = vmax.f32 %v7719_v55, %v7720_v0 }
 0x6a7   : > { %v7781_v35 = vmax.f32 %v7779_v36, %v7780_v9  ;;  %v7931_v49 = vmax.f32 %v14059_v12, %v7767_v7  ;;  %v7703_v51 = vrot.slane %v7702_v2, 1  ;;  %v7709_v62 = vmax.f32 %v7707_v8, %v7708_v40 }
 0x6a8   : > { %v7932_v37 = vmax.f32 %v14064_v6, %v7774_v39  ;;  %v9333_v11 = vpack.c.bf16 %v7930_v58, %v7930_v58  ;;  %v7716_v1 = vmax.f32 %v7714_v13, %v7715_v22  ;;  %v7722_v34 = vrot.slane %v7721_v63, 2  ;;  %v14784_v13 = vld [vmem:[#allocation105_spill] sm:$0xff] }
 0x6a9   : > { %v7933_v18 = vmax.f32 %v14066_v41, %v7781_v35  ;;  %v9334_v5 = vpack.c.bf16 %v7931_v49, %v7931_v49  ;;  %v7704_v43 = vmax.f32 %v7702_v2, %v7703_v51  ;;  %v7710_v28 = vrot.slane %v7709_v62, 1 }
 0x6aa   : > { %v9335_v3 = vpack.c.bf16 %v7932_v37, %v7932_v37  ;;  %v8570_v29 = vunpack.c.l.b16 %v9333_v11  ;;  %v7717_v21 = vrot.slane %v7716_v1, 1  ;;  %v7723_v12 = vmax.f32 %v7721_v63, %v7722_v34 }
 0x6ab   : > { %v9336_v57 = vpack.c.bf16 %v7933_v18, %v7933_v18  ;;  %v8571_v50 = vunpack.c.l.b16 %v9334_v5  ;;  %v7711_v15 = vmax.f32 %v7709_v62, %v7710_v28  ;;  %v7922_v6 = vmax.f32 %v14068_v31, %v7704_v43 }
 0x6ac   : > { %v8572_v44 = vunpack.c.l.b16 %v9335_v3  ;;  %v4473_v33 = vmul.f32 %v14029_v32, %v4402_v42  ;;  %v7718_v56 = vmax.f32 %v7716_v1, %v7717_v21  ;;  %v7724_v30 = vrot.slane %v7723_v12, 1 }
 0x6ad   : > { %v8573_v47 = vunpack.c.l.b16 %v9336_v57  ;;  %v8690_v41 = vsel %vm8578_vm14, %v8571_v50, %v8570_v29  ;;  %v7923_v19 = vmax.f32 %v14070_v60, %v7711_v15  ;;  %v9325_v36 = vpack.c.bf16 %v7922_v6, %v7922_v6 }
 0x6ae   : > { %v8691_v46 = vsel %vm8580_vm15, %v8572_v44, %v8690_v41  ;;  %v4544_v48 = vadd.f32 %v14006_v52, %v4473_v33  ;;  %v7725_v55 = vmax.f32 %v7723_v12, %v7724_v30  ;;  %v7924_v27 = vmax.f32 %v14072_v16, %v7718_v56 }
 0x6af   : > { %v14124_v26 = vsel %vm8582_vm0, %v8573_v47, %v8691_v46  ;;  %v4328_v31 = vadd.f32 %v13858_v17, %v13750_v53  ;;  %v7619_v42 = vrot.slane %v14095_v20, 1  ;;  %v7631_v25 = vrot.slane %v14089_v54, 2 }
 0x6b0   : > { %v9326_v8 = vpack.c.bf16 %v7923_v19, %v7923_v19  ;;  %v4608_v7 = vmax.f32 %v4544_v48, 0.0  ;;  %v14133_v60 = vmax.f32 %v14082_v38, %v7624_v61  ;;  %v7925_v9 = vmax.f32 %v14074_v24, %v7725_v55 }
 0x6b1   : > { %v9327_v16 = vpack.c.bf16 %v7924_v27, %v7924_v27  ;;  %v4400_v0 = vadd.f32 %v4328_v31, %v14784_v13  ;;  %v8562_v39 = vunpack.c.l.b16 %v9325_v36  ;;  %v7638_v17 = vrot.slane %v14103_v45, 2 }
 0x6b2   : > { %v8563_v58 = vunpack.c.l.b16 %v9326_v8  ;;  %v5744_v2 = vcombine.high %v4608_v7, %v4608_v7  ;;  %v5751_v53 = vrot.slane %v4608_v7, %v12605_v59  ;;  %v9328_v40 = vpack.c.bf16 %v7925_v9, %v7925_v9 }
 0x6b3   : > { %v8564_v35 = vunpack.c.l.b16 %v9327_v16  ;;  %v4471_v49 = vmul.f32 %v14029_v32, %v4400_v0  ;;  %v14146_v62 = vmax.f32 %v14089_v54, %v7631_v25  ;;  %v14151_v43 = vmax.f32 %v14095_v20, %v7619_v42 }
 0x6b4   : > { %v8683_v22 = vsel %vm8578_vm14, %v8563_v58, %v8562_v39  ;;  %v5758_v38 = vrot.slane %v5744_v2, %v12605_v59  ;;  %v5759_v61 = vcombine.high %v5751_v53, %v5751_v53  ;;  %v7782_v24 = vsel %vm6017_vm13, %v5751_v53, -inf }
 0x6b5   : > { %v8565_v63 = vunpack.c.l.b16 %v9328_v40  ;;  %v8684_v37 = vsel %vm8580_vm15, %v8564_v35, %v8683_v22  ;;  %v7783_v11 = vrot.slane %v7782_v24, 4  ;;  %v4542_v51 = vadd.f32 %v14006_v52, %v4471_v49 }
 0x6b6   : > { %v5760_v18 = vcombine.high %v5758_v38, %v5758_v38  ;;  %v7789_v5 = vsel %vm6017_vm13, %v5759_v61, -inf  ;;  %v7796_v32 = vsel %vm6017_vm13, %v5758_v38, -inf  ;;  %v14154_v28 = vmax.f32 %v14103_v45, %v7638_v17 }
 0x6b7   : > { %v7784_v1 = vmax.f32 %v7782_v24, %v7783_v11  ;;  %v7790_v34 = vrot.slane %v7789_v5, 4  ;;  %v7797_v3 = vrot.slane %v7796_v32, 4  ;;  %v4606_v29 = vmax.f32 %v4542_v51, 0.0 }
 0x6b8   : > { %v7803_v52 = vsel %vm6017_vm13, %v5760_v18, -inf  ;;  %v14158_v54 = vsel %vm8582_vm0, %v8565_v63, %v8684_v37  ;;  %v7626_v44 = vrot.slane %v14133_v60, 1  ;;  %v7633_v15 = vrot.slane %v14146_v62, 1 }
 0x6b9   : > { %v7785_v57 = vrot.slane %v7784_v1, 2  ;;  %v7791_v50 = vmax.f32 %v7789_v5, %v7790_v34  ;;  %v7798_v21 = vmax.f32 %v7796_v32, %v7797_v3  ;;  %v7804_v12 = vrot.slane %v7803_v52, 4 }
 0x6ba   : > { %v5710_v6 = vcombine.high %v4606_v29, %v4606_v29  ;;  %v5717_v20 = vrot.slane %v4606_v29, %v12605_v59  ;;  %v7640_v56 = vrot.slane %v14154_v28, 1 }
 0x6bb   : > { %v7786_v33 = vmax.f32 %v7784_v1, %v7785_v57  ;;  %v7792_v47 = vrot.slane %v7791_v50, 2  ;;  %v7799_v45 = vrot.slane %v7798_v21, 2  ;;  %v7805_v41 = vmax.f32 %v7803_v52, %v7804_v12 }
 0x6bc   : > { %v5724_v30 = vrot.slane %v5710_v6, %v12605_v59  ;;  %v5725_v46 = vcombine.high %v5717_v20, %v5717_v20  ;;  %v7726_v19 = vsel %vm6017_vm13, %v5717_v20, -inf }
 0x6bd   : > { %v7787_v36 = vrot.slane %v7786_v33, 1  ;;  %v7793_v48 = vmax.f32 %v7791_v50, %v7792_v47  ;;  %v7800_v55 = vmax.f32 %v7798_v21, %v7799_v45  ;;  %v7806_v27 = vrot.slane %v7805_v41, 2 }
 0x6be   : > { %v5726_v31 = vcombine.high %v5724_v30, %v5724_v30  ;;  %v7727_v42 = vrot.slane %v7726_v19, 4  ;;  %v7733_v25 = vsel %vm6017_vm13, %v5725_v46, -inf  ;;  %v7740_v8 = vsel %vm6017_vm13, %v5724_v30, -inf }
 0x6bf   : > { %v7788_v7 = vmax.f32 %v7786_v33, %v7787_v36  ;;  %v7794_v9 = vrot.slane %v7793_v48, 1  ;;  %v7801_v16 = vrot.slane %v7800_v55, 1  ;;  %v7807_v13 = vmax.f32 %v7805_v41, %v7806_v27 }
 0x6c0   : > { %v7728_v0 = vmax.f32 %v7726_v19, %v7727_v42  ;;  %v7734_v39 = vrot.slane %v7733_v25, 4  ;;  %v7741_v59 = vrot.slane %v7740_v8, 4  ;;  %v7747_v58 = vsel %vm6017_vm13, %v5726_v31, -inf }
 0x6c1   : > { %v7795_v2 = vmax.f32 %v7793_v48, %v7794_v9  ;;  %v7802_v53 = vmax.f32 %v7800_v55, %v7801_v16  ;;  %v7808_v17 = vrot.slane %v7807_v13, 1  ;;  %v7934_v40 = vmax.f32 %v14079_v14, %v7788_v7 }
 0x6c2   : > { %v7729_v35 = vrot.slane %v7728_v0, 2  ;;  %v7735_v49 = vmax.f32 %v7733_v25, %v7734_v39  ;;  %v7742_v22 = vmax.f32 %v7740_v8, %v7741_v59  ;;  %v7748_v38 = vrot.slane %v7747_v58, 4 }
 0x6c3   : > { %v7809_v61 = vmax.f32 %v7807_v13, %v7808_v17  ;;  %v7935_v24 = vmax.f32 %v14087_v23, %v7795_v2  ;;  %v7936_v63 = vmax.f32 %v14092_v10, %v7802_v53  ;;  %v9337_v37 = vpack.c.bf16 %v7934_v40, %v7934_v40 }
 0x6c4   : > { %v7730_v11 = vmax.f32 %v7728_v0, %v7729_v35  ;;  %v7736_v51 = vrot.slane %v7735_v49, 2  ;;  %v7743_v18 = vrot.slane %v7742_v22, 2  ;;  %v7749_v5 = vmax.f32 %v7747_v58, %v7748_v38 }
 0x6c5   : > { %v7937_v32 = vmax.f32 %v14098_v4, %v7809_v61  ;;  %v9338_v1 = vpack.c.bf16 %v7935_v24, %v7935_v24  ;;  %v9339_v34 = vpack.c.bf16 %v7936_v63, %v7936_v63  ;;  %v8574_v3 = vunpack.c.l.b16 %v9337_v37 }
 0x6c6   : > { %v7731_v14 = vrot.slane %v7730_v11, 1  ;;  %v7737_v29 = vmax.f32 %v7735_v49, %v7736_v51  ;;  %v7744_v52 = vmax.f32 %v7742_v22, %v7743_v18  ;;  %v7750_v57 = vrot.slane %v7749_v5, 2 }
 0x6c7   : > { %v9340_v50 = vpack.c.bf16 %v7937_v32, %v7937_v32  ;;  %v8575_v21 = vunpack.c.l.b16 %v9338_v1  ;;  %v8576_v12 = vunpack.c.l.b16 %v9339_v34  ;;  %v8693_v23 = vsel %vm8584_vm1, %v8574_v3, %v14124_v26 }
 0x6c8   : > { %v7732_v10 = vmax.f32 %v7730_v11, %v7731_v14  ;;  %v7738_v6 = vrot.slane %v7737_v29, 1  ;;  %v7745_v20 = vrot.slane %v7744_v52, 1  ;;  %v7751_v33 = vmax.f32 %v7749_v5, %v7750_v57 }
 0x6c9   : > { %v7627_v4 = vmax.f32 %v14133_v60, %v7626_v44  ;;  %v7634_v47 = vmax.f32 %v14146_v62, %v7633_v15  ;;  %v8577_v45 = vunpack.c.l.b16 %v9340_v50  ;;  %v8694_v41 = vsel %vm8586_vm2, %v8575_v21, %v8693_v23 }
 0x6ca   : > { %v8695_v30 = vsel %vm8588_vm4, %v8576_v12, %v8694_v41  ;;  %v7739_v46 = vmax.f32 %v7737_v29, %v7738_v6  ;;  %v7746_v19 = vmax.f32 %v7744_v52, %v7745_v20  ;;  %v7752_v36 = vrot.slane %v7751_v33, 1 }
 0x6cb   : > { %v7641_v26 = vmax.f32 %v14154_v28, %v7640_v56  ;;  %v8696_v48 = vsel %vm1681_vm3, %v8577_v45, %v8695_v30  ;;  %v7926_v55 = vmax.f32 %v14151_v43, %v7732_v10 }
 0x6cc   : > { %v8712_v27 = vpack.c.b16 %v8696_v48, %v8696_v48  ;;  %v7753_v60 = vmax.f32 %v7751_v33, %v7752_v36  ;;  %v7927_v44 = vmax.f32 %v7627_v4, %v7739_v46  ;;  %v7928_v62 = vmax.f32 %v7634_v47, %v7746_v19 }
 0x6cd   : > { %v9329_v15 = vpack.c.bf16 %v7926_v55, %v7926_v55 }
 0x6ce   : > { %8744 = vst [vmem:[%s12834_s30 + $0x3c] sm:$0xf] %v8712_v27  ;;  %v7929_v31 = vmax.f32 %v7641_v26, %v7753_v60  ;;  %v9330_v42 = vpack.c.bf16 %v7927_v44, %v7927_v44  ;;  %v9331_v25 = vpack.c.bf16 %v7928_v62, %v7928_v62 }
 0x6cf   : > { %v8566_v8 = vunpack.c.l.b16 %v9329_v15 }
 0x6d0   : > { %v9332_v28 = vpack.c.bf16 %v7929_v31, %v7929_v31  ;;  %v8567_v56 = vunpack.c.l.b16 %v9330_v42  ;;  %v8568_v43 = vunpack.c.l.b16 %v9331_v25 }
 0x6d1   : > { %v8686_v7 = vsel %vm8584_vm1, %v8566_v8, %v14158_v54 }
 0x6d2   : > { %v8569_v9 = vunpack.c.l.b16 %v9332_v28  ;;  %v8687_v16 = vsel %vm8586_vm2, %v8567_v56, %v8686_v7 }
 0x6d3   : > { %v8688_v13 = vsel %vm8588_vm4, %v8568_v43, %v8687_v16 }
 0x6d4   : > { %v8689_v0 = vsel %vm1681_vm3, %v8569_v9, %v8688_v13 }
 0x6d5   : > { %v8711_v39 = vpack.c.b16 %v8689_v0, %v8689_v0 }
 0x6d7   : > { %8743 = vst [vmem:[%s12834_s30 + $0x38] sm:$0xf] %v8711_v39 }
 0x6d8   : > { %10206 = shalt.err (!%p10203_p13)
}
 0x6d9   : > { %s10207_s5 = scalar_lea.hbm %s14196_s1, 1024  ;;  %s10211_s15 = scalar_lea.hbm %s14786_s20, 4096 }
 0x6da   : > { %p10208_p11 = scmp.ne.s32.totalorder %s14196_s1, %s10207_s5  ;;  %p10212_p3 = scmp.lt.u32.totalorder %s14196_s1, %s14786_s20 }
 0x6db   : > { %p10213_p12 = scmp.lt.u32.totalorder %s10211_s15, %s10207_s5  ;;  %p10215_p5 = scmp.lt.u32.totalorder %s10207_s5, %s14196_s1 }
 0x6dc   : > { %p10209_p0 = pnand %p10208_p11, %p14787_p10 }
 0x6dd   : > { %p10214_p4 = por %p10213_p12, %p10212_p3 }
 0x6de   : > { %p10210_p1 = pneg %p10209_p0 }
 0x6df   : > { %p10216_p8 = por %p10215_p5, %p10214_p4 }
 0x6e1   : > { %p10217_p2 = pnand %p10216_p8, %p10210_p1 }
 0x6e3   : > { %10220 = shalt.err (!%p10217_p2)
}
 0x6e4   : > { %s10368_s16 = smov 64   ;;  %s10369_s8 = smov 4  }
 0x6e5   : > { %9736 = dma.vmem_to_hbm [thread:$0]  (%p14787_p10), %s14191_s0, 1024, %s14196_s1, %s8746_s23, %s10368_s16, %s10368_s16, %s10369_s8  }
 0x6e6 PF: > { %p9769_p9 = scmp.ge.s32.totalorder %s10355_s10, 2  ;;  %s8777_s9 = sand.u32 1, %s10327_s27  }
 0x6e7   : > { %p14788_p7 = scmp.ne.s32.totalorder %s14371_s17, 0  ;;  %s8778_s3 = scalar_lea.sflag [#allocation5], %s8777_s9 }
 0x6e9   : > { %p9759_p6 = pnand %p9769_p9, %p14788_p7 }
 0x6eb   : > { %10298 = dma.done.wait (!%p9759_p6), %s8778_s3, 1024  }
 0x6ec   : > { %10300 = vsyncadd (!%p9759_p6), %s8778_s3, 4294966272  ;;  %s27_s10 = sadd.s32 1, %s10355_s10   ;;  %s14790_s21 = sld [smem:[#allocation22_spill]] }
 0x6ed   : > { %p14228_p13 = scmp.ge.s32.totalorder %s27_s10, 6   ;;  %s14791_s22 = sld [smem:[#allocation23_spill]] }
 0x6ee   : > { %s14792_s7 = sld [smem:[#allocation24_spill]]  ;;  %s14793_s0 = smov %s10567_s24 }
 0x6ef   : > { %s14794_s19 = sld [smem:[#allocation35_spill]]  ;;  %s14795_s30 = sld [smem:[#allocation27_spill]] }
 0x6f0   : > { %s14796_s17 = sld [smem:[#allocation28_spill]]  ;;  %s14797_s8 = sld [smem:[#allocation30_spill]] }
 0x6f1   : > { %s14798_s9 = sld [smem:[#allocation31_spill]]  ;;  %s14800_s23 = smov %s14823_s18 }
 0x6f2   : > { %s14802_s25 = smov %s10323_s26  ;;  %s14803_s26 = smov %s14793_s0 }
 0x6f3   : > { %s14804_s27 = smov %s10331_s28  ;;  %s14805_s28 = smov %s10335_s29 }
 0x6f4   : > { %s14801_s24 = smov %s14792_s7  ;;  %26 = sbr.rel (!%p14228_p13) target bundleno = 22 (0x16), region = 130 }
 0x6f5   : > { %s14806_s29 = smov %s14794_s19 }
 0x6f6   : > { %s14807_s7 = smov %s14796_s17 }
 0x6fb   :  { %8783 = vsyncpa [#allocation4], 1 }
 0x6fc   :  { %8785 = vsyncpa [#allocation4 + $0x1], 1 }
 0x6fd   :  { %8786 = vsyncpa [#allocation7], 1 }
 0x6fe   :  { %8788 = vsyncpa [#allocation7 + $0x1], 1 }
 0x6ff   :  { %8789 = vsyncpa [#allocation10], 1 }
 0x700   :  { %8790 = vsyncpa [#allocation13], 1 }
 0x701   :  { %8791 = vsyncpa [#allocation5], 1 }
 0x702   :  { %8793 = vsyncpa [#allocation5 + $0x1], 1 }

</bundles_post_ra>
